<compile_context>
chip_gen: v7x
topology: tpu7x:2x2x1
jax: 0.10.0
libtpu: 0.0.40
codegen_flags: <defaults>
</compile_context>

<pallas_src>
import jax
import jax.numpy as jnp
from jax.experimental import pallas as pl
from jax.experimental.pallas import tpu as pltpu


_LANES = 128
_VMEM_LIMIT_BYTES = 48 * 1024 * 1024   # explicit scoped-VMEM limit (safe on v7x's 64 MiB)


def _round_up(a, b):
    return (a + b - 1) // b * b


def _attn_rows_per_tile(nsample, vmem_budget_bytes):
    """Max rows per tile for the attention kernel under a VMEM budget.

    Counts f32, lane-padded-to-128 storage, double-buffered pipelined
    inputs/outputs plus a conservative allowance for in-kernel temporaries.
    """
    units_per_row = (
        2 * 2 * nsample   # xk_g + xv_g, double buffered
        + 2 * nsample     # h (positional features), double buffered
        + 2 + 2           # xq + out, double buffered
        + 4 * nsample     # live f32 temporaries inside the kernel
    )
    per_row_bytes = 4 * _LANES * units_per_row
    return max(8, (vmem_budget_bytes // per_row_bytes) // 8 * 8)


def _full_spec(shape):
    return pl.BlockSpec(shape, lambda i, _n=len(shape): (0,) * _n)


# ---------------------------------------------------------------------------
# Kernel 1: fused q / k / v projection (single concatenated matmul)
# ---------------------------------------------------------------------------
def _qkv_kernel(x_ref, w_ref, b_ref, o_ref):
    o_ref[...] = (jnp.dot(x_ref[...], w_ref[...],
                          preferred_element_type=jnp.float32) + b_ref[...])


def qkv_project(x, w, b, *, tn):
    n, cin = x.shape
    ctot = w.shape[1]
    return pl.pallas_call(
        _qkv_kernel,
        out_shape=jax.ShapeDtypeStruct((n, ctot), jnp.float32),
        grid=(n // tn,),
        in_specs=[pl.BlockSpec((tn, cin), lambda i: (i, 0)),
                  _full_spec((cin, ctot)), _full_spec((1, ctot))],
        out_specs=pl.BlockSpec((tn, ctot), lambda i: (i, 0)),
        compiler_params=pltpu.CompilerParams(
            dimension_semantics=("parallel",),
            vmem_limit_bytes=_VMEM_LIMIT_BYTES),
    )(x, w, b)


# ---------------------------------------------------------------------------
# Kernel 2: point-transformer attention (linear_p stage 2, linear_w, softmax,
#           weighted aggregation)
# ---------------------------------------------------------------------------
def _pt_attn_kernel(xq_ref, xkg_ref, xvg_ref, h_ref,
                    wp2_ref, bp2_ref, s1_ref, t1_ref,
                    ww1_ref, bw1_ref, ww2_ref, bw2_ref,
                    out_ref):
    tn, ns, c = xkg_ref.shape

    # linear_p stage 2: ReLU'd positional features (tn*ns, 3) -> (tn*ns, c)
    h = h_ref[...].reshape(tn * ns, 3)
    p_re = jnp.dot(h, wp2_ref[...], preferred_element_type=jnp.float32) + bp2_ref[...]
    p_re3 = p_re.reshape(tn, ns, c)

    # w = x_k - x_q + p_r   (out_planes // mid_planes == 1 in this module, so the
    # PyTorch .view(...,1,mid).sum(2) is a no-op)
    w = (xkg_ref[...] - xq_ref[...][:, None, :] + p_re3).reshape(tn * ns, c)

    # linear_w: BN(c)+ReLU (s1/t1 kept in-kernel), Linear(c,cs) with its trailing
    # BN folded into the weight, ReLU, Linear(cs,·) with the share_planes channel
    # tiling folded into the weight -> output is already (tn*ns, c).
    w = jnp.maximum(w * s1_ref[...] + t1_ref[...], 0.0)
    w = jnp.dot(w, ww1_ref[...], preferred_element_type=jnp.float32) + bw1_ref[...]
    w = jnp.maximum(w, 0.0)
    w = jnp.dot(w, ww2_ref[...], preferred_element_type=jnp.float32) + bw2_ref[...]

    # softmax over the nsample axis (per channel; tiled channels share values)
    wg = w.reshape(tn, ns, c)
    wg = wg - jnp.max(wg, axis=1, keepdims=True)
    e = jnp.exp(wg)
    wg = e * pl.reciprocal(jnp.sum(e, axis=1, keepdims=True), approx=True)

    # aggregation: sum over neighbors of (x_v + p_r) * w
    out_ref[...] = jnp.sum((xvg_ref[...] + p_re3) * wg, axis=1)


def pt_attention(xq, xk_g, xv_g, h, wts, *, tn):
    n, ns, c = xk_g.shape
    cs = wts["ww1"].shape[1]
    return pl.pallas_call(
        _pt_attn_kernel,
        out_shape=jax.ShapeDtypeStruct((n, c), jnp.float32),
        grid=(n // tn,),
        in_specs=[pl.BlockSpec((tn, c), lambda i: (i, 0)),
                  pl.BlockSpec((tn, ns, c), lambda i: (i, 0, 0)),
                  pl.BlockSpec((tn, ns, c), lambda i: (i, 0, 0)),
                  pl.BlockSpec((tn, ns, 3), lambda i: (i, 0, 0)),
                  _full_spec((3, c)), _full_spec((1, c)),
                  _full_spec((1, c)), _full_spec((1, c)),
                  _full_spec((c, cs)), _full_spec((1, cs)),
                  _full_spec((cs, c)), _full_spec((1, c))],
        out_specs=pl.BlockSpec((tn, c), lambda i: (i, 0)),
        compiler_params=pltpu.CompilerParams(
            dimension_semantics=("parallel",),
            vmem_limit_bytes=_VMEM_LIMIT_BYTES),
    )(xq, xk_g, xv_g, h,
      wts["wp2"], wts["bp2"], wts["s1"], wts["t1"],
      wts["ww1"], wts["bw1"], wts["ww2"], wts["bw2"])


# ---------------------------------------------------------------------------
# Glue: per-batch KNN neighbor indices (pointops.queryandgroup equivalent).
# Row-chunked lax.top_k instead of a full NxN argsort.
# ---------------------------------------------------------------------------
def knn_indices(p, o, nsample, row_chunk=2048):
    N = p.shape[0]
    batch_id = jnp.sum(jnp.arange(N)[:, None] >= o[None, :], axis=1).astype(jnp.int32)
    rc = min(row_chunk, N)
    n_pad = _round_up(N, rc)
    p_pad = jnp.pad(p, ((0, n_pad - N), (0, 0)))
    b_pad = jnp.pad(batch_id, (0, n_pad - N), constant_values=-1)

    def chunk(args):
        q_p, q_b = args
        d2 = jnp.sum((q_p[:, None, :] - p[None, :, :]) ** 2, axis=-1)
        d2 = jnp.where(q_b[:, None] == batch_id[None, :], d2, jnp.inf)
        return jax.lax.top_k(-d2, nsample)[1]

    idx = jax.lax.map(chunk, (p_pad.reshape(n_pad // rc, rc, 3),
                              b_pad.reshape(n_pad // rc, rc)))
    return idx.reshape(n_pad, nsample)[:N].astype(jnp.int32)


# ---------------------------------------------------------------------------
# Full forward of PointTransformerLayer
# ---------------------------------------------------------------------------
def point_transformer_layer(p, x, o, wts, *, nsample, share_planes,
                            tn=None, vmem_budget_bytes=32 * 1024 * 1024):
    N, _ = x.shape
    mid = wts["wq"].shape[1]
    cout = wts["wv"].shape[1]
    cs = cout // share_planes
    assert mid == cout  # mid_planes = out_planes // 1 in the PyTorch module

    # ---- one-time weight preprocessing (outside the kernels) ----
    wqkv = jnp.concatenate([wts["wq"], wts["wk"], wts["wv"]], axis=1)   # (cin, 2*mid+cout)
    bqkv = jnp.concatenate([wts["bq"], wts["bk"], wts["bv"]], axis=1)
    wp1f = wts["wp1"] * wts["sp"]                  # fold BN(3) into Linear(3,3)
    bp1f = wts["bp1"] * wts["sp"] + wts["tp"]
    ww1f = wts["ww1"] * wts["s2"]                  # fold BN(cs) into Linear(mid,cs)
    bw1f = wts["bw1"] * wts["s2"] + wts["t2"]
    # fold the share_planes channel-tiling into the last Linear: output channel j
    # of the fused weight reads source channel j % cs.
    tile_mat = (jnp.arange(cout)[None, :] % cs ==
                jnp.arange(cs)[:, None]).astype(jnp.float32)            # (cs, cout)
    ww2f = wts["ww2"] @ tile_mat
    bw2f = wts["bw2"] @ tile_mat

    # ---- tile selection under a generation-safe VMEM budget ----
    cap = _attn_rows_per_tile(nsample, vmem_budget_bytes)
    tn = cap if tn is None else tn
    tn = max(8, min(tn, cap, _round_up(N, 8)) // 8 * 8)
    n_pad = _round_up(N, tn)

    # ---- neighbor search + gather (plain-JAX glue == pointops.queryandgroup) ----
    idx = knn_indices(p, o, nsample)                                    # (N, nsample)
    idx_p = jnp.pad(idx, ((0, n_pad - N), (0, 0)))
    x_p = jnp.pad(x, ((0, n_pad - N), (0, 0)))

    qkv = qkv_project(x_p, wqkv, bqkv, tn=tn)                           # (n_pad, 2*mid+cout)
    xq = qkv[:, :mid]
    xk_g = jnp.take(qkv[:, mid:2 * mid], idx_p, axis=0)                 # (n_pad, ns, mid)
    xv_g = jnp.take(qkv[:, 2 * mid:], idx_p, axis=0)                    # (n_pad, ns, cout)

    # linear_p stage 1 hoisted per-point: (p_j - p_i) @ W == pW_j - pW_i
    pw = p @ wp1f                                                       # (N, 3)
    pw_p = jnp.pad(pw, ((0, n_pad - N), (0, 0)))
    h = jax.nn.relu(jnp.take(pw_p, idx_p, axis=0) - pw_p[:, None, :] + bp1f)

    attn_wts = dict(wp2=wts["wp2"], bp2=wts["bp2"], s1=wts["s1"], t1=wts["t1"],
                    ww1=ww1f, bw1=bw1f, ww2=ww2f, bw2=bw2f)
    out = pt_attention(xq, xk_g, xv_g, h, attn_wts, tn=tn)
    return out[:N]


# pure-JAX reference (mirrors the PyTorch forward, unfolded weights) for validation
def reference_forward(p, x, o, wts, *, nsample, share_planes):
    xq = x @ wts["wq"] + wts["bq"]
    xk = x @ wts["wk"] + wts["bk"]
    xv = x @ wts["wv"] + wts["bv"]
    idx = knn_indices(p, o, nsample)
    pr = p[idx] - p[:, None, :]
    xk_g, xv_g = xk[idx], xv[idx]
    h = pr @ wts["wp1"] + wts["bp1"]
    h = jnp.maximum(h * wts["sp"] + wts["tp"], 0.0)
    p_re = h @ wts["wp2"] + wts["bp2"]
    w = xk_g - xq[:, None, :] + p_re
    w = jnp.maximum(w * wts["s1"] + wts["t1"], 0.0) @ wts["ww1"] + wts["bw1"]
    w = jnp.maximum(w * wts["s2"] + wts["t2"], 0.0) @ wts["ww2"] + wts["bw2"]
    w = jax.nn.softmax(w, axis=1)
    n, ns, c = xv_g.shape
    s = share_planes
    out = ((xv_g + p_re).reshape(n, ns, s, c // s) * w[:, :, None, :]).sum(1)
    return out.reshape(n, c)


if __name__ == "__main__":
    in_planes, out_planes, share_planes, nsample = 16, 32, 8, 16
    mid_planes = out_planes
    cs = out_planes // share_planes
    N = 64
    eps = 1e-5

    key = jax.random.PRNGKey(0)
    ks = jax.random.split(key, 24)

    p = jax.random.normal(ks[0], (N, 3), jnp.float32)
    x = jax.random.normal(ks[1], (N, in_planes), jnp.float32) * 0.5
    o = jnp.array([32, 64], jnp.int32)     # two batches of 32 points

    def w_init(k, shape, scale=0.2):
        return (jax.random.normal(k, shape, jnp.float32) * scale).astype(jnp.float32)

    # BatchNorm (eval): scale = gamma / sqrt(var + eps), bias = beta  (mean=0, var=1)
    def bn_fold(k, c):
        k1, k2 = jax.random.split(k)
        gamma = 1.0 + 0.1 * jax.random.normal(k1, (1, c), jnp.float32)
        beta = 0.1 * jax.random.normal(k2, (1, c), jnp.float32)
        return gamma / jnp.sqrt(1.0 + eps), beta

    sp, tp = bn_fold(ks[10], 3)
    s1, t1 = bn_fold(ks[11], mid_planes)
    s2, t2 = bn_fold(ks[12], cs)

    wts = dict(
        wq=w_init(ks[2], (in_planes, mid_planes)), bq=w_init(ks[3], (1, mid_planes), 0.05),
        wk=w_init(ks[4], (in_planes, mid_planes)), bk=w_init(ks[5], (1, mid_planes), 0.05),
        wv=w_init(ks[6], (in_planes, out_planes)), bv=w_init(ks[7], (1, out_planes), 0.05),
        wp1=w_init(ks[8], (3, 3)), bp1=w_init(ks[9], (1, 3), 0.05),
        sp=sp, tp=tp,
        wp2=w_init(ks[13], (3, out_planes)), bp2=w_init(ks[14], (1, out_planes), 0.05),
        s1=s1, t1=t1,
        ww1=w_init(ks[15], (mid_planes, cs)), bw1=w_init(ks[16], (1, cs), 0.05),
        s2=s2, t2=t2,
        ww2=w_init(ks[17], (cs, cs)), bw2=w_init(ks[18], (1, cs), 0.05),
    )

    fwd = jax.jit(point_transformer_layer,
                  static_argnames=("nsample", "share_planes", "tn", "vmem_budget_bytes"))
    out = fwd(p, x, o, wts, nsample=nsample, share_planes=share_planes)
    out = jax.block_until_ready(out)

    ref = reference_forward(p, x, o, wts, nsample=nsample, share_planes=share_planes)
    assert out.shape == (N, out_planes)
    assert jnp.allclose(out, ref, atol=2e-2, rtol=2e-2), "mismatch vs pure-JAX reference"

    print("KERNEL_OK")
</pallas_src>

<mosaic_0001>
module attributes {stable_mosaic.version = 11 : i64} {
  func.func @_qkv_kernel(%arg0: i32, %arg1: memref<64x16xf32, #tpu.memory_space<vmem>>, %arg2: memref<16x96xf32, #tpu.memory_space<vmem>>, %arg3: memref<1x96xf32, #tpu.memory_space<vmem>>, %arg4: memref<64x96xf32, #tpu.memory_space<vmem>>) attributes {dimension_semantics = [#tpu.dimension_semantics<parallel>], iteration_bounds = array<i64: 1>, scalar_prefetch = 0 : i64, scratch_operands = 0 : i64, tpu.core_type = #tpu.core_type<tc>, window_params = [{transform_indices = @transform_0, window_bounds = array<i64: 64, 16>}, {pipeline_mode = #tpu.pipeline_mode<synchronous>, transform_indices = @transform_1, window_bounds = array<i64: 16, 96>}, {pipeline_mode = #tpu.pipeline_mode<synchronous>, transform_indices = @transform_2, window_bounds = array<i64: 1, 96>}, {transform_indices = @transform_3, window_bounds = array<i64: 64, 96>}]} {
    %c0 = arith.constant 0 : index
    %c0_0 = arith.constant 0 : index
    %0 = vector.load %arg1[%c0, %c0_0] : memref<64x16xf32, #tpu.memory_space<vmem>>, vector<64x16xf32>
    %c0_1 = arith.constant 0 : index
    %c0_2 = arith.constant 0 : index
    %1 = vector.load %arg2[%c0_1, %c0_2] : memref<16x96xf32, #tpu.memory_space<vmem>>, vector<16x96xf32>
    %cst = arith.constant dense<0.000000e+00> : vector<64x96xf32>
    %2 = tpu.matmul %0, %1, %cst {dimension_numbers = #tpu.dot_dimension_numbers<[1], [0], [0], [1], [0, 0, 1, 1], [], []>} : vector<64x16xf32>, vector<16x96xf32>, vector<64x96xf32> -> vector<64x96xf32>
    %c0_3 = arith.constant 0 : index
    %c0_4 = arith.constant 0 : index
    %3 = vector.load %arg3[%c0_3, %c0_4] : memref<1x96xf32, #tpu.memory_space<vmem>>, vector<1x96xf32>
    %4 = vector.broadcast %3 : vector<1x96xf32> to vector<64x96xf32>
    %5 = arith.addf %2, %4 : vector<64x96xf32>
    %c0_5 = arith.constant 0 : index
    %c0_6 = arith.constant 0 : index
    %6 = vector.load %arg4[%c0_5, %c0_6] : memref<64x96xf32, #tpu.memory_space<vmem>>, vector<64x96xf32>
    tpu.vector_store %arg4[%c0_5, %c0_6], %5 {strides = array<i32>} : memref<64x96xf32, #tpu.memory_space<vmem>>, vector<64x96xf32>,
    return
  }
  func.func @transform_0(%arg0: i32) -> (i32, i32) {
    %c0_i32 = arith.constant 0 : i32
    %c0_i32_0 = arith.constant 0 : i32
    return %arg0, %c0_i32 : i32, i32
  }
  func.func @transform_1(%arg0: i32) -> (i32, i32) {
    %c0_i32 = arith.constant 0 : i32
    %c0_i32_0 = arith.constant 0 : i32
    %c0_i32_1 = arith.constant 0 : i32
    return %c0_i32, %c0_i32_0 : i32, i32
  }
  func.func @transform_2(%arg0: i32) -> (i32, i32) {
    %c0_i32 = arith.constant 0 : i32
    %c0_i32_0 = arith.constant 0 : i32
    %c0_i32_1 = arith.constant 0 : i32
    return %c0_i32, %c0_i32_0 : i32, i32
  }
  func.func @transform_3(%arg0: i32) -> (i32, i32) {
    %c0_i32 = arith.constant 0 : i32
    %c0_i32_0 = arith.constant 0 : i32
    return %arg0, %c0_i32 : i32, i32
  }
}

module attributes {stable_mosaic.version = 11 : i64} {
  func.func @_pt_attn_kernel(%arg0: i32, %arg1: memref<64x32xf32, #tpu.memory_space<vmem>>, %arg2: memref<64x16x32xf32, #tpu.memory_space<vmem>>, %arg3: memref<64x16x32xf32, #tpu.memory_space<vmem>>, %arg4: memref<64x16x3xf32, #tpu.memory_space<vmem>>, %arg5: memref<3x32xf32, #tpu.memory_space<vmem>>, %arg6: memref<1x32xf32, #tpu.memory_space<vmem>>, %arg7: memref<1x32xf32, #tpu.memory_space<vmem>>, %arg8: memref<1x32xf32, #tpu.memory_space<vmem>>, %arg9: memref<32x4xf32, #tpu.memory_space<vmem>>, %arg10: memref<1x4xf32, #tpu.memory_space<vmem>>, %arg11: memref<4x32xf32, #tpu.memory_space<vmem>>, %arg12: memref<1x32xf32, #tpu.memory_space<vmem>>, %arg13: memref<64x32xf32, #tpu.memory_space<vmem>>) attributes {dimension_semantics = [#tpu.dimension_semantics<parallel>], iteration_bounds = array<i64: 1>, scalar_prefetch = 0 : i64, scratch_operands = 0 : i64, tpu.core_type = #tpu.core_type<tc>, window_params = [{transform_indices = @transform_0, window_bounds = array<i64: 64, 32>}, {transform_indices = @transform_1, window_bounds = array<i64: 64, 16, 32>}, {transform_indices = @transform_2, window_bounds = array<i64: 64, 16, 32>}, {transform_indices = @transform_3, window_bounds = array<i64: 64, 16, 3>}, {pipeline_mode = #tpu.pipeline_mode<synchronous>, transform_indices = @transform_4, window_bounds = array<i64: 3, 32>}, {pipeline_mode = #tpu.pipeline_mode<synchronous>, transform_indices = @transform_5, window_bounds = array<i64: 1, 32>}, {pipeline_mode = #tpu.pipeline_mode<synchronous>, transform_indices = @transform_6, window_bounds = array<i64: 1, 32>}, {pipeline_mode = #tpu.pipeline_mode<synchronous>, transform_indices = @transform_7, window_bounds = array<i64: 1, 32>}, {pipeline_mode = #tpu.pipeline_mode<synchronous>, transform_indices = @transform_8, window_bounds = array<i64: 32, 4>}, {pipeline_mode = #tpu.pipeline_mode<synchronous>, transform_indices = @transform_9, window_bounds = array<i64: 1, 4>}, {pipeline_mode = #tpu.pipeline_mode<synchronous>, transform_indices = @transform_10, window_bounds = array<i64: 4, 32>}, {pipeline_mode = #tpu.pipeline_mode<synchronous>, transform_indices = @transform_11, window_bounds = array<i64: 1, 32>}, {transform_indices = @transform_12, window_bounds = array<i64: 64, 32>}]} {
    %c0 = arith.constant 0 : index
    %c0_0 = arith.constant 0 : index
    %c0_1 = arith.constant 0 : index
    %0 = vector.load %arg4[%c0, %c0_0, %c0_1] : memref<64x16x3xf32, #tpu.memory_space<vmem>>, vector<64x16x3xf32>
    %1 = vector.shape_cast %0 : vector<64x16x3xf32> to vector<1024x3xf32>
    %c0_2 = arith.constant 0 : index
    %c0_3 = arith.constant 0 : index
    %2 = vector.load %arg5[%c0_2, %c0_3] : memref<3x32xf32, #tpu.memory_space<vmem>>, vector<3x32xf32>
    %cst = arith.constant dense<0.000000e+00> : vector<1024x32xf32>
    %3 = tpu.matmul %1, %2, %cst {dimension_numbers = #tpu.dot_dimension_numbers<[1], [0], [0], [1], [0, 0, 1, 1], [], []>} : vector<1024x3xf32>, vector<3x32xf32>, vector<1024x32xf32> -> vector<1024x32xf32>
    %c0_4 = arith.constant 0 : index
    %c0_5 = arith.constant 0 : index
    %4 = vector.load %arg6[%c0_4, %c0_5] : memref<1x32xf32, #tpu.memory_space<vmem>>, vector<1x32xf32>
    %5 = vector.broadcast %4 : vector<1x32xf32> to vector<1024x32xf32>
    %6 = arith.addf %3, %5 : vector<1024x32xf32>
    %7 = vector.shape_cast %6 : vector<1024x32xf32> to vector<64x16x32xf32>
    %c0_6 = arith.constant 0 : index
    %c0_7 = arith.constant 0 : index
    %c0_8 = arith.constant 0 : index
    %8 = vector.load %arg2[%c0_6, %c0_7, %c0_8] : memref<64x16x32xf32, #tpu.memory_space<vmem>>, vector<64x16x32xf32>
    %c0_9 = arith.constant 0 : index
    %c0_10 = arith.constant 0 : index
    %9 = vector.load %arg1[%c0_9, %c0_10] : memref<64x32xf32, #tpu.memory_space<vmem>>, vector<64x32xf32>
    %10 = vector.shape_cast %9 : vector<64x32xf32> to vector<64x1x32xf32>
    %11 = vector.broadcast %10 : vector<64x1x32xf32> to vector<64x16x32xf32>
    %12 = arith.subf %8, %11 : vector<64x16x32xf32>
    %13 = arith.addf %12, %7 : vector<64x16x32xf32>
    %14 = vector.shape_cast %13 : vector<64x16x32xf32> to vector<1024x32xf32>
    %c0_11 = arith.constant 0 : index
    %c0_12 = arith.constant 0 : index
    %15 = vector.load %arg7[%c0_11, %c0_12] : memref<1x32xf32, #tpu.memory_space<vmem>>, vector<1x32xf32>
    %16 = vector.broadcast %15 : vector<1x32xf32> to vector<1024x32xf32>
    %17 = arith.mulf %14, %16 : vector<1024x32xf32>
    %c0_13 = arith.constant 0 : index
    %c0_14 = arith.constant 0 : index
    %18 = vector.load %arg8[%c0_13, %c0_14] : memref<1x32xf32, #tpu.memory_space<vmem>>, vector<1x32xf32>
    %19 = vector.broadcast %18 : vector<1x32xf32> to vector<1024x32xf32>
    %20 = arith.addf %17, %19 : vector<1024x32xf32>
    %cst_15 = arith.constant 0.000000e+00 : f32
    %21 = vector.broadcast %cst_15 : f32 to vector<1024x32xf32>
    %22 = arith.maximumf %20, %21 : vector<1024x32xf32>
    %c0_16 = arith.constant 0 : index
    %c0_17 = arith.constant 0 : index
    %23 = vector.load %arg9[%c0_16, %c0_17] : memref<32x4xf32, #tpu.memory_space<vmem>>, vector<32x4xf32>
    %cst_18 = arith.constant dense<0.000000e+00> : vector<1024x4xf32>
    %24 = tpu.matmul %22, %23, %cst_18 {dimension_numbers = #tpu.dot_dimension_numbers<[1], [0], [0], [1], [0, 0, 1, 1], [], []>} : vector<1024x32xf32>, vector<32x4xf32>, vector<1024x4xf32> -> vector<1024x4xf32>
    %c0_19 = arith.constant 0 : index
    %c0_20 = arith.constant 0 : index
    %25 = vector.load %arg10[%c0_19, %c0_20] : memref<1x4xf32, #tpu.memory_space<vmem>>, vector<1x4xf32>
    %26 = vector.broadcast %25 : vector<1x4xf32> to vector<1024x4xf32>
    %27 = arith.addf %24, %26 : vector<1024x4xf32>
    %cst_21 = arith.constant 0.000000e+00 : f32
    %28 = vector.broadcast %cst_21 : f32 to vector<1024x4xf32>
    %29 = arith.maximumf %27, %28 : vector<1024x4xf32>
    %c0_22 = arith.constant 0 : index
    %c0_23 = arith.constant 0 : index
    %30 = vector.load %arg11[%c0_22, %c0_23] : memref<4x32xf32, #tpu.memory_space<vmem>>, vector<4x32xf32>
    %cst_24 = arith.constant dense<0.000000e+00> : vector<1024x32xf32>
    %31 = tpu.matmul %29, %30, %cst_24 {dimension_numbers = #tpu.dot_dimension_numbers<[1], [0], [0], [1], [0, 0, 1, 1], [], []>} : vector<1024x4xf32>, vector<4x32xf32>, vector<1024x32xf32> -> vector<1024x32xf32>
    %c0_25 = arith.constant 0 : index
    %c0_26 = arith.constant 0 : index
    %32 = vector.load %arg12[%c0_25, %c0_26] : memref<1x32xf32, #tpu.memory_space<vmem>>, vector<1x32xf32>
    %33 = vector.broadcast %32 : vector<1x32xf32> to vector<1024x32xf32>
    %34 = arith.addf %31, %33 : vector<1024x32xf32>
    %35 = vector.shape_cast %34 : vector<1024x32xf32> to vector<64x16x32xf32>
    %cst_27 = arith.constant dense<0xFF800000> : vector<64x32xf32>
    %36 = vector.multi_reduction <maximumf>, %35, %cst_27 [1] : vector<64x16x32xf32> to vector<64x32xf32>
    %37 = vector.shape_cast %36 : vector<64x32xf32> to vector<64x1x32xf32>
    %38 = vector.broadcast %37 : vector<64x1x32xf32> to vector<64x16x32xf32>
    %39 = arith.subf %35, %38 : vector<64x16x32xf32>
    %40 = math.exp %39 : vector<64x16x32xf32>
    %cst_28 = arith.constant dense<0.000000e+00> : vector<64x32xf32>
    %41 = vector.multi_reduction <add>, %40, %cst_28 [1] : vector<64x16x32xf32> to vector<64x32xf32>
    %42 = vector.shape_cast %41 : vector<64x32xf32> to vector<64x1x32xf32>
    %43 = tpu.reciprocal %42 {approx = true} : vector<64x1x32xf32> -> vector<64x1x32xf32>
    %44 = vector.broadcast %43 : vector<64x1x32xf32> to vector<64x16x32xf32>
    %45 = arith.mulf %40, %44 : vector<64x16x32xf32>
    %c0_29 = arith.constant 0 : index
    %c0_30 = arith.constant 0 : index
    %c0_31 = arith.constant 0 : index
    %46 = vector.load %arg3[%c0_29, %c0_30, %c0_31] : memref<64x16x32xf32, #tpu.memory_space<vmem>>, vector<64x16x32xf32>
    %47 = arith.addf %46, %7 : vector<64x16x32xf32>
    %48 = arith.mulf %47, %45 : vector<64x16x32xf32>
    %cst_32 = arith.constant dense<0.000000e+00> : vector<64x32xf32>
    %49 = vector.multi_reduction <add>, %48, %cst_32 [1] : vector<64x16x32xf32> to vector<64x32xf32>
    %c0_33 = arith.constant 0 : index
    %c0_34 = arith.constant 0 : index
    %50 = vector.load %arg13[%c0_33, %c0_34] : memref<64x32xf32, #tpu.memory_space<vmem>>, vector<64x32xf32>
    tpu.vector_store %arg13[%c0_33, %c0_34], %49 {strides = array<i32>} : memref<64x32xf32, #tpu.memory_space<vmem>>, vector<64x32xf32>,
    return
  }
  func.func @transform_0(%arg0: i32) -> (i32, i32) {
    %c0_i32 = arith.constant 0 : i32
    %c0_i32_0 = arith.constant 0 : i32
    return %arg0, %c0_i32 : i32, i32
  }
  func.func @transform_1(%arg0: i32) -> (i32, i32, i32) {
    %c0_i32 = arith.constant 0 : i32
    %c0_i32_0 = arith.constant 0 : i32
    %c0_i32_1 = arith.constant 0 : i32
    return %arg0, %c0_i32, %c0_i32_0 : i32, i32, i32
  }
  func.func @transform_2(%arg0: i32) -> (i32, i32, i32) {
    %c0_i32 = arith.constant 0 : i32
    %c0_i32_0 = arith.constant 0 : i32
    %c0_i32_1 = arith.constant 0 : i32
    return %arg0, %c0_i32, %c0_i32_0 : i32, i32, i32
  }
  func.func @transform_3(%arg0: i32) -> (i32, i32, i32) {
    %c0_i32 = arith.constant 0 : i32
    %c0_i32_0 = arith.constant 0 : i32
    %c0_i32_1 = arith.constant 0 : i32
    return %arg0, %c0_i32, %c0_i32_0 : i32, i32, i32
  }
  func.func @transform_4(%arg0: i32) -> (i32, i32) {
    %c0_i32 = arith.constant 0 : i32
    %c0_i32_0 = arith.constant 0 : i32
    %c0_i32_1 = arith.constant 0 : i32
    return %c0_i32, %c0_i32_0 : i32, i32
  }
  func.func @transform_5(%arg0: i32) -> (i32, i32) {
    %c0_i32 = arith.constant 0 : i32
    %c0_i32_0 = arith.constant 0 : i32
    %c0_i32_1 = arith.constant 0 : i32
    return %c0_i32, %c0_i32_0 : i32, i32
  }
  func.func @transform_6(%arg0: i32) -> (i32, i32) {
    %c0_i32 = arith.constant 0 : i32
    %c0_i32_0 = arith.constant 0 : i32
    %c0_i32_1 = arith.constant 0 : i32
    return %c0_i32, %c0_i32_0 : i32, i32
  }
  func.func @transform_7(%arg0: i32) -> (i32, i32) {
    %c0_i32 = arith.constant 0 : i32
    %c0_i32_0 = arith.constant 0 : i32
    %c0_i32_1 = arith.constant 0 : i32
    return %c0_i32, %c0_i32_0 : i32, i32
  }
  func.func @transform_8(%arg0: i32) -> (i32, i32) {
    %c0_i32 = arith.constant 0 : i32
    %c0_i32_0 = arith.constant 0 : i32
    %c0_i32_1 = arith.constant 0 : i32
    return %c0_i32, %c0_i32_0 : i32, i32
  }
  func.func @transform_9(%arg0: i32) -> (i32, i32) {
    %c0_i32 = arith.constant 0 : i32
    %c0_i32_0 = arith.constant 0 : i32
    %c0_i32_1 = arith.constant 0 : i32
    return %c0_i32, %c0_i32_0 : i32, i32
  }
  func.func @transform_10(%arg0: i32) -> (i32, i32) {
    %c0_i32 = arith.constant 0 : i32
    %c0_i32_0 = arith.constant 0 : i32
    %c0_i32_1 = arith.constant 0 : i32
    return %c0_i32, %c0_i32_0 : i32, i32
  }
  func.func @transform_11(%arg0: i32) -> (i32, i32) {
    %c0_i32 = arith.constant 0 : i32
    %c0_i32_0 = arith.constant 0 : i32
    %c0_i32_1 = arith.constant 0 : i32
    return %c0_i32, %c0_i32_0 : i32, i32
  }
  func.func @transform_12(%arg0: i32) -> (i32, i32) {
    %c0_i32 = arith.constant 0 : i32
    %c0_i32_0 = arith.constant 0 : i32
    return %arg0, %c0_i32 : i32, i32
  }
}

</mosaic_0001>

<bundles_post_ra>
// kernel: point_transformer_layer.2
= control target key start
LH: loop header
LB: loop body
LE: loop exit
PB: predicated region body
PF: predicated region fallthrough
CT: control target
= control target key end

     0   :  { %vm31_vm0 = vcmask 130048   ;;  %vm161_vm1 = vcmask 785408   ;;  %s308_s1 = inlined_call_operand.vmem [shape: f32[16,96], index: 1, kind: input, shape index: {}]   ;;  %s309_s0 = inlined_call_operand.vmem [shape: f32[64,16], index: 0, kind: input, shape index: {}]   ;;  %s310_s2 = inlined_call_operand.vmem [shape: f32[1,96], index: 2, kind: input, shape index: {}]   ;;  %s311_s3 = inlined_call_operand.vmem [shape: f32[64,96], index: 3, kind: output, shape index: {}]  }
   0x1   :  { %v22_v0 = vld [vmem:[%s308_s1] sm:$0xff]  ;;  %v23_v1 = vld [vmem:[%s308_s1 + $0x8] sm:$0xff]  ;;  %v16_v7 = vld [vmem:[%s309_s0 + $0x10] sm:$0xff] }
   0x2   :  { %v14_v2 = vld [vmem:[%s309_s0] sm:$0xff]  ;;  %v209_v3 = vpack.c.bf16 %v23_v1, %v22_v0  ;;  %v15_v5 = vld [vmem:[%s309_s0 + $0x8] sm:$0xff]  ;;  %v20_v8 = vld [vmem:[%s309_s0 + $0x30] sm:$0xff] }
   0x3   :  { %197 = vmatprep.mubr.msk.f32.mxu0 %vm31_vm0, %v14_v2  ;;  %v18_v4 = vld [vmem:[%s309_s0 + $0x20] sm:$0xff]  ;;  %v19_v6 = vld [vmem:[%s309_s0 + $0x28] sm:$0xff]  ;;  %v17_v9 = vld [vmem:[%s309_s0 + $0x18] sm:$0xff] }
   0x4   :  { %203 = vmatprep.mubr.msk.f32.mxu1 %vm31_vm0, %v18_v4  ;;  %210 = vmatprep.subr.bf16.mxu0 %v209_v3  ;;  %v21_v10 = vld [vmem:[%s309_s0 + $0x38] sm:$0xff]  ;;  %v174_v11 = vld [vmem:[%s310_s2] ss:$0 sm:$0xff] }
   0x5   :  { %213 = vmatprep.subr.bf16.mxu1 %v209_v3  ;;  %212 = vmatpush3.bf16.msra.mxu0 %v209_v3 }
   0x6   :  { %214 = vmatpush3.bf16.msra.mxu1 %v209_v3 }
   0x8   :  { %198 = vmatmul.mubr.msk.f32.vlgmr.msra.gmra.mrb[0].mxu0 %vm31_vm0, %v15_v5 }
   0x9   :  { %204 = vmatmul.mubr.msk.f32.vlgmr.msra.gmra.mrb[0].mxu1 %vm31_vm0, %v19_v6  ;;  %200 = vmatprep.mubr.msk.f32.mxu0 %vm31_vm0, %v16_v7 }
   0xa   :  { %206 = vmatprep.mubr.msk.f32.mxu1 %vm31_vm0, %v20_v8 }
   0xc   :  { %201 = vmatmul.mubr.msk.f32.gmra.mrb[2].mxu0 %vm31_vm0, %v17_v9 }
   0xd   :  { %207 = vmatmul.mubr.msk.f32.gmra.mrb[2].mxu1 %vm31_vm0, %v21_v10 }
  0xdb   :  { %v199_v12 = vpop.f32.mrb[0].mxu0 }
  0xdc   :  { %v205_v13 = vpop.f32.mrb[0].mxu1  ;;  %v128_v14 = vadd.f32 %v199_v12, %v174_v11  ;;  %v122_v16 = vpop.f32.mrb[1].mxu0 }
  0xdd   :  { %v148_v15 = vadd.f32 %v205_v13, %v174_v11  ;;  %v142_v17 = vpop.f32.mrb[1].mxu1  ;;  %v123_v18 = vadd.f32 %v174_v11, %v122_v16 }
  0xde   :  { %v143_v19 = vadd.f32 %v174_v11, %v142_v17  ;;  %163 = vst.msk [vmem:[%s311_s3 + $0x8] sm:$0xff] %vm161_vm1, %v128_v14 }
  0xdf   :  { %167 = vst.msk [vmem:[%s311_s3 + $0x28] sm:$0xff] %vm161_vm1, %v148_v15  ;;  %162 = vst.msk [vmem:[%s311_s3] sm:$0xff] %vm161_vm1, %v123_v18  ;;  %v202_v20 = vpop.f32.mrb[2].mxu0 }
  0xe0   :  { %166 = vst.msk [vmem:[%s311_s3 + $0x20] sm:$0xff] %vm161_vm1, %v143_v19  ;;  %v208_v21 = vpop.f32.mrb[2].mxu1  ;;  %v138_v22 = vadd.f32 %v202_v20, %v174_v11  ;;  %v132_v24 = vpop.f32.mrb[3].mxu0 }
  0xe1   :  { %v158_v23 = vadd.f32 %v208_v21, %v174_v11  ;;  %v152_v25 = vpop.f32.mrb[3].mxu1  ;;  %v133_v26 = vadd.f32 %v174_v11, %v132_v24 }
  0xe2   :  { %v153_v27 = vadd.f32 %v174_v11, %v152_v25  ;;  %165 = vst.msk [vmem:[%s311_s3 + $0x18] sm:$0xff] %vm161_vm1, %v138_v22 }
  0xe3   :  { %169 = vst.msk [vmem:[%s311_s3 + $0x38] sm:$0xff] %vm161_vm1, %v158_v23  ;;  %164 = vst.msk [vmem:[%s311_s3 + $0x10] sm:$0xff] %vm161_vm1, %v133_v26 }
  0xe4   :  { %168 = vst.msk [vmem:[%s311_s3 + $0x30] sm:$0xff] %vm161_vm1, %v153_v27 }

// kernel: point_transformer_layer.3
= control target key start
LH: loop header
LB: loop body
LE: loop exit
PB: predicated region body
PF: predicated region fallthrough
CT: control target
= control target key end

     0   :  { %vm562_vm0 = vcmask 1042432   ;;  %vm177_vm1 = vcmask 23552   ;;  %vm4403_vm2 = vcmask 1043456   ;;  %vm2792_vm3 = vcmask 261120   ;;  %s15418_s4 = inlined_call_operand.vmem [shape: f32[3,32], index: 4, kind: input, shape index: {}]   ;;  %s15419_s3 = inlined_call_operand.vmem [shape: f32[64,16,3], index: 3, kind: input, shape index: {}]   ;;  %s15420_s8 = inlined_call_operand.vmem [shape: f32[32,4], index: 8, kind: input, shape index: {}]   ;;  %s15421_s0 = inlined_call_operand.vmem [shape: f32[64,32], index: 0, kind: input, shape index: {}]   ;;  %s15422_s10 = inlined_call_operand.vmem [shape: f32[4,32], index: 10, kind: input, shape index: {}]   ;;  %s15423_s1 = inlined_call_operand.vmem [shape: f32[64,16,32], index: 1, kind: input, shape index: {}]   ;;  %s15424_s5 = inlined_call_operand.vmem [shape: f32[1,32], index: 5, kind: input, shape index: {}]   ;;  %s15425_s6 = inlined_call_operand.vmem [shape: f32[1,32], index: 6, kind: input, shape index: {}]   ;;  %s15426_s7 = inlined_call_operand.vmem [shape: f32[1,32], index: 7, kind: input, shape index: {}]   ;;  %s15427_s9 = inlined_call_operand.vmem [shape: f32[1,4], index: 9, kind: input, shape index: {}]   ;;  %s15428_s2 = inlined_call_operand.vmem [shape: f32[64,16,32], index: 2, kind: input, shape index: {}]   ;;  %s15429_s11 = inlined_call_operand.vmem [shape: f32[1,32], index: 11, kind: input, shape index: {}]   ;;  %s15430_s12 = inlined_call_operand.vmem [shape: f32[64,32], index: 12, kind: output, shape index: {}]  }
   0x1   :  { %v169_v0 = vld [vmem:[%s15418_s4] sm:$0x7]  ;;  %v42_v2 = vld [vmem:[%s15419_s3 + $0x8] sm:$0xff]  ;;  %v43_v3 = vld [vmem:[%s15419_s3 + $0x10] sm:$0xff]  ;;  %vm4018_vm4 = vcmask 31744   ;;  %vm7864_vm5 = vcmask 1041409  }
   0x2   :  { %v41_v1 = vld [vmem:[%s15419_s3] sm:$0xff]  ;;  %8728 = vmatprep.subr.msk.mxu0 %vm562_vm0, %v169_v0  ;;  %9324 = vmatprep.subr.msk.mxu1 %vm562_vm0, %v169_v0  ;;  %v44_v4 = vld [vmem:[%s15419_s3 + $0x18] sm:$0xff]  ;;  %v46_v6 = vld [vmem:[%s15419_s3 + $0x28] sm:$0xff]  ;;  %vm7866_vm6 = vcmask 1042434   ;;  %vm7868_vm7 = vcmask 1043459   ;;  %vm7870_vm8 = vcmask 1044484  }
   0x3   :  { %8730 = vmatprep.mubr.msk.f32.mxu0 %vm177_vm1, %v41_v1  ;;  %8729 = vmatpush3.msk.msra.mxu0 %vm562_vm0, %v169_v0  ;;  %v45_v5 = vld [vmem:[%s15419_s3 + $0x20] sm:$0xff]  ;;  %v47_v7 = vld [vmem:[%s15419_s3 + $0x30] sm:$0xff]  ;;  %v48_v8 = vld [vmem:[%s15419_s3 + $0x38] sm:$0xff]  ;;  %vm7872_vm9 = vcmask 1045509   ;;  %vm7874_vm10 = vcmask 1046534   ;;  %vm7876_vm11 = vcmask 1047559  }
   0x4   :  { %8731 = vmatmul.mubr.msk.f32.vlgmr.msra.gmra.mrb[0].mxu0 %vm177_vm1, %v42_v2  ;;  %9325 = vmatpush3.msk.msra.mxu1 %vm562_vm0, %v169_v0  ;;  %v49_v9 = vld [vmem:[%s15419_s3 + $0x40] sm:$0xff]  ;;  %v50_v10 = vld [vmem:[%s15419_s3 + $0x48] sm:$0xff]  ;;  %v51_v11 = vld [vmem:[%s15419_s3 + $0x50] sm:$0xff] }
   0x5   :  { %8733 = vmatprep.mubr.msk.f32.mxu0 %vm177_vm1, %v43_v3  ;;  %v105_v12 = vld [vmem:[%s15419_s3 + $0x200] sm:$0xff]  ;;  %v106_v13 = vld [vmem:[%s15419_s3 + $0x208] sm:$0xff]  ;;  %v107_v17 = vld [vmem:[%s15419_s3 + $0x210] sm:$0xff] }
   0x6   :  { %8826 = vmatprep.mubr.msk.f32.mxu1 %vm177_vm1, %v105_v12  ;;  %v2781_v14 = vld [vmem:[%s15420_s8] sm:$0xff]  ;;  %v2782_v15 = vld [vmem:[%s15420_s8 + $0x8] sm:$0xff]  ;;  %v108_v18 = vld [vmem:[%s15419_s3 + $0x218] sm:$0xff] }
   0x7   :  { %8827 = vmatmul.mubr.msk.f32.vlgmr.msra.gmra.mrb[0].mxu1 %vm177_vm1, %v106_v13  ;;  %v9316_v16 = vpack.c.bf16 %v2782_v15, %v2781_v14  ;;  %v52_v19 = vld [vmem:[%s15419_s3 + $0x58] sm:$0xff]  ;;  %v109_v20 = vld [vmem:[%s15419_s3 + $0x220] sm:$0xff]  ;;  %v110_v22 = vld [vmem:[%s15419_s3 + $0x228] sm:$0xff] }
   0x8   :  { %8734 = vmatmul.mubr.msk.f32.gmra.mrb[2].mxu0 %vm177_vm1, %v44_v4  ;;  %8829 = vmatprep.mubr.msk.f32.mxu1 %vm177_vm1, %v107_v17  ;;  %v53_v21 = vld [vmem:[%s15419_s3 + $0x60] sm:$0xff]  ;;  %v54_v23 = vld [vmem:[%s15419_s3 + $0x68] sm:$0xff]  ;;  %v111_v24 = vld [vmem:[%s15419_s3 + $0x230] sm:$0xff] }
   0x9   :  { %8736 = vmatprep.mubr.msk.f32.mxu0 %vm177_vm1, %v45_v5  ;;  %9317 = vmatprep.subr.bf16.mxu1 %v9316_v16  ;;  %v55_v25 = vld [vmem:[%s15419_s3 + $0x70] sm:$0xff]  ;;  %v112_v26 = vld [vmem:[%s15419_s3 + $0x238] sm:$0xff]  ;;  %v113_v28 = vld [vmem:[%s15419_s3 + $0x240] sm:$0xff] }
   0xa   :  { %9319 = vmatpush3.bf16.msra.mxu1 %v9316_v16  ;;  %v56_v27 = vld [vmem:[%s15419_s3 + $0x78] sm:$0xff]  ;;  %v57_v29 = vld [vmem:[%s15419_s3 + $0x80] sm:$0xff]  ;;  %v114_v30 = vld [vmem:[%s15419_s3 + $0x248] sm:$0xff] }
   0xb   :  { %8830 = vmatmul.mubr.msk.f32.gmra.mrb[2].mxu1 %vm177_vm1, %v108_v18  ;;  %v58_v31 = vld [vmem:[%s15419_s3 + $0x88] sm:$0xff]  ;;  %v115_v32 = vld [vmem:[%s15419_s3 + $0x250] sm:$0xff]  ;;  %v2784_v35 = vld [vmem:[%s15420_s8 + $0x18] sm:$0xff] }
   0xc   :  { %8737 = vmatmul.mubr.msk.f32.gmra.mrb[4].mxu0 %vm177_vm1, %v46_v6  ;;  %8832 = vmatprep.mubr.msk.f32.mxu1 %vm177_vm1, %v109_v20  ;;  %v59_v33 = vld [vmem:[%s15419_s3 + $0x90] sm:$0xff]  ;;  %v116_v36 = vld [vmem:[%s15419_s3 + $0x258] sm:$0xff]  ;;  %v117_v39 = vld [vmem:[%s15419_s3 + $0x260] sm:$0xff] }
   0xd   :  { %8739 = vmatprep.mubr.msk.f32.mxu0 %vm177_vm1, %v47_v7  ;;  %v2783_v34 = vld [vmem:[%s15420_s8 + $0x10] sm:$0xff]  ;;  %v60_v38 = vld [vmem:[%s15419_s3 + $0x98] sm:$0xff]  ;;  %v61_v40 = vld [vmem:[%s15419_s3 + $0xa0] sm:$0xff] }
   0xe   :  { %v9320_v37 = vpack.c.bf16 %v2784_v35, %v2783_v34  ;;  %v118_v41 = vld [vmem:[%s15419_s3 + $0x268] sm:$0xff]  ;;  %v119_v43 = vld [vmem:[%s15419_s3 + $0x270] sm:$0xff]  ;;  %v120_v45 = vld [vmem:[%s15419_s3 + $0x278] sm:$0xff] }
   0xf   :  { %8833 = vmatmul.mubr.msk.f32.gmra.mrb[4].mxu1 %vm177_vm1, %v110_v22  ;;  %v62_v42 = vld [vmem:[%s15419_s3 + $0xa8] sm:$0xff]  ;;  %v63_v44 = vld [vmem:[%s15419_s3 + $0xb0] sm:$0xff]  ;;  %v64_v46 = vld [vmem:[%s15419_s3 + $0xb8] sm:$0xff] }
  0x10   :  { %8740 = vmatmul.mubr.msk.f32.gmra.mrb[6].mxu0 %vm177_vm1, %v48_v8  ;;  %8835 = vmatprep.mubr.msk.f32.mxu1 %vm177_vm1, %v111_v24  ;;  %v121_v47 = vld [vmem:[%s15419_s3 + $0x280] sm:$0xff]  ;;  %v122_v49 = vld [vmem:[%s15419_s3 + $0x288] sm:$0xff]  ;;  %v123_v51 = vld [vmem:[%s15419_s3 + $0x290] sm:$0xff] }
  0x11   :  { %8742 = vmatprep.mubr.msk.f32.mxu0 %vm177_vm1, %v49_v9  ;;  %9321 = vmatprep.subr.bf16.mxu1 %v9320_v37  ;;  %v65_v48 = vld [vmem:[%s15419_s3 + $0xc0] sm:$0xff]  ;;  %v66_v50 = vld [vmem:[%s15419_s3 + $0xc8] sm:$0xff]  ;;  %v67_v52 = vld [vmem:[%s15419_s3 + $0xd0] sm:$0xff] }
  0x12   :  { %9323 = vmatpush3.bf16.msra.mxu1 %v9320_v37  ;;  %v124_v53 = vld [vmem:[%s15419_s3 + $0x298] sm:$0xff]  ;;  %v125_v55 = vld [vmem:[%s15419_s3 + $0x2a0] sm:$0xff]  ;;  %v126_v57 = vld [vmem:[%s15419_s3 + $0x2a8] sm:$0xff] }
  0x13   :  { %8836 = vmatmul.mubr.msk.f32.gmra.mrb[6].mxu1 %vm177_vm1, %v112_v26  ;;  %v68_v54 = vld [vmem:[%s15419_s3 + $0xd8] sm:$0xff]  ;;  %v69_v56 = vld [vmem:[%s15419_s3 + $0xe0] sm:$0xff]  ;;  %v70_v58 = vld [vmem:[%s15419_s3 + $0xe8] sm:$0xff] }
  0x14   :  { %8743 = vmatmul.mubr.msk.f32.gmra.mrb[8].mxu0 %vm177_vm1, %v50_v10  ;;  %8838 = vmatprep.mubr.msk.f32.mxu1 %vm177_vm1, %v113_v28  ;;  %v127_v59 = vld [vmem:[%s15419_s3 + $0x2b0] sm:$0xff]  ;;  %v128_v61 = vld [vmem:[%s15419_s3 + $0x2b8] sm:$0xff]  ;;  %v129_v63 = vld [vmem:[%s15419_s3 + $0x2c0] sm:$0xff] }
  0x15   :  { %8745 = vmatprep.mubr.msk.f32.mxu0 %vm177_vm1, %v51_v11  ;;  %v71_v60 = vld [vmem:[%s15419_s3 + $0xf0] sm:$0xff]  ;;  %v72_v62 = vld [vmem:[%s15419_s3 + $0xf8] sm:$0xff]  ;;  %v73_v0 = vld [vmem:[%s15419_s3 + $0x100] sm:$0xff] }
  0x16   :  { %v130_v1 = vld [vmem:[%s15419_s3 + $0x2c8] sm:$0xff]  ;;  %v131_v3 = vld [vmem:[%s15419_s3 + $0x2d0] sm:$0xff]  ;;  %v132_v5 = vld [vmem:[%s15419_s3 + $0x2d8] sm:$0xff] }
  0x17   :  { %8839 = vmatmul.mubr.msk.f32.gmra.mrb[8].mxu1 %vm177_vm1, %v114_v30  ;;  %v74_v2 = vld [vmem:[%s15419_s3 + $0x108] sm:$0xff]  ;;  %v75_v4 = vld [vmem:[%s15419_s3 + $0x110] sm:$0xff]  ;;  %v76_v6 = vld [vmem:[%s15419_s3 + $0x118] sm:$0xff] }
  0x18   :  { %8746 = vmatmul.mubr.msk.f32.gmra.mrb[10].mxu0 %vm177_vm1, %v52_v19  ;;  %8841 = vmatprep.mubr.msk.f32.mxu1 %vm177_vm1, %v115_v32  ;;  %v133_v7 = vld [vmem:[%s15419_s3 + $0x2e0] sm:$0xff]  ;;  %v134_v9 = vld [vmem:[%s15419_s3 + $0x2e8] sm:$0xff]  ;;  %v135_v11 = vld [vmem:[%s15419_s3 + $0x2f0] sm:$0xff] }
  0x19   :  { %8748 = vmatprep.mubr.msk.f32.mxu0 %vm177_vm1, %v53_v21  ;;  %v77_v8 = vld [vmem:[%s15419_s3 + $0x120] sm:$0xff]  ;;  %v78_v10 = vld [vmem:[%s15419_s3 + $0x128] sm:$0xff]  ;;  %v79_v12 = vld [vmem:[%s15419_s3 + $0x130] sm:$0xff] }
  0x1a   :  { %v136_v13 = vld [vmem:[%s15419_s3 + $0x2f8] sm:$0xff]  ;;  %v137_v15 = vld [vmem:[%s15419_s3 + $0x300] sm:$0xff]  ;;  %v138_v17 = vld [vmem:[%s15419_s3 + $0x308] sm:$0xff] }
  0x1b   :  { %8842 = vmatmul.mubr.msk.f32.gmra.mrb[10].mxu1 %vm177_vm1, %v116_v36  ;;  %v80_v14 = vld [vmem:[%s15419_s3 + $0x138] sm:$0xff]  ;;  %v81_v16 = vld [vmem:[%s15419_s3 + $0x140] sm:$0xff]  ;;  %v82_v18 = vld [vmem:[%s15419_s3 + $0x148] sm:$0xff] }
  0x1c   :  { %8749 = vmatmul.mubr.msk.f32.gmra.mrb[12].mxu0 %vm177_vm1, %v54_v23  ;;  %8844 = vmatprep.mubr.msk.f32.mxu1 %vm177_vm1, %v117_v39  ;;  %v139_v19 = vld [vmem:[%s15419_s3 + $0x310] sm:$0xff]  ;;  %v140_v21 = vld [vmem:[%s15419_s3 + $0x318] sm:$0xff]  ;;  %v141_v23 = vld [vmem:[%s15419_s3 + $0x320] sm:$0xff] }
  0x1d   :  { %8751 = vmatprep.mubr.msk.f32.mxu0 %vm177_vm1, %v55_v25  ;;  %v83_v20 = vld [vmem:[%s15419_s3 + $0x150] sm:$0xff]  ;;  %v84_v22 = vld [vmem:[%s15419_s3 + $0x158] sm:$0xff]  ;;  %v85_v24 = vld [vmem:[%s15419_s3 + $0x160] sm:$0xff] }
  0x1e   :  { %v142_v25 = vld [vmem:[%s15419_s3 + $0x328] sm:$0xff]  ;;  %v87_v28 = vld [vmem:[%s15419_s3 + $0x170] sm:$0xff]  ;;  %v88_v30 = vld [vmem:[%s15419_s3 + $0x178] sm:$0xff] }
  0x1f   :  { %8845 = vmatmul.mubr.msk.f32.gmra.mrb[12].mxu1 %vm177_vm1, %v118_v41  ;;  %v86_v26 = vld [vmem:[%s15419_s3 + $0x168] sm:$0xff]  ;;  %v89_v32 = vld [vmem:[%s15419_s3 + $0x180] sm:$0xff]  ;;  %v147_v35 = vld [vmem:[%s15419_s3 + $0x350] sm:$0xff] }
  0x20   :  { %8752 = vmatmul.mubr.msk.f32.gmra.mrb[14].mxu0 %vm177_vm1, %v56_v27  ;;  %8847 = vmatprep.mubr.msk.f32.mxu1 %vm177_vm1, %v119_v43  ;;  %v143_v27 = vld [vmem:[%s15419_s3 + $0x330] sm:$0xff]  ;;  %v90_v34 = vld [vmem:[%s15419_s3 + $0x188] sm:$0xff]  ;;  %v148_v37 = vld [vmem:[%s15419_s3 + $0x358] sm:$0xff] }
  0x21   :  { %8754 = vmatprep.mubr.msk.f32.mxu0 %vm177_vm1, %v57_v29  ;;  %v144_v29 = vld [vmem:[%s15419_s3 + $0x338] sm:$0xff]  ;;  %v91_v36 = vld [vmem:[%s15419_s3 + $0x190] sm:$0xff]  ;;  %v149_v39 = vld [vmem:[%s15419_s3 + $0x360] sm:$0xff] }
  0x22   :  { %v150_v41 = vld [vmem:[%s15419_s3 + $0x368] sm:$0xff]  ;;  %v151_v43 = vld [vmem:[%s15419_s3 + $0x370] sm:$0xff] }
  0x23   :  { %8848 = vmatmul.mubr.msk.f32.gmra.mrb[14].mxu1 %vm177_vm1, %v120_v45  ;;  %v152_v45 = vld [vmem:[%s15419_s3 + $0x378] sm:$0xff] }
  0x24   :  { %8755 = vmatmul.mubr.msk.f32.gmra.mrb[16].mxu0 %vm177_vm1, %v58_v31  ;;  %8850 = vmatprep.mubr.msk.f32.mxu1 %vm177_vm1, %v121_v47  ;;  %v145_v31 = vld [vmem:[%s15419_s3 + $0x340] sm:$0xff] }
  0x25   :  { %8757 = vmatprep.mubr.msk.f32.mxu0 %vm177_vm1, %v59_v33  ;;  %v146_v33 = vld [vmem:[%s15419_s3 + $0x348] sm:$0xff]  ;;  %v153_v47 = vld [vmem:[%s15419_s3 + $0x380] sm:$0xff] }
  0x27   :  { %8851 = vmatmul.mubr.msk.f32.gmra.mrb[16].mxu1 %vm177_vm1, %v122_v49  ;;  %v154_v49 = vld [vmem:[%s15419_s3 + $0x388] sm:$0xff] }
  0x28   :  { %8758 = vmatmul.mubr.msk.f32.gmra.mrb[18].mxu0 %vm177_vm1, %v60_v38  ;;  %8853 = vmatprep.mubr.msk.f32.mxu1 %vm177_vm1, %v123_v51  ;;  %v92_v38 = vld [vmem:[%s15419_s3 + $0x198] sm:$0xff]  ;;  %v155_v51 = vld [vmem:[%s15419_s3 + $0x390] sm:$0xff] }
  0x29   :  { %8760 = vmatprep.mubr.msk.f32.mxu0 %vm177_vm1, %v61_v40  ;;  %v93_v40 = vld [vmem:[%s15419_s3 + $0x1a0] sm:$0xff] }
  0x2b   :  { %8854 = vmatmul.mubr.msk.f32.gmra.mrb[18].mxu1 %vm177_vm1, %v124_v53  ;;  %v156_v53 = vld [vmem:[%s15419_s3 + $0x398] sm:$0xff] }
  0x2c   :  { %8761 = vmatmul.mubr.msk.f32.gmra.mrb[20].mxu0 %vm177_vm1, %v62_v42  ;;  %8856 = vmatprep.mubr.msk.f32.mxu1 %vm177_vm1, %v125_v55  ;;  %v94_v42 = vld [vmem:[%s15419_s3 + $0x1a8] sm:$0xff]  ;;  %v157_v55 = vld [vmem:[%s15419_s3 + $0x3a0] sm:$0xff] }
  0x2d   :  { %8763 = vmatprep.mubr.msk.f32.mxu0 %vm177_vm1, %v63_v44  ;;  %v95_v44 = vld [vmem:[%s15419_s3 + $0x1b0] sm:$0xff] }
  0x2f   :  { %8857 = vmatmul.mubr.msk.f32.gmra.mrb[20].mxu1 %vm177_vm1, %v126_v57  ;;  %v158_v57 = vld [vmem:[%s15419_s3 + $0x3a8] sm:$0xff] }
  0x30   :  { %8764 = vmatmul.mubr.msk.f32.gmra.mrb[22].mxu0 %vm177_vm1, %v64_v46  ;;  %8859 = vmatprep.mubr.msk.f32.mxu1 %vm177_vm1, %v127_v59  ;;  %v96_v46 = vld [vmem:[%s15419_s3 + $0x1b8] sm:$0xff]  ;;  %v159_v59 = vld [vmem:[%s15419_s3 + $0x3b0] sm:$0xff] }
  0x31   :  { %8766 = vmatprep.mubr.msk.f32.mxu0 %vm177_vm1, %v65_v48  ;;  %v97_v48 = vld [vmem:[%s15419_s3 + $0x1c0] sm:$0xff] }
  0x33   :  { %8860 = vmatmul.mubr.msk.f32.gmra.mrb[22].mxu1 %vm177_vm1, %v128_v61  ;;  %v160_v61 = vld [vmem:[%s15419_s3 + $0x3b8] sm:$0xff] }
  0x34   :  { %8767 = vmatmul.mubr.msk.f32.gmra.mrb[24].mxu0 %vm177_vm1, %v66_v50  ;;  %8862 = vmatprep.mubr.msk.f32.mxu1 %vm177_vm1, %v129_v63  ;;  %v98_v50 = vld [vmem:[%s15419_s3 + $0x1c8] sm:$0xff]  ;;  %v161_v63 = vld [vmem:[%s15419_s3 + $0x3c0] sm:$0xff] }
  0x35   :  { %8769 = vmatprep.mubr.msk.f32.mxu0 %vm177_vm1, %v67_v52  ;;  %v99_v52 = vld [vmem:[%s15419_s3 + $0x1d0] sm:$0xff] }
  0x37   :  { %8863 = vmatmul.mubr.msk.f32.gmra.mrb[24].mxu1 %vm177_vm1, %v130_v1  ;;  %v163_v1 = vld [vmem:[%s15419_s3 + $0x3d0] sm:$0xff] }
  0x38   :  { %8770 = vmatmul.mubr.msk.f32.gmra.mrb[26].mxu0 %vm177_vm1, %v68_v54  ;;  %8865 = vmatprep.mubr.msk.f32.mxu1 %vm177_vm1, %v131_v3  ;;  %v100_v54 = vld [vmem:[%s15419_s3 + $0x1d8] sm:$0xff]  ;;  %v165_v3 = vld [vmem:[%s15419_s3 + $0x3e0] sm:$0xff] }
  0x39   :  { %8772 = vmatprep.mubr.msk.f32.mxu0 %vm177_vm1, %v69_v56  ;;  %v101_v56 = vld [vmem:[%s15419_s3 + $0x1e0] sm:$0xff] }
  0x3b   :  { %8866 = vmatmul.mubr.msk.f32.gmra.mrb[26].mxu1 %vm177_vm1, %v132_v5  ;;  %v167_v5 = vld [vmem:[%s15419_s3 + $0x3f0] sm:$0xff] }
  0x3c   :  { %8773 = vmatmul.mubr.msk.f32.gmra.mrb[28].mxu0 %vm177_vm1, %v70_v58  ;;  %8868 = vmatprep.mubr.msk.f32.mxu1 %vm177_vm1, %v133_v7  ;;  %v102_v58 = vld [vmem:[%s15419_s3 + $0x1e8] sm:$0xff]  ;;  %v9732_v7 = vmov 1966171168  }
  0x3d   :  { %8775 = vmatprep.mubr.msk.f32.mxu0 %vm177_vm1, %v71_v60  ;;  %v103_v60 = vld [vmem:[%s15419_s3 + $0x1f0] sm:$0xff] }
  0x3f   :  { %8869 = vmatmul.mubr.msk.f32.gmra.mrb[28].mxu1 %vm177_vm1, %v134_v9  ;;  %v1419_v9 = vlaneseq }
  0x40   :  { %8776 = vmatmul.mubr.msk.f32.gmra.mrb[30].mxu0 %vm177_vm1, %v72_v62  ;;  %8871 = vmatprep.mubr.msk.f32.mxu1 %vm177_vm1, %v135_v11  ;;  %v104_v62 = vld [vmem:[%s15419_s3 + $0x1f8] sm:$0xff] }
  0x41   :  { %8778 = vmatprep.mubr.msk.f32.mxu0 %vm177_vm1, %v73_v0  ;;  %v162_v0 = vld [vmem:[%s15419_s3 + $0x3c8] sm:$0xff]  ;;  %v1420_v11 = vshrl.u32 %v1419_v9, 7 }
  0x43   :  { %8872 = vmatmul.mubr.msk.f32.gmra.mrb[30].mxu1 %vm177_vm1, %v136_v13  ;;  %v4010_v13 = vld [vmem:[%s15422_s10] sm:$0xf] }
  0x44   :  { %8779 = vmatmul.mubr.msk.f32.gmra.mrb[32].mxu0 %vm177_vm1, %v74_v2  ;;  %8874 = vmatprep.mubr.msk.f32.mxu1 %vm177_vm1, %v137_v15  ;;  %v164_v2 = vld [vmem:[%s15419_s3 + $0x3d8] sm:$0xff] }
  0x45   :  { %8781 = vmatprep.mubr.msk.f32.mxu0 %vm177_vm1, %v75_v4  ;;  %v166_v4 = vld [vmem:[%s15419_s3 + $0x3e8] sm:$0xff]  ;;  %9122 = vmatprep.subr.msk.mxu0 %vm4403_vm2, %v4010_v13 }
  0x46   :  { %9123 = vmatpush3.msk.msra.mxu0 %vm4403_vm2, %v4010_v13 }
  0x47   :  { %8875 = vmatmul.mubr.msk.f32.gmra.mrb[32].mxu1 %vm177_vm1, %v138_v17  ;;  %v10335_v17 = vsub.s32 0, %v1420_v11 }
  0x48   :  { %8782 = vmatmul.mubr.msk.f32.gmra.mrb[34].mxu0 %vm177_vm1, %v76_v6  ;;  %8877 = vmatprep.mubr.msk.f32.mxu1 %vm177_vm1, %v139_v19  ;;  %v168_v6 = vld [vmem:[%s15419_s3 + $0x3f8] sm:$0xff] }
  0x49   :  { %8784 = vmatprep.mubr.msk.f32.mxu0 %vm177_vm1, %v77_v8  ;;  %v1417_v8 = vunpack.c.l.s4 %v9732_v7 }
  0x4b   :  { %8878 = vmatmul.mubr.msk.f32.gmra.mrb[34].mxu1 %vm177_vm1, %v140_v21  ;;  %v1272_v21 = vld [vmem:[%s15423_s1 + $0x8] sm:$0xff] }
  0x4c   :  { %8785 = vmatmul.mubr.msk.f32.gmra.mrb[36].mxu0 %vm177_vm1, %v78_v10  ;;  %8880 = vmatprep.mubr.msk.f32.mxu1 %vm177_vm1, %v141_v23  ;;  %v1418_v10 = vunpack.c.0.s8 %v1417_v8  ;;  %v10348_v23 = vld [vmem:[%s15424_s5] ss:$0 sm:$0xff] }
  0x4d   :  { %8787 = vmatprep.mubr.msk.f32.mxu0 %vm177_vm1, %v79_v12 }
  0x4e   :  { %v10325_v12 = vsub.s32 %v1418_v10, %v1420_v11 }
  0x4f   :  { %8881 = vmatmul.mubr.msk.f32.gmra.mrb[36].mxu1 %vm177_vm1, %v142_v25 }
  0x50   :  { %8788 = vmatmul.mubr.msk.f32.gmra.mrb[38].mxu0 %vm177_vm1, %v80_v14  ;;  %8883 = vmatprep.mubr.msk.f32.mxu1 %vm177_vm1, %v143_v27  ;;  %v1399_v14 = vld [vmem:[%s15421_s0] sm:$0xff] }
  0x51   :  { %8790 = vmatprep.mubr.msk.f32.mxu0 %vm177_vm1, %v81_v16  ;;  %v1422_v15 = vrot.slane %v1399_v14, %v10325_v12  ;;  %v1415_v27 = vcombine.high %v1399_v14, %v1399_v14 }
  0x53   :  { %8884 = vmatmul.mubr.msk.f32.gmra.mrb[38].mxu1 %vm177_vm1, %v144_v29  ;;  %v1438_v16 = vrot.slane %v1422_v15, %v10325_v12 }
  0x54   :  { %8791 = vmatmul.mubr.msk.f32.gmra.mrb[40].mxu0 %vm177_vm1, %v82_v18  ;;  %8886 = vmatprep.mubr.msk.f32.mxu1 %vm177_vm1, %v145_v31  ;;  %v1430_v18 = vcombine.high %v1422_v15, %v1422_v15 }
  0x55   :  { %8793 = vmatprep.mubr.msk.f32.mxu0 %vm177_vm1, %v83_v20  ;;  %v1810_v19 = vrot.slane %v1438_v16, %v10335_v17 }
  0x56   :  { %v1452_v20 = vrot.slane %v1430_v18, %v10325_v12  ;;  %v1280_v18 = vld [vmem:[%s15423_s1 + $0x48] sm:$0xff] }
  0x57   :  { %8887 = vmatmul.mubr.msk.f32.gmra.mrb[40].mxu1 %vm177_vm1, %v146_v33  ;;  %v1273_v33 = vld [vmem:[%s15423_s1 + $0x10] sm:$0xff] }
  0x58   :  { %8794 = vmatmul.mubr.msk.f32.gmra.mrb[42].mxu0 %vm177_vm1, %v84_v22  ;;  %8889 = vmatprep.mubr.msk.f32.mxu1 %vm177_vm1, %v147_v35  ;;  %v1271_v22 = vld [vmem:[%s15423_s1] sm:$0xff]  ;;  %v1814_v25 = vrot.slane %v1452_v20, %v10335_v17 }
  0x59   :  { %8796 = vmatprep.mubr.msk.f32.mxu0 %vm177_vm1, %v85_v24  ;;  %v2128_v24 = vsub.f32 %v1272_v21, %v1810_v19  ;;  %v2127_v29 = vsub.f32 %v1271_v22, %v1810_v19  ;;  %v1279_v22 = vld [vmem:[%s15423_s1 + $0x40] sm:$0xff] }
  0x5b   :  { %8890 = vmatmul.mubr.msk.f32.gmra.mrb[42].mxu1 %vm177_vm1, %v148_v37 }
  0x5c   :  { %8797 = vmatmul.mubr.msk.f32.gmra.mrb[44].mxu0 %vm177_vm1, %v86_v26  ;;  %8892 = vmatprep.mubr.msk.f32.mxu1 %vm177_vm1, %v149_v39  ;;  %v1460_v26 = vcombine.high %v1438_v16, %v1438_v16 }
  0x5d   :  { %8799 = vmatprep.mubr.msk.f32.mxu0 %vm177_vm1, %v87_v28 }
  0x5e   :  { %v1818_v39 = vrot.slane %v1460_v26, %v10335_v17 }
  0x5f   :  { %8893 = vmatmul.mubr.msk.f32.gmra.mrb[44].mxu1 %vm177_vm1, %v150_v41  ;;  %v10374_v41 = vld [vmem:[%s15426_s7] ss:$0 sm:$0xff] }
  0x60   :  { %8800 = vmatmul.mubr.msk.f32.gmra.mrb[46].mxu0 %vm177_vm1, %v88_v30  ;;  %8895 = vmatprep.mubr.msk.f32.mxu1 %vm177_vm1, %v151_v43  ;;  %v1274_v30 = vld [vmem:[%s15423_s1 + $0x18] sm:$0xff] }
  0x61   :  { %8802 = vmatprep.mubr.msk.f32.mxu0 %vm177_vm1, %v89_v32 }
  0x63   :  { %8896 = vmatmul.mubr.msk.f32.gmra.mrb[46].mxu1 %vm177_vm1, %v152_v45  ;;  %v1276_v45 = vld [vmem:[%s15423_s1 + $0x28] sm:$0xff] }
  0x64   :  { %8803 = vmatmul.mubr.msk.f32.gmra.mrb[48].mxu0 %vm177_vm1, %v90_v34  ;;  %8898 = vmatprep.mubr.msk.f32.mxu1 %vm177_vm1, %v153_v47  ;;  %v10363_v34 = vld [vmem:[%s15425_s6] ss:$0 sm:$0xff] }
  0x65   :  { %8805 = vmatprep.mubr.msk.f32.mxu0 %vm177_vm1, %v91_v36  ;;  %v1462_v36 = vcombine.high %v1452_v20, %v1452_v20 }
  0x67   :  { %8899 = vmatmul.mubr.msk.f32.gmra.mrb[48].mxu1 %vm177_vm1, %v154_v49  ;;  %v1275_v49 = vld [vmem:[%s15423_s1 + $0x20] sm:$0xff] }
  0x68   :  { %8806 = vmatmul.mubr.msk.f32.gmra.mrb[50].mxu0 %vm177_vm1, %v92_v38  ;;  %8901 = vmatprep.mubr.msk.f32.mxu1 %vm177_vm1, %v155_v51  ;;  %v2130_v38 = vsub.f32 %v1274_v30, %v1814_v25 }
  0x69   :  { %8808 = vmatprep.mubr.msk.f32.mxu0 %vm177_vm1, %v93_v40  ;;  %v1429_v40 = vrot.slane %v1415_v27, %v10325_v12 }
  0x6b   :  { %8902 = vmatmul.mubr.msk.f32.gmra.mrb[50].mxu1 %vm177_vm1, %v156_v53  ;;  %v1822_v53 = vrot.slane %v1462_v36, %v10335_v17 }
  0x6c   :  { %8809 = vmatmul.mubr.msk.f32.gmra.mrb[52].mxu0 %vm177_vm1, %v94_v42  ;;  %8904 = vmatprep.mubr.msk.f32.mxu1 %vm177_vm1, %v157_v55 }
  0x6d   :  { %8811 = vmatprep.mubr.msk.f32.mxu0 %vm177_vm1, %v95_v44  ;;  %v2129_v44 = vsub.f32 %v1273_v33, %v1814_v25 }
  0x6f   :  { %8905 = vmatmul.mubr.msk.f32.gmra.mrb[52].mxu1 %vm177_vm1, %v158_v57  ;;  %v1278_v57 = vld [vmem:[%s15423_s1 + $0x38] sm:$0xff] }
  0x70   :  { %8812 = vmatmul.mubr.msk.f32.gmra.mrb[54].mxu0 %vm177_vm1, %v96_v46  ;;  %8907 = vmatprep.mubr.msk.f32.mxu1 %vm177_vm1, %v159_v59  ;;  %v2134_v7 = vsub.f32 %v1278_v57, %v1822_v53 }
  0x71   :  { %8814 = vmatprep.mubr.msk.f32.mxu0 %vm177_vm1, %v97_v48 }
  0x73   :  { %8908 = vmatmul.mubr.msk.f32.gmra.mrb[54].mxu1 %vm177_vm1, %v160_v61 }
  0x74   :  { %8815 = vmatmul.mubr.msk.f32.gmra.mrb[56].mxu0 %vm177_vm1, %v98_v50  ;;  %8910 = vmatprep.mubr.msk.f32.mxu1 %vm177_vm1, %v161_v63  ;;  %v1431_v50 = vcombine.high %v1429_v40, %v1429_v40 }
  0x75   :  { %8817 = vmatprep.mubr.msk.f32.mxu0 %vm177_vm1, %v99_v52 }
  0x77   :  { %8911 = vmatmul.mubr.msk.f32.gmra.mrb[56].mxu1 %vm177_vm1, %v162_v0 }
  0x78   :  { %8818 = vmatmul.mubr.msk.f32.gmra.mrb[58].mxu0 %vm177_vm1, %v100_v54  ;;  %8913 = vmatprep.mubr.msk.f32.mxu1 %vm177_vm1, %v163_v1 }
  0x79   :  { %8820 = vmatprep.mubr.msk.f32.mxu0 %vm177_vm1, %v101_v56  ;;  %v2132_v56 = vsub.f32 %v1276_v45, %v1818_v39 }
  0x7b   :  { %8914 = vmatmul.mubr.msk.f32.gmra.mrb[58].mxu1 %vm177_vm1, %v164_v2  ;;  %v1277_v2 = vld [vmem:[%s15423_s1 + $0x30] sm:$0xff] }
  0x7c   :  { %8821 = vmatmul.mubr.msk.f32.gmra.mrb[60].mxu0 %vm177_vm1, %v102_v58  ;;  %8916 = vmatprep.mubr.msk.f32.mxu1 %vm177_vm1, %v165_v3  ;;  %v1445_v58 = vrot.slane %v1429_v40, %v10325_v12  ;;  %v10408_v3 = vrot.slane %v1431_v50, %v10325_v12  ;;  %v2133_v16 = vsub.f32 %v1277_v2, %v1822_v53  ;;  %v1281_v50 = vld [vmem:[%s15423_s1 + $0x50] sm:$0xff] }
  0x7d   :  { %8823 = vmatprep.mubr.msk.f32.mxu0 %vm177_vm1, %v103_v60 }
  0x7e   :  { %v1826_v11 = vrot.slane %v1445_v58, %v10335_v17  ;;  %v1461_v25 = vcombine.high %v1445_v58, %v1445_v58 }
  0x7f   :  { %8917 = vmatmul.mubr.msk.f32.gmra.mrb[60].mxu1 %vm177_vm1, %v166_v4 }
  0x80   :  { %8824 = vmatmul.mubr.msk.f32.gmra.mrb[62].mxu0 %vm177_vm1, %v104_v62  ;;  %8919 = vmatprep.mubr.msk.f32.mxu1 %vm177_vm1, %v167_v5  ;;  %v2131_v62 = vsub.f32 %v1275_v49, %v1818_v39  ;;  %v2136_v36 = vsub.f32 %v1280_v18, %v1826_v11 }
  0x83   :  { %8920 = vmatmul.mubr.msk.f32.gmra.mrb[62].mxu1 %vm177_vm1, %v168_v6 }
  0xd7   :  { %v8732_v28 = vpop.f32.mrb[0].mxu0 }
  0xd8   :  { %v10355_v31 = vadd.f32 %v8732_v28, %v10348_v23  ;;  %v632_v32 = vpop.f32.mrb[1].mxu0 }
  0xd9   :  { %v10366_v35 = vadd.f32 %v10348_v23, %v632_v32 }
  0xda   :  { %15539 = vst [vmem:[#allocation2_spill] sm:$0xff] %v10355_v31  ;;  %v2256_v37 = vadd.f32 %v2128_v24, %v10355_v31  ;;  %v1830_v24 = vrot.slane %v10408_v3, %v10335_v17  ;;  %v1313_v31 = vld [vmem:[%s15423_s1 + $0x150] sm:$0xff] }
  0xdb   :  { %15540 = vst [vmem:[#allocation3_spill] sm:$0xff] %v10366_v35  ;;  %v2255_v42 = vadd.f32 %v2127_v29, %v10366_v35  ;;  %v8735_v43 = vpop.f32.mrb[2].mxu0  ;;  %v1282_v29 = vld [vmem:[%s15423_s1 + $0x58] sm:$0xff] }
  0xdc   :  { %v2391_v46 = vmul.f32 %v10363_v34, %v2256_v37  ;;  %v10382_v47 = vadd.f32 %v8735_v43, %v10348_v23  ;;  %v642_v48 = vpop.f32.mrb[3].mxu0  ;;  %v10445_v37 = vld [vmem:[%s15421_s0 + $0x8] sm:$0xff]  ;;  %v2135_v43 = vsub.f32 %v1279_v22, %v1826_v11  ;;  %v2138_v49 = vsub.f32 %v1282_v29, %v1830_v24 }
  0xdd   :  { %v2390_v51 = vmul.f32 %v10363_v34, %v2255_v42  ;;  %v10389_v52 = vadd.f32 %v10348_v23, %v642_v48  ;;  %v1471_v57 = vrot.slane %v10445_v37, %v10325_v12 }
  0xde   :  { %15541 = vst [vmem:[#allocation4_spill] sm:$0xff] %v10382_v47  ;;  %v2526_v54 = vadd.f32 %v10374_v41, %v2391_v46  ;;  %v2258_v55 = vadd.f32 %v2130_v38, %v10382_v47  ;;  %v10447_v38 = vpop.f32.mrb[0].mxu1 }
  0xdf   :  { %15542 = vst [vmem:[#allocation5_spill] sm:$0xff] %v10389_v52  ;;  %v2525_v59 = vadd.f32 %v10374_v41, %v2390_v51  ;;  %v2257_v60 = vadd.f32 %v2129_v44, %v10389_v52  ;;  %v8738_v61 = vpop.f32.mrb[4].mxu0  ;;  %v10452_v44 = vpop.f32.mrb[1].mxu1  ;;  %v1834_v51 = vrot.slane %v1461_v25, %v10335_v17  ;;  %v1479_v11 = vcombine.high %v1471_v57, %v1471_v57 }
  0xe0   :  { %v2393_v63 = vmul.f32 %v10363_v34, %v2258_v55  ;;  %v10402_v0 = vadd.f32 %v8738_v61, %v10348_v23  ;;  %v652_v1 = vpop.f32.mrb[5].mxu0  ;;  %v2654_v8 = vmax.f32 %v2526_v54, 0.0  ;;  %v1463_v61 = vcombine.high %v10408_v3, %v10408_v3 }
  0xe1   :  { %v2653_v4 = vmax.f32 %v2525_v59, 0.0  ;;  %v2392_v5 = vmul.f32 %v10363_v34, %v2257_v60  ;;  %v10412_v6 = vadd.f32 %v10348_v23, %v652_v1 }
  0xe2   :  { %15543 = vst [vmem:[#allocation6_spill] sm:$0xff] %v10402_v0  ;;  %v2528_v9 = vadd.f32 %v10374_v41, %v2393_v63  ;;  %v2260_v10 = vadd.f32 %v2132_v56, %v10402_v0  ;;  %v1284_v56 = vld [vmem:[%s15423_s1 + $0x68] sm:$0xff]  ;;  %v1838_v22 = vrot.slane %v1463_v61, %v10335_v17 }
  0xe3   :  { %15544 = vst [vmem:[#allocation7_spill] sm:$0xff] %v10412_v6  ;;  %v2527_v13 = vadd.f32 %v10374_v41, %v2392_v5  ;;  %v2259_v14 = vadd.f32 %v2131_v62, %v10412_v6  ;;  %v8741_v15 = vpop.f32.mrb[6].mxu0  ;;  %8930 = vmatprep.mubr.msk.f32.mxu1 %vm2792_vm3, %v2653_v4  ;;  %v10476_v62 = vpop.f32.mrb[2].mxu1  ;;  %v2137_v4 = vsub.f32 %v1281_v50, %v1830_v24 }
  0xe4   :  { %v2395_v19 = vmul.f32 %v10363_v34, %v2260_v10  ;;  %v10425_v20 = vadd.f32 %v8741_v15, %v10348_v23  ;;  %v662_v21 = vpop.f32.mrb[7].mxu0  ;;  %8931 = vmatmul.mubr.msk.f32.vlgmr.msra.gmra.mrb[64].mxu1 %vm2792_vm3, %v2654_v8  ;;  %v2656_v30 = vmax.f32 %v2528_v9, 0.0  ;;  %v10481_v5 = vpop.f32.mrb[3].mxu1  ;;  %v2140_v3 = vsub.f32 %v1284_v56, %v1834_v51  ;;  %v1283_v10 = vld [vmem:[%s15423_s1 + $0x60] sm:$0xff]  ;;  %v1288_v56 = vld [vmem:[%s15423_s1 + $0x88] sm:$0xff] }
  0xe5   :  { %v2655_v26 = vmax.f32 %v2527_v13, 0.0  ;;  %v2394_v27 = vmul.f32 %v10363_v34, %v2259_v14  ;;  %v10435_v28 = vadd.f32 %v10348_v23, %v662_v21  ;;  %v10501_v24 = vpop.f32.mrb[4].mxu1  ;;  %v2139_v29 = vsub.f32 %v1283_v10, %v1834_v51 }
  0xe6   :  { %15545 = vst [vmem:[#allocation8_spill] sm:$0xff] %v10425_v20  ;;  %v2530_v32 = vadd.f32 %v10374_v41, %v2395_v19  ;;  %v2262_v33 = vadd.f32 %v2134_v7, %v10425_v20 }
  0xe7   :  { %15546 = vst [vmem:[#allocation9_spill] sm:$0xff] %v10435_v28  ;;  %v2529_v39 = vadd.f32 %v10374_v41, %v2394_v27  ;;  %v2261_v40 = vadd.f32 %v2133_v16, %v10435_v28  ;;  %v8744_v42 = vpop.f32.mrb[8].mxu0  ;;  %8933 = vmatprep.mubr.msk.f32.mxu1 %vm2792_vm3, %v2655_v26  ;;  %v10496_v16 = vrot.slane %v1471_v57, %v10325_v12 }
  0xe8   :  { %v2397_v45 = vmul.f32 %v10363_v34, %v2262_v33  ;;  %v10456_v46 = vadd.f32 %v8744_v42, %v10348_v23  ;;  %v672_v48 = vpop.f32.mrb[9].mxu0  ;;  %8934 = vmatmul.mubr.msk.f32.gmra.mrb[66].mxu1 %vm2792_vm3, %v2656_v30  ;;  %v2658_v58 = vmax.f32 %v2530_v32, 0.0  ;;  %v1286_v30 = vld [vmem:[%s15423_s1 + $0x78] sm:$0xff]  ;;  %v10509_v32 = vpop.f32.mrb[5].mxu1  ;;  %v10520_v42 = vrot.slane %v1479_v11, %v10325_v12 }
  0xe9   :  { %v2657_v53 = vmax.f32 %v2529_v39, 0.0  ;;  %v2396_v54 = vmul.f32 %v10363_v34, %v2261_v40  ;;  %v10465_v55 = vadd.f32 %v10348_v23, %v672_v48  ;;  %v1285_v40 = vld [vmem:[%s15423_s1 + $0x70] sm:$0xff]  ;;  %v10533_v57 = vpop.f32.mrb[6].mxu1 }
  0xea   :  { %15547 = vst [vmem:[#allocation10_spill] sm:$0xff] %v10456_v46  ;;  %v2532_v59 = vadd.f32 %v10374_v41, %v2397_v45  ;;  %v2264_v60 = vadd.f32 %v2136_v36, %v10456_v46  ;;  %v2141_v61 = vsub.f32 %v1285_v40, %v1838_v22 }
  0xeb   :  { %15548 = vst [vmem:[#allocation11_spill] sm:$0xff] %v10465_v55  ;;  %v2531_v63 = vadd.f32 %v10374_v41, %v2396_v54  ;;  %v2263_v1 = vadd.f32 %v2135_v43, %v10465_v55  ;;  %v8747_v2 = vpop.f32.mrb[10].mxu0  ;;  %8936 = vmatprep.mubr.msk.f32.mxu1 %vm2792_vm3, %v2657_v53  ;;  %v2142_v54 = vsub.f32 %v1286_v30, %v1838_v22 }
  0xec   :  { %v2399_v7 = vmul.f32 %v10363_v34, %v2264_v60  ;;  %v10485_v8 = vadd.f32 %v8747_v2, %v10348_v23  ;;  %v682_v9 = vpop.f32.mrb[11].mxu0  ;;  %8937 = vmatmul.mubr.msk.f32.gmra.mrb[68].mxu1 %vm2792_vm3, %v2658_v58  ;;  %v2660_v18 = vmax.f32 %v2532_v59, 0.0 }
  0xed   :  { %v2659_v13 = vmax.f32 %v2531_v63, 0.0  ;;  %v2398_v14 = vmul.f32 %v10363_v34, %v2263_v1  ;;  %v10493_v15 = vadd.f32 %v10348_v23, %v682_v9  ;;  %v10538_v63 = vpop.f32.mrb[7].mxu1  ;;  %v1846_v9 = vrot.slane %v10520_v42, %v10335_v17 }
  0xee   :  { %15549 = vst [vmem:[#allocation12_spill] sm:$0xff] %v10485_v8  ;;  %v2534_v19 = vadd.f32 %v10374_v41, %v2399_v7  ;;  %v2266_v21 = vadd.f32 %v2138_v49, %v10485_v8  ;;  %v1842_v49 = vrot.slane %v10496_v16, %v10335_v17  ;;  %v1287_v7 = vld [vmem:[%s15423_s1 + $0x80] sm:$0xff] }
  0xef   :  { %15550 = vst [vmem:[#allocation13_spill] sm:$0xff] %v10493_v15  ;;  %v2533_v25 = vadd.f32 %v10374_v41, %v2398_v14  ;;  %v2265_v26 = vadd.f32 %v2137_v4, %v10493_v15  ;;  %v8750_v27 = vpop.f32.mrb[12].mxu0  ;;  %8939 = vmatprep.mubr.msk.f32.mxu1 %vm2792_vm3, %v2659_v13 }
  0xf0   :  { %v2401_v33 = vmul.f32 %v10363_v34, %v2266_v21  ;;  %v10513_v36 = vadd.f32 %v8750_v27, %v10348_v23  ;;  %v692_v39 = vpop.f32.mrb[13].mxu0  ;;  %8940 = vmatmul.mubr.msk.f32.gmra.mrb[70].mxu1 %vm2792_vm3, %v2660_v18  ;;  %v2662_v50 = vmax.f32 %v2534_v19, 0.0  ;;  %v2144_v14 = vsub.f32 %v1288_v56, %v1842_v49  ;;  %v1290_v18 = vld [vmem:[%s15423_s1 + $0x98] sm:$0xff] }
  0xf1   :  { %v2661_v43 = vmax.f32 %v2533_v25, 0.0  ;;  %v2400_v45 = vmul.f32 %v10363_v34, %v2265_v26  ;;  %v10524_v48 = vadd.f32 %v10348_v23, %v692_v39  ;;  %v1464_v25 = vcombine.high %v10445_v37, %v10445_v37 }
  0xf2   :  { %15551 = vst [vmem:[#allocation14_spill] sm:$0xff] %v10513_v36  ;;  %v2536_v51 = vadd.f32 %v10374_v41, %v2401_v33  ;;  %v2268_v53 = vadd.f32 %v2140_v3, %v10513_v36  ;;  %v1509_v3 = vcombine.high %v10496_v16, %v10496_v16  ;;  %v10563_v16 = vpop.f32.mrb[8].mxu1  ;;  %v2143_v30 = vsub.f32 %v1287_v7, %v1842_v49 }
  0xf3   :  { %15552 = vst [vmem:[#allocation15_spill] sm:$0xff] %v10524_v48  ;;  %v2535_v58 = vadd.f32 %v10374_v41, %v2400_v45  ;;  %v2267_v59 = vadd.f32 %v2139_v29, %v10524_v48  ;;  %v8753_v60 = vpop.f32.mrb[14].mxu0  ;;  %8942 = vmatprep.mubr.msk.f32.mxu1 %vm2792_vm3, %v2661_v43  ;;  %v10568_v33 = vpop.f32.mrb[9].mxu1  ;;  %v2146_v37 = vsub.f32 %v1290_v18, %v1846_v9  ;;  %v1289_v45 = vld [vmem:[%s15423_s1 + $0x90] sm:$0xff] }
  0xf4   :  { %v2403_v1 = vmul.f32 %v10363_v34, %v2268_v53  ;;  %v10542_v2 = vadd.f32 %v8753_v60, %v10348_v23  ;;  %v702_v4 = vpop.f32.mrb[15].mxu0  ;;  %8943 = vmatmul.mubr.msk.f32.gmra.mrb[72].mxu1 %vm2792_vm3, %v2662_v50  ;;  %v2664_v19 = vmax.f32 %v2536_v51, 0.0  ;;  %v1850_v50 = vrot.slane %v1509_v3, %v10335_v17 }
  0xf5   :  { %v2663_v10 = vmax.f32 %v2535_v58, 0.0  ;;  %v2402_v11 = vmul.f32 %v10363_v34, %v2267_v59  ;;  %v10554_v13 = vadd.f32 %v10348_v23, %v702_v4  ;;  %v1511_v56 = vcombine.high %v10520_v42, %v10520_v42 }
  0xf6   :  { %15553 = vst [vmem:[#allocation16_spill] sm:$0xff] %v10542_v2  ;;  %v2538_v21 = vadd.f32 %v10374_v41, %v2403_v1  ;;  %v2270_v22 = vadd.f32 %v2142_v54, %v10542_v2  ;;  %v1292_v54 = vld [vmem:[%s15423_s1 + $0xa8] sm:$0xff]  ;;  %v10591_v1 = vpop.f32.mrb[10].mxu1 }
  0xf7   :  { %15554 = vst [vmem:[#allocation17_spill] sm:$0xff] %v10554_v13  ;;  %v2537_v26 = vadd.f32 %v10374_v41, %v2402_v11  ;;  %v2269_v27 = vadd.f32 %v2141_v61, %v10554_v13  ;;  %v8756_v29 = vpop.f32.mrb[16].mxu0  ;;  %8945 = vmatprep.mubr.msk.f32.mxu1 %vm2792_vm3, %v2663_v10  ;;  %v1478_v61 = vrot.slane %v1464_v25, %v10325_v12  ;;  %v10596_v11 = vpop.f32.mrb[11].mxu1 }
  0xf8   :  { %v2405_v39 = vmul.f32 %v10363_v34, %v2270_v22  ;;  %v10572_v40 = vadd.f32 %v8756_v29, %v10348_v23  ;;  %v712_v43 = vpop.f32.mrb[17].mxu0  ;;  %8946 = vmatmul.mubr.msk.f32.gmra.mrb[74].mxu1 %vm2792_vm3, %v2664_v19  ;;  %v2666_v58 = vmax.f32 %v2538_v21, 0.0  ;;  %v2145_v10 = vsub.f32 %v1289_v45, %v1846_v9  ;;  %v1291_v21 = vld [vmem:[%s15423_s1 + $0xa0] sm:$0xff] }
  0xf9   :  { %v2665_v51 = vmax.f32 %v2537_v26, 0.0  ;;  %v2404_v49 = vmul.f32 %v10363_v34, %v2269_v27  ;;  %v10581_v53 = vadd.f32 %v10348_v23, %v712_v43  ;;  %v2148_v19 = vsub.f32 %v1292_v54, %v1850_v50  ;;  %v1294_v43 = vld [vmem:[%s15423_s1 + $0xb8] sm:$0xff] }
  0xfa   :  { %15555 = vst [vmem:[#allocation18_spill] sm:$0xff] %v10572_v40  ;;  %v2540_v59 = vadd.f32 %v10374_v41, %v2405_v39  ;;  %v2272_v60 = vadd.f32 %v2144_v14, %v10572_v40  ;;  %v1480_v22 = vcombine.high %v1478_v61, %v1478_v61  ;;  %v1854_v27 = vrot.slane %v1511_v56, %v10335_v17 }
  0xfb   :  { %15556 = vst [vmem:[#allocation19_spill] sm:$0xff] %v10581_v53  ;;  %v2539_v4 = vadd.f32 %v10374_v41, %v2404_v49  ;;  %v2271_v7 = vadd.f32 %v2143_v30, %v10581_v53  ;;  %v8759_v3 = vpop.f32.mrb[18].mxu0  ;;  %8948 = vmatprep.mubr.msk.f32.mxu1 %vm2792_vm3, %v2665_v51  ;;  %v1494_v45 = vrot.slane %v1478_v61, %v10325_v12  ;;  %v10617_v51 = vpop.f32.mrb[12].mxu1  ;;  %v1293_v61 = vld [vmem:[%s15423_s1 + $0xb0] sm:$0xff] }
  0xfc   :  { %v2407_v42 = vmul.f32 %v10363_v34, %v2272_v60  ;;  %v10600_v18 = vadd.f32 %v8759_v3, %v10348_v23  ;;  %v722_v14 = vpop.f32.mrb[19].mxu0  ;;  %8949 = vmatmul.mubr.msk.f32.gmra.mrb[76].mxu1 %vm2792_vm3, %v2666_v58  ;;  %v2668_v29 = vmax.f32 %v2540_v59, 0.0  ;;  %v2147_v56 = vsub.f32 %v1291_v21, %v1850_v50  ;;  %v10622_v59 = vpop.f32.mrb[13].mxu1 }
  0xfd   :  { %v2667_v25 = vmax.f32 %v2539_v4, 0.0  ;;  %v2406_v26 = vmul.f32 %v10363_v34, %v2271_v7  ;;  %v10608_v9 = vadd.f32 %v10348_v23, %v722_v14  ;;  %v10633_v7 = vrot.slane %v1480_v22, %v10325_v12 }
  0xfe   :  { %15557 = vst [vmem:[#allocation20_spill] sm:$0xff] %v10600_v18  ;;  %v2542_v30 = vadd.f32 %v10374_v41, %v2407_v42  ;;  %v2274_v39 = vadd.f32 %v2146_v37, %v10600_v18  ;;  %v2150_v42 = vsub.f32 %v1294_v43, %v1854_v27  ;;  %v10679_v18 = vld [vmem:[%s15421_s0 + $0x10] sm:$0xff] }
  0xff   :  { %15558 = vst [vmem:[#allocation21_spill] sm:$0xff] %v10608_v9  ;;  %v2541_v49 = vadd.f32 %v10374_v41, %v2406_v26  ;;  %v2273_v54 = vadd.f32 %v2145_v10, %v10608_v9  ;;  %v8762_v58 = vpop.f32.mrb[20].mxu0  ;;  %8951 = vmatprep.mubr.msk.f32.mxu1 %vm2792_vm3, %v2667_v25  ;;  %v1858_v26 = vrot.slane %v1494_v45, %v10335_v17 }
 0x100   :  { %v2409_v37 = vmul.f32 %v10363_v34, %v2274_v39  ;;  %v10626_v60 = vadd.f32 %v8762_v58, %v10348_v23  ;;  %v732_v4 = vpop.f32.mrb[21].mxu0  ;;  %8952 = vmatmul.mubr.msk.f32.gmra.mrb[78].mxu1 %vm2792_vm3, %v2668_v29  ;;  %v2670_v14 = vmax.f32 %v2542_v30, 0.0  ;;  %v10642_v29 = vpop.f32.mrb[14].mxu1  ;;  %v1296_v30 = vld [vmem:[%s15423_s1 + $0xc8] sm:$0xff] }
 0x101   :  { %v2669_v3 = vmax.f32 %v2541_v49, 0.0  ;;  %v2408_v50 = vmul.f32 %v10363_v34, %v2273_v54  ;;  %v10637_v10 = vadd.f32 %v10348_v23, %v732_v4  ;;  %v2149_v54 = vsub.f32 %v1293_v61, %v1854_v27  ;;  %v10650_v43 = vpop.f32.mrb[15].mxu1 }
 0x102   :  { %15559 = vst [vmem:[#allocation22_spill] sm:$0xff] %v10626_v60  ;;  %v2544_v21 = vadd.f32 %v10374_v41, %v2409_v37  ;;  %v2276_v25 = vadd.f32 %v2148_v19, %v10626_v60  ;;  %v1862_v27 = vrot.slane %v10633_v7, %v10335_v17  ;;  %v1510_v4 = vcombine.high %v1494_v45, %v1494_v45  ;;  %v10671_v9 = vpop.f32.mrb[16].mxu1 }
 0x103   :  { %15560 = vst [vmem:[#allocation23_spill] sm:$0xff] %v10637_v10  ;;  %v2543_v39 = vadd.f32 %v10374_v41, %v2408_v50  ;;  %v2275_v22 = vadd.f32 %v2147_v56, %v10637_v10  ;;  %v8765_v49 = vpop.f32.mrb[22].mxu0  ;;  %8954 = vmatprep.mubr.msk.f32.mxu1 %vm2792_vm3, %v2669_v3  ;;  %v1295_v56 = vld [vmem:[%s15423_s1 + $0xc0] sm:$0xff]  ;;  %v2152_v60 = vsub.f32 %v1296_v30, %v1858_v26 }
 0x104   :  { %v2411_v19 = vmul.f32 %v10363_v34, %v2276_v25  ;;  %v10654_v58 = vadd.f32 %v8765_v49, %v10348_v23  ;;  %v742_v37 = vpop.f32.mrb[23].mxu0  ;;  %8955 = vmatmul.mubr.msk.f32.gmra.mrb[80].mxu1 %vm2792_vm3, %v2670_v14  ;;  %v1298_v25 = vld [vmem:[%s15423_s1 + $0xd8] sm:$0xff]  ;;  %v2672_v49 = vmax.f32 %v2544_v21, 0.0  ;;  %v10681_v21 = vpop.f32.mrb[17].mxu1 }
 0x105   :  { %v2671_v61 = vmax.f32 %v2543_v39, 0.0  ;;  %v2410_v3 = vmul.f32 %v10363_v34, %v2275_v22  ;;  %v10664_v50 = vadd.f32 %v10348_v23, %v742_v37  ;;  %v2151_v37 = vsub.f32 %v1295_v56, %v1858_v26  ;;  %v1297_v26 = vld [vmem:[%s15423_s1 + $0xd0] sm:$0xff] }
 0x106   :  { %15561 = vst [vmem:[#allocation24_spill] sm:$0xff] %v10654_v58  ;;  %v2546_v14 = vadd.f32 %v10374_v41, %v2411_v19  ;;  %v2278_v10 = vadd.f32 %v2150_v42, %v10654_v58  ;;  %v1866_v56 = vrot.slane %v1510_v4, %v10335_v17  ;;  %v1520_v4 = vrot.slane %v10679_v18, %v10325_v12 }
 0x107   :  { %15562 = vst [vmem:[#allocation25_spill] sm:$0xff] %v10664_v50  ;;  %v2545_v45 = vadd.f32 %v10374_v41, %v2410_v3  ;;  %v2277_v39 = vadd.f32 %v2149_v54, %v10664_v50  ;;  %v8768_v22 = vpop.f32.mrb[24].mxu0  ;;  %8957 = vmatprep.mubr.msk.f32.mxu1 %vm2792_vm3, %v2671_v61  ;;  %v2154_v54 = vsub.f32 %v1298_v25, %v1862_v27 }
 0x108   :  { %v2413_v42 = vmul.f32 %v10363_v34, %v2278_v10  ;;  %v10685_v30 = vadd.f32 %v8768_v22, %v10348_v23  ;;  %v752_v19 = vpop.f32.mrb[25].mxu0  ;;  %8958 = vmatmul.mubr.msk.f32.gmra.mrb[82].mxu1 %vm2792_vm3, %v2672_v49  ;;  %v1300_v10 = vld [vmem:[%s15423_s1 + $0xe8] sm:$0xff]  ;;  %v1512_v49 = vcombine.high %v10633_v7, %v10633_v7  ;;  %v2674_v25 = vmax.f32 %v2546_v14, 0.0 }
 0x109   :  { %v2673_v61 = vmax.f32 %v2545_v45, 0.0  ;;  %v2412_v3 = vmul.f32 %v10363_v34, %v2277_v39  ;;  %v10694_v50 = vadd.f32 %v10348_v23, %v752_v19  ;;  %v10705_v45 = vpop.f32.mrb[18].mxu1  ;;  %v2153_v40 = vsub.f32 %v1297_v26, %v1862_v27 }
 0x10a   :  { %15563 = vst [vmem:[#allocation26_spill] sm:$0xff] %v10685_v30  ;;  %v2548_v22 = vadd.f32 %v10374_v41, %v2413_v42  ;;  %v2280_v58 = vadd.f32 %v2152_v60, %v10685_v30  ;;  %v10710_v13 = vpop.f32.mrb[19].mxu1  ;;  %v2156_v42 = vsub.f32 %v1300_v10, %v1866_v56  ;;  %v1302_v10 = vld [vmem:[%s15423_s1 + $0xf8] sm:$0xff] }
 0x10b   :  { %15564 = vst [vmem:[#allocation27_spill] sm:$0xff] %v10694_v50  ;;  %v2547_v39 = vadd.f32 %v10374_v41, %v2412_v3  ;;  %v2279_v19 = vadd.f32 %v2151_v37, %v10694_v50  ;;  %v8771_v53 = vpop.f32.mrb[26].mxu0  ;;  %8960 = vmatprep.mubr.msk.f32.mxu1 %vm2792_vm3, %v2673_v61  ;;  %v1299_v3 = vld [vmem:[%s15423_s1 + $0xe0] sm:$0xff]  ;;  %v1528_v37 = vcombine.high %v1520_v4, %v1520_v4 }
 0x10c   :  { %v2415_v7 = vmul.f32 %v10363_v34, %v2280_v58  ;;  %v10714_v14 = vadd.f32 %v8771_v53, %v10348_v23  ;;  %v762_v60 = vpop.f32.mrb[27].mxu0  ;;  %8961 = vmatmul.mubr.msk.f32.gmra.mrb[84].mxu1 %vm2792_vm3, %v2674_v25  ;;  %v1870_v58 = vrot.slane %v1512_v49, %v10335_v17  ;;  %v2676_v26 = vmax.f32 %v2548_v22, 0.0 }
 0x10d   :  { %v2675_v50 = vmax.f32 %v2547_v39, 0.0  ;;  %v2414_v61 = vmul.f32 %v10363_v34, %v2279_v19  ;;  %v10722_v27 = vadd.f32 %v10348_v23, %v762_v60  ;;  %v10731_v25 = vrot.slane %v1520_v4, %v10325_v12  ;;  %v10733_v39 = vpop.f32.mrb[20].mxu1  ;;  %v1301_v4 = vld [vmem:[%s15423_s1 + $0xf0] sm:$0xff] }
 0x10e   :  { %15565 = vst [vmem:[#allocation28_spill] sm:$0xff] %v10714_v14  ;;  %v2550_v53 = vadd.f32 %v10374_v41, %v2415_v7  ;;  %v2282_v30 = vadd.f32 %v2154_v54, %v10714_v14  ;;  %v2155_v49 = vsub.f32 %v1299_v3, %v1866_v56  ;;  %v10738_v22 = vpop.f32.mrb[21].mxu1 }
 0x10f   :  { %15566 = vst [vmem:[#allocation29_spill] sm:$0xff] %v10722_v27  ;;  %v2549_v19 = vadd.f32 %v10374_v41, %v2414_v61  ;;  %v2281_v60 = vadd.f32 %v2153_v40, %v10722_v27  ;;  %v8774_v2 = vpop.f32.mrb[28].mxu0  ;;  %8963 = vmatprep.mubr.msk.f32.mxu1 %vm2792_vm3, %v2675_v50  ;;  %v10749_v40 = vrot.slane %v1528_v37, %v10325_v12  ;;  %v10759_v48 = vpop.f32.mrb[22].mxu1 }
 0x110   :  { %v2417_v54 = vmul.f32 %v10363_v34, %v2282_v30  ;;  %v10742_v7 = vadd.f32 %v8774_v2, %v10348_v23  ;;  %v772_v14 = vpop.f32.mrb[29].mxu0  ;;  %8964 = vmatmul.mubr.msk.f32.gmra.mrb[86].mxu1 %vm2792_vm3, %v2676_v26  ;;  %v2158_v30 = vsub.f32 %v1302_v10, %v1870_v58  ;;  %v2678_v3 = vmax.f32 %v2550_v53, 0.0  ;;  %15569 = vst [vmem:[#allocation32_spill] sm:$0xff] %v10759_v48  ;;  %v1304_v53 = vld [vmem:[%s15423_s1 + $0x108] sm:$0xff]  ;;  %v10767_v10 = vpop.f32.mrb[23].mxu1 }
 0x111   :  { %v2677_v61 = vmax.f32 %v2549_v19, 0.0  ;;  %v2416_v50 = vmul.f32 %v10363_v34, %v2281_v60  ;;  %v10753_v56 = vadd.f32 %v10348_v23, %v772_v14  ;;  %v1874_v26 = vrot.slane %v10731_v25, %v10335_v17 }
 0x112   :  { %15567 = vst [vmem:[#allocation30_spill] sm:$0xff] %v10742_v7  ;;  %v2552_v2 = vadd.f32 %v10374_v41, %v2417_v54  ;;  %v2284_v27 = vadd.f32 %v2156_v42, %v10742_v7  ;;  %v2157_v14 = vsub.f32 %v1301_v4, %v1870_v58  ;;  %v1878_v58 = vrot.slane %v10749_v40, %v10335_v17 }
 0x113   :  { %15568 = vst [vmem:[#allocation31_spill] sm:$0xff] %v10753_v56  ;;  %v2551_v37 = vadd.f32 %v10374_v41, %v2416_v50  ;;  %v2283_v19 = vadd.f32 %v2155_v49, %v10753_v56  ;;  %v8777_v36 = vpop.f32.mrb[30].mxu0  ;;  %8966 = vmatprep.mubr.msk.f32.mxu1 %vm2792_vm3, %v2677_v61  ;;  %v1303_v49 = vld [vmem:[%s15423_s1 + $0x100] sm:$0xff]  ;;  %v1513_v4 = vcombine.high %v10679_v18, %v10679_v18  ;;  %v10792_v18 = vpop.f32.mrb[24].mxu1 }
 0x114   :  { %v2419_v42 = vmul.f32 %v10363_v34, %v2284_v27  ;;  %v10771_v60 = vadd.f32 %v8777_v36, %v10348_v23  ;;  %v782_v54 = vpop.f32.mrb[31].mxu0  ;;  %8967 = vmatmul.mubr.msk.f32.gmra.mrb[88].mxu1 %vm2792_vm3, %v2678_v3  ;;  %v1306_v36 = vld [vmem:[%s15423_s1 + $0x118] sm:$0xff]  ;;  %v1558_v3 = vcombine.high %v10731_v25, %v10731_v25  ;;  %v2680_v56 = vmax.f32 %v2552_v2, 0.0  ;;  %15572 = vst [vmem:[#allocation35_spill] sm:$0xff] %v10792_v18  ;;  %v10797_v46 = vpop.f32.mrb[25].mxu1 }
 0x115   :  { %v2679_v61 = vmax.f32 %v2551_v37, 0.0  ;;  %v2418_v50 = vmul.f32 %v10363_v34, %v2283_v19  ;;  %v10783_v27 = vadd.f32 %v10348_v23, %v782_v54  ;;  %v2160_v8 = vsub.f32 %v1304_v53, %v1874_v26  ;;  %15573 = vst [vmem:[#allocation36_spill] sm:$0xff] %v10797_v46  ;;  %v1305_v53 = vld [vmem:[%s15423_s1 + $0x110] sm:$0xff] }
 0x116   :  { %15570 = vst [vmem:[#allocation33_spill] sm:$0xff] %v10771_v60  ;;  %v2554_v7 = vadd.f32 %v10374_v41, %v2419_v42  ;;  %v2286_v15 = vadd.f32 %v2158_v30, %v10771_v60  ;;  %v2159_v55 = vsub.f32 %v1303_v49, %v1874_v26  ;;  %v2162_v30 = vsub.f32 %v1306_v36, %v1878_v58  ;;  %v1308_v36 = vld [vmem:[%s15423_s1 + $0x128] sm:$0xff] }
 0x117   :  { %15571 = vst [vmem:[#allocation34_spill] sm:$0xff] %v10783_v27  ;;  %v2553_v37 = vadd.f32 %v10374_v41, %v2418_v50  ;;  %v2285_v19 = vadd.f32 %v2157_v14, %v10783_v27  ;;  %v8780_v54 = vpop.f32.mrb[32].mxu0  ;;  %8969 = vmatprep.mubr.msk.f32.mxu1 %vm2792_vm3, %v2679_v61  ;;  %v1527_v14 = vrot.slane %v1513_v4, %v10325_v12 }
 0x118   :  { %v2421_v25 = vmul.f32 %v10363_v34, %v2286_v15  ;;  %v10801_v2 = vadd.f32 %v8780_v54, %v10348_v23  ;;  %v792_v42 = vpop.f32.mrb[33].mxu0  ;;  %8970 = vmatmul.mubr.msk.f32.gmra.mrb[90].mxu1 %vm2792_vm3, %v2680_v56  ;;  %v1882_v15 = vrot.slane %v1558_v3, %v10335_v17  ;;  %v2682_v61 = vmax.f32 %v2554_v7, 0.0 }
 0x119   :  { %v2681_v50 = vmax.f32 %v2553_v37, 0.0  ;;  %v2420_v26 = vmul.f32 %v10363_v34, %v2285_v19  ;;  %v10810_v49 = vadd.f32 %v10348_v23, %v792_v42  ;;  %v1560_v4 = vcombine.high %v10749_v40, %v10749_v40  ;;  %v10820_v37 = vpop.f32.mrb[26].mxu1  ;;  %v1307_v40 = vld [vmem:[%s15423_s1 + $0x120] sm:$0xff] }
 0x11a   :  { %15574 = vst [vmem:[#allocation37_spill] sm:$0xff] %v10801_v2  ;;  %v2556_v54 = vadd.f32 %v10374_v41, %v2421_v25  ;;  %v2288_v56 = vadd.f32 %v2160_v8, %v10801_v2  ;;  %15576 = vst [vmem:[#allocation39_spill] sm:$0xff] %v10820_v37  ;;  %v2161_v7 = vsub.f32 %v1305_v53, %v1878_v58  ;;  %v10825_v3 = vpop.f32.mrb[27].mxu1 }
 0x11b   :  { %15575 = vst [vmem:[#allocation38_spill] sm:$0xff] %v10810_v49  ;;  %v2555_v19 = vadd.f32 %v10374_v41, %v2420_v26  ;;  %v2287_v42 = vadd.f32 %v2159_v55, %v10810_v49  ;;  %v8783_v27 = vpop.f32.mrb[34].mxu0  ;;  %8972 = vmatprep.mubr.msk.f32.mxu1 %vm2792_vm3, %v2681_v50  ;;  %15577 = vst [vmem:[#allocation40_spill] sm:$0xff] %v10825_v3  ;;  %v10836_v55 = vrot.slane %v1527_v14, %v10325_v12  ;;  %v10845_v28 = vpop.f32.mrb[28].mxu1 }
 0x11c   :  { %v2423_v8 = vmul.f32 %v10363_v34, %v2288_v56  ;;  %v10829_v25 = vadd.f32 %v8783_v27, %v10348_v23  ;;  %v802_v2 = vpop.f32.mrb[35].mxu0  ;;  %8973 = vmatmul.mubr.msk.f32.gmra.mrb[92].mxu1 %vm2792_vm3, %v2682_v61  ;;  %v1529_v26 = vcombine.high %v1527_v14, %v1527_v14  ;;  %v2164_v56 = vsub.f32 %v1308_v36, %v1882_v15 }
 0x11d   :  { %v2683_v50 = vmax.f32 %v2555_v19, 0.0  ;;  %v2422_v58 = vmul.f32 %v10363_v34, %v2287_v42  ;;  %v10840_v53 = vadd.f32 %v10348_v23, %v802_v2  ;;  %v2684_v27 = vmax.f32 %v2556_v54, 0.0  ;;  %15580 = vst [vmem:[#allocation43_spill] sm:$0xff] %v10845_v28  ;;  %v1310_v2 = vld [vmem:[%s15423_s1 + $0x138] sm:$0xff]  ;;  %v10853_v54 = vpop.f32.mrb[29].mxu1 }
 0x11e   :  { %15578 = vst [vmem:[#allocation41_spill] sm:$0xff] %v10829_v25  ;;  %v2558_v49 = vadd.f32 %v10374_v41, %v2423_v8  ;;  %v2290_v61 = vadd.f32 %v2162_v30, %v10829_v25  ;;  %v1886_v60 = vrot.slane %v1560_v4, %v10335_v17  ;;  %v2163_v42 = vsub.f32 %v1307_v40, %v1882_v15 }
 0x11f   :  { %15579 = vst [vmem:[#allocation42_spill] sm:$0xff] %v10840_v53  ;;  %v2557_v20 = vadd.f32 %v10374_v41, %v2422_v58  ;;  %v2289_v14 = vadd.f32 %v2161_v7, %v10840_v53  ;;  %v8786_v19 = vpop.f32.mrb[36].mxu0  ;;  %8975 = vmatprep.mubr.msk.f32.mxu1 %vm2792_vm3, %v2683_v50  ;;  %15581 = vst [vmem:[#allocation44_spill] sm:$0xff] %v10853_v54  ;;  %v1309_v7 = vld [vmem:[%s15423_s1 + $0x130] sm:$0xff]  ;;  %v10865_v15 = vrot.slane %v10836_v55, %v10335_v17 }
 0x120   :  { %v2425_v30 = vmul.f32 %v10363_v34, %v2290_v61  ;;  %v10857_v36 = vadd.f32 %v8786_v19, %v10348_v23  ;;  %v812_v4 = vpop.f32.mrb[37].mxu0  ;;  %8976 = vmatmul.mubr.msk.f32.gmra.mrb[94].mxu1 %vm2792_vm3, %v2684_v27  ;;  %v10868_v8 = vrot.slane %v1529_v26, %v10325_v12  ;;  %v1312_v27 = vld [vmem:[%s15423_s1 + $0x148] sm:$0xff]  ;;  %v2686_v61 = vmax.f32 %v2558_v49, 0.0  ;;  %v10882_v26 = vld [vmem:[%s15421_s0 + $0x20] sm:$0xff] }
 0x121   :  { %v2685_v40 = vmax.f32 %v2557_v20, 0.0  ;;  %v2424_v50 = vmul.f32 %v10363_v34, %v2289_v14  ;;  %v10872_v58 = vadd.f32 %v10348_v23, %v812_v4  ;;  %v2166_v25 = vsub.f32 %v1310_v2, %v1886_v60  ;;  %v10884_v20 = vpop.f32.mrb[30].mxu1 }
 0x122   :  { %15582 = vst [vmem:[#allocation45_spill] sm:$0xff] %v10857_v36  ;;  %v2560_v19 = vadd.f32 %v10374_v41, %v2425_v30  ;;  %v2292_v53 = vadd.f32 %v2164_v56, %v10857_v36  ;;  %15584 = vst [vmem:[#allocation47_spill] sm:$0xff] %v10884_v20  ;;  %v2165_v49 = vsub.f32 %v1309_v7, %v1886_v60  ;;  %v1311_v56 = vld [vmem:[%s15423_s1 + $0x140] sm:$0xff]  ;;  %v10894_v30 = vpop.f32.mrb[31].mxu1 }
 0x123   :  { %15583 = vst [vmem:[#allocation46_spill] sm:$0xff] %v10872_v58  ;;  %v2559_v14 = vadd.f32 %v10374_v41, %v2424_v50  ;;  %v2291_v4 = vadd.f32 %v2163_v42, %v10872_v58  ;;  %v8789_v6 = vpop.f32.mrb[38].mxu0  ;;  %8978 = vmatprep.mubr.msk.f32.mxu1 %vm2792_vm3, %v2685_v40  ;;  %v1559_v2 = vcombine.high %v10836_v55, %v10836_v55  ;;  %15585 = vst [vmem:[#allocation48_spill] sm:$0xff] %v10894_v30  ;;  %v10909_v55 = vld [vmem:[%s15421_s0 + $0x18] sm:$0xff]  ;;  %v10925_v47 = vpop.f32.mrb[32].mxu1 }
 0x124   :  { %v2427_v36 = vmul.f32 %v10363_v34, %v2292_v53  ;;  %v10898_v0 = vadd.f32 %v8789_v6, %v10348_v23  ;;  %v822_v50 = vpop.f32.mrb[39].mxu0  ;;  %8979 = vmatmul.mubr.msk.f32.gmra.mrb[96].mxu1 %vm2792_vm3, %v2686_v61  ;;  %v2168_v42 = vsub.f32 %v1312_v27, %v10865_v15  ;;  %v10904_v60 = vrot.slane %v10868_v8, %v10335_v17  ;;  %v1314_v40 = vld [vmem:[%s15423_s1 + $0x158] sm:$0xff] }
 0x125   :  { %v2687_v7 = vmax.f32 %v2559_v14, 0.0  ;;  %v2426_v53 = vmul.f32 %v10363_v34, %v2291_v4  ;;  %v10913_v6 = vadd.f32 %v10348_v23, %v822_v50  ;;  %v10920_v27 = vrot.slane %v10882_v26, %v10325_v12  ;;  %15588 = vst [vmem:[#allocation51_spill] sm:$0xff] %v10925_v47 }
 0x126   :  { %15586 = vst [vmem:[#allocation49_spill] sm:$0xff] %v10898_v0  ;;  %v2688_v61 = vmax.f32 %v2560_v19, 0.0  ;;  %v2562_v58 = vadd.f32 %v10374_v41, %v2427_v36  ;;  %v2294_v52 = vadd.f32 %v2166_v25, %v10898_v0  ;;  %v2167_v14 = vsub.f32 %v1311_v56, %v10865_v15  ;;  %v10940_v36 = vpop.f32.mrb[33].mxu1 }
 0x127   :  { %15587 = vst [vmem:[#allocation50_spill] sm:$0xff] %v10913_v6  ;;  %v2561_v4 = vadd.f32 %v10374_v41, %v2426_v53  ;;  %v2293_v50 = vadd.f32 %v2165_v49, %v10913_v6  ;;  %v8792_v35 = vpop.f32.mrb[40].mxu0  ;;  %8981 = vmatprep.mubr.msk.f32.mxu1 %vm2792_vm3, %v2687_v7  ;;  %v10934_v19 = vrot.slane %v1559_v2, %v10335_v17  ;;  %15589 = vst [vmem:[#allocation52_spill] sm:$0xff] %v10940_v36  ;;  %v1316_v2 = vld [vmem:[%s15423_s1 + $0x168] sm:$0xff] }
 0x128   :  { %v10938_v25 = vrot.slane %v10909_v55, %v10325_v12  ;;  %v2429_v15 = vmul.f32 %v10363_v34, %v2294_v52  ;;  %v10944_v49 = vadd.f32 %v8792_v35, %v10348_v23  ;;  %v832_v56 = vpop.f32.mrb[41].mxu0  ;;  %8982 = vmatmul.mubr.msk.f32.gmra.mrb[98].mxu1 %vm2792_vm3, %v2688_v61  ;;  %v2170_v7 = vsub.f32 %v1314_v40, %v10904_v60  ;;  %v1315_v35 = vld [vmem:[%s15423_s1 + $0x160] sm:$0xff] }
 0x129   :  { %v1561_v53 = vcombine.high %v10868_v8, %v10868_v8  ;;  %v2689_v6 = vmax.f32 %v2561_v4, 0.0  ;;  %v2428_v0 = vmul.f32 %v10363_v34, %v2293_v50  ;;  %v10955_v52 = vadd.f32 %v10348_v23, %v832_v56  ;;  %v10967_v4 = vpop.f32.mrb[34].mxu1 }
 0x12a   :  { %15590 = vst [vmem:[#allocation53_spill] sm:$0xff] %v10944_v49  ;;  %v10962_v40 = vrot.slane %v10920_v27, %v10325_v12  ;;  %v2690_v61 = vmax.f32 %v2562_v58, 0.0  ;;  %v2564_v47 = vadd.f32 %v10374_v41, %v2429_v15  ;;  %v2296_v36 = vadd.f32 %v2168_v42, %v10944_v49  ;;  %15592 = vst [vmem:[#allocation55_spill] sm:$0xff] %v10967_v4  ;;  %v10977_v15 = vpop.f32.mrb[35].mxu1 }
 0x12b   :  { %15591 = vst [vmem:[#allocation54_spill] sm:$0xff] %v10955_v52  ;;  %v2169_v8 = vsub.f32 %v1313_v31, %v10904_v60  ;;  %v2563_v50 = vadd.f32 %v10374_v41, %v2428_v0  ;;  %v2295_v56 = vadd.f32 %v2167_v14, %v10955_v52  ;;  %v8795_v20 = vpop.f32.mrb[42].mxu0  ;;  %8984 = vmatprep.mubr.msk.f32.mxu1 %vm2792_vm3, %v2689_v6  ;;  %15593 = vst [vmem:[#allocation56_spill] sm:$0xff] %v10977_v15 }
 0x12c   :  { %v2172_v30 = vsub.f32 %v1316_v2, %v10934_v19  ;;  %v10975_v58 = vrot.slane %v10938_v25, %v10325_v12  ;;  %v2431_v42 = vmul.f32 %v10363_v34, %v2296_v36  ;;  %v10981_v31 = vadd.f32 %v8795_v20, %v10348_v23  ;;  %v842_v60 = vpop.f32.mrb[43].mxu0  ;;  %8985 = vmatmul.mubr.msk.f32.gmra.mrb[100].mxu1 %vm2792_vm3, %v2690_v61  ;;  %v1318_v36 = vld [vmem:[%s15423_s1 + $0x178] sm:$0xff]  ;;  %v1317_v20 = vld [vmem:[%s15423_s1 + $0x170] sm:$0xff] }
 0x12d   :  { %v2171_v0 = vsub.f32 %v1315_v35, %v10934_v19  ;;  %v10986_v6 = vrot.slane %v1561_v53, %v10335_v17  ;;  %v2691_v14 = vmax.f32 %v2563_v50, 0.0  ;;  %v2430_v2 = vmul.f32 %v10363_v34, %v2295_v56  ;;  %v11007_v50 = vld [vmem:[%s15423_s1 + $0x208] sm:$0xff] }
 0x12e   :  { %15594 = vst [vmem:[#allocation57_spill] sm:$0xff] %v10981_v31  ;;  %v10990_v52 = vadd.f32 %v10348_v23, %v842_v60  ;;  %v11000_v19 = vrot.slane %v10962_v40, %v10335_v17  ;;  %v2692_v53 = vmax.f32 %v2564_v47, 0.0  ;;  %v2566_v35 = vadd.f32 %v10374_v41, %v2431_v42  ;;  %v11011_v60 = vpop.f32.mrb[36].mxu1 }
 0x12f   :  { %v2298_v61 = vadd.f32 %v2170_v7, %v10981_v31  ;;  %v1577_v56 = vcombine.high %v10938_v25, %v10938_v25  ;;  %15596 = vst [vmem:[#allocation59_spill] sm:$0xff] %v11011_v60  ;;  %v2565_v49 = vadd.f32 %v10374_v41, %v2430_v2  ;;  %v8798_v4 = vpop.f32.mrb[44].mxu0  ;;  %8987 = vmatprep.mubr.msk.f32.mxu1 %vm2792_vm3, %v2691_v14  ;;  %v11022_v42 = vpop.f32.mrb[37].mxu1 }
 0x130   :  { %15595 = vst [vmem:[#allocation58_spill] sm:$0xff] %v10990_v52  ;;  %v2297_v15 = vadd.f32 %v2169_v8, %v10990_v52  ;;  %v11018_v47 = vrot.slane %v10975_v58, %v10335_v17  ;;  %v1626_v7 = vcombine.high %v10920_v27, %v10920_v27  ;;  %15597 = vst [vmem:[#allocation60_spill] sm:$0xff] %v11022_v42  ;;  %v852_v2 = vpop.f32.mrb[45].mxu0  ;;  %8988 = vmatmul.mubr.msk.f32.gmra.mrb[102].mxu1 %vm2792_vm3, %v2692_v53  ;;  %v1320_v52 = vld [vmem:[%s15423_s1 + $0x188] sm:$0xff] }
 0x131   :  { %v2433_v25 = vmul.f32 %v10363_v34, %v2298_v61  ;;  %v11026_v31 = vadd.f32 %v8798_v4, %v10348_v23  ;;  %v2174_v8 = vsub.f32 %v1318_v36, %v10986_v6  ;;  %v2173_v14 = vsub.f32 %v1317_v20, %v10986_v6  ;;  %v11038_v61 = vld [vmem:[%s15424_s5] ss:$0 sm:$0xff]  ;;  %v11055_v20 = vpop.f32.mrb[38].mxu1 }
 0x132   :  { %v2693_v60 = vmax.f32 %v2565_v49, 0.0  ;;  %v2432_v27 = vmul.f32 %v10363_v34, %v2297_v15  ;;  %v11041_v23 = vadd.f32 %v11038_v61, %v852_v2  ;;  %v11048_v6 = vld [vmem:[%s15423_s1 + $0x200] sm:$0xff]  ;;  %v2694_v36 = vmax.f32 %v2566_v35, 0.0  ;;  %15600 = vst [vmem:[#allocation63_spill] sm:$0xff] %v11055_v20 }
 0x133   :  { %15598 = vst [vmem:[#allocation61_spill] sm:$0xff] %v11026_v31  ;;  %v2568_v49 = vadd.f32 %v10374_v41, %v2433_v25  ;;  %v2300_v34 = vadd.f32 %v2172_v30, %v11026_v31  ;;  %v11053_v15 = vrot.slane %v1577_v56, %v10325_v12  ;;  %v8801_v4 = vpop.f32.mrb[46].mxu0  ;;  %v2176_v42 = vsub.f32 %v1320_v52, %v11018_v47  ;;  %v11064_v25 = vpop.f32.mrb[39].mxu1  ;;  %v11069_v30 = vld [vmem:[%s15425_s6] ss:$0 sm:$0xff] }
 0x134   :  { %15599 = vst [vmem:[#allocation62_spill] sm:$0xff] %v11041_v23  ;;  %v2567_v53 = vadd.f32 %v10374_v41, %v2432_v27  ;;  %v2299_v2 = vadd.f32 %v2171_v0, %v11041_v23  ;;  %8990 = vmatprep.mubr.msk.f32.mxu1 %vm2792_vm3, %v2693_v60  ;;  %v11062_v35 = vrot.slane %v1626_v7, %v10325_v12  ;;  %15601 = vst [vmem:[#allocation64_spill] sm:$0xff] %v11064_v25  ;;  %v862_v0 = vpop.f32.mrb[47].mxu0  ;;  %v1319_v60 = vld [vmem:[%s15423_s1 + $0x180] sm:$0xff] }
 0x135   :  { %v2435_v56 = vmul.f32 %v11069_v30, %v2300_v34  ;;  %v11073_v41 = vadd.f32 %v11038_v61, %v8801_v4  ;;  %8991 = vmatmul.mubr.msk.f32.gmra.mrb[104].mxu1 %vm2792_vm3, %v2694_v36  ;;  %v1607_v7 = vcombine.high %v10975_v58, %v10975_v58  ;;  %v11085_v34 = vadd.f32 %v11038_v61, %v862_v0  ;;  %v11092_v52 = vld [vmem:[%s15426_s7] ss:$0 sm:$0xff] }
 0x136   :  { %v2695_v27 = vmax.f32 %v2567_v53, 0.0  ;;  %v2434_v23 = vmul.f32 %v11069_v30, %v2299_v2  ;;  %v1562_v4 = vcombine.high %v10909_v55, %v10909_v55  ;;  %v2696_v36 = vmax.f32 %v2568_v49, 0.0  ;;  %v11098_v53 = vpop.f32.mrb[40].mxu1 }
 0x137   :  { %15602 = vst [vmem:[#allocation65_spill] sm:$0xff] %v11073_v41  ;;  %15603 = vst [vmem:[#allocation66_spill] sm:$0xff] %v11085_v34  ;;  %v2570_v31 = vadd.f32 %v11092_v52, %v2435_v56  ;;  %v2302_v20 = vadd.f32 %v2174_v8, %v11073_v41  ;;  %v1910_v58 = vrot.slane %v11053_v15, %v10335_v17  ;;  %v8804_v55 = vpop.f32.mrb[48].mxu0  ;;  %v1322_v8 = vld [vmem:[%s15423_s1 + $0x198] sm:$0xff]  ;;  %v11111_v56 = vpop.f32.mrb[41].mxu1 }
 0x138   :  { %15604 = vst [vmem:[#allocation67_spill] sm:$0xff] %v11098_v53  ;;  %v2569_v2 = vadd.f32 %v11092_v52, %v2434_v23  ;;  %v2301_v0 = vadd.f32 %v2173_v14, %v11085_v34  ;;  %8993 = vmatprep.mubr.msk.f32.mxu1 %vm2792_vm3, %v2695_v27  ;;  %v2175_v49 = vsub.f32 %v1319_v60, %v11018_v47  ;;  %15605 = vst [vmem:[#allocation68_spill] sm:$0xff] %v11111_v56  ;;  %v872_v14 = vpop.f32.mrb[49].mxu0  ;;  %v1321_v47 = vld [vmem:[%s15423_s1 + $0x190] sm:$0xff]  ;;  %v11136_v37 = vpop.f32.mrb[42].mxu1 }
 0x139   :  { %v11106_v25 = vrot.slane %v11062_v35, %v10335_v17  ;;  %v2437_v41 = vmul.f32 %v11069_v30, %v2302_v20  ;;  %v11115_v23 = vadd.f32 %v11038_v61, %v8804_v55  ;;  %8994 = vmatmul.mubr.msk.f32.gmra.mrb[106].mxu1 %vm2792_vm3, %v2696_v36  ;;  %v11122_v60 = vrot.slane %v1607_v7, %v10335_v17  ;;  %v1324_v36 = vld [vmem:[%s15423_s1 + $0x1a8] sm:$0xff] }
 0x13a   :  { %v1609_v27 = vcombine.high %v11053_v15, %v11053_v15  ;;  %v2697_v34 = vmax.f32 %v2569_v2, 0.0  ;;  %v2436_v53 = vmul.f32 %v11069_v30, %v2301_v0  ;;  %v11128_v20 = vadd.f32 %v11038_v61, %v872_v14  ;;  %15608 = vst [vmem:[#allocation71_spill] sm:$0xff] %v11136_v37 }
 0x13b   :  { %15606 = vst [vmem:[#allocation69_spill] sm:$0xff] %v11115_v23  ;;  %v1576_v55 = vrot.slane %v1562_v4, %v10325_v12  ;;  %v2698_v56 = vmax.f32 %v2570_v31, 0.0  ;;  %v2572_v54 = vadd.f32 %v11092_v52, %v2437_v41  ;;  %v2304_v7 = vadd.f32 %v2176_v42, %v11115_v23  ;;  %v8807_v0 = vpop.f32.mrb[50].mxu0  ;;  %v11143_v4 = vpop.f32.mrb[43].mxu1  ;;  %v11149_v42 = vld [vmem:[%s15423_s1 + $0x218] sm:$0xff] }
 0x13c   :  { %15607 = vst [vmem:[#allocation70_spill] sm:$0xff] %v11128_v20  ;;  %v2178_v28 = vsub.f32 %v1322_v8, %v1910_v58  ;;  %v2571_v15 = vadd.f32 %v11092_v52, %v2436_v53  ;;  %v2303_v2 = vadd.f32 %v2175_v49, %v11128_v20  ;;  %8996 = vmatprep.mubr.msk.f32.mxu1 %vm2792_vm3, %v2697_v34  ;;  %15609 = vst [vmem:[#allocation72_spill] sm:$0xff] %v11143_v4  ;;  %v882_v53 = vpop.f32.mrb[51].mxu0  ;;  %v11174_v23 = vpop.f32.mrb[44].mxu1 }
 0x13d   :  { %v2177_v14 = vsub.f32 %v1321_v47, %v1910_v58  ;;  %v1656_v3 = vcombine.high %v10962_v40, %v10962_v40  ;;  %v2439_v31 = vmul.f32 %v11069_v30, %v2304_v7  ;;  %v11152_v41 = vadd.f32 %v11038_v61, %v8807_v0  ;;  %8997 = vmatmul.mubr.msk.f32.gmra.mrb[108].mxu1 %vm2792_vm3, %v2698_v56  ;;  %v1323_v40 = vld [vmem:[%s15423_s1 + $0x1a0] sm:$0xff]  ;;  %v1326_v7 = vld [vmem:[%s15423_s1 + $0x1b8] sm:$0xff] }
 0x13e   :  { %v2180_v34 = vsub.f32 %v1324_v36, %v11122_v60  ;;  %v11160_v58 = vrot.slane %v1609_v27, %v10335_v17  ;;  %v2699_v49 = vmax.f32 %v2571_v15, 0.0  ;;  %v2438_v8 = vmul.f32 %v11069_v30, %v2303_v2  ;;  %15612 = vst [vmem:[#allocation75_spill] sm:$0xff] %v11174_v23 }
 0x13f   :  { %15610 = vst [vmem:[#allocation73_spill] sm:$0xff] %v11152_v41  ;;  %v11164_v47 = vadd.f32 %v11038_v61, %v882_v53  ;;  %v11170_v56 = vrot.slane %v1576_v55, %v10325_v12  ;;  %v2700_v36 = vmax.f32 %v2572_v54, 0.0  ;;  %v2574_v0 = vadd.f32 %v11092_v52, %v2439_v31  ;;  %v8810_v37 = vpop.f32.mrb[52].mxu0  ;;  %v11182_v54 = vpop.f32.mrb[45].mxu1 }
 0x140   :  { %v2306_v20 = vadd.f32 %v2178_v28, %v11152_v41  ;;  %v1578_v27 = vcombine.high %v1576_v55, %v1576_v55  ;;  %v2573_v15 = vadd.f32 %v11092_v52, %v2438_v8  ;;  %8999 = vmatprep.mubr.msk.f32.mxu1 %vm2792_vm3, %v2699_v49  ;;  %v2179_v4 = vsub.f32 %v1323_v40, %v11122_v60  ;;  %v11188_v28 = vld [vmem:[%s15423_s1 + $0x210] sm:$0xff]  ;;  %v11220_v41 = vpop.f32.mrb[46].mxu1 }
 0x141   :  { %15611 = vst [vmem:[#allocation74_spill] sm:$0xff] %v11164_v47  ;;  %v2305_v53 = vadd.f32 %v2177_v14, %v11164_v47  ;;  %15613 = vst [vmem:[#allocation76_spill] sm:$0xff] %v11182_v54  ;;  %v11191_v55 = vrot.slane %v1656_v3, %v10335_v17  ;;  %v11194_v8 = vadd.f32 %v11038_v61, %v8810_v37  ;;  %v892_v14 = vpop.f32.mrb[53].mxu0  ;;  %9000 = vmatmul.mubr.msk.f32.gmra.mrb[110].mxu1 %vm2792_vm3, %v2700_v36  ;;  %v11205_v3 = vld [vmem:[%s15423_s1 + $0x228] sm:$0xff] }
 0x142   :  { %v2441_v31 = vmul.f32 %v11069_v30, %v2306_v20  ;;  %v2182_v60 = vsub.f32 %v1326_v7, %v11160_v58  ;;  %v1325_v20 = vld [vmem:[%s15423_s1 + $0x1b0] sm:$0xff]  ;;  %v2701_v40 = vmax.f32 %v2573_v15, 0.0  ;;  %v11208_v37 = vadd.f32 %v11038_v61, %v892_v14  ;;  %v1328_v15 = vld [vmem:[%s15423_s1 + $0x1c8] sm:$0xff]  ;;  %15616 = vst [vmem:[#allocation79_spill] sm:$0xff] %v11220_v41  ;;  %v11236_v14 = vld [vmem:[%s15423_s1 + $0x220] sm:$0xff] }
 0x143   :  { %15614 = vst [vmem:[#allocation77_spill] sm:$0xff] %v11194_v8  ;;  %v2440_v49 = vmul.f32 %v11069_v30, %v2305_v53  ;;  %v1922_v36 = vrot.slane %v11170_v56, %v10335_v17  ;;  %v2702_v2 = vmax.f32 %v2574_v0, 0.0  ;;  %v2308_v47 = vadd.f32 %v2180_v34, %v11194_v8  ;;  %v8813_v23 = vpop.f32.mrb[54].mxu0 }
 0x144   :  { %15615 = vst [vmem:[#allocation78_spill] sm:$0xff] %v11208_v37  ;;  %v2576_v7 = vadd.f32 %v11092_v52, %v2441_v31  ;;  %v11218_v53 = vrot.slane %v1578_v27, %v10325_v12  ;;  %v2307_v0 = vadd.f32 %v2179_v4, %v11208_v37  ;;  %9002 = vmatprep.mubr.msk.f32.mxu1 %vm2792_vm3, %v2701_v40  ;;  %v11228_v31 = vpop.f32.mrb[47].mxu1  ;;  %v902_v4 = vpop.f32.mrb[55].mxu0 }
 0x145   :  { %v2575_v54 = vadd.f32 %v11092_v52, %v2440_v49  ;;  %v2181_v34 = vsub.f32 %v1325_v20, %v11160_v58  ;;  %15617 = vst [vmem:[#allocation80_spill] sm:$0xff] %v11228_v31  ;;  %v2443_v8 = vmul.f32 %v11069_v30, %v2308_v47  ;;  %v11239_v49 = vadd.f32 %v11038_v61, %v8813_v23  ;;  %v1327_v58 = vld [vmem:[%s15423_s1 + $0x1c0] sm:$0xff]  ;;  %v11255_v46 = vpop.f32.mrb[48].mxu1 }
 0x146   :  { %9003 = vmatmul.mubr.msk.f32.gmra.mrb[112].mxu1 %vm2792_vm3, %v2702_v2  ;;  %v1608_v20 = vcombine.high %v11170_v56, %v11170_v56  ;;  %v2442_v47 = vmul.f32 %v11069_v30, %v2307_v0  ;;  %v11249_v27 = vadd.f32 %v11038_v61, %v902_v4  ;;  %v2184_v37 = vsub.f32 %v1328_v15, %v1922_v36 }
 0x147   :  { %15618 = vst [vmem:[#allocation81_spill] sm:$0xff] %v11239_v49  ;;  %v2703_v40 = vmax.f32 %v2575_v54, 0.0  ;;  %v2704_v31 = vmax.f32 %v2576_v7, 0.0  ;;  %v2578_v23 = vadd.f32 %v11092_v52, %v2443_v8  ;;  %v2310_v41 = vadd.f32 %v2182_v60, %v11239_v49  ;;  %15620 = vst [vmem:[#allocation83_spill] sm:$0xff] %v11255_v46  ;;  %v8816_v4 = vpop.f32.mrb[56].mxu0  ;;  %v1330_v8 = vld [vmem:[%s15423_s1 + $0x1d8] sm:$0xff] }
 0x148   :  { %15619 = vst [vmem:[#allocation82_spill] sm:$0xff] %v11249_v27  ;;  %v1926_v2 = vrot.slane %v11218_v53, %v10335_v17  ;;  %v2577_v54 = vadd.f32 %v11092_v52, %v2442_v47  ;;  %v2309_v0 = vadd.f32 %v2181_v34, %v11249_v27  ;;  %v2183_v7 = vsub.f32 %v1327_v58, %v1922_v36  ;;  %v11265_v60 = vpop.f32.mrb[49].mxu1  ;;  %v912_v47 = vpop.f32.mrb[57].mxu0  ;;  %v1329_v36 = vld [vmem:[%s15423_s1 + $0x1d0] sm:$0xff] }
 0x149   :  { %9005 = vmatprep.mubr.msk.f32.mxu1 %vm2792_vm3, %v2703_v40  ;;  %15621 = vst [vmem:[#allocation84_spill] sm:$0xff] %v11265_v60  ;;  %v2445_v15 = vmul.f32 %v11069_v30, %v2310_v41  ;;  %v1611_v49 = vcombine.high %v10882_v26, %v10882_v26  ;;  %v11271_v56 = vadd.f32 %v11038_v61, %v8816_v4  ;;  %v1332_v26 = vld [vmem:[%s15423_s1 + $0x1e8] sm:$0xff] }
 0x14a   :  { %9006 = vmatmul.mubr.msk.f32.gmra.mrb[114].mxu1 %vm2792_vm3, %v2704_v31  ;;  %v1930_v34 = vrot.slane %v1608_v20, %v10335_v17  ;;  %v2705_v58 = vmax.f32 %v2577_v54, 0.0  ;;  %v2444_v40 = vmul.f32 %v11069_v30, %v2309_v0  ;;  %v11280_v41 = vadd.f32 %v11038_v61, %v912_v47  ;;  %v11289_v20 = vpop.f32.mrb[50].mxu1 }
 0x14b   :  { %15622 = vst [vmem:[#allocation85_spill] sm:$0xff] %v11271_v56  ;;  %v1610_v4 = vcombine.high %v11218_v53, %v11218_v53  ;;  %v2706_v31 = vmax.f32 %v2578_v23, 0.0  ;;  %v2580_v27 = vadd.f32 %v11092_v52, %v2445_v15  ;;  %v2312_v60 = vadd.f32 %v2184_v37, %v11271_v56  ;;  %v8819_v18 = vpop.f32.mrb[58].mxu0  ;;  %v11296_v53 = vpop.f32.mrb[51].mxu1 }
 0x14c   :  { %15623 = vst [vmem:[#allocation86_spill] sm:$0xff] %v11280_v41  ;;  %v2186_v46 = vsub.f32 %v1330_v8, %v1926_v2  ;;  %v1658_v54 = vcombine.high %v11062_v35, %v11062_v35  ;;  %v2579_v0 = vadd.f32 %v11092_v52, %v2444_v40  ;;  %v2311_v47 = vadd.f32 %v2183_v7, %v11280_v41  ;;  %v922_v15 = vpop.f32.mrb[59].mxu0  ;;  %v1331_v7 = vld [vmem:[%s15423_s1 + $0x1e0] sm:$0xff] }
 0x14d   :  { %9008 = vmatprep.mubr.msk.f32.mxu1 %vm2792_vm3, %v2705_v58  ;;  %v2185_v48 = vsub.f32 %v1329_v36, %v1926_v2  ;;  %v11299_v23 = vrot.slane %v1611_v49, %v10325_v12  ;;  %v2447_v37 = vmul.f32 %v11069_v30, %v2312_v60  ;;  %v11303_v8 = vadd.f32 %v11038_v61, %v8819_v18 }
 0x14e   :  { %9009 = vmatmul.mubr.msk.f32.gmra.mrb[116].mxu1 %vm2792_vm3, %v2706_v31  ;;  %v2188_v35 = vsub.f32 %v1332_v26, %v1930_v34  ;;  %v2707_v58 = vmax.f32 %v2579_v0, 0.0  ;;  %v2446_v2 = vmul.f32 %v11069_v30, %v2311_v47  ;;  %v11311_v36 = vadd.f32 %v11038_v61, %v922_v15  ;;  %v1334_v31 = vld [vmem:[%s15423_s1 + $0x1f8] sm:$0xff]  ;;  %v11323_v0 = vpop.f32.mrb[52].mxu1 }
 0x14f   :  { %15624 = vst [vmem:[#allocation87_spill] sm:$0xff] %v11303_v8  ;;  %v1934_v49 = vrot.slane %v1610_v4, %v10335_v17  ;;  %v11316_v18 = vadd.f32 %v11038_v61, %v10452_v44  ;;  %v2708_v60 = vmax.f32 %v2580_v27, 0.0  ;;  %v2582_v40 = vadd.f32 %v11092_v52, %v2447_v37  ;;  %15626 = vst [vmem:[#allocation89_spill] sm:$0xff] %v11323_v0  ;;  %v8822_v44 = vpop.f32.mrb[60].mxu0  ;;  %v11331_v37 = vpop.f32.mrb[53].mxu1 }
 0x150   :  { %15625 = vst [vmem:[#allocation88_spill] sm:$0xff] %v11311_v36  ;;  %v2314_v26 = vadd.f32 %v2186_v46, %v11303_v8  ;;  %v11326_v47 = vrot.slane %v1658_v54, %v10335_v17  ;;  %v2581_v4 = vadd.f32 %v11092_v52, %v2446_v2  ;;  %v2313_v15 = vadd.f32 %v2185_v48, %v11311_v36  ;;  %v932_v48 = vpop.f32.mrb[61].mxu0  ;;  %v11359_v0 = vpop.f32.mrb[54].mxu1 }
 0x151   :  { %9011 = vmatprep.mubr.msk.f32.mxu1 %vm2792_vm3, %v2707_v58  ;;  %v2187_v27 = vsub.f32 %v1331_v7, %v1930_v34  ;;  %v11335_v46 = vadd.f32 %v11038_v61, %v10447_v38  ;;  %v11339_v8 = vrot.slane %v11299_v23, %v10325_v12  ;;  %v11343_v2 = vadd.f32 %v11038_v61, %v8822_v44  ;;  %v1333_v34 = vld [vmem:[%s15423_s1 + $0x1f0] sm:$0xff] }
 0x152   :  { %v2449_v54 = vmul.f32 %v11069_v30, %v2314_v26  ;;  %9012 = vmatmul.mubr.msk.f32.gmra.mrb[118].mxu1 %vm2792_vm3, %v2708_v60  ;;  %v2709_v7 = vmax.f32 %v2581_v4, 0.0  ;;  %v2448_v38 = vmul.f32 %v11069_v30, %v2313_v15  ;;  %v11351_v58 = vadd.f32 %v11038_v61, %v932_v48 }
 0x153   :  { %15627 = vst [vmem:[#allocation90_spill] sm:$0xff] %v11343_v2  ;;  %v2190_v36 = vsub.f32 %v1334_v31, %v1934_v49  ;;  %v15629_v26 = vsub.f32 %v11048_v6, %v11000_v19  ;;  %v2710_v41 = vmax.f32 %v2582_v40, 0.0  ;;  %v2316_v60 = vadd.f32 %v2188_v35, %v11343_v2  ;;  %v8825_v48 = vpop.f32.mrb[62].mxu0 }
 0x154   :  { %15628 = vst [vmem:[#allocation91_spill] sm:$0xff] %v11351_v58  ;;  %v2584_v56 = vadd.f32 %v11092_v52, %v2449_v54  ;;  %v11363_v4 = vadd.f32 %v11038_v61, %v10481_v5  ;;  %v2583_v15 = vadd.f32 %v11092_v52, %v2448_v38  ;;  %v2315_v31 = vadd.f32 %v2187_v27, %v11351_v58  ;;  %v942_v27 = vpop.f32.mrb[63].mxu0 }
 0x155   :  { %v2319_v44 = vadd.f32 %v15629_v26, %v11316_v18  ;;  %9014 = vmatprep.mubr.msk.f32.mxu1 %vm2792_vm3, %v2709_v7  ;;  %v2189_v6 = vsub.f32 %v1333_v34, %v1934_v49  ;;  %v11368_v26 = vpop.f32.mrb[55].mxu1  ;;  %v15630_v35 = vsub.f32 %v11007_v50, %v11000_v19  ;;  %v1627_v54 = vcombine.high %v11299_v23, %v11299_v23  ;;  %v1341_v19 = vld [vmem:[%s15423_s1 + $0x230] sm:$0xff] }
 0x156   :  { %v2451_v5 = vmul.f32 %v11069_v30, %v2316_v60  ;;  %v11378_v38 = vadd.f32 %v11038_v61, %v8825_v48  ;;  %9015 = vmatmul.mubr.msk.f32.gmra.mrb[120].mxu1 %vm2792_vm3, %v2710_v41  ;;  %v11383_v49 = vadd.f32 %v11038_v61, %v10476_v62  ;;  %v2711_v50 = vmax.f32 %v2583_v15, 0.0 }
 0x157   :  { %v2320_v40 = vadd.f32 %v15630_v35, %v11335_v46  ;;  %v2450_v34 = vmul.f32 %v11069_v30, %v2315_v31  ;;  %v11390_v23 = vadd.f32 %v11038_v61, %v942_v27  ;;  %v2454_v7 = vmul.f32 %v11069_v30, %v2319_v44  ;;  %v11395_v35 = vpop.f32.mrb[56].mxu1 }
 0x158   :  { %15631 = vst [vmem:[#allocation92_spill] sm:$0xff] %v11378_v38  ;;  %v2712_v60 = vmax.f32 %v2584_v56, 0.0  ;;  %v2586_v48 = vadd.f32 %v11092_v52, %v2451_v5  ;;  %v2318_v41 = vadd.f32 %v2190_v36, %v11378_v38  ;;  %v15633_v62 = vsub.f32 %v11188_v28, %v11106_v25  ;;  %9017 = vmatprep.mubr.msk.f32.mxu1 %vm2792_vm3, %v2711_v50  ;;  %v11408_v56 = vpop.f32.mrb[57].mxu1 }
 0x159   :  { %15632 = vst [vmem:[#allocation93_spill] sm:$0xff] %v11390_v23  ;;  %v11403_v15 = vadd.f32 %v11038_v61, %v10509_v32  ;;  %v2585_v31 = vadd.f32 %v11092_v52, %v2450_v34  ;;  %v2317_v44 = vadd.f32 %v2189_v6, %v11390_v23  ;;  %v2197_v36 = vsub.f32 %v1341_v19, %v11326_v47  ;;  %v1342_v19 = vld [vmem:[%s15423_s1 + $0x238] sm:$0xff] }
 0x15a   :  { %v2321_v58 = vadd.f32 %v15633_v62, %v11363_v4  ;;  %v11413_v5 = vrot.slane %v11339_v8, %v10335_v17  ;;  %v11416_v28 = vrot.slane %v1627_v54, %v10325_v12  ;;  %v2453_v32 = vmul.f32 %v11069_v30, %v2318_v41  ;;  %9018 = vmatmul.mubr.msk.f32.gmra.mrb[122].mxu1 %vm2792_vm3, %v2712_v60 }
 0x15b   :  { %v2455_v27 = vmul.f32 %v11069_v30, %v2320_v40  ;;  %v15634_v6 = vsub.f32 %v11149_v42, %v11106_v25  ;;  %v2713_v34 = vmax.f32 %v2585_v31, 0.0  ;;  %v2452_v62 = vmul.f32 %v11069_v30, %v2317_v44  ;;  %v1343_v40 = vld [vmem:[%s15423_s1 + $0x240] sm:$0xff]  ;;  %v11438_v42 = vpop.f32.mrb[58].mxu1 }
 0x15c   :  { %v2589_v54 = vadd.f32 %v11092_v52, %v2454_v7  ;;  %v11432_v41 = vadd.f32 %v11038_v61, %v10501_v24  ;;  %v2714_v60 = vmax.f32 %v2586_v48, 0.0  ;;  %v2588_v25 = vadd.f32 %v11092_v52, %v2453_v32  ;;  %v11451_v48 = vpop.f32.mrb[59].mxu1 }
 0x15d   :  { %v2322_v50 = vadd.f32 %v15634_v6, %v11383_v49  ;;  %v2456_v6 = vmul.f32 %v11069_v30, %v2321_v58  ;;  %v15635_v31 = vsub.f32 %v11236_v14, %v11191_v55  ;;  %v11447_v24 = vadd.f32 %v11038_v61, %v10538_v63  ;;  %9020 = vmatprep.mubr.msk.f32.mxu1 %vm2792_vm3, %v2713_v34  ;;  %v1344_v34 = vld [vmem:[%s15423_s1 + $0x248] sm:$0xff]  ;;  %v11487_v38 = vpop.f32.mrb[60].mxu1 }
 0x15e   :  { %v2587_v44 = vadd.f32 %v11092_v52, %v2452_v62  ;;  %v2198_v32 = vsub.f32 %v1342_v19, %v11326_v47  ;;  %v11456_v58 = vrot.slane %v11416_v28, %v10335_v17  ;;  %v1657_v14 = vcombine.high %v11339_v8, %v11339_v8  ;;  %9021 = vmatmul.mubr.msk.f32.gmra.mrb[124].mxu1 %vm2792_vm3, %v2714_v60  ;;  %v1345_v19 = vld [vmem:[%s15423_s1 + $0x250] sm:$0xff] }
 0x15f   :  { %v2323_v7 = vadd.f32 %v15635_v31, %v11403_v15  ;;  %15636 = vst [vmem:[#allocation94_spill] sm:$0xff] %v11447_v24  ;;  %v2457_v63 = vmul.f32 %v11069_v30, %v2322_v50  ;;  %v11464_v62 = vadd.f32 %v11038_v61, %v10533_v57  ;;  %v2199_v47 = vsub.f32 %v1343_v40, %v11413_v5  ;;  %v11485_v40 = vld [vmem:[%s15421_s0 + $0x28] sm:$0xff] }
 0x160   :  { %v2715_v31 = vmax.f32 %v2587_v44, 0.0  ;;  %v2590_v8 = vadd.f32 %v11092_v52, %v2455_v27  ;;  %v15638_v50 = vsub.f32 %v11205_v3, %v11191_v55  ;;  %v11480_v57 = vadd.f32 %v11038_v61, %v10568_v33  ;;  %v11493_v3 = vpop.f32.mrb[61].mxu1 }
 0x161   :  { %15637 = vst [vmem:[#allocation95_spill] sm:$0xff] %v11464_v62  ;;  %v2716_v23 = vmax.f32 %v2588_v25, 0.0  ;;  %v2717_v44 = vmax.f32 %v2589_v54, 0.0  ;;  %v2591_v27 = vadd.f32 %v11092_v52, %v2456_v6  ;;  %v2458_v2 = vmul.f32 %v11069_v30, %v2323_v7  ;;  %v1347_v7 = vld [vmem:[%s15423_s1 + $0x260] sm:$0xff] }
 0x162   :  { %v2324_v60 = vadd.f32 %v15638_v50, %v11432_v41  ;;  %15639 = vst [vmem:[#allocation96_spill] sm:$0xff] %v11480_v57  ;;  %v2325_v55 = vadd.f32 %v2197_v36, %v11447_v24  ;;  %9023 = vmatprep.mubr.msk.f32.mxu1 %vm2792_vm3, %v2715_v31  ;;  %v2200_v33 = vsub.f32 %v1344_v34, %v11413_v5  ;;  %v1346_v36 = vld [vmem:[%s15423_s1 + $0x258] sm:$0xff] }
 0x163   :  { %v2201_v25 = vsub.f32 %v1345_v19, %v11456_v58  ;;  %v1962_v50 = vrot.slane %v1657_v14, %v10335_v17  ;;  %9024 = vmatmul.mubr.msk.f32.gmra.mrb[126].mxu1 %vm2792_vm3, %v2716_v23  ;;  %v2592_v54 = vadd.f32 %v11092_v52, %v2457_v63  ;;  %v2326_v6 = vadd.f32 %v2198_v32, %v11464_v62  ;;  %v11518_v19 = vpop.f32.mrb[62].mxu1 }
 0x164   :  { %v1659_v5 = vcombine.high %v11416_v28, %v11416_v28  ;;  %v1667_v14 = vrot.slane %v11485_v40, %v10325_v12  ;;  %9026 = vmatprep.mubr.msk.f32.mxu1 %vm2792_vm3, %v2717_v44  ;;  %v2718_v23 = vmax.f32 %v2590_v8, 0.0  ;;  %v2459_v63 = vmul.f32 %v11069_v30, %v2324_v60  ;;  %v11526_v8 = vpop.f32.mrb[63].mxu1 }
 0x165   :  { %v11515_v32 = vadd.f32 %v11038_v61, %v10563_v16  ;;  %v2327_v34 = vadd.f32 %v2199_v47, %v11480_v57  ;;  %v2719_v31 = vmax.f32 %v2591_v27, 0.0  ;;  %v2593_v24 = vadd.f32 %v11092_v52, %v2458_v2  ;;  %v1348_v2 = vld [vmem:[%s15423_s1 + $0x268] sm:$0xff] }
 0x166   :  { %v2460_v28 = vmul.f32 %v11069_v30, %v2325_v55  ;;  %v11524_v62 = vadd.f32 %v11038_v61, %v10596_v11  ;;  %v2202_v60 = vsub.f32 %v1346_v36, %v11456_v58  ;;  %v2203_v44 = vsub.f32 %v1347_v7, %v1962_v50 }
 0x167   :  { %v1675_v16 = vcombine.high %v1667_v14, %v1667_v14  ;;  %9027 = vmatmul.mubr.msk.f32.gmra.mrb[128].mxu1 %vm2792_vm3, %v2718_v23  ;;  %v2720_v47 = vmax.f32 %v2592_v54, 0.0  ;;  %v2461_v57 = vmul.f32 %v11069_v30, %v2326_v6  ;;  %v11535_v27 = vrot.slane %v1659_v5, %v10335_v17  ;;  %v1349_v6 = vld [vmem:[%s15423_s1 + $0x270] sm:$0xff] }
 0x168   :  { %v1683_v11 = vrot.slane %v1667_v14, %v10325_v12  ;;  %9029 = vmatprep.mubr.msk.f32.mxu1 %vm2792_vm3, %v2719_v31  ;;  %v2594_v58 = vadd.f32 %v11092_v52, %v2459_v63  ;;  %v2328_v55 = vadd.f32 %v2200_v33, %v11515_v32  ;;  %v2462_v36 = vmul.f32 %v11069_v30, %v2327_v34 }
 0x169   :  { %v11544_v54 = vadd.f32 %v11038_v61, %v10591_v1  ;;  %v2721_v7 = vmax.f32 %v2593_v24, 0.0  ;;  %v2595_v5 = vadd.f32 %v11092_v52, %v2460_v28  ;;  %v2329_v14 = vadd.f32 %v2201_v25, %v11524_v62  ;;  %v1350_v24 = vld [vmem:[%s15423_s1 + $0x278] sm:$0xff] }
 0x16a   :  { %v11553_v23 = vadd.f32 %v11038_v61, %v10622_v59  ;;  %v2204_v33 = vsub.f32 %v1348_v2, %v1962_v50  ;;  %v11556_v63 = vrot.slane %v1675_v16, %v10325_v12  ;;  %v2596_v1 = vadd.f32 %v11092_v52, %v2461_v57 }
 0x16b   :  { %9030 = vmatmul.mubr.msk.f32.gmra.mrb[130].mxu1 %vm2792_vm3, %v2720_v47  ;;  %v11562_v34 = vadd.f32 %v11038_v61, %v10617_v51  ;;  %v2205_v25 = vsub.f32 %v1349_v6, %v11535_v27  ;;  %v1970_v59 = vrot.slane %v1683_v11, %v10335_v17  ;;  %v2722_v50 = vmax.f32 %v2594_v58, 0.0  ;;  %v1351_v51 = vld [vmem:[%s15423_s1 + $0x280] sm:$0xff] }
 0x16c   :  { %15640 = vst [vmem:[#allocation97_spill] sm:$0xff] %v11553_v23  ;;  %9032 = vmatprep.mubr.msk.f32.mxu1 %vm2792_vm3, %v2721_v7  ;;  %v2463_v31 = vmul.f32 %v11069_v30, %v2328_v55  ;;  %v2597_v28 = vadd.f32 %v11092_v52, %v2462_v36  ;;  %v2330_v57 = vadd.f32 %v2202_v60, %v11544_v54  ;;  %v2723_v16 = vmax.f32 %v2595_v5, 0.0  ;;  %v1352_v5 = vld [vmem:[%s15423_s1 + $0x288] sm:$0xff] }
 0x16d   :  { %15641 = vst [vmem:[#allocation98_spill] sm:$0xff] %v11562_v34  ;;  %v2464_v47 = vmul.f32 %v11069_v30, %v2329_v14  ;;  %v2331_v2 = vadd.f32 %v2203_v44, %v11553_v23  ;;  %v11580_v6 = vadd.f32 %v11038_v61, %v10650_v43  ;;  %v2206_v58 = vsub.f32 %v1350_v24, %v11535_v27  ;;  %v1353_v43 = vld [vmem:[%s15423_s1 + $0x290] sm:$0xff] }
 0x16e   :  { %v1974_v55 = vrot.slane %v11556_v63, %v10335_v17  ;;  %v1705_v36 = vcombine.high %v1683_v11, %v1683_v11  ;;  %v2724_v60 = vmax.f32 %v2596_v1, 0.0  ;;  %v2332_v7 = vadd.f32 %v2204_v33, %v11562_v34 }
 0x16f   :  { %15642 = vst [vmem:[#allocation99_spill] sm:$0xff] %v11580_v6  ;;  %9033 = vmatmul.mubr.msk.f32.gmra.mrb[132].mxu1 %vm2792_vm3, %v2722_v50  ;;  %v2207_v44 = vsub.f32 %v1351_v51, %v1970_v59  ;;  %v1660_v27 = vcombine.high %v11485_v40, %v11485_v40  ;;  %v2598_v11 = vadd.f32 %v11092_v52, %v2463_v31  ;;  %v2725_v14 = vmax.f32 %v2597_v28, 0.0  ;;  %v1354_v31 = vld [vmem:[%s15423_s1 + $0x298] sm:$0xff] }
 0x170   :  { %9035 = vmatprep.mubr.msk.f32.mxu1 %vm2792_vm3, %v2723_v16  ;;  %v2465_v1 = vmul.f32 %v11069_v30, %v2330_v57  ;;  %v11600_v33 = vadd.f32 %v11038_v61, %v10642_v29  ;;  %v2599_v24 = vadd.f32 %v11092_v52, %v2464_v47  ;;  %v2466_v50 = vmul.f32 %v11069_v30, %v2331_v2  ;;  %v1356_v47 = vld [vmem:[%s15423_s1 + $0x2a8] sm:$0xff] }
 0x171   :  { %v2333_v51 = vadd.f32 %v2205_v25, %v11580_v6  ;;  %v11607_v40 = vadd.f32 %v11038_v61, %v10681_v21  ;;  %v11614_v28 = vadd.f32 %v11038_v61, %v10671_v9  ;;  %v2208_v29 = vsub.f32 %v1352_v5, %v1970_v59  ;;  %v1355_v9 = vld [vmem:[%s15423_s1 + $0x2a0] sm:$0xff] }
 0x172   :  { %v2209_v57 = vsub.f32 %v1353_v43, %v1974_v55  ;;  %v1978_v16 = vrot.slane %v1705_v36, %v10335_v17  ;;  %v2467_v25 = vmul.f32 %v11069_v30, %v2332_v7  ;;  %v11621_v21 = vadd.f32 %v11038_v61, %v10710_v13 }
 0x173   :  { %9036 = vmatmul.mubr.msk.f32.gmra.mrb[134].mxu1 %vm2792_vm3, %v2724_v60  ;;  %v1707_v59 = vcombine.high %v11556_v63, %v11556_v63  ;;  %v1674_v2 = vrot.slane %v1660_v27, %v10325_v12  ;;  %v2726_v36 = vmax.f32 %v2598_v11, 0.0  ;;  %v2600_v60 = vadd.f32 %v11092_v52, %v2465_v1 }
 0x174   :  { %15643 = vst [vmem:[#allocation100_spill] sm:$0xff] %v11621_v21  ;;  %9038 = vmatprep.mubr.msk.f32.mxu1 %vm2792_vm3, %v2725_v14  ;;  %v2334_v13 = vadd.f32 %v2206_v58, %v11600_v33  ;;  %v2210_v7 = vsub.f32 %v1354_v31, %v1974_v55  ;;  %v2727_v5 = vmax.f32 %v2599_v24, 0.0  ;;  %v2601_v43 = vadd.f32 %v11092_v52, %v2466_v50 }
 0x175   :  { %v2468_v6 = vmul.f32 %v11069_v30, %v2333_v51  ;;  %v2335_v23 = vadd.f32 %v2207_v44, %v11607_v40  ;;  %v2336_v34 = vadd.f32 %v2208_v29, %v11614_v28  ;;  %v11641_v63 = vadd.f32 %v11038_v61, %v10705_v45  ;;  %v1357_v51 = vld [vmem:[%s15423_s1 + $0x2b0] sm:$0xff] }
 0x176   :  { %v2212_v27 = vsub.f32 %v1356_v47, %v1978_v16  ;;  %v2211_v11 = vsub.f32 %v1355_v9, %v1978_v16  ;;  %v2602_v58 = vadd.f32 %v11092_v52, %v2467_v25  ;;  %v2337_v55 = vadd.f32 %v2209_v57, %v11621_v21  ;;  %v1358_v9 = vld [vmem:[%s15423_s1 + $0x2b8] sm:$0xff]  ;;  %v15691_v21 = vld [vmem:[#allocation80_spill] sm:$0xff] }
 0x177   :  { %15644 = vst [vmem:[#allocation101_spill] sm:$0xff] %v11641_v63  ;;  %9039 = vmatmul.mubr.msk.f32.gmra.mrb[136].mxu1 %vm2792_vm3, %v2726_v36  ;;  %v1982_v14 = vrot.slane %v1707_v59, %v10335_v17  ;;  %v1690_v1 = vrot.slane %v1674_v2, %v10325_v12  ;;  %v2728_v44 = vmax.f32 %v2600_v60, 0.0  ;;  %v2469_v24 = vmul.f32 %v11069_v30, %v2334_v13  ;;  %v1360_v60 = vld [vmem:[%s15423_s1 + $0x2c8] sm:$0xff] }
 0x178   :  { %9041 = vmatprep.mubr.msk.f32.mxu1 %vm2792_vm3, %v2727_v5  ;;  %v11652_v45 = vadd.f32 %v11038_v61, %v10733_v39  ;;  %v11656_v50 = vadd.f32 %v11038_v61, %v10738_v22  ;;  %v2729_v31 = vmax.f32 %v2601_v43, 0.0  ;;  %v2603_v29 = vadd.f32 %v11092_v52, %v2468_v6 }
 0x179   :  { %v2470_v57 = vmul.f32 %v11069_v30, %v2335_v23  ;;  %v1676_v16 = vcombine.high %v1674_v2, %v1674_v2  ;;  %v2471_v25 = vmul.f32 %v11069_v30, %v2336_v34  ;;  %v2338_v47 = vadd.f32 %v2210_v7, %v11641_v63 }
 0x17a   :  { %15645 = vst [vmem:[#allocation102_spill] sm:$0xff] %v11652_v45  ;;  %15646 = vst [vmem:[#allocation103_spill] sm:$0xff] %v11656_v50  ;;  %v2730_v39 = vmax.f32 %v2602_v58, 0.0  ;;  %v2472_v22 = vmul.f32 %v11069_v30, %v2337_v55  ;;  %v2213_v59 = vsub.f32 %v1357_v51, %v1982_v14  ;;  %v1986_v36 = vrot.slane %v1690_v1, %v10335_v17 }
 0x17b   :  { %9042 = vmatmul.mubr.msk.f32.gmra.mrb[138].mxu1 %vm2792_vm3, %v2728_v44  ;;  %v2604_v23 = vadd.f32 %v11092_v52, %v2469_v24  ;;  %v2340_v34 = vadd.f32 %v2212_v27, %v11652_v45  ;;  %v2339_v6 = vadd.f32 %v2211_v11, %v11656_v50  ;;  %v11677_v2 = vadd.f32 %v11038_v61, %v10767_v10  ;;  %v15648_v27 = vld [vmem:[#allocation32_spill] sm:$0xff]  ;;  %v1359_v10 = vld [vmem:[%s15423_s1 + $0x2c0] sm:$0xff]  ;;  %v15650_v24 = vld [vmem:[#allocation35_spill] sm:$0xff] }
 0x17c   :  { %9044 = vmatprep.mubr.msk.f32.mxu1 %vm2792_vm3, %v2729_v31  ;;  %v2731_v13 = vmax.f32 %v2603_v29, 0.0  ;;  %v2605_v7 = vadd.f32 %v11092_v52, %v2470_v57  ;;  %v1704_v5 = vrot.slane %v1676_v16, %v10325_v12  ;;  %v2606_v43 = vadd.f32 %v11092_v52, %v2471_v25 }
 0x17d   :  { %15647 = vst [vmem:[#allocation104_spill] sm:$0xff] %v11677_v2  ;;  %v2473_v58 = vmul.f32 %v11069_v30, %v2338_v47  ;;  %v11688_v11 = vadd.f32 %v11038_v61, %v15648_v27  ;;  %v2214_v55 = vsub.f32 %v1358_v9, %v1982_v14  ;;  %v2607_v44 = vadd.f32 %v11092_v52, %v2472_v22  ;;  %v15652_v9 = vld [vmem:[#allocation36_spill] sm:$0xff] }
 0x17e   :  { %v11697_v51 = vadd.f32 %v11038_v61, %v15650_v24  ;;  %v2216_v31 = vsub.f32 %v1360_v60, %v1986_v36  ;;  %v1706_v29 = vcombine.high %v1690_v1, %v1690_v1  ;;  %v2732_v57 = vmax.f32 %v2604_v23, 0.0  ;;  %v11711_v1 = vld [vmem:[%s15421_s0 + $0x30] sm:$0xff] }
 0x17f   :  { %15649 = vst [vmem:[#allocation32_spill] sm:$0xff] %v11688_v11  ;;  %9045 = vmatmul.mubr.msk.f32.gmra.mrb[140].mxu1 %vm2792_vm3, %v2730_v39  ;;  %v2475_v16 = vmul.f32 %v11069_v30, %v2340_v34  ;;  %v2474_v14 = vmul.f32 %v11069_v30, %v2339_v6  ;;  %v2341_v25 = vadd.f32 %v2213_v59, %v11677_v2  ;;  %v2733_v47 = vmax.f32 %v2605_v7, 0.0  ;;  %v1361_v59 = vld [vmem:[%s15423_s1 + $0x2d0] sm:$0xff]  ;;  %v15658_v2 = vld [vmem:[#allocation43_spill] sm:$0xff] }
 0x180   :  { %15651 = vst [vmem:[#allocation35_spill] sm:$0xff] %v11697_v51  ;;  %9047 = vmatprep.mubr.msk.f32.mxu1 %vm2792_vm3, %v2731_v13  ;;  %v11705_v39 = vadd.f32 %v11038_v61, %v15652_v9  ;;  %v2215_v22 = vsub.f32 %v1359_v10, %v1986_v36  ;;  %v1990_v27 = vrot.slane %v1704_v5, %v10335_v17  ;;  %v2734_v23 = vmax.f32 %v2606_v43, 0.0  ;;  %v1362_v13 = vld [vmem:[%s15423_s1 + $0x2d8] sm:$0xff] }
 0x181   :  { %v2342_v34 = vadd.f32 %v2214_v55, %v11688_v11  ;;  %v2608_v6 = vadd.f32 %v11092_v52, %v2473_v58  ;;  %v2735_v60 = vmax.f32 %v2607_v44, 0.0  ;;  %v2344_v36 = vadd.f32 %v2216_v31, %v11697_v51  ;;  %v1364_v58 = vld [vmem:[%s15423_s1 + $0x2e8] sm:$0xff]  ;;  %v1363_v44 = vld [vmem:[%s15423_s1 + $0x2e0] sm:$0xff] }
 0x182   :  { %15653 = vst [vmem:[#allocation36_spill] sm:$0xff] %v11705_v39  ;;  %v1994_v7 = vrot.slane %v1706_v29, %v10335_v17  ;;  %v2610_v43 = vadd.f32 %v11092_v52, %v2475_v16  ;;  %v2609_v55 = vadd.f32 %v11092_v52, %v2474_v14  ;;  %v2476_v10 = vmul.f32 %v11069_v30, %v2341_v25  ;;  %v15654_v29 = vld [vmem:[#allocation40_spill] sm:$0xff] }
 0x183   :  { %9048 = vmatmul.mubr.msk.f32.gmra.mrb[142].mxu1 %vm2792_vm3, %v2732_v57  ;;  %v1716_v24 = vrot.slane %v11711_v1, %v10325_v12  ;;  %v2343_v31 = vadd.f32 %v2215_v22, %v11705_v39  ;;  %v11739_v57 = vadd.f32 %v11038_v61, %v15654_v29  ;;  %v2217_v16 = vsub.f32 %v1361_v59, %v1990_v27  ;;  %v15660_v29 = vld [vmem:[#allocation44_spill] sm:$0xff] }
 0x184   :  { %9050 = vmatprep.mubr.msk.f32.mxu1 %vm2792_vm3, %v2733_v47  ;;  %v1708_v14 = vcombine.high %v1704_v5, %v1704_v5  ;;  %v2477_v25 = vmul.f32 %v11069_v30, %v2342_v34  ;;  %v15656_v47 = vld [vmem:[#allocation39_spill] sm:$0xff]  ;;  %v2218_v51 = vsub.f32 %v1362_v13, %v1990_v27  ;;  %v11748_v11 = vadd.f32 %v11038_v61, %v15658_v2 }
 0x185   :  { %15655 = vst [vmem:[#allocation40_spill] sm:$0xff] %v11739_v57  ;;  %v11744_v9 = vadd.f32 %v11038_v61, %v15656_v47  ;;  %v2479_v22 = vmul.f32 %v11069_v30, %v2344_v36  ;;  %v2220_v39 = vsub.f32 %v1364_v58, %v1994_v7  ;;  %v11754_v59 = vadd.f32 %v11038_v61, %v15660_v29 }
 0x186   :  { %15659 = vst [vmem:[#allocation43_spill] sm:$0xff] %v11748_v11  ;;  %v2219_v5 = vsub.f32 %v1363_v44, %v1994_v7  ;;  %v2736_v34 = vmax.f32 %v2608_v6, 0.0  ;;  %v2611_v47 = vadd.f32 %v11092_v52, %v2476_v10  ;;  %v1732_v27 = vrot.slane %v1716_v24, %v10325_v12 }
 0x187   :  { %15657 = vst [vmem:[#allocation39_spill] sm:$0xff] %v11744_v9  ;;  %9051 = vmatmul.mubr.msk.f32.gmra.mrb[144].mxu1 %vm2792_vm3, %v2734_v23  ;;  %15661 = vst [vmem:[#allocation44_spill] sm:$0xff] %v11754_v59  ;;  %v1724_v13 = vcombine.high %v1716_v24, %v1716_v24  ;;  %v2737_v2 = vmax.f32 %v2609_v55, 0.0  ;;  %v2478_v50 = vmul.f32 %v11069_v30, %v2343_v31  ;;  %v2738_v58 = vmax.f32 %v2610_v43, 0.0  ;;  %v1366_v43 = vld [vmem:[%s15423_s1 + $0x2f8] sm:$0xff] }
 0x188   :  { %9053 = vmatprep.mubr.msk.f32.mxu1 %vm2792_vm3, %v2735_v60  ;;  %v2345_v23 = vadd.f32 %v2217_v16, %v11739_v57  ;;  %v1998_v36 = vrot.slane %v1708_v14, %v10335_v17  ;;  %v2346_v29 = vadd.f32 %v2218_v51, %v11744_v9  ;;  %v1365_v60 = vld [vmem:[%s15423_s1 + $0x2f0] sm:$0xff]  ;;  %v2612_v6 = vadd.f32 %v11092_v52, %v2477_v25  ;;  %v15670_v57 = vld [vmem:[#allocation55_spill] sm:$0xff] }
 0x189   :  { %v2614_v7 = vadd.f32 %v11092_v52, %v2479_v22  ;;  %v2348_v55 = vadd.f32 %v2220_v39, %v11748_v11  ;;  %v2347_v10 = vadd.f32 %v2219_v5, %v11754_v59  ;;  %v2739_v51 = vmax.f32 %v2611_v47, 0.0  ;;  %v15662_v25 = vld [vmem:[#allocation48_spill] sm:$0xff]  ;;  %v1367_v5 = vld [vmem:[%s15423_s1 + $0x300] sm:$0xff]  ;;  %v15664_v47 = vld [vmem:[#allocation47_spill] sm:$0xff] }
 0x18a   :  { %v2002_v44 = vrot.slane %v1732_v27, %v10335_v17  ;;  %v1746_v24 = vrot.slane %v1724_v13, %v10325_v12  ;;  %v1754_v31 = vcombine.high %v1732_v27, %v1732_v27  ;;  %v2613_v16 = vadd.f32 %v11092_v52, %v2478_v50  ;;  %v11827_v11 = vld [vmem:[%s15424_s5] ss:$0 sm:$0xff] }
 0x18b   :  { %9054 = vmatmul.mubr.msk.f32.gmra.mrb[146].mxu1 %vm2792_vm3, %v2736_v34  ;;  %v2480_v14 = vmul.f32 %v11069_v30, %v2345_v23  ;;  %v11781_v39 = vadd.f32 %v11038_v61, %v15662_v25  ;;  %v2221_v22 = vsub.f32 %v1365_v60, %v1998_v36  ;;  %v2481_v34 = vmul.f32 %v11069_v30, %v2346_v29  ;;  %v1368_v60 = vld [vmem:[%s15423_s1 + $0x308] sm:$0xff]  ;;  %v15666_v29 = vld [vmem:[#allocation52_spill] sm:$0xff] }
 0x18c   :  { %9056 = vmatprep.mubr.msk.f32.mxu1 %vm2792_vm3, %v2737_v2  ;;  %v11789_v2 = vadd.f32 %v11038_v61, %v15664_v47  ;;  %v2222_v27 = vsub.f32 %v1366_v43, %v1998_v36  ;;  %v2740_v50 = vmax.f32 %v2612_v6, 0.0  ;;  %v2742_v13 = vmax.f32 %v2614_v7, 0.0  ;;  %v1369_v43 = vld [vmem:[%s15423_s1 + $0x310] sm:$0xff] }
 0x18d   :  { %15663 = vst [vmem:[#allocation48_spill] sm:$0xff] %v11781_v39  ;;  %v2483_v23 = vmul.f32 %v11069_v30, %v2348_v55  ;;  %v2482_v25 = vmul.f32 %v11069_v30, %v2347_v10  ;;  %v11800_v59 = vadd.f32 %v11038_v61, %v15666_v29  ;;  %v2223_v47 = vsub.f32 %v1367_v5, %v2002_v44  ;;  %v1370_v10 = vld [vmem:[%s15423_s1 + $0x318] sm:$0xff] }
 0x18e   :  { %15665 = vst [vmem:[#allocation47_spill] sm:$0xff] %v11789_v2  ;;  %v2006_v36 = vrot.slane %v1746_v24, %v10335_v17  ;;  %v2741_v6 = vmax.f32 %v2613_v16, 0.0  ;;  %v2615_v7 = vadd.f32 %v11092_v52, %v2480_v14  ;;  %v2349_v55 = vadd.f32 %v2221_v22, %v11781_v39  ;;  %v15668_v22 = vld [vmem:[#allocation51_spill] sm:$0xff] }
 0x18f   :  { %9057 = vmatmul.mubr.msk.f32.gmra.mrb[148].mxu1 %vm2792_vm3, %v2738_v58  ;;  %15667 = vst [vmem:[#allocation52_spill] sm:$0xff] %v11800_v59  ;;  %v2010_v58 = vrot.slane %v1754_v31, %v10335_v17  ;;  %v1709_v31 = vcombine.high %v11711_v1, %v11711_v1  ;;  %v2616_v16 = vadd.f32 %v11092_v52, %v2481_v34  ;;  %v15672_v34 = vld [vmem:[#allocation56_spill] sm:$0xff] }
 0x190   :  { %9059 = vmatprep.mubr.msk.f32.mxu1 %vm2792_vm3, %v2739_v51  ;;  %v1371_v51 = vld [vmem:[%s15423_s1 + $0x320] sm:$0xff]  ;;  %v2350_v14 = vadd.f32 %v2222_v27, %v11789_v2  ;;  %v11821_v5 = vadd.f32 %v11038_v61, %v15668_v22  ;;  %v1756_v29 = vcombine.high %v1746_v24, %v1746_v24  ;;  %v2224_v39 = vsub.f32 %v1368_v60, %v2002_v44  ;;  %v15674_v2 = vld [vmem:[#allocation60_spill] sm:$0xff]  ;;  %v1372_v60 = vld [vmem:[%s15423_s1 + $0x328] sm:$0xff] }
 0x191   :  { %v11831_v1 = vadd.f32 %v11827_v11, %v15670_v57  ;;  %v11835_v27 = vadd.f32 %v11827_v11, %v15672_v34  ;;  %v11839_v61 = vadd.f32 %v11827_v11, %v15674_v2  ;;  %v2351_v44 = vadd.f32 %v2223_v47, %v11800_v59  ;;  %v11853_v47 = vld [vmem:[%s15425_s6] ss:$0 sm:$0xff]  ;;  %v15690_v59 = vld [vmem:[#allocation79_spill] sm:$0xff] }
 0x192   :  { %15669 = vst [vmem:[#allocation51_spill] sm:$0xff] %v11821_v5  ;;  %v2226_v24 = vsub.f32 %v1370_v10, %v2006_v36  ;;  %v2227_v57 = vsub.f32 %v1371_v51, %v2010_v58  ;;  %v2743_v22 = vmax.f32 %v2615_v7, 0.0  ;;  %v2617_v9 = vadd.f32 %v11092_v52, %v2482_v25  ;;  %v15676_v10 = vld [vmem:[#allocation59_spill] sm:$0xff] }
 0x193   :  { %9060 = vmatmul.mubr.msk.f32.gmra.mrb[150].mxu1 %vm2792_vm3, %v2740_v50  ;;  %15671 = vst [vmem:[#allocation55_spill] sm:$0xff] %v11831_v1  ;;  %15673 = vst [vmem:[#allocation56_spill] sm:$0xff] %v11835_v27  ;;  %v2225_v50 = vsub.f32 %v1369_v43, %v2006_v36  ;;  %v2484_v34 = vmul.f32 %v11069_v30, %v2349_v55  ;;  %v1723_v45 = vrot.slane %v1709_v31, %v10325_v12 }
 0x194   :  { %15675 = vst [vmem:[#allocation60_spill] sm:$0xff] %v11839_v61  ;;  %9062 = vmatprep.mubr.msk.f32.mxu1 %vm2792_vm3, %v2741_v6  ;;  %v2618_v2 = vadd.f32 %v11092_v52, %v2483_v23  ;;  %v2485_v36 = vmul.f32 %v11853_v47, %v2350_v14  ;;  %v2014_v6 = vrot.slane %v1756_v29, %v10335_v17  ;;  %v2744_v7 = vmax.f32 %v2616_v16, 0.0  ;;  %v1373_v52 = vld [vmem:[%s15423_s1 + $0x330] sm:$0xff] }
 0x195   :  { %v2352_v25 = vadd.f32 %v2224_v39, %v11821_v5  ;;  %v11861_v30 = vadd.f32 %v11827_v11, %v15676_v10  ;;  %v2228_v55 = vsub.f32 %v1372_v60, %v2010_v58  ;;  %v2486_v23 = vmul.f32 %v11853_v47, %v2351_v44  ;;  %v1374_v39 = vld [vmem:[%s15423_s1 + $0x338] sm:$0xff]  ;;  %v11877_v58 = vld [vmem:[%s15426_s7] ss:$0 sm:$0xff]  ;;  %v15680_v10 = vld [vmem:[#allocation63_spill] sm:$0xff] }
 0x196   :  { %v2354_v43 = vadd.f32 %v2226_v24, %v11831_v1  ;;  %v2355_v51 = vadd.f32 %v2227_v57, %v11839_v61  ;;  %v2745_v31 = vmax.f32 %v2617_v9, 0.0  ;;  %v2619_v16 = vadd.f32 %v11877_v58, %v2484_v34 }
 0x197   :  { %9063 = vmatmul.mubr.msk.f32.gmra.mrb[152].mxu1 %vm2792_vm3, %v2742_v13  ;;  %15677 = vst [vmem:[#allocation59_spill] sm:$0xff] %v11861_v30  ;;  %v2353_v13 = vadd.f32 %v2225_v50, %v11835_v27  ;;  %v1739_v14 = vrot.slane %v1723_v45, %v10325_v12  ;;  %v1725_v29 = vcombine.high %v1723_v45, %v1723_v45  ;;  %v2746_v44 = vmax.f32 %v2618_v2, 0.0  ;;  %v15678_v50 = vld [vmem:[#allocation64_spill] sm:$0xff] }
 0x198   :  { %9065 = vmatprep.mubr.msk.f32.mxu1 %vm2792_vm3, %v2743_v22  ;;  %v2620_v24 = vadd.f32 %v11877_v58, %v2485_v36  ;;  %v11884_v60 = vadd.f32 %v11827_v11, %v15678_v50  ;;  %v2229_v57 = vsub.f32 %v1373_v52, %v2014_v6  ;;  %v2487_v9 = vmul.f32 %v11853_v47, %v2352_v25 }
 0x199   :  { %v2356_v22 = vadd.f32 %v2228_v55, %v11861_v30  ;;  %v11891_v34 = vadd.f32 %v11827_v11, %v15680_v10  ;;  %v2230_v61 = vsub.f32 %v1374_v39, %v2014_v6  ;;  %v2621_v45 = vadd.f32 %v11877_v58, %v2486_v23  ;;  %v1375_v6 = vld [vmem:[%s15423_s1 + $0x340] sm:$0xff]  ;;  %v15687_v30 = vld [vmem:[#allocation71_spill] sm:$0xff] }
 0x19a   :  { %15679 = vst [vmem:[#allocation64_spill] sm:$0xff] %v11884_v60  ;;  %v2489_v2 = vmul.f32 %v11853_v47, %v2354_v43  ;;  %v2488_v36 = vmul.f32 %v11853_v47, %v2353_v13  ;;  %v2490_v52 = vmul.f32 %v11853_v47, %v2355_v51  ;;  %v2018_v25 = vrot.slane %v1739_v14, %v10335_v17  ;;  %v1376_v51 = vld [vmem:[%s15423_s1 + $0x348] sm:$0xff] }
 0x19b   :  { %9066 = vmatmul.mubr.msk.f32.gmra.mrb[154].mxu1 %vm2792_vm3, %v2744_v7  ;;  %15681 = vst [vmem:[#allocation63_spill] sm:$0xff] %v11891_v34  ;;  %v2747_v7 = vmax.f32 %v2619_v16, 0.0  ;;  %v1753_v55 = vrot.slane %v1725_v29, %v10325_v12  ;;  %v2748_v50 = vmax.f32 %v2620_v24, 0.0  ;;  %v2357_v10 = vadd.f32 %v2229_v57, %v11884_v60 }
 0x19c   :  { %9068 = vmatprep.mubr.msk.f32.mxu1 %vm2792_vm3, %v2745_v31  ;;  %v2622_v23 = vadd.f32 %v11877_v58, %v2487_v9  ;;  %v2491_v43 = vmul.f32 %v11853_v47, %v2356_v22  ;;  %v2358_v13 = vadd.f32 %v2230_v61, %v11891_v34  ;;  %v1755_v39 = vcombine.high %v1739_v14, %v1739_v14  ;;  %v11914_v31 = vld [vmem:[%s15421_s0 + $0x38] sm:$0xff]  ;;  %v15682_v61 = vld [vmem:[#allocation68_spill] sm:$0xff]  ;;  %v15684_v34 = vld [vmem:[#allocation67_spill] sm:$0xff] }
 0x19d   :  { %v2749_v16 = vmax.f32 %v2621_v45, 0.0  ;;  %v2624_v29 = vadd.f32 %v11877_v58, %v2489_v2  ;;  %v2625_v24 = vadd.f32 %v11877_v58, %v2490_v52  ;;  %v11922_v57 = vadd.f32 %v11827_v11, %v15682_v61  ;;  %v1377_v2 = vld [vmem:[%s15423_s1 + $0x350] sm:$0xff] }
 0x19e   :  { %v2231_v9 = vsub.f32 %v1375_v6, %v2018_v25  ;;  %v2022_v14 = vrot.slane %v1753_v55, %v10335_v17  ;;  %v1757_v22 = vcombine.high %v1753_v55, %v1753_v55  ;;  %v2492_v60 = vmul.f32 %v11853_v47, %v2357_v10 }
 0x19f   :  { %9069 = vmatmul.mubr.msk.f32.gmra.mrb[156].mxu1 %vm2792_vm3, %v2746_v44  ;;  %v2623_v44 = vadd.f32 %v11877_v58, %v2488_v36  ;;  %15683 = vst [vmem:[#allocation68_spill] sm:$0xff] %v11922_v57  ;;  %v2232_v45 = vsub.f32 %v1376_v51, %v2018_v25  ;;  %v1765_v36 = vrot.slane %v11914_v31, %v10325_v12  ;;  %v2750_v52 = vmax.f32 %v2622_v23, 0.0  ;;  %v1378_v51 = vld [vmem:[%s15423_s1 + $0x358] sm:$0xff] }
 0x1a0   :  { %9071 = vmatprep.mubr.msk.f32.mxu1 %vm2792_vm3, %v2747_v7  ;;  %v11928_v7 = vadd.f32 %v11827_v11, %v15684_v34  ;;  %v2626_v6 = vadd.f32 %v11877_v58, %v2491_v43  ;;  %v2026_v55 = vrot.slane %v1755_v39, %v10335_v17  ;;  %v2752_v10 = vmax.f32 %v2624_v29, 0.0  ;;  %v15686_v43 = vld [vmem:[#allocation72_spill] sm:$0xff]  ;;  %v1379_v29 = vld [vmem:[%s15423_s1 + $0x360] sm:$0xff] }
 0x1a1   :  { %v2751_v34 = vmax.f32 %v2623_v44, 0.0  ;;  %v2753_v61 = vmax.f32 %v2625_v24, 0.0  ;;  %v2493_v25 = vmul.f32 %v11853_v47, %v2358_v13  ;;  %v2359_v23 = vadd.f32 %v2231_v9, %v11922_v57  ;;  %v1382_v9 = vld [vmem:[%s15423_s1 + $0x378] sm:$0xff] }
 0x1a2   :  { %15685 = vst [vmem:[#allocation67_spill] sm:$0xff] %v11928_v7  ;;  %v11949_v39 = vadd.f32 %v11827_v11, %v15686_v43  ;;  %v2030_v13 = vrot.slane %v1757_v22, %v10335_v17  ;;  %v2627_v44 = vadd.f32 %v11877_v58, %v2492_v60  ;;  %v2360_v24 = vadd.f32 %v2232_v45, %v11928_v7  ;;  %v15688_v60 = vld [vmem:[#allocation75_spill] sm:$0xff] }
 0x1a3   :  { %9072 = vmatmul.mubr.msk.f32.gmra.mrb[158].mxu1 %vm2792_vm3, %v2748_v50  ;;  %v1380_v50 = vld [vmem:[%s15423_s1 + $0x368] sm:$0xff]  ;;  %v11959_v27 = vadd.f32 %v11827_v11, %v15687_v30  ;;  %v1781_v43 = vrot.slane %v1765_v36, %v10325_v12  ;;  %v2234_v22 = vsub.f32 %v1378_v51, %v2022_v14  ;;  %v11971_v45 = vadd.f32 %v11827_v11, %v15688_v60  ;;  %v15689_v30 = vld [vmem:[#allocation76_spill] sm:$0xff] }
 0x1a4   :  { %9074 = vmatprep.mubr.msk.f32.mxu1 %vm2792_vm3, %v2749_v16  ;;  %v2233_v16 = vsub.f32 %v1377_v2, %v2022_v14  ;;  %v1381_v2 = vld [vmem:[%s15423_s1 + $0x370] sm:$0xff]  ;;  %v2236_v57 = vsub.f32 %v1380_v50, %v2026_v55  ;;  %v11975_v7 = vadd.f32 %v11827_v11, %v15689_v30  ;;  %v2235_v1 = vsub.f32 %v1379_v29, %v2026_v55 }
 0x1a5   :  { %v11980_v5 = vadd.f32 %v11827_v11, %v15690_v59  ;;  %v1773_v14 = vcombine.high %v1765_v36, %v1765_v36  ;;  %v2494_v51 = vmul.f32 %v11853_v47, %v2359_v23  ;;  %v2238_v60 = vsub.f32 %v1382_v9, %v2030_v13 }
 0x1a6   :  { %v2361_v50 = vadd.f32 %v2233_v16, %v11949_v39  ;;  %v2237_v63 = vsub.f32 %v1381_v2, %v2030_v13  ;;  %v2495_v30 = vmul.f32 %v11853_v47, %v2360_v24  ;;  %v2754_v55 = vmax.f32 %v2626_v6, 0.0 }
 0x1a7   :  { %9075 = vmatmul.mubr.msk.f32.gmra.mrb[160].mxu1 %vm2792_vm3, %v2750_v52  ;;  %v11984_v52 = vadd.f32 %v11827_v11, %v15691_v21  ;;  %v2362_v59 = vadd.f32 %v2234_v22, %v11959_v27  ;;  %v2364_v29 = vadd.f32 %v2236_v57, %v11971_v45  ;;  %v1384_v21 = vld [vmem:[%s15423_s1 + $0x388] sm:$0xff]  ;;  %v2628_v36 = vadd.f32 %v11877_v58, %v2493_v25 }
 0x1a8   :  { %9077 = vmatprep.mubr.msk.f32.mxu1 %vm2792_vm3, %v2751_v34  ;;  %v2034_v34 = vrot.slane %v1781_v43, %v10335_v17  ;;  %v2755_v23 = vmax.f32 %v2627_v44, 0.0  ;;  %v2363_v16 = vadd.f32 %v2235_v1, %v11975_v7  ;;  %v1795_v6 = vrot.slane %v1773_v14, %v10325_v12  ;;  %v15692_v25 = vld [vmem:[#allocation83_spill] sm:$0xff] }
 0x1a9   :  { %v2629_v13 = vadd.f32 %v11877_v58, %v2494_v51  ;;  %v2496_v57 = vmul.f32 %v11853_v47, %v2361_v50  ;;  %v2366_v24 = vadd.f32 %v2238_v60, %v11980_v5  ;;  %v2365_v9 = vadd.f32 %v2237_v63, %v11984_v52  ;;  %v15693_v51 = vld [vmem:[#allocation84_spill] sm:$0xff] }
 0x1aa   :  { %v12010_v44 = vadd.f32 %v11827_v11, %v15692_v25  ;;  %v2240_v1 = vsub.f32 %v1384_v21, %v2034_v34  ;;  %v1803_v2 = vcombine.high %v1781_v43, %v1781_v43  ;;  %v2497_v22 = vmul.f32 %v11853_v47, %v2362_v59 }
 0x1ab   :  { %9078 = vmatmul.mubr.msk.f32.gmra.mrb[162].mxu1 %vm2792_vm3, %v2752_v10  ;;  %v1383_v10 = vld [vmem:[%s15423_s1 + $0x380] sm:$0xff]  ;;  %v2499_v14 = vmul.f32 %v11853_v47, %v2364_v29  ;;  %v12017_v50 = vadd.f32 %v11827_v11, %v15693_v51  ;;  %v2756_v63 = vmax.f32 %v2628_v36, 0.0  ;;  %v2038_v25 = vrot.slane %v1795_v6, %v10335_v17 }
 0x1ac   :  { %9080 = vmatprep.mubr.msk.f32.mxu1 %vm2792_vm3, %v2753_v61  ;;  %v2630_v61 = vadd.f32 %v11877_v58, %v2495_v30  ;;  %v2239_v60 = vsub.f32 %v1383_v10, %v2034_v34  ;;  %v2498_v30 = vmul.f32 %v11853_v47, %v2363_v16  ;;  %v1758_v43 = vcombine.high %v11914_v31, %v11914_v31  ;;  %v1385_v34 = vld [vmem:[%s15423_s1 + $0x390] sm:$0xff] }
 0x1ad   :  { %15694 = vst [vmem:[#allocation72_spill] sm:$0xff] %v12017_v50  ;;  %v2631_v59 = vadd.f32 %v11877_v58, %v2496_v57  ;;  %v2501_v29 = vmul.f32 %v11853_v47, %v2366_v24  ;;  %v2500_v21 = vmul.f32 %v11853_v47, %v2365_v9  ;;  %v2368_v36 = vadd.f32 %v2240_v1, %v12010_v44  ;;  %v1386_v57 = vld [vmem:[%s15423_s1 + $0x398] sm:$0xff]  ;;  %v1387_v24 = vld [vmem:[%s15423_s1 + $0x3a0] sm:$0xff] }
 0x1ae   :  { %v2042_v16 = vrot.slane %v1803_v2, %v10335_v17  ;;  %v2632_v31 = vadd.f32 %v11877_v58, %v2497_v22  ;;  %v12035_v10 = vadd.f32 %v11877_v58, %v2499_v14  ;;  %v1805_v9 = vcombine.high %v1795_v6, %v1795_v6 }
 0x1af   :  { %9081 = vmatmul.mubr.msk.f32.gmra.mrb[164].mxu1 %vm2792_vm3, %v2754_v55  ;;  %v2757_v55 = vmax.f32 %v2629_v13, 0.0  ;;  %v2367_v13 = vadd.f32 %v2239_v60, %v12017_v50  ;;  %v12048_v1 = vadd.f32 %v11827_v11, %v11296_v53  ;;  %v2241_v2 = vsub.f32 %v1385_v34, %v2038_v25  ;;  %v15697_v34 = vld [vmem:[#allocation89_spill] sm:$0xff] }
 0x1b0   :  { %9083 = vmatprep.mubr.msk.f32.mxu1 %vm2792_vm3, %v2755_v23  ;;  %v2758_v23 = vmax.f32 %v2630_v61, 0.0  ;;  %v2633_v61 = vadd.f32 %v11877_v58, %v2498_v30  ;;  %v1772_v22 = vrot.slane %v1758_v43, %v10325_v12  ;;  %v2759_v14 = vmax.f32 %v2631_v59, 0.0 }
 0x1b1   :  { %15695 = vst [vmem:[#allocation71_spill] sm:$0xff] %v12048_v1  ;;  %v12052_v51 = vadd.f32 %v11877_v58, %v2501_v29  ;;  %v2635_v60 = vadd.f32 %v11877_v58, %v2500_v21  ;;  %v12057_v6 = vadd.f32 %v11827_v11, %v11289_v20  ;;  %v2503_v53 = vmul.f32 %v11853_v47, %v2368_v36 }
 0x1b2   :  { %v2242_v30 = vsub.f32 %v1386_v57, %v2038_v25  ;;  %v12065_v43 = vadd.f32 %v11827_v11, %v11331_v37  ;;  %v2760_v59 = vmax.f32 %v2632_v31, 0.0  ;;  %v2762_v29 = vmax.f32 %v12035_v10, 0.0  ;;  %v12075_v25 = vld [vmem:[%s15427_s9] ss:$0 sm:$0xff]  ;;  %v1389_v31 = vld [vmem:[%s15423_s1 + $0x3b0] sm:$0xff] }
 0x1b3   :  { %9084 = vmatmul.mubr.msk.f32.gmra.mrb[166].mxu1 %vm2792_vm3, %v2756_v63  ;;  %v1388_v63 = vld [vmem:[%s15423_s1 + $0x3a8] sm:$0xff]  ;;  %v2502_v20 = vmul.f32 %v11853_v47, %v2367_v13  ;;  %v2046_v21 = vrot.slane %v1805_v9, %v10335_v17  ;;  %v2369_v37 = vadd.f32 %v2241_v2, %v12048_v1  ;;  %v12080_v36 = vadd.f32 %v11827_v11, %v15697_v34 }
 0x1b4   :  { %9086 = vmatprep.mubr.msk.f32.mxu1 %vm2792_vm3, %v2757_v55  ;;  %15696 = vst [vmem:[#allocation75_spill] sm:$0xff] %v12065_v43  ;;  %v2243_v55 = vsub.f32 %v1387_v24, %v2042_v16  ;;  %v12086_v10 = vrot.slane %v1772_v22, %v10325_v12  ;;  %v2761_v13 = vmax.f32 %v2633_v61, 0.0  ;;  %v2764_v57 = vmax.f32 %v12052_v51, 0.0 }
 0x1b5   :  { %15698 = vst [vmem:[#allocation76_spill] sm:$0xff] %v12080_v36  ;;  %v2763_v24 = vmax.f32 %v2635_v60, 0.0  ;;  %v1774_v9 = vcombine.high %v1772_v22, %v1772_v22  ;;  %v12090_v2 = vadd.f32 %v11877_v58, %v2503_v53  ;;  %v2370_v34 = vadd.f32 %v2242_v30, %v12057_v6 }
 0x1b6   :  { %v2637_v61 = vadd.f32 %v11877_v58, %v2502_v20  ;;  %v12102_v22 = vadd.f32 %v11827_v11, %v11368_v26  ;;  %v2245_v51 = vsub.f32 %v1389_v31, %v2046_v21  ;;  %v2504_v53 = vmul.f32 %v11853_v47, %v2369_v37 }
 0x1b7   :  { %9087 = vmatmul.mubr.msk.f32.gmra.mrb[168].mxu1 %vm2792_vm3, %v2758_v23  ;;  %v2244_v23 = vsub.f32 %v1388_v63, %v2042_v16  ;;  %v2371_v16 = vadd.f32 %v2243_v55, %v12065_v43  ;;  %v1390_v63 = vld [vmem:[%s15423_s1 + $0x3b8] sm:$0xff]  ;;  %v12110_v55 = vrot.slane %v12086_v10, %v10335_v17  ;;  %v12120_v20 = vrot.slane %v1774_v9, %v10325_v12 }
 0x1b8   :  { %9089 = vmatprep.mubr.msk.f32.mxu1 %vm2792_vm3, %v2759_v14  ;;  %v8932_v14 = vpop.f32.mrb[64].mxu1  ;;  %15699 = vst [vmem:[#allocation79_spill] sm:$0xff] %v12102_v22  ;;  %v2246_v26 = vsub.f32 %v1390_v63, %v2046_v21  ;;  %v2373_v21 = vadd.f32 %v2245_v51, %v12102_v22  ;;  %v12129_v63 = vadd.f32 %v11827_v11, %v11395_v35  ;;  %v15743_v22 = vld [vmem:[#allocation24_spill] sm:$0xff] }
 0x1b9   :  { %v3249_v1 = vadd.f32 %v8932_v14, %v12075_v25  ;;  %v3243_v50 = vpop.f32.mrb[65].mxu1  ;;  %v2372_v30 = vadd.f32 %v2244_v23, %v12080_v36  ;;  %v2505_v23 = vmul.f32 %v11853_v47, %v2370_v34  ;;  %v12141_v34 = vadd.f32 %v11827_v11, %v11408_v56 }
 0x1ba   :  { %v3244_v60 = vadd.f32 %v12075_v25, %v3243_v50  ;;  %v1391_v50 = vld [vmem:[%s15423_s1 + $0x3c0] sm:$0xff]  ;;  %15701 = vst [vmem:[#allocation83_spill] sm:$0xff] %v12129_v63 }
 0x1bb   :  { %9090 = vmatmul.mubr.msk.f32.gmra.mrb[170].mxu1 %vm2792_vm3, %v2760_v59  ;;  %v12114_v59 = vadd.f32 %v11827_v11, %v11359_v0  ;;  %v8935_v31 = vpop.f32.mrb[66].mxu1  ;;  %v3883_v14 = vmax.f32 %v3249_v1, 0.0  ;;  %v2765_v0 = vmax.f32 %v2637_v61, 0.0  ;;  %v2639_v1 = vadd.f32 %v11877_v58, %v2504_v53  ;;  %15702 = vst [vmem:[#allocation84_spill] sm:$0xff] %v12141_v34  ;;  %v1393_v53 = vld [vmem:[%s15423_s1 + $0x3d0] sm:$0xff] }
 0x1bc   :  { %9092 = vmatprep.mubr.msk.f32.mxu1 %vm2792_vm3, %v2761_v13  ;;  %v3882_v37 = vmax.f32 %v3244_v60, 0.0  ;;  %v2506_v13 = vmul.f32 %v11853_v47, %v2371_v16  ;;  %v3259_v43 = vadd.f32 %v8935_v31, %v12075_v25  ;;  %v3253_v36 = vpop.f32.mrb[67].mxu1  ;;  %v2507_v9 = vmul.f32 %v11853_v47, %v2372_v30 }
 0x1bd   :  { %15700 = vst [vmem:[#allocation80_spill] sm:$0xff] %v12114_v59  ;;  %v3254_v12 = vadd.f32 %v12075_v25, %v3253_v36  ;;  %v2247_v35 = vsub.f32 %v1391_v50, %v12110_v55  ;;  %v2374_v36 = vadd.f32 %v2246_v26, %v12114_v59  ;;  %v1804_v16 = vcombine.high %v12086_v10, %v12086_v10 }
 0x1be   :  { %9124 = vmatprep.mubr.msk.f32.mxu0 %vm4018_vm4, %v3882_v37  ;;  %v2640_v60 = vadd.f32 %v11877_v58, %v2505_v23  ;;  %v2641_v56 = vadd.f32 %v11877_v58, %v2506_v13  ;;  %v3885_v30 = vmax.f32 %v3259_v43, 0.0  ;;  %v2766_v37 = vmax.f32 %v12090_v2, 0.0  ;;  %v1394_v2 = vld [vmem:[%s15423_s1 + $0x3d8] sm:$0xff] }
 0x1bf   :  { %9093 = vmatmul.mubr.msk.f32.gmra.mrb[172].mxu1 %vm2792_vm3, %v2762_v29  ;;  %v1392_v29 = vld [vmem:[%s15423_s1 + $0x3c8] sm:$0xff]  ;;  %9125 = vmatmul.mubr.msk.f32.vlgmr.msra.gmra.mrb[64].mxu0 %vm4018_vm4, %v3883_v14  ;;  %v3884_v61 = vmax.f32 %v3254_v12, 0.0  ;;  %v8938_v51 = vpop.f32.mrb[68].mxu1  ;;  %v2508_v10 = vmul.f32 %v11853_v47, %v2373_v21  ;;  %v2767_v13 = vmax.f32 %v2639_v1, 0.0  ;;  %v2642_v43 = vadd.f32 %v11877_v58, %v2507_v9 }
 0x1c0   :  { %9095 = vmatprep.mubr.msk.f32.mxu1 %vm2792_vm3, %v2763_v24  ;;  %v12148_v24 = vrot.slane %v12120_v20, %v10335_v17  ;;  %v3269_v26 = vadd.f32 %v8938_v51, %v12075_v25  ;;  %v3263_v50 = vpop.f32.mrb[69].mxu1  ;;  %v2248_v31 = vsub.f32 %v1392_v29, %v12110_v55  ;;  %v2375_v14 = vadd.f32 %v2247_v35, %v12141_v34  ;;  %v1395_v29 = vld [vmem:[%s15423_s1 + $0x3e0] sm:$0xff]  ;;  %v6867_v34 = vld [vmem:[%s15428_s2 + $0xd8] sm:$0xff] }
 0x1c1   :  { %v3264_v23 = vadd.f32 %v12075_v25, %v3263_v50  ;;  %9127 = vmatprep.mubr.msk.f32.mxu0 %vm4018_vm4, %v3884_v61  ;;  %v1806_v21 = vcombine.high %v12120_v20, %v12120_v20  ;;  %v2768_v9 = vmax.f32 %v2640_v60, 0.0  ;;  %v12195_v60 = vadd.f32 %v11827_v11, %v11438_v42 }
 0x1c2   :  { %v2249_v55 = vsub.f32 %v1393_v53, %v12148_v24  ;;  %v3887_v35 = vmax.f32 %v3269_v26, 0.0  ;;  %v2643_v53 = vadd.f32 %v11877_v58, %v2508_v10  ;;  %v2376_v20 = vadd.f32 %v2248_v31, %v12129_v63 }
 0x1c3   :  { %9096 = vmatmul.mubr.msk.f32.gmra.mrb[174].mxu1 %vm2792_vm3, %v2764_v57  ;;  %v12169_v57 = vadd.f32 %v11827_v11, %v11451_v48  ;;  %9128 = vmatmul.mubr.msk.f32.gmra.mrb[66].mxu0 %vm4018_vm4, %v3885_v30  ;;  %v3886_v12 = vmax.f32 %v3264_v23, 0.0  ;;  %v8941_v1 = vpop.f32.mrb[70].mxu1  ;;  %v2509_v48 = vmul.f32 %v11853_v47, %v2374_v36  ;;  %v2510_v36 = vmul.f32 %v11853_v47, %v2375_v14 }
 0x1c4   :  { %9098 = vmatprep.mubr.msk.f32.mxu1 %vm2792_vm3, %v2765_v0  ;;  %v12177_v0 = vrot.slane %v1804_v16, %v10335_v17  ;;  %v3279_v61 = vadd.f32 %v8941_v1, %v12075_v25  ;;  %v3273_v51 = vpop.f32.mrb[71].mxu1  ;;  %v2769_v16 = vmax.f32 %v2641_v56, 0.0  ;;  %15704 = vst [vmem:[#allocation105_spill] sm:$0xff] %v12195_v60  ;;  %v2250_v26 = vsub.f32 %v1394_v2, %v12148_v24 }
 0x1c5   :  { %15703 = vst [vmem:[#allocation89_spill] sm:$0xff] %v12169_v57  ;;  %v3274_v30 = vadd.f32 %v12075_v25, %v3273_v51  ;;  %9130 = vmatprep.mubr.msk.f32.mxu0 %vm4018_vm4, %v3886_v12  ;;  %v12200_v56 = vadd.f32 %v11827_v11, %v11493_v3  ;;  %v2377_v50 = vadd.f32 %v2249_v55, %v12169_v57  ;;  %v1397_v3 = vld [vmem:[%s15423_s1 + $0x3f0] sm:$0xff]  ;;  %v2771_v12 = vmax.f32 %v2643_v53, 0.0 }
 0x1c6   :  { %v2251_v10 = vsub.f32 %v1395_v29, %v12177_v0  ;;  %v2062_v31 = vrot.slane %v1806_v21, %v10335_v17  ;;  %v2644_v24 = vadd.f32 %v11877_v58, %v2509_v48  ;;  %v3889_v14 = vmax.f32 %v3279_v61, 0.0  ;;  %v1398_v61 = vld [vmem:[%s15423_s1 + $0x3f8] sm:$0xff] }
 0x1c7   :  { %9099 = vmatmul.mubr.msk.f32.gmra.mrb[176].mxu1 %vm2792_vm3, %v2766_v37  ;;  %15705 = vst [vmem:[#allocation106_spill] sm:$0xff] %v12200_v56  ;;  %9131 = vmatmul.mubr.msk.f32.gmra.mrb[68].mxu0 %vm4018_vm4, %v3887_v35  ;;  %v1396_v37 = vld [vmem:[%s15423_s1 + $0x3e8] sm:$0xff]  ;;  %v3888_v42 = vmax.f32 %v3274_v30, 0.0  ;;  %v8944_v23 = vpop.f32.mrb[72].mxu1  ;;  %v2511_v1 = vmul.f32 %v11853_v47, %v2376_v20  ;;  %v12218_v17 = vadd.f32 %v11827_v11, %v11487_v38 }
 0x1c8   :  { %9101 = vmatprep.mubr.msk.f32.mxu1 %vm2792_vm3, %v2767_v13  ;;  %v2770_v13 = vmax.f32 %v2642_v43, 0.0  ;;  %v3289_v2 = vadd.f32 %v8944_v23, %v12075_v25  ;;  %v3283_v55 = vpop.f32.mrb[73].mxu1  ;;  %v2645_v21 = vadd.f32 %v11877_v58, %v2510_v36  ;;  %v2378_v48 = vadd.f32 %v2250_v26, %v12195_v60  ;;  %v6864_v60 = vld [vmem:[%s15428_s2 + $0xc0] sm:$0xff] }
 0x1c9   :  { %15706 = vst [vmem:[#allocation107_spill] sm:$0xff] %v12218_v17  ;;  %v3284_v43 = vadd.f32 %v12075_v25, %v3283_v55  ;;  %9133 = vmatprep.mubr.msk.f32.mxu0 %vm4018_vm4, %v3888_v42  ;;  %v2252_v29 = vsub.f32 %v1396_v37, %v12177_v0  ;;  %v2512_v38 = vmul.f32 %v11853_v47, %v2377_v50 }
 0x1ca   :  { %v2379_v35 = vadd.f32 %v2251_v10, %v12200_v56  ;;  %v2253_v51 = vsub.f32 %v1397_v3, %v2062_v31  ;;  %v3891_v20 = vmax.f32 %v3289_v2, 0.0  ;;  %v2646_v36 = vadd.f32 %v11877_v58, %v2511_v1  ;;  %v6862_v56 = vld [vmem:[%s15428_s2 + $0xb0] sm:$0xff] }
 0x1cb   :  { %9102 = vmatmul.mubr.msk.f32.gmra.mrb[178].mxu1 %vm2792_vm3, %v2768_v9  ;;  %v12228_v9 = vadd.f32 %v11827_v11, %v11526_v8  ;;  %9134 = vmatmul.mubr.msk.f32.gmra.mrb[70].mxu0 %vm4018_vm4, %v3889_v14  ;;  %v8947_v53 = vpop.f32.mrb[74].mxu1  ;;  %v2772_v8 = vmax.f32 %v2644_v24, 0.0  ;;  %v12241_v26 = vadd.f32 %v11827_v11, %v11518_v19  ;;  %v2773_v37 = vmax.f32 %v2645_v21, 0.0 }
 0x1cc   :  { %9104 = vmatprep.mubr.msk.f32.mxu1 %vm2792_vm3, %v2769_v16  ;;  %v3890_v16 = vmax.f32 %v3284_v43, 0.0  ;;  %v3299_v0 = vadd.f32 %v8947_v53, %v12075_v25  ;;  %v3293_v30 = vpop.f32.mrb[75].mxu1  ;;  %v2513_v10 = vmul.f32 %v11853_v47, %v2378_v48  ;;  %v2380_v42 = vadd.f32 %v2252_v29, %v12218_v17 }
 0x1cd   :  { %15707 = vst [vmem:[#allocation108_spill] sm:$0xff] %v12228_v9  ;;  %15708 = vst [vmem:[#allocation109_spill] sm:$0xff] %v12241_v26  ;;  %v3294_v50 = vadd.f32 %v12075_v25, %v3293_v30  ;;  %v2254_v23 = vsub.f32 %v1398_v61, %v2062_v31  ;;  %v2514_v24 = vmul.f32 %v11853_v47, %v2379_v35  ;;  %v2774_v31 = vmax.f32 %v2646_v36, 0.0 }
 0x1ce   :  { %9136 = vmatprep.mubr.msk.f32.mxu0 %vm4018_vm4, %v3890_v16  ;;  %v2381_v19 = vadd.f32 %v2253_v51, %v12228_v9  ;;  %v3893_v14 = vmax.f32 %v3299_v0, 0.0  ;;  %v2648_v1 = vadd.f32 %v11877_v58, %v2513_v10  ;;  %v2515_v43 = vmul.f32 %v11853_v47, %v2380_v42 }
 0x1cf   :  { %9105 = vmatmul.mubr.msk.f32.gmra.mrb[180].mxu1 %vm2792_vm3, %v2770_v13  ;;  %9137 = vmatmul.mubr.msk.f32.gmra.mrb[72].mxu0 %vm4018_vm4, %v3891_v20  ;;  %v2647_v13 = vadd.f32 %v11877_v58, %v2512_v38  ;;  %v3892_v11 = vmax.f32 %v3294_v50, 0.0  ;;  %v8950_v3 = vpop.f32.mrb[76].mxu1  ;;  %v2382_v21 = vadd.f32 %v2254_v23, %v12241_v26  ;;  %v2649_v29 = vadd.f32 %v11877_v58, %v2514_v24  ;;  %v6858_v26 = vld [vmem:[%s15428_s2 + $0x90] sm:$0xff] }
 0x1d0   :  { %9107 = vmatprep.mubr.msk.f32.mxu1 %vm2792_vm3, %v2771_v12  ;;  %v3309_v2 = vadd.f32 %v8950_v3, %v12075_v25  ;;  %v3303_v55 = vpop.f32.mrb[77].mxu1  ;;  %v2516_v38 = vmul.f32 %v11853_v47, %v2381_v19  ;;  %v2776_v0 = vmax.f32 %v2648_v1, 0.0  ;;  %v2650_v30 = vadd.f32 %v11877_v58, %v2515_v43 }
 0x1d1   :  { %v3304_v12 = vadd.f32 %v12075_v25, %v3303_v55  ;;  %9139 = vmatprep.mubr.msk.f32.mxu0 %vm4018_vm4, %v3892_v11  ;;  %v2775_v48 = vmax.f32 %v2647_v13, 0.0  ;;  %v2777_v36 = vmax.f32 %v2649_v29, 0.0 }
 0x1d2   :  { %v3895_v51 = vmax.f32 %v3309_v2, 0.0  ;;  %v2651_v50 = vadd.f32 %v11877_v58, %v2516_v38 }
 0x1d3   :  { %9108 = vmatmul.mubr.msk.f32.gmra.mrb[182].mxu1 %vm2792_vm3, %v2772_v8  ;;  %9140 = vmatmul.mubr.msk.f32.gmra.mrb[74].mxu0 %vm4018_vm4, %v3893_v14  ;;  %v3894_v35 = vmax.f32 %v3304_v12, 0.0  ;;  %v8953_v61 = vpop.f32.mrb[78].mxu1  ;;  %v2517_v8 = vmul.f32 %v11853_v47, %v2382_v21  ;;  %v2778_v47 = vmax.f32 %v2650_v30, 0.0 }
 0x1d4   :  { %9110 = vmatprep.mubr.msk.f32.mxu1 %vm2792_vm3, %v2773_v37  ;;  %v3319_v16 = vadd.f32 %v8953_v61, %v12075_v25  ;;  %v3313_v53 = vpop.f32.mrb[79].mxu1  ;;  %v2779_v11 = vmax.f32 %v2651_v50, 0.0 }
 0x1d5   :  { %v3314_v20 = vadd.f32 %v12075_v25, %v3313_v53  ;;  %9142 = vmatprep.mubr.msk.f32.mxu0 %vm4018_vm4, %v3894_v35  ;;  %v2652_v19 = vadd.f32 %v11877_v58, %v2517_v8 }
 0x1d6   :  { %v3897_v42 = vmax.f32 %v3319_v16, 0.0 }
 0x1d7   :  { %9111 = vmatmul.mubr.msk.f32.gmra.mrb[184].mxu1 %vm2792_vm3, %v2774_v31  ;;  %9143 = vmatmul.mubr.msk.f32.gmra.mrb[76].mxu0 %vm4018_vm4, %v3895_v51  ;;  %v3896_v37 = vmax.f32 %v3314_v20, 0.0  ;;  %v8956_v10 = vpop.f32.mrb[80].mxu1  ;;  %v2780_v1 = vmax.f32 %v2652_v19, 0.0 }
 0x1d8   :  { %9113 = vmatprep.mubr.msk.f32.mxu1 %vm2792_vm3, %v2775_v48  ;;  %v3329_v23 = vadd.f32 %v8956_v10, %v12075_v25  ;;  %v3323_v13 = vpop.f32.mrb[81].mxu1 }
 0x1d9   :  { %v3324_v24 = vadd.f32 %v12075_v25, %v3323_v13  ;;  %9145 = vmatprep.mubr.msk.f32.mxu0 %vm4018_vm4, %v3896_v37 }
 0x1da   :  { %v3899_v2 = vmax.f32 %v3329_v23, 0.0 }
 0x1db   :  { %9114 = vmatmul.mubr.msk.f32.gmra.mrb[186].mxu1 %vm2792_vm3, %v2776_v0  ;;  %9146 = vmatmul.mubr.msk.f32.gmra.mrb[78].mxu0 %vm4018_vm4, %v3897_v42  ;;  %v3898_v3 = vmax.f32 %v3324_v24, 0.0  ;;  %v8959_v14 = vpop.f32.mrb[82].mxu1 }
 0x1dc   :  { %9116 = vmatprep.mubr.msk.f32.mxu1 %vm2792_vm3, %v2777_v36  ;;  %v3339_v55 = vadd.f32 %v8959_v14, %v12075_v25  ;;  %v3333_v12 = vpop.f32.mrb[83].mxu1 }
 0x1dd   :  { %v3334_v31 = vadd.f32 %v12075_v25, %v3333_v12  ;;  %9148 = vmatprep.mubr.msk.f32.mxu0 %vm4018_vm4, %v3898_v3 }
 0x1de   :  { %v3901_v21 = vmax.f32 %v3339_v55, 0.0 }
 0x1df   :  { %9117 = vmatmul.mubr.msk.f32.gmra.mrb[188].mxu1 %vm2792_vm3, %v2778_v47  ;;  %9149 = vmatmul.mubr.msk.f32.gmra.mrb[80].mxu0 %vm4018_vm4, %v3899_v2  ;;  %v3900_v58 = vmax.f32 %v3334_v31, 0.0  ;;  %v8962_v43 = vpop.f32.mrb[84].mxu1 }
 0x1e0   :  { %9119 = vmatprep.mubr.msk.f32.mxu1 %vm2792_vm3, %v2779_v11  ;;  %v3349_v48 = vadd.f32 %v8962_v43, %v12075_v25  ;;  %v3343_v29 = vpop.f32.mrb[85].mxu1 }
 0x1e1   :  { %v3344_v38 = vadd.f32 %v12075_v25, %v3343_v29  ;;  %9151 = vmatprep.mubr.msk.f32.mxu0 %vm4018_vm4, %v3900_v58 }
 0x1e2   :  { %v3903_v51 = vmax.f32 %v3349_v48, 0.0 }
 0x1e3   :  { %9120 = vmatmul.mubr.msk.f32.gmra.mrb[190].mxu1 %vm2792_vm3, %v2780_v1  ;;  %9152 = vmatmul.mubr.msk.f32.gmra.mrb[82].mxu0 %vm4018_vm4, %v3901_v21  ;;  %v3902_v35 = vmax.f32 %v3344_v38, 0.0  ;;  %v8965_v61 = vpop.f32.mrb[86].mxu1 }
 0x1e4   :  { %v3359_v16 = vadd.f32 %v8965_v61, %v12075_v25  ;;  %v3353_v53 = vpop.f32.mrb[87].mxu1 }
 0x1e5   :  { %v3354_v20 = vadd.f32 %v12075_v25, %v3353_v53  ;;  %9154 = vmatprep.mubr.msk.f32.mxu0 %vm4018_vm4, %v3902_v35 }
 0x1e6   :  { %v3905_v8 = vmax.f32 %v3359_v16, 0.0 }
 0x1e7   :  { %9155 = vmatmul.mubr.msk.f32.gmra.mrb[84].mxu0 %vm4018_vm4, %v3903_v51  ;;  %v3904_v0 = vmax.f32 %v3354_v20, 0.0  ;;  %v8968_v30 = vpop.f32.mrb[88].mxu1 }
 0x1e8   :  { %v3369_v36 = vadd.f32 %v8968_v30, %v12075_v25  ;;  %v3363_v50 = vpop.f32.mrb[89].mxu1 }
 0x1e9   :  { %v3364_v37 = vadd.f32 %v12075_v25, %v3363_v50  ;;  %9157 = vmatprep.mubr.msk.f32.mxu0 %vm4018_vm4, %v3904_v0 }
 0x1ea   :  { %v3907_v23 = vmax.f32 %v3369_v36, 0.0 }
 0x1eb   :  { %9158 = vmatmul.mubr.msk.f32.gmra.mrb[86].mxu0 %vm4018_vm4, %v3905_v8  ;;  %v3906_v10 = vmax.f32 %v3364_v37, 0.0  ;;  %v8971_v42 = vpop.f32.mrb[90].mxu1 }
 0x1ec   :  { %v3379_v13 = vadd.f32 %v8971_v42, %v12075_v25  ;;  %v3373_v24 = vpop.f32.mrb[91].mxu1 }
 0x1ed   :  { %v3374_v47 = vadd.f32 %v12075_v25, %v3373_v24  ;;  %9160 = vmatprep.mubr.msk.f32.mxu0 %vm4018_vm4, %v3906_v10 }
 0x1ee   :  { %v3909_v3 = vmax.f32 %v3379_v13, 0.0 }
 0x1ef   :  { %9161 = vmatmul.mubr.msk.f32.gmra.mrb[88].mxu0 %vm4018_vm4, %v3907_v23  ;;  %v3908_v19 = vmax.f32 %v3374_v47, 0.0  ;;  %v8974_v11 = vpop.f32.mrb[92].mxu1 }
 0x1f0   :  { %v3389_v14 = vadd.f32 %v8974_v11, %v12075_v25  ;;  %v3383_v2 = vpop.f32.mrb[93].mxu1 }
 0x1f1   :  { %v3384_v55 = vadd.f32 %v12075_v25, %v3383_v2  ;;  %9163 = vmatprep.mubr.msk.f32.mxu0 %vm4018_vm4, %v3908_v19 }
 0x1f2   :  { %v3911_v1 = vmax.f32 %v3389_v14, 0.0 }
 0x1f3   :  { %9164 = vmatmul.mubr.msk.f32.gmra.mrb[90].mxu0 %vm4018_vm4, %v3909_v3  ;;  %v3910_v12 = vmax.f32 %v3384_v55, 0.0  ;;  %v8977_v31 = vpop.f32.mrb[94].mxu1 }
 0x1f4   :  { %v3399_v58 = vadd.f32 %v8977_v31, %v12075_v25  ;;  %v3393_v43 = vpop.f32.mrb[95].mxu1 }
 0x1f5   :  { %v3394_v21 = vadd.f32 %v12075_v25, %v3393_v43  ;;  %9166 = vmatprep.mubr.msk.f32.mxu0 %vm4018_vm4, %v3910_v12 }
 0x1f6   :  { %v3913_v38 = vmax.f32 %v3399_v58, 0.0 }
 0x1f7   :  { %9167 = vmatmul.mubr.msk.f32.gmra.mrb[92].mxu0 %vm4018_vm4, %v3911_v1  ;;  %v3912_v48 = vmax.f32 %v3394_v21, 0.0  ;;  %v8980_v29 = vpop.f32.mrb[96].mxu1 }
 0x1f8   :  { %v3409_v35 = vadd.f32 %v8980_v29, %v12075_v25  ;;  %v3403_v61 = vpop.f32.mrb[97].mxu1 }
 0x1f9   :  { %v3404_v51 = vadd.f32 %v12075_v25, %v3403_v61  ;;  %9169 = vmatprep.mubr.msk.f32.mxu0 %vm4018_vm4, %v3912_v48 }
 0x1fa   :  { %v3915_v20 = vmax.f32 %v3409_v35, 0.0 }
 0x1fb   :  { %9170 = vmatmul.mubr.msk.f32.gmra.mrb[94].mxu0 %vm4018_vm4, %v3913_v38  ;;  %v3914_v16 = vmax.f32 %v3404_v51, 0.0  ;;  %v8983_v53 = vpop.f32.mrb[98].mxu1 }
 0x1fc   :  { %v3419_v0 = vadd.f32 %v8983_v53, %v12075_v25  ;;  %v3413_v30 = vpop.f32.mrb[99].mxu1 }
 0x1fd   :  { %v3414_v8 = vadd.f32 %v12075_v25, %v3413_v30  ;;  %9172 = vmatprep.mubr.msk.f32.mxu0 %vm4018_vm4, %v3914_v16 }
 0x1fe   :  { %v3917_v37 = vmax.f32 %v3419_v0, 0.0 }
 0x1ff   :  { %9173 = vmatmul.mubr.msk.f32.gmra.mrb[96].mxu0 %vm4018_vm4, %v3915_v20  ;;  %v3916_v36 = vmax.f32 %v3414_v8, 0.0  ;;  %v8986_v50 = vpop.f32.mrb[100].mxu1 }
 0x200   :  { %v3429_v10 = vadd.f32 %v8986_v50, %v12075_v25  ;;  %v3423_v42 = vpop.f32.mrb[101].mxu1 }
 0x201   :  { %v3424_v23 = vadd.f32 %v12075_v25, %v3423_v42  ;;  %9175 = vmatprep.mubr.msk.f32.mxu0 %vm4018_vm4, %v3916_v36 }
 0x202   :  { %v3919_v47 = vmax.f32 %v3429_v10, 0.0 }
 0x203   :  { %9176 = vmatmul.mubr.msk.f32.gmra.mrb[98].mxu0 %vm4018_vm4, %v3917_v37  ;;  %v3918_v13 = vmax.f32 %v3424_v23, 0.0  ;;  %v8989_v24 = vpop.f32.mrb[102].mxu1 }
 0x204   :  { %v3439_v19 = vadd.f32 %v8989_v24, %v12075_v25  ;;  %v3433_v11 = vpop.f32.mrb[103].mxu1 }
 0x205   :  { %v3434_v3 = vadd.f32 %v12075_v25, %v3433_v11  ;;  %9178 = vmatprep.mubr.msk.f32.mxu0 %vm4018_vm4, %v3918_v13 }
 0x206   :  { %v3921_v55 = vmax.f32 %v3439_v19, 0.0 }
 0x207   :  { %9179 = vmatmul.mubr.msk.f32.gmra.mrb[100].mxu0 %vm4018_vm4, %v3919_v47  ;;  %v3920_v14 = vmax.f32 %v3434_v3, 0.0 }
 0x208   :  { %v8992_v2 = vpop.f32.mrb[104].mxu1 }
 0x209   :  { %v3449_v12 = vadd.f32 %v8992_v2, %v12075_v25  ;;  %v3443_v31 = vpop.f32.mrb[105].mxu1  ;;  %9181 = vmatprep.mubr.msk.f32.mxu0 %vm4018_vm4, %v3920_v14 }
 0x20a   :  { %v3444_v1 = vadd.f32 %v12075_v25, %v3443_v31 }
 0x20b   :  { %9182 = vmatmul.mubr.msk.f32.gmra.mrb[102].mxu0 %vm4018_vm4, %v3921_v55  ;;  %v3923_v21 = vmax.f32 %v3449_v12, 0.0 }
 0x20c   :  { %v3922_v58 = vmax.f32 %v3444_v1, 0.0  ;;  %v8995_v43 = vpop.f32.mrb[106].mxu1 }
 0x20d   :  { %v3459_v48 = vadd.f32 %v8995_v43, %v12075_v25  ;;  %v3453_v29 = vpop.f32.mrb[107].mxu1 }
 0x20e   :  { %v3454_v38 = vadd.f32 %v12075_v25, %v3453_v29  ;;  %9184 = vmatprep.mubr.msk.f32.mxu0 %vm4018_vm4, %v3922_v58 }
 0x20f   :  { %9185 = vmatmul.mubr.msk.f32.gmra.mrb[104].mxu0 %vm4018_vm4, %v3923_v21  ;;  %v3925_v51 = vmax.f32 %v3459_v48, 0.0 }
 0x210   :  { %v3924_v35 = vmax.f32 %v3454_v38, 0.0  ;;  %v8998_v61 = vpop.f32.mrb[108].mxu1 }
 0x211   :  { %v3469_v16 = vadd.f32 %v8998_v61, %v12075_v25  ;;  %v3463_v53 = vpop.f32.mrb[109].mxu1 }
 0x212   :  { %v3464_v20 = vadd.f32 %v12075_v25, %v3463_v53  ;;  %9187 = vmatprep.mubr.msk.f32.mxu0 %vm4018_vm4, %v3924_v35 }
 0x213   :  { %9188 = vmatmul.mubr.msk.f32.gmra.mrb[106].mxu0 %vm4018_vm4, %v3925_v51  ;;  %v3927_v8 = vmax.f32 %v3469_v16, 0.0 }
 0x214   :  { %v3926_v0 = vmax.f32 %v3464_v20, 0.0  ;;  %v9001_v30 = vpop.f32.mrb[110].mxu1 }
 0x215   :  { %v3479_v36 = vadd.f32 %v9001_v30, %v12075_v25  ;;  %v3473_v50 = vpop.f32.mrb[111].mxu1 }
 0x216   :  { %v3474_v37 = vadd.f32 %v12075_v25, %v3473_v50  ;;  %9190 = vmatprep.mubr.msk.f32.mxu0 %vm4018_vm4, %v3926_v0 }
 0x217   :  { %9191 = vmatmul.mubr.msk.f32.gmra.mrb[108].mxu0 %vm4018_vm4, %v3927_v8  ;;  %v3929_v23 = vmax.f32 %v3479_v36, 0.0 }
 0x218   :  { %v3928_v10 = vmax.f32 %v3474_v37, 0.0 }
 0x219   :  { %v9004_v42 = vpop.f32.mrb[112].mxu1 }
 0x21a   :  { %v3489_v13 = vadd.f32 %v9004_v42, %v12075_v25  ;;  %v3483_v24 = vpop.f32.mrb[113].mxu1  ;;  %9193 = vmatprep.mubr.msk.f32.mxu0 %vm4018_vm4, %v3928_v10 }
 0x21b   :  { %v3484_v47 = vadd.f32 %v12075_v25, %v3483_v24  ;;  %9194 = vmatmul.mubr.msk.f32.gmra.mrb[110].mxu0 %vm4018_vm4, %v3929_v23 }
 0x21c   :  { %v3931_v3 = vmax.f32 %v3489_v13, 0.0 }
 0x21d   :  { %v3930_v19 = vmax.f32 %v3484_v47, 0.0  ;;  %v9007_v11 = vpop.f32.mrb[114].mxu1 }
 0x21e   :  { %v3499_v14 = vadd.f32 %v9007_v11, %v12075_v25  ;;  %v3493_v2 = vpop.f32.mrb[115].mxu1 }
 0x21f   :  { %v3494_v55 = vadd.f32 %v12075_v25, %v3493_v2  ;;  %9196 = vmatprep.mubr.msk.f32.mxu0 %vm4018_vm4, %v3930_v19 }
 0x220   :  { %9197 = vmatmul.mubr.msk.f32.gmra.mrb[112].mxu0 %vm4018_vm4, %v3931_v3  ;;  %v3933_v1 = vmax.f32 %v3499_v14, 0.0 }
 0x221   :  { %v3932_v12 = vmax.f32 %v3494_v55, 0.0  ;;  %v9010_v31 = vpop.f32.mrb[116].mxu1 }
 0x222   :  { %v3509_v58 = vadd.f32 %v9010_v31, %v12075_v25  ;;  %v3503_v43 = vpop.f32.mrb[117].mxu1 }
 0x223   :  { %v3504_v21 = vadd.f32 %v12075_v25, %v3503_v43  ;;  %9199 = vmatprep.mubr.msk.f32.mxu0 %vm4018_vm4, %v3932_v12 }
 0x224   :  { %9200 = vmatmul.mubr.msk.f32.gmra.mrb[114].mxu0 %vm4018_vm4, %v3933_v1  ;;  %v3935_v38 = vmax.f32 %v3509_v58, 0.0 }
 0x225   :  { %v3934_v48 = vmax.f32 %v3504_v21, 0.0  ;;  %v9013_v29 = vpop.f32.mrb[118].mxu1 }
 0x226   :  { %v3519_v35 = vadd.f32 %v9013_v29, %v12075_v25  ;;  %v3513_v61 = vpop.f32.mrb[119].mxu1 }
 0x227   :  { %v3514_v51 = vadd.f32 %v12075_v25, %v3513_v61  ;;  %9202 = vmatprep.mubr.msk.f32.mxu0 %vm4018_vm4, %v3934_v48 }
 0x228   :  { %9203 = vmatmul.mubr.msk.f32.gmra.mrb[116].mxu0 %vm4018_vm4, %v3935_v38  ;;  %v3937_v20 = vmax.f32 %v3519_v35, 0.0 }
 0x229   :  { %v3936_v16 = vmax.f32 %v3514_v51, 0.0  ;;  %v9016_v53 = vpop.f32.mrb[120].mxu1 }
 0x22a   :  { %v3529_v0 = vadd.f32 %v9016_v53, %v12075_v25  ;;  %v3523_v30 = vpop.f32.mrb[121].mxu1 }
 0x22b   :  { %v3524_v8 = vadd.f32 %v12075_v25, %v3523_v30  ;;  %9205 = vmatprep.mubr.msk.f32.mxu0 %vm4018_vm4, %v3936_v16 }
 0x22c   :  { %9206 = vmatmul.mubr.msk.f32.gmra.mrb[118].mxu0 %vm4018_vm4, %v3937_v20  ;;  %v3939_v37 = vmax.f32 %v3529_v0, 0.0 }
 0x22d   :  { %v3938_v36 = vmax.f32 %v3524_v8, 0.0  ;;  %v9019_v50 = vpop.f32.mrb[122].mxu1 }
 0x22e   :  { %v3539_v10 = vadd.f32 %v9019_v50, %v12075_v25  ;;  %v3533_v42 = vpop.f32.mrb[123].mxu1 }
 0x22f   :  { %v3534_v23 = vadd.f32 %v12075_v25, %v3533_v42  ;;  %9208 = vmatprep.mubr.msk.f32.mxu0 %vm4018_vm4, %v3938_v36 }
 0x230   :  { %9209 = vmatmul.mubr.msk.f32.gmra.mrb[120].mxu0 %vm4018_vm4, %v3939_v37  ;;  %v3941_v47 = vmax.f32 %v3539_v10, 0.0 }
 0x231   :  { %v3940_v13 = vmax.f32 %v3534_v23, 0.0  ;;  %v9022_v24 = vpop.f32.mrb[124].mxu1 }
 0x232   :  { %v3549_v19 = vadd.f32 %v9022_v24, %v12075_v25  ;;  %v3543_v11 = vpop.f32.mrb[125].mxu1 }
 0x233   :  { %v3544_v3 = vadd.f32 %v12075_v25, %v3543_v11  ;;  %9211 = vmatprep.mubr.msk.f32.mxu0 %vm4018_vm4, %v3940_v13 }
 0x234   :  { %9212 = vmatmul.mubr.msk.f32.gmra.mrb[122].mxu0 %vm4018_vm4, %v3941_v47  ;;  %v3943_v55 = vmax.f32 %v3549_v19, 0.0 }
 0x235   :  { %v3942_v14 = vmax.f32 %v3544_v3, 0.0 }
 0x236   :  { %v9025_v2 = vpop.f32.mrb[126].mxu1 }
 0x237   :  { %v3559_v12 = vadd.f32 %v9025_v2, %v12075_v25  ;;  %v3553_v31 = vpop.f32.mrb[127].mxu1  ;;  %9214 = vmatprep.mubr.msk.f32.mxu0 %vm4018_vm4, %v3942_v14 }
 0x238   :  { %v3554_v1 = vadd.f32 %v12075_v25, %v3553_v31  ;;  %9215 = vmatmul.mubr.msk.f32.gmra.mrb[124].mxu0 %vm4018_vm4, %v3943_v55 }
 0x239   :  { %v3945_v21 = vmax.f32 %v3559_v12, 0.0 }
 0x23a   :  { %v3944_v58 = vmax.f32 %v3554_v1, 0.0  ;;  %v9028_v43 = vpop.f32.mrb[128].mxu1 }
 0x23b   :  { %v3569_v48 = vadd.f32 %v9028_v43, %v12075_v25  ;;  %v3563_v29 = vpop.f32.mrb[129].mxu1 }
 0x23c   :  { %v3564_v38 = vadd.f32 %v12075_v25, %v3563_v29  ;;  %9217 = vmatprep.mubr.msk.f32.mxu0 %vm4018_vm4, %v3944_v58 }
 0x23d   :  { %9218 = vmatmul.mubr.msk.f32.gmra.mrb[126].mxu0 %vm4018_vm4, %v3945_v21  ;;  %v3947_v51 = vmax.f32 %v3569_v48, 0.0 }
 0x23e   :  { %v3946_v35 = vmax.f32 %v3564_v38, 0.0  ;;  %v9031_v61 = vpop.f32.mrb[130].mxu1 }
 0x23f   :  { %v3579_v16 = vadd.f32 %v9031_v61, %v12075_v25  ;;  %v3573_v53 = vpop.f32.mrb[131].mxu1 }
 0x240   :  { %v3574_v20 = vadd.f32 %v12075_v25, %v3573_v53  ;;  %9220 = vmatprep.mubr.msk.f32.mxu0 %vm4018_vm4, %v3946_v35 }
 0x241   :  { %9221 = vmatmul.mubr.msk.f32.gmra.mrb[128].mxu0 %vm4018_vm4, %v3947_v51  ;;  %v3949_v8 = vmax.f32 %v3579_v16, 0.0 }
 0x242   :  { %v3948_v0 = vmax.f32 %v3574_v20, 0.0  ;;  %v9034_v30 = vpop.f32.mrb[132].mxu1 }
 0x243   :  { %v3589_v36 = vadd.f32 %v9034_v30, %v12075_v25  ;;  %v3583_v50 = vpop.f32.mrb[133].mxu1 }
 0x244   :  { %v3584_v37 = vadd.f32 %v12075_v25, %v3583_v50  ;;  %9223 = vmatprep.mubr.msk.f32.mxu0 %vm4018_vm4, %v3948_v0 }
 0x245   :  { %9224 = vmatmul.mubr.msk.f32.gmra.mrb[130].mxu0 %vm4018_vm4, %v3949_v8  ;;  %v3951_v23 = vmax.f32 %v3589_v36, 0.0 }
 0x246   :  { %v3950_v10 = vmax.f32 %v3584_v37, 0.0  ;;  %v9037_v42 = vpop.f32.mrb[134].mxu1 }
 0x247   :  { %v3599_v13 = vadd.f32 %v9037_v42, %v12075_v25  ;;  %v3593_v24 = vpop.f32.mrb[135].mxu1 }
 0x248   :  { %v3594_v47 = vadd.f32 %v12075_v25, %v3593_v24  ;;  %9226 = vmatprep.mubr.msk.f32.mxu0 %vm4018_vm4, %v3950_v10 }
 0x249   :  { %9227 = vmatmul.mubr.msk.f32.gmra.mrb[132].mxu0 %vm4018_vm4, %v3951_v23  ;;  %v3953_v3 = vmax.f32 %v3599_v13, 0.0 }
 0x24a   :  { %v3952_v19 = vmax.f32 %v3594_v47, 0.0  ;;  %v9040_v11 = vpop.f32.mrb[136].mxu1 }
 0x24b   :  { %v3609_v14 = vadd.f32 %v9040_v11, %v12075_v25  ;;  %v3603_v2 = vpop.f32.mrb[137].mxu1 }
 0x24c   :  { %v3604_v55 = vadd.f32 %v12075_v25, %v3603_v2  ;;  %9229 = vmatprep.mubr.msk.f32.mxu0 %vm4018_vm4, %v3952_v19 }
 0x24d   :  { %9230 = vmatmul.mubr.msk.f32.gmra.mrb[134].mxu0 %vm4018_vm4, %v3953_v3  ;;  %v3955_v1 = vmax.f32 %v3609_v14, 0.0 }
 0x24e   :  { %v3954_v12 = vmax.f32 %v3604_v55, 0.0  ;;  %v9043_v31 = vpop.f32.mrb[138].mxu1 }
 0x24f   :  { %v3619_v58 = vadd.f32 %v9043_v31, %v12075_v25  ;;  %v3613_v43 = vpop.f32.mrb[139].mxu1 }
 0x250   :  { %v3614_v21 = vadd.f32 %v12075_v25, %v3613_v43  ;;  %9232 = vmatprep.mubr.msk.f32.mxu0 %vm4018_vm4, %v3954_v12 }
 0x251   :  { %9233 = vmatmul.mubr.msk.f32.gmra.mrb[136].mxu0 %vm4018_vm4, %v3955_v1  ;;  %v3957_v38 = vmax.f32 %v3619_v58, 0.0 }
 0x252   :  { %v3956_v48 = vmax.f32 %v3614_v21, 0.0  ;;  %v9046_v29 = vpop.f32.mrb[140].mxu1 }
 0x253   :  { %v3629_v35 = vadd.f32 %v9046_v29, %v12075_v25  ;;  %v3623_v61 = vpop.f32.mrb[141].mxu1 }
 0x254   :  { %v3624_v51 = vadd.f32 %v12075_v25, %v3623_v61  ;;  %9235 = vmatprep.mubr.msk.f32.mxu0 %vm4018_vm4, %v3956_v48 }
 0x255   :  { %9236 = vmatmul.mubr.msk.f32.gmra.mrb[138].mxu0 %vm4018_vm4, %v3957_v38  ;;  %v3959_v20 = vmax.f32 %v3629_v35, 0.0 }
 0x256   :  { %v3958_v16 = vmax.f32 %v3624_v51, 0.0  ;;  %v9049_v53 = vpop.f32.mrb[142].mxu1 }
 0x257   :  { %v3639_v0 = vadd.f32 %v9049_v53, %v12075_v25  ;;  %v3633_v30 = vpop.f32.mrb[143].mxu1 }
 0x258   :  { %v3634_v8 = vadd.f32 %v12075_v25, %v3633_v30  ;;  %9238 = vmatprep.mubr.msk.f32.mxu0 %vm4018_vm4, %v3958_v16 }
 0x259   :  { %9239 = vmatmul.mubr.msk.f32.gmra.mrb[140].mxu0 %vm4018_vm4, %v3959_v20  ;;  %v3961_v37 = vmax.f32 %v3639_v0, 0.0 }
 0x25a   :  { %v3960_v36 = vmax.f32 %v3634_v8, 0.0  ;;  %v9052_v50 = vpop.f32.mrb[144].mxu1 }
 0x25b   :  { %v3649_v10 = vadd.f32 %v9052_v50, %v12075_v25  ;;  %v3643_v42 = vpop.f32.mrb[145].mxu1 }
 0x25c   :  { %v3644_v23 = vadd.f32 %v12075_v25, %v3643_v42  ;;  %9241 = vmatprep.mubr.msk.f32.mxu0 %vm4018_vm4, %v3960_v36  ;;  %v6840_v42 = vld [vmem:[%s15428_s2] sm:$0xff] }
 0x25d   :  { %9242 = vmatmul.mubr.msk.f32.gmra.mrb[142].mxu0 %vm4018_vm4, %v3961_v37  ;;  %v3963_v47 = vmax.f32 %v3649_v10, 0.0  ;;  %v6841_v10 = vld [vmem:[%s15428_s2 + $0x8] sm:$0xff] }
 0x25e   :  { %v3962_v13 = vmax.f32 %v3644_v23, 0.0  ;;  %v9055_v24 = vpop.f32.mrb[146].mxu1  ;;  %v6843_v23 = vld [vmem:[%s15428_s2 + $0x18] sm:$0xff] }
 0x25f   :  { %v3659_v19 = vadd.f32 %v9055_v24, %v12075_v25  ;;  %v3653_v11 = vpop.f32.mrb[147].mxu1 }
 0x260   :  { %v3654_v3 = vadd.f32 %v12075_v25, %v3653_v11  ;;  %9244 = vmatprep.mubr.msk.f32.mxu0 %vm4018_vm4, %v3962_v13  ;;  %v6842_v13 = vld [vmem:[%s15428_s2 + $0x10] sm:$0xff]  ;;  %v6844_v11 = vld [vmem:[%s15428_s2 + $0x20] sm:$0xff] }
 0x261   :  { %9245 = vmatmul.mubr.msk.f32.gmra.mrb[144].mxu0 %vm4018_vm4, %v3963_v47  ;;  %v3965_v55 = vmax.f32 %v3659_v19, 0.0  ;;  %v6845_v19 = vld [vmem:[%s15428_s2 + $0x28] sm:$0xff] }
 0x262   :  { %v3964_v14 = vmax.f32 %v3654_v3, 0.0  ;;  %v9058_v2 = vpop.f32.mrb[148].mxu1  ;;  %v6847_v3 = vld [vmem:[%s15428_s2 + $0x38] sm:$0xff] }
 0x263   :  { %v3669_v12 = vadd.f32 %v9058_v2, %v12075_v25  ;;  %v3663_v31 = vpop.f32.mrb[149].mxu1 }
 0x264   :  { %v3664_v1 = vadd.f32 %v12075_v25, %v3663_v31  ;;  %9247 = vmatprep.mubr.msk.f32.mxu0 %vm4018_vm4, %v3964_v14  ;;  %v6849_v31 = vld [vmem:[%s15428_s2 + $0x48] sm:$0xff] }
 0x265   :  { %9248 = vmatmul.mubr.msk.f32.gmra.mrb[146].mxu0 %vm4018_vm4, %v3965_v55  ;;  %v3967_v21 = vmax.f32 %v3669_v12, 0.0  ;;  %v6846_v12 = vld [vmem:[%s15428_s2 + $0x30] sm:$0xff] }
 0x266   :  { %v3966_v58 = vmax.f32 %v3664_v1, 0.0  ;;  %v9061_v43 = vpop.f32.mrb[150].mxu1  ;;  %v6848_v1 = vld [vmem:[%s15428_s2 + $0x40] sm:$0xff] }
 0x267   :  { %v3679_v48 = vadd.f32 %v9061_v43, %v12075_v25  ;;  %v3673_v29 = vpop.f32.mrb[151].mxu1  ;;  %v15709_v43 = vld [vmem:[#allocation2_spill] sm:$0xff] }
 0x268   :  { %v3674_v38 = vadd.f32 %v12075_v25, %v3673_v29  ;;  %9250 = vmatprep.mubr.msk.f32.mxu0 %vm4018_vm4, %v3966_v58 }
 0x269   :  { %9251 = vmatmul.mubr.msk.f32.gmra.mrb[148].mxu0 %vm4018_vm4, %v3967_v21  ;;  %v3969_v51 = vmax.f32 %v3679_v48, 0.0  ;;  %v12464_v21 = vadd.f32 %v6841_v10, %v15709_v43  ;;  %v15710_v48 = vld [vmem:[#allocation3_spill] sm:$0xff]  ;;  %v6852_v10 = vld [vmem:[%s15428_s2 + $0x60] sm:$0xff] }
 0x26a   :  { %v3968_v35 = vmax.f32 %v3674_v38, 0.0  ;;  %v9064_v61 = vpop.f32.mrb[152].mxu1  ;;  %v12467_v29 = vadd.f32 %v6840_v42, %v15710_v48  ;;  %v15711_v38 = vld [vmem:[#allocation4_spill] sm:$0xff]  ;;  %v6904_v42 = vld [vmem:[%s15428_s2 + $0x200] sm:$0xff]  ;;  %v15718_v48 = vld [vmem:[#allocation11_spill] sm:$0xff] }
 0x26b   :  { %v3689_v16 = vadd.f32 %v9064_v61, %v12075_v25  ;;  %v3683_v53 = vpop.f32.mrb[153].mxu1  ;;  %v15712_v61 = vld [vmem:[#allocation5_spill] sm:$0xff] }
 0x26c   :  { %v3684_v20 = vadd.f32 %v12075_v25, %v3683_v53  ;;  %9253 = vmatprep.mubr.msk.f32.mxu0 %vm4018_vm4, %v3968_v35  ;;  %v12470_v35 = vadd.f32 %v6843_v23, %v15711_v38  ;;  %v6905_v53 = vld [vmem:[%s15428_s2 + $0x208] sm:$0xff]  ;;  %v12525_v38 = vadd.f32 %v6848_v1, %v15718_v48 }
 0x26d   :  { %9254 = vmatmul.mubr.msk.f32.gmra.mrb[150].mxu0 %vm4018_vm4, %v3969_v51  ;;  %v3971_v8 = vmax.f32 %v3689_v16, 0.0  ;;  %v12473_v51 = vadd.f32 %v6842_v13, %v15712_v61  ;;  %v6851_v16 = vld [vmem:[%s15428_s2 + $0x58] sm:$0xff]  ;;  %v15719_v61 = vld [vmem:[#allocation12_spill] sm:$0xff] }
 0x26e   :  { %v3970_v0 = vmax.f32 %v3684_v20, 0.0  ;;  %v9067_v30 = vpop.f32.mrb[154].mxu1  ;;  %v15713_v20 = vld [vmem:[#allocation6_spill] sm:$0xff] }
 0x26f   :  { %v3699_v36 = vadd.f32 %v9067_v30, %v12075_v25  ;;  %v3693_v50 = vpop.f32.mrb[155].mxu1  ;;  %v15714_v30 = vld [vmem:[#allocation7_spill] sm:$0xff] }
 0x270   :  { %v3694_v37 = vadd.f32 %v12075_v25, %v3693_v50  ;;  %9256 = vmatprep.mubr.msk.f32.mxu0 %vm4018_vm4, %v3970_v0  ;;  %v12486_v0 = vadd.f32 %v6845_v19, %v15713_v20  ;;  %v15717_v19 = vld [vmem:[#allocation10_spill] sm:$0xff]  ;;  %v12528_v20 = vadd.f32 %v6851_v16, %v15719_v61  ;;  %v15721_v16 = vld [vmem:[#allocation13_spill] sm:$0xff]  ;;  %v15723_v61 = vld [vmem:[#allocation15_spill] sm:$0xff] }
 0x271   :  { %9257 = vmatmul.mubr.msk.f32.gmra.mrb[152].mxu0 %vm4018_vm4, %v3971_v8  ;;  %v3973_v14 = vmax.f32 %v3699_v36, 0.0  ;;  %v12489_v8 = vadd.f32 %v6844_v11, %v15714_v30  ;;  %v15715_v36 = vld [vmem:[#allocation8_spill] sm:$0xff]  ;;  %v12507_v11 = vadd.f32 %v6849_v31, %v15717_v19  ;;  %v6857_v30 = vld [vmem:[%s15428_s2 + $0x88] sm:$0xff]  ;;  %v15722_v19 = vld [vmem:[#allocation14_spill] sm:$0xff]  ;;  %v12551_v9 = vadd.f32 %v6852_v10, %v15723_v61 }
 0x272   :  { %v3972_v24 = vmax.f32 %v3694_v37, 0.0  ;;  %v9070_v47 = vpop.f32.mrb[156].mxu1  ;;  %v12492_v50 = vadd.f32 %v6847_v3, %v15715_v36  ;;  %v6853_v37 = vld [vmem:[%s15428_s2 + $0x68] sm:$0xff]  ;;  %v6855_v3 = vld [vmem:[%s15428_s2 + $0x78] sm:$0xff]  ;;  %v15730_v61 = vld [vmem:[#allocation18_spill] sm:$0xff] }
 0x273   :  { %v3709_v2 = vadd.f32 %v9070_v47, %v12075_v25  ;;  %v3703_v55 = vpop.f32.mrb[157].mxu1  ;;  %v6859_v36 = vld [vmem:[%s15428_s2 + $0x98] sm:$0xff]  ;;  %v12548_v48 = vadd.f32 %v6853_v37, %v15722_v19  ;;  %v15725_v37 = vld [vmem:[#allocation16_spill] sm:$0xff] }
 0x274   :  { %v3704_v58 = vadd.f32 %v12075_v25, %v3703_v55  ;;  %9259 = vmatprep.mubr.msk.f32.mxu0 %vm4018_vm4, %v3972_v24  ;;  %v6850_v25 = vld [vmem:[%s15428_s2 + $0x50] sm:$0xff]  ;;  %v15716_v24 = vld [vmem:[#allocation9_spill] sm:$0xff]  ;;  %v12567_v10 = vadd.f32 %v6855_v3, %v15725_v37  ;;  %v15732_v37 = vld [vmem:[#allocation19_spill] sm:$0xff] }
 0x275   :  { %9260 = vmatmul.mubr.msk.f32.gmra.mrb[154].mxu0 %vm4018_vm4, %v3973_v14  ;;  %v12504_v47 = vadd.f32 %v6846_v12, %v15716_v24  ;;  %v6854_v14 = vld [vmem:[%s15428_s2 + $0x70] sm:$0xff]  ;;  %v6907_v55 = vld [vmem:[%s15428_s2 + $0x218] sm:$0xff]  ;;  %v12521_v12 = vld [vmem:[%s15427_s9] ss:$0 sm:$0xff]  ;;  %v12545_v24 = vadd.f32 %v6850_v25, %v15721_v16 }
 0x276   :  { %v3974_v23 = vmax.f32 %v3704_v58, 0.0  ;;  %v9073_v13 = vpop.f32.mrb[158].mxu1  ;;  %v3975_v58 = vmax.f32 %v3709_v2, 0.0  ;;  %v6856_v2 = vld [vmem:[%s15428_s2 + $0x80] sm:$0xff]  ;;  %v6906_v25 = vld [vmem:[%s15428_s2 + $0x210] sm:$0xff]  ;;  %15726 = vst [vmem:[#allocation4_spill] sm:$0xff] %v12567_v10 }
 0x277   :  { %v3719_v31 = vadd.f32 %v12521_v12, %v9073_v13  ;;  %v3713_v43 = vpop.f32.mrb[159].mxu1  ;;  %v12540_v13 = vadd.f32 %v6905_v53, %v11335_v46  ;;  %v6861_v46 = vld [vmem:[%s15428_s2 + $0xa8] sm:$0xff]  ;;  %v12560_v53 = vadd.f32 %v6904_v42, %v11316_v18  ;;  %v6860_v16 = vld [vmem:[%s15428_s2 + $0xa0] sm:$0xff]  ;;  %v6863_v18 = vld [vmem:[%s15428_s2 + $0xb8] sm:$0xff]  ;;  %v12579_v42 = vadd.f32 %v6907_v55, %v11383_v49 }
 0x278   :  { %v3714_v1 = vadd.f32 %v12521_v12, %v3713_v43  ;;  %9262 = vmatprep.mubr.msk.f32.mxu0 %vm4018_vm4, %v3974_v23  ;;  %v15727_v23 = vld [vmem:[#allocation17_spill] sm:$0xff]  ;;  %v6865_v49 = vld [vmem:[%s15428_s2 + $0xc8] sm:$0xff]  ;;  %v6908_v55 = vld [vmem:[%s15428_s2 + $0x220] sm:$0xff]  ;;  %v12627_v59 = vadd.f32 %v6863_v18, %v15743_v22 }
 0x279   :  { %15720 = vst [vmem:[#allocation2_spill] sm:$0xff] %v12540_v13  ;;  %15724 = vst [vmem:[#allocation3_spill] sm:$0xff] %v12560_v53  ;;  %9263 = vmatmul.mubr.msk.f32.gmra.mrb[156].mxu0 %vm4018_vm4, %v3975_v58  ;;  %v12570_v43 = vadd.f32 %v6854_v14, %v15727_v23  ;;  %v6909_v58 = vld [vmem:[%s15428_s2 + $0x228] sm:$0xff]  ;;  %v12585_v14 = vadd.f32 %v6857_v30, %v15730_v61  ;;  %v12588_v23 = vadd.f32 %v6856_v2, %v15732_v37  ;;  %v15734_v61 = vld [vmem:[#allocation20_spill] sm:$0xff] }
 0x27a   :  { %15729 = vst [vmem:[#allocation6_spill] sm:$0xff] %v12579_v42  ;;  %v3976_v3 = vmax.f32 %v3714_v1, 0.0  ;;  %v9076_v19 = vpop.f32.mrb[160].mxu1  ;;  %v3977_v1 = vmax.f32 %v3719_v31, 0.0  ;;  %v12601_v57 = vadd.f32 %v6859_v36, %v15734_v61  ;;  %v15736_v2 = vld [vmem:[#allocation21_spill] sm:$0xff]  ;;  %v6866_v31 = vld [vmem:[%s15428_s2 + $0xd0] sm:$0xff] }
 0x27b   :  { %15728 = vst [vmem:[#allocation5_spill] sm:$0xff] %v12570_v43  ;;  %15731 = vst [vmem:[#allocation7_spill] sm:$0xff] %v12585_v14  ;;  %v3729_v17 = vadd.f32 %v12521_v12, %v9076_v19  ;;  %v3723_v30 = vpop.f32.mrb[161].mxu1  ;;  %v12604_v37 = vadd.f32 %v6858_v26, %v15736_v2  ;;  %v12616_v19 = vadd.f32 %v6906_v25, %v11363_v4  ;;  %v15739_v26 = vld [vmem:[#allocation22_spill] sm:$0xff]  ;;  %v15741_v2 = vld [vmem:[#allocation23_spill] sm:$0xff] }
 0x27c   :  { %15733 = vst [vmem:[#allocation8_spill] sm:$0xff] %v12588_v23  ;;  %15735 = vst [vmem:[#allocation9_spill] sm:$0xff] %v12601_v57  ;;  %v3724_v36 = vadd.f32 %v12521_v12, %v3723_v30  ;;  %9265 = vmatprep.mubr.msk.f32.mxu0 %vm4018_vm4, %v3976_v3  ;;  %v12621_v61 = vadd.f32 %v6861_v46, %v15739_v26  ;;  %v12624_v63 = vadd.f32 %v6860_v16, %v15741_v2  ;;  %v6869_v42 = vld [vmem:[%s15428_s2 + $0xe8] sm:$0xff]  ;;  %v6868_v4 = vld [vmem:[%s15428_s2 + $0xe0] sm:$0xff] }
 0x27d   :  { %15737 = vst [vmem:[#allocation10_spill] sm:$0xff] %v12604_v37  ;;  %15738 = vst [vmem:[#allocation11_spill] sm:$0xff] %v12616_v19  ;;  %v12636_v25 = vadd.f32 %v6909_v58, %v11432_v41  ;;  %v6911_v46 = vld [vmem:[%s15428_s2 + $0x238] sm:$0xff]  ;;  %9266 = vmatmul.mubr.msk.f32.gmra.mrb[158].mxu0 %vm4018_vm4, %v3977_v1  ;;  %v15748_v18 = vld [vmem:[#allocation26_spill] sm:$0xff]  ;;  %v12655_v58 = vadd.f32 %v6908_v55, %v11403_v15 }
 0x27e   :  { %15740 = vst [vmem:[#allocation12_spill] sm:$0xff] %v12621_v61  ;;  %15742 = vst [vmem:[#allocation13_spill] sm:$0xff] %v12624_v63  ;;  %v15746_v16 = vld [vmem:[#allocation25_spill] sm:$0xff]  ;;  %v12646_v3 = vadd.f32 %v6865_v49, %v15748_v18  ;;  %v6870_v41 = vld [vmem:[%s15428_s2 + $0xf0] sm:$0xff]  ;;  %v9079_v26 = vpop.f32.mrb[162].mxu1 }
 0x27f   :  { %15744 = vst [vmem:[#allocation14_spill] sm:$0xff] %v12627_v59  ;;  %15745 = vst [vmem:[#allocation15_spill] sm:$0xff] %v12636_v25  ;;  %v12643_v22 = vadd.f32 %v6862_v56, %v15746_v16  ;;  %v6871_v30 = vld [vmem:[%s15428_s2 + $0xf8] sm:$0xff]  ;;  %v6910_v1 = vld [vmem:[%s15428_s2 + $0x230] sm:$0xff]  ;;  %v3978_v56 = vmax.f32 %v3724_v36, 0.0  ;;  %v3979_v36 = vmax.f32 %v3729_v17, 0.0 }
 0x280   :  { %15749 = vst [vmem:[#allocation17_spill] sm:$0xff] %v12646_v3  ;;  %15750 = vst [vmem:[#allocation18_spill] sm:$0xff] %v12655_v58  ;;  %v15751_v2 = vld [vmem:[#allocation27_spill] sm:$0xff]  ;;  %v15753_v16 = vld [vmem:[#allocation28_spill] sm:$0xff]  ;;  %v3739_v58 = vadd.f32 %v12521_v12, %v9079_v26 }
 0x281   :  { %15747 = vst [vmem:[#allocation16_spill] sm:$0xff] %v12643_v22  ;;  %v12661_v49 = vadd.f32 %v6864_v60, %v15751_v2  ;;  %v12664_v18 = vadd.f32 %v6867_v34, %v15753_v16  ;;  %v6873_v25 = vld [vmem:[%s15428_s2 + $0x108] sm:$0xff]  ;;  %v6872_v15 = vld [vmem:[%s15428_s2 + $0x100] sm:$0xff]  ;;  %v3733_v60 = vpop.f32.mrb[163].mxu1  ;;  %v15755_v2 = vld [vmem:[#allocation29_spill] sm:$0xff]  ;;  %9268 = vmatprep.mubr.msk.f32.mxu0 %vm4018_vm4, %v3978_v56 }
 0x282   :  { %v6913_v55 = vld [vmem:[%s15428_s2 + $0x248] sm:$0xff]  ;;  %v12677_v19 = vadd.f32 %v6866_v31, %v15755_v2  ;;  %v15757_v34 = vld [vmem:[#allocation30_spill] sm:$0xff]  ;;  %v6875_v13 = vld [vmem:[%s15428_s2 + $0x118] sm:$0xff]  ;;  %v3734_v31 = vadd.f32 %v12521_v12, %v3733_v60  ;;  %9269 = vmatmul.mubr.msk.f32.gmra.mrb[160].mxu0 %vm4018_vm4, %v3979_v36 }
 0x283   :  { %15752 = vst [vmem:[#allocation19_spill] sm:$0xff] %v12661_v49  ;;  %15754 = vst [vmem:[#allocation20_spill] sm:$0xff] %v12664_v18  ;;  %v12680_v16 = vadd.f32 %v6869_v42, %v15757_v34  ;;  %v6874_v53 = vld [vmem:[%s15428_s2 + $0x110] sm:$0xff]  ;;  %v6877_v17 = vld [vmem:[%s15428_s2 + $0x128] sm:$0xff] }
 0x284   :  { %15756 = vst [vmem:[#allocation21_spill] sm:$0xff] %v12677_v19  ;;  %v15759_v26 = vld [vmem:[#allocation95_spill] sm:$0xff]  ;;  %v15763_v34 = vld [vmem:[#allocation33_spill] sm:$0xff]  ;;  %v15765_v19 = vld [vmem:[#allocation34_spill] sm:$0xff] }
 0x285   :  { %15758 = vst [vmem:[#allocation22_spill] sm:$0xff] %v12680_v16  ;;  %v12692_v18 = vadd.f32 %v6911_v46, %v15759_v26  ;;  %v15761_v42 = vld [vmem:[#allocation31_spill] sm:$0xff]  ;;  %v12700_v16 = vadd.f32 %v6871_v30, %v15763_v34  ;;  %v12703_v3 = vadd.f32 %v6870_v41, %v15765_v19  ;;  %v6876_v49 = vld [vmem:[%s15428_s2 + $0x120] sm:$0xff]  ;;  %v6879_v46 = vld [vmem:[%s15428_s2 + $0x138] sm:$0xff]  ;;  %v12731_v34 = vadd.f32 %v6913_v55, %v11515_v32 }
 0x286   :  { %v12697_v2 = vadd.f32 %v6868_v4, %v15761_v42  ;;  %v15767_v60 = vld [vmem:[#allocation94_spill] sm:$0xff]  ;;  %v15769_v30 = vld [vmem:[#allocation37_spill] sm:$0xff]  ;;  %v6878_v42 = vld [vmem:[%s15428_s2 + $0x130] sm:$0xff] }
 0x287   :  { %15760 = vst [vmem:[#allocation23_spill] sm:$0xff] %v12692_v18  ;;  %15764 = vst [vmem:[#allocation25_spill] sm:$0xff] %v12700_v16  ;;  %v12712_v26 = vadd.f32 %v6910_v1, %v15767_v60  ;;  %v6912_v4 = vld [vmem:[%s15428_s2 + $0x240] sm:$0xff]  ;;  %v12719_v19 = vadd.f32 %v6873_v25, %v15769_v30  ;;  %v6881_v1 = vld [vmem:[%s15428_s2 + $0x148] sm:$0xff]  ;;  %v3980_v25 = vmax.f32 %v3734_v31, 0.0  ;;  %v9082_v60 = vpop.f32.mrb[164].mxu1 }
 0x288   :  { %15762 = vst [vmem:[#allocation24_spill] sm:$0xff] %v12697_v2  ;;  %15766 = vst [vmem:[#allocation26_spill] sm:$0xff] %v12703_v3  ;;  %v15771_v41 = vld [vmem:[#allocation38_spill] sm:$0xff]  ;;  %v6915_v36 = vld [vmem:[%s15428_s2 + $0x258] sm:$0xff]  ;;  %v3981_v31 = vmax.f32 %v3739_v58, 0.0 }
 0x289   :  { %15768 = vst [vmem:[#allocation27_spill] sm:$0xff] %v12712_v26  ;;  %15770 = vst [vmem:[#allocation28_spill] sm:$0xff] %v12719_v19  ;;  %v12722_v56 = vadd.f32 %v6872_v15, %v15771_v41  ;;  %v15774_v30 = vld [vmem:[#allocation41_spill] sm:$0xff]  ;;  %v15776_v41 = vld [vmem:[#allocation42_spill] sm:$0xff]  ;;  %9271 = vmatprep.mubr.msk.f32.mxu0 %vm4018_vm4, %v3980_v25 }
 0x28a   :  { %15773 = vst [vmem:[#allocation30_spill] sm:$0xff] %v12731_v34  ;;  %v12737_v15 = vadd.f32 %v6875_v13, %v15774_v30  ;;  %v12740_v18 = vadd.f32 %v6874_v53, %v15776_v41  ;;  %v6880_v26 = vld [vmem:[%s15428_s2 + $0x140] sm:$0xff]  ;;  %v6883_v32 = vld [vmem:[%s15428_s2 + $0x158] sm:$0xff]  ;;  %v6914_v55 = vld [vmem:[%s15428_s2 + $0x250] sm:$0xff]  ;;  %v3749_v34 = vadd.f32 %v12521_v12, %v9082_v60  ;;  %v3743_v13 = vpop.f32.mrb[165].mxu1  ;;  %9272 = vmatmul.mubr.msk.f32.gmra.mrb[162].mxu0 %vm4018_vm4, %v3981_v31 }
 0x28b   :  { %15772 = vst [vmem:[#allocation29_spill] sm:$0xff] %v12722_v56  ;;  %v15778_v30 = vld [vmem:[#allocation45_spill] sm:$0xff]  ;;  %v15780_v53 = vld [vmem:[#allocation46_spill] sm:$0xff]  ;;  %v6885_v19 = vld [vmem:[%s15428_s2 + $0x168] sm:$0xff] }
 0x28c   :  { %15775 = vst [vmem:[#allocation95_spill] sm:$0xff] %v12737_v15  ;;  %15777 = vst [vmem:[#allocation31_spill] sm:$0xff] %v12740_v18  ;;  %v12753_v15 = vadd.f32 %v6877_v17, %v15778_v30  ;;  %v12756_v41 = vadd.f32 %v6876_v49, %v15780_v53  ;;  %v6882_v18 = vld [vmem:[%s15428_s2 + $0x150] sm:$0xff]  ;;  %v6884_v58 = vld [vmem:[%s15428_s2 + $0x160] sm:$0xff]  ;;  %v3744_v17 = vadd.f32 %v12521_v12, %v3743_v13 }
 0x28d   :  { %v15782_v60 = vld [vmem:[#allocation96_spill] sm:$0xff]  ;;  %v15784_v49 = vld [vmem:[#allocation49_spill] sm:$0xff]  ;;  %v15786_v53 = vld [vmem:[#allocation50_spill] sm:$0xff]  ;;  %v12788_v13 = vadd.f32 %v6915_v36, %v11544_v54  ;;  %v12807_v36 = vadd.f32 %v6914_v55, %v11524_v62 }
 0x28e   :  { %15779 = vst [vmem:[#allocation33_spill] sm:$0xff] %v12753_v15  ;;  %15781 = vst [vmem:[#allocation34_spill] sm:$0xff] %v12756_v41  ;;  %v12768_v56 = vadd.f32 %v6912_v4, %v15782_v60  ;;  %v12773_v30 = vadd.f32 %v6879_v46, %v15784_v49  ;;  %v12776_v15 = vadd.f32 %v6878_v42, %v15786_v53  ;;  %v15788_v41 = vld [vmem:[#allocation53_spill] sm:$0xff]  ;;  %v6886_v4 = vld [vmem:[%s15428_s2 + $0x170] sm:$0xff]  ;;  %v9085_v49 = vpop.f32.mrb[166].mxu1 }
 0x28f   :  { %v12779_v16 = vadd.f32 %v6881_v1, %v15788_v41  ;;  %v6887_v3 = vld [vmem:[%s15428_s2 + $0x178] sm:$0xff]  ;;  %15790 = vst [vmem:[#allocation42_spill] sm:$0xff] %v12788_v13  ;;  %v6917_v46 = vld [vmem:[%s15428_s2 + $0x268] sm:$0xff]  ;;  %v15791_v42 = vld [vmem:[#allocation54_spill] sm:$0xff] }
 0x290   :  { %15783 = vst [vmem:[#allocation94_spill] sm:$0xff] %v12768_v56  ;;  %15785 = vst [vmem:[#allocation37_spill] sm:$0xff] %v12773_v30  ;;  %v12795_v1 = vadd.f32 %v6880_v26, %v15791_v42  ;;  %v15793_v25 = vld [vmem:[#allocation57_spill] sm:$0xff]  ;;  %v6889_v60 = vld [vmem:[%s15428_s2 + $0x188] sm:$0xff]  ;;  %v3982_v26 = vmax.f32 %v3744_v17, 0.0  ;;  %v3983_v17 = vmax.f32 %v3749_v34, 0.0 }
 0x291   :  { %15787 = vst [vmem:[#allocation38_spill] sm:$0xff] %v12776_v15  ;;  %15789 = vst [vmem:[#allocation41_spill] sm:$0xff] %v12779_v16  ;;  %v12798_v41 = vadd.f32 %v6883_v32, %v15793_v25  ;;  %v6888_v54 = vld [vmem:[%s15428_s2 + $0x180] sm:$0xff]  ;;  %v15798_v42 = vld [vmem:[#allocation61_spill] sm:$0xff] }
 0x292   :  { %15792 = vst [vmem:[#allocation45_spill] sm:$0xff] %v12795_v1  ;;  %15795 = vst [vmem:[#allocation96_spill] sm:$0xff] %v12807_v36  ;;  %v6916_v31 = vld [vmem:[%s15428_s2 + $0x260] sm:$0xff]  ;;  %v12816_v25 = vadd.f32 %v6885_v19, %v15798_v42  ;;  %v6891_v13 = vld [vmem:[%s15428_s2 + $0x198] sm:$0xff]  ;;  %v3759_v36 = vadd.f32 %v12521_v12, %v9085_v49  ;;  %9274 = vmatprep.mubr.msk.f32.mxu0 %vm4018_vm4, %v3982_v26 }
 0x293   :  { %15794 = vst [vmem:[#allocation46_spill] sm:$0xff] %v12798_v41  ;;  %v15796_v53 = vld [vmem:[#allocation58_spill] sm:$0xff]  ;;  %v6890_v62 = vld [vmem:[%s15428_s2 + $0x190] sm:$0xff]  ;;  %v6919_v55 = vld [vmem:[%s15428_s2 + $0x278] sm:$0xff]  ;;  %9275 = vmatmul.mubr.msk.f32.gmra.mrb[164].mxu0 %vm4018_vm4, %v3983_v17 }
 0x294   :  { %v12813_v32 = vadd.f32 %v6882_v18, %v15796_v53  ;;  %15799 = vst [vmem:[#allocation50_spill] sm:$0xff] %v12816_v25  ;;  %v3753_v18 = vpop.f32.mrb[167].mxu1  ;;  %v15800_v53 = vld [vmem:[#allocation62_spill] sm:$0xff]  ;;  %v15802_v19 = vld [vmem:[#allocation65_spill] sm:$0xff]  ;;  %v6893_v25 = vld [vmem:[%s15428_s2 + $0x1a8] sm:$0xff] }
 0x295   :  { %v12829_v56 = vadd.f32 %v6884_v58, %v15800_v53  ;;  %v12832_v42 = vadd.f32 %v6887_v3, %v15802_v19  ;;  %v6892_v41 = vld [vmem:[%s15428_s2 + $0x1a0] sm:$0xff]  ;;  %v6895_v34 = vld [vmem:[%s15428_s2 + $0x1b8] sm:$0xff]  ;;  %v3754_v58 = vadd.f32 %v12521_v12, %v3753_v18  ;;  %v6894_v1 = vld [vmem:[%s15428_s2 + $0x1b0] sm:$0xff] }
 0x296   :  { %15797 = vst [vmem:[#allocation49_spill] sm:$0xff] %v12813_v32  ;;  %v15804_v49 = vld [vmem:[#allocation98_spill] sm:$0xff]  ;;  %v15808_v19 = vld [vmem:[#allocation69_spill] sm:$0xff]  ;;  %v6921_v17 = vld [vmem:[%s15428_s2 + $0x288] sm:$0xff] }
 0x297   :  { %15801 = vst [vmem:[#allocation53_spill] sm:$0xff] %v12829_v56  ;;  %15803 = vst [vmem:[#allocation54_spill] sm:$0xff] %v12832_v42  ;;  %v12844_v32 = vadd.f32 %v6917_v46, %v15804_v49  ;;  %v15806_v3 = vld [vmem:[#allocation66_spill] sm:$0xff]  ;;  %v12852_v42 = vadd.f32 %v6889_v60, %v15808_v19  ;;  %v6897_v46 = vld [vmem:[%s15428_s2 + $0x1c8] sm:$0xff]  ;;  %v12883_v19 = vadd.f32 %v6919_v55, %v11600_v33 }
 0x298   :  { %v12849_v53 = vadd.f32 %v6886_v4, %v15806_v3  ;;  %v15810_v56 = vld [vmem:[#allocation70_spill] sm:$0xff]  ;;  %v15812_v18 = vld [vmem:[#allocation97_spill] sm:$0xff]  ;;  %v6918_v4 = vld [vmem:[%s15428_s2 + $0x270] sm:$0xff] }
 0x299   :  { %15805 = vst [vmem:[#allocation57_spill] sm:$0xff] %v12844_v32  ;;  %15809 = vst [vmem:[#allocation61_spill] sm:$0xff] %v12852_v42  ;;  %v12855_v16 = vadd.f32 %v6888_v54, %v15810_v56  ;;  %v12864_v49 = vadd.f32 %v6916_v31, %v15812_v18  ;;  %v15814_v60 = vld [vmem:[#allocation73_spill] sm:$0xff]  ;;  %v15816_v54 = vld [vmem:[#allocation74_spill] sm:$0xff]  ;;  %v9088_v18 = vpop.f32.mrb[168].mxu1 }
 0x29a   :  { %15807 = vst [vmem:[#allocation58_spill] sm:$0xff] %v12849_v53  ;;  %v12871_v56 = vadd.f32 %v6891_v13, %v15814_v60  ;;  %v12874_v26 = vadd.f32 %v6890_v62, %v15816_v54  ;;  %v6896_v3 = vld [vmem:[%s15428_s2 + $0x1c0] sm:$0xff]  ;;  %v6899_v31 = vld [vmem:[%s15428_s2 + $0x1d8] sm:$0xff]  ;;  %15818 = vst [vmem:[#allocation69_spill] sm:$0xff] %v12883_v19  ;;  %v3984_v13 = vmax.f32 %v3754_v58, 0.0  ;;  %v3985_v58 = vmax.f32 %v3759_v36, 0.0 }
 0x29b   :  { %15811 = vst [vmem:[#allocation62_spill] sm:$0xff] %v12855_v16  ;;  %15813 = vst [vmem:[#allocation65_spill] sm:$0xff] %v12864_v49  ;;  %v15819_v60 = vld [vmem:[#allocation77_spill] sm:$0xff]  ;;  %v15821_v54 = vld [vmem:[#allocation78_spill] sm:$0xff]  ;;  %v3769_v19 = vadd.f32 %v12521_v12, %v9088_v18 }
 0x29c   :  { %15815 = vst [vmem:[#allocation98_spill] sm:$0xff] %v12871_v56  ;;  %15817 = vst [vmem:[#allocation66_spill] sm:$0xff] %v12874_v26  ;;  %v12889_v62 = vadd.f32 %v6893_v25, %v15819_v60  ;;  %v12892_v32 = vadd.f32 %v6892_v41, %v15821_v54  ;;  %v6898_v49 = vld [vmem:[%s15428_s2 + $0x1d0] sm:$0xff]  ;;  %v6901_v33 = vld [vmem:[%s15428_s2 + $0x1e8] sm:$0xff]  ;;  %v3763_v25 = vpop.f32.mrb[169].mxu1  ;;  %9277 = vmatprep.mubr.msk.f32.mxu0 %vm4018_vm4, %v3984_v13 }
 0x29d   :  { %v6920_v55 = vld [vmem:[%s15428_s2 + $0x280] sm:$0xff]  ;;  %v15823_v60 = vld [vmem:[#allocation81_spill] sm:$0xff]  ;;  %v15827_v26 = vld [vmem:[#allocation99_spill] sm:$0xff]  ;;  %9278 = vmatmul.mubr.msk.f32.gmra.mrb[166].mxu0 %vm4018_vm4, %v3985_v58 }
 0x29e   :  { %15820 = vst [vmem:[#allocation70_spill] sm:$0xff] %v12889_v62  ;;  %15822 = vst [vmem:[#allocation97_spill] sm:$0xff] %v12892_v32  ;;  %v12905_v62 = vadd.f32 %v6895_v34, %v15823_v60  ;;  %v15825_v41 = vld [vmem:[#allocation82_spill] sm:$0xff]  ;;  %v6903_v56 = vld [vmem:[%s15428_s2 + $0x1f8] sm:$0xff]  ;;  %v12917_v42 = vadd.f32 %v6918_v4, %v15827_v26  ;;  %v3764_v34 = vadd.f32 %v12521_v12, %v3763_v25 }
 0x29f   :  { %v12908_v54 = vadd.f32 %v6894_v1, %v15825_v41  ;;  %v6900_v32 = vld [vmem:[%s15428_s2 + $0x1e0] sm:$0xff]  ;;  %v6902_v36 = vld [vmem:[%s15428_s2 + $0x1f0] sm:$0xff]  ;;  %v15829_v1 = vld [vmem:[#allocation85_spill] sm:$0xff]  ;;  %v12934_v4 = vadd.f32 %v6921_v17, %v11614_v28  ;;  %v12953_v17 = vadd.f32 %v6920_v55, %v11607_v40 }
 0x2a0   :  { %15824 = vst [vmem:[#allocation73_spill] sm:$0xff] %v12905_v62  ;;  %15828 = vst [vmem:[#allocation77_spill] sm:$0xff] %v12917_v42  ;;  %v12925_v18 = vadd.f32 %v6897_v46, %v15829_v1  ;;  %v15831_v60 = vld [vmem:[#allocation86_spill] sm:$0xff]  ;;  %v15833_v62 = vld [vmem:[#allocation87_spill] sm:$0xff] }
 0x2a1   :  { %15826 = vst [vmem:[#allocation74_spill] sm:$0xff] %v12908_v54  ;;  %v12928_v41 = vadd.f32 %v6896_v3, %v15831_v60  ;;  %v12931_v54 = vadd.f32 %v6899_v31, %v15833_v62  ;;  %15835 = vst [vmem:[#allocation99_spill] sm:$0xff] %v12934_v4  ;;  %v6923_v26 = vld [vmem:[%s15428_s2 + $0x298] sm:$0xff]  ;;  %v6922_v13 = vld [vmem:[%s15428_s2 + $0x290] sm:$0xff]  ;;  %v9091_v60 = vpop.f32.mrb[170].mxu1 }
 0x2a2   :  { %15830 = vst [vmem:[#allocation78_spill] sm:$0xff] %v12925_v18  ;;  %v6925_v46 = vld [vmem:[%s15428_s2 + $0x2a8] sm:$0xff]  ;;  %v15836_v3 = vld [vmem:[#allocation88_spill] sm:$0xff]  ;;  %v15838_v62 = vld [vmem:[#allocation90_spill] sm:$0xff]  ;;  %v3779_v42 = vadd.f32 %v12521_v12, %v9091_v60 }
 0x2a3   :  { %15832 = vst [vmem:[#allocation81_spill] sm:$0xff] %v12928_v41  ;;  %15834 = vst [vmem:[#allocation82_spill] sm:$0xff] %v12931_v54  ;;  %v12947_v31 = vadd.f32 %v6898_v49, %v15836_v3  ;;  %v12950_v28 = vadd.f32 %v6901_v33, %v15838_v62  ;;  %v6924_v25 = vld [vmem:[%s15428_s2 + $0x2a0] sm:$0xff]  ;;  %v6927_v1 = vld [vmem:[%s15428_s2 + $0x2b8] sm:$0xff]  ;;  %v3986_v49 = vmax.f32 %v3764_v34, 0.0  ;;  %v3987_v34 = vmax.f32 %v3769_v19, 0.0 }
 0x2a4   :  { %15840 = vst [vmem:[#allocation87_spill] sm:$0xff] %v12953_v17  ;;  %v6926_v58 = vld [vmem:[%s15428_s2 + $0x2b0] sm:$0xff]  ;;  %v15841_v3 = vld [vmem:[#allocation91_spill] sm:$0xff]  ;;  %v6928_v4 = vld [vmem:[%s15428_s2 + $0x2c0] sm:$0xff] }
 0x2a5   :  { %15837 = vst [vmem:[#allocation85_spill] sm:$0xff] %v12947_v31  ;;  %15839 = vst [vmem:[#allocation86_spill] sm:$0xff] %v12950_v28  ;;  %v12965_v33 = vadd.f32 %v6900_v32, %v15841_v3  ;;  %v15843_v62 = vld [vmem:[#allocation92_spill] sm:$0xff]  ;;  %v6929_v55 = vld [vmem:[%s15428_s2 + $0x2c8] sm:$0xff]  ;;  %v3773_v32 = vpop.f32.mrb[171].mxu1  ;;  %9280 = vmatprep.mubr.msk.f32.mxu0 %vm4018_vm4, %v3986_v49 }
 0x2a6   :  { %v12968_v40 = vadd.f32 %v6903_v56, %v15843_v62  ;;  %v6931_v17 = vld [vmem:[%s15428_s2 + $0x2d8] sm:$0xff]  ;;  %v6930_v54 = vld [vmem:[%s15428_s2 + $0x2d0] sm:$0xff]  ;;  %v6933_v19 = vld [vmem:[%s15428_s2 + $0x2e8] sm:$0xff]  ;;  %9281 = vmatmul.mubr.msk.f32.gmra.mrb[168].mxu0 %vm4018_vm4, %v3987_v34 }
 0x2a7   :  { %15842 = vst [vmem:[#allocation88_spill] sm:$0xff] %v12965_v33  ;;  %v15845_v3 = vld [vmem:[#allocation93_spill] sm:$0xff]  ;;  %v6932_v60 = vld [vmem:[%s15428_s2 + $0x2e0] sm:$0xff]  ;;  %v6934_v49 = vld [vmem:[%s15428_s2 + $0x2f0] sm:$0xff] }
 0x2a8   :  { %15844 = vst [vmem:[#allocation90_spill] sm:$0xff] %v12968_v40  ;;  %v12981_v28 = vadd.f32 %v6902_v36, %v15845_v3  ;;  %v15847_v56 = vld [vmem:[#allocation101_spill] sm:$0xff]  ;;  %v15849_v40 = vld [vmem:[#allocation100_spill] sm:$0xff]  ;;  %v3774_v36 = vadd.f32 %v12521_v12, %v3773_v32 }
 0x2a9   :  { %v12984_v62 = vadd.f32 %v6923_v26, %v15847_v56  ;;  %v12987_v33 = vadd.f32 %v6922_v13, %v15849_v40  ;;  %v15851_v26 = vld [vmem:[#allocation102_spill] sm:$0xff]  ;;  %v15853_v13 = vld [vmem:[#allocation103_spill] sm:$0xff]  ;;  %v15855_v56 = vld [vmem:[#allocation32_spill] sm:$0xff] }
 0x2aa   :  { %15846 = vst [vmem:[#allocation91_spill] sm:$0xff] %v12981_v28  ;;  %v13001_v3 = vadd.f32 %v6925_v46, %v15851_v26  ;;  %v13004_v40 = vadd.f32 %v6924_v25, %v15853_v13  ;;  %v6935_v31 = vld [vmem:[%s15428_s2 + $0x2f8] sm:$0xff]  ;;  %v6937_v46 = vld [vmem:[%s15428_s2 + $0x308] sm:$0xff]  ;;  %v15861_v32 = vld [vmem:[#allocation36_spill] sm:$0xff] }
 0x2ab   :  { %15848 = vst [vmem:[#allocation92_spill] sm:$0xff] %v12984_v62  ;;  %15850 = vst [vmem:[#allocation93_spill] sm:$0xff] %v12987_v33  ;;  %v13007_v62 = vadd.f32 %v6927_v1, %v15855_v56  ;;  %v15857_v33 = vld [vmem:[#allocation104_spill] sm:$0xff]  ;;  %v15859_v25 = vld [vmem:[#allocation35_spill] sm:$0xff] }
 0x2ac   :  { %15852 = vst [vmem:[#allocation101_spill] sm:$0xff] %v13001_v3  ;;  %15854 = vst [vmem:[#allocation100_spill] sm:$0xff] %v13004_v40  ;;  %v13010_v28 = vadd.f32 %v6926_v58, %v15857_v33  ;;  %v13023_v1 = vadd.f32 %v6929_v55, %v15859_v25  ;;  %v13026_v58 = vadd.f32 %v6928_v4, %v15861_v32  ;;  %v15863_v33 = vld [vmem:[#allocation39_spill] sm:$0xff]  ;;  %v6936_v13 = vld [vmem:[%s15428_s2 + $0x300] sm:$0xff]  ;;  %v9126_v40 = vpop.f32.mrb[64].mxu0 }
 0x2ad   :  { %15856 = vst [vmem:[#allocation102_spill] sm:$0xff] %v13007_v62  ;;  %v13029_v26 = vadd.f32 %v6931_v17, %v15863_v33  ;;  %v6939_v56 = vld [vmem:[%s15428_s2 + $0x318] sm:$0xff]  ;;  %v3988_v62 = vmax.f32 %v3774_v36, 0.0  ;;  %v13040_v55 = vld [vmem:[%s15429_s11] ss:$0 sm:$0xff]  ;;  %v15865_v4 = vld [vmem:[#allocation40_spill] sm:$0xff] }
 0x2ae   :  { %15858 = vst [vmem:[#allocation103_spill] sm:$0xff] %v13010_v28  ;;  %15860 = vst [vmem:[#allocation32_spill] sm:$0xff] %v13023_v1  ;;  %v9094_v28 = vpop.f32.mrb[172].mxu1  ;;  %v13043_v34 = vadd.f32 %v6930_v54, %v15865_v4  ;;  %v15867_v17 = vld [vmem:[#allocation43_spill] sm:$0xff]  ;;  %v6938_v32 = vld [vmem:[%s15428_s2 + $0x310] sm:$0xff]  ;;  %v3989_v33 = vmax.f32 %v3779_v42, 0.0 }
 0x2af   :  { %15862 = vst [vmem:[#allocation104_spill] sm:$0xff] %v13026_v58  ;;  %15864 = vst [vmem:[#allocation35_spill] sm:$0xff] %v13029_v26  ;;  %v13046_v25 = vadd.f32 %v6933_v19, %v15867_v17  ;;  %v6941_v36 = vld [vmem:[%s15428_s2 + $0x328] sm:$0xff]  ;;  %v3789_v26 = vadd.f32 %v12521_v12, %v9094_v28  ;;  %v3783_v1 = vpop.f32.mrb[173].mxu1  ;;  %v15869_v58 = vld [vmem:[#allocation44_spill] sm:$0xff]  ;;  %9283 = vmatprep.mubr.msk.f32.mxu0 %vm4018_vm4, %v3988_v62  ;;  %v4473_v62 = vpop.f32.mrb[65].mxu0 }
 0x2b0   :  { %15866 = vst [vmem:[#allocation36_spill] sm:$0xff] %v13043_v34  ;;  %v13056_v3 = vadd.f32 %v6932_v60, %v15869_v58  ;;  %v15871_v54 = vld [vmem:[#allocation47_spill] sm:$0xff]  ;;  %v15873_v19 = vld [vmem:[#allocation48_spill] sm:$0xff]  ;;  %v3784_v34 = vadd.f32 %v12521_v12, %v3783_v1  ;;  %9284 = vmatmul.mubr.msk.f32.gmra.mrb[170].mxu0 %vm4018_vm4, %v3989_v33 }
 0x2b1   :  { %15868 = vst [vmem:[#allocation39_spill] sm:$0xff] %v13046_v25  ;;  %v13059_v4 = vadd.f32 %v6935_v31, %v15871_v54  ;;  %v13062_v17 = vadd.f32 %v6934_v49, %v15873_v19  ;;  %v6940_v25 = vld [vmem:[%s15428_s2 + $0x320] sm:$0xff]  ;;  %v15875_v42 = vld [vmem:[#allocation51_spill] sm:$0xff]  ;;  %v15877_v60 = vld [vmem:[#allocation52_spill] sm:$0xff]  ;;  %v13085_v19 = vadd.f32 %v9126_v40, %v13040_v55  ;;  %v13101_v40 = vadd.f32 %v13040_v55, %v4473_v62 }
 0x2b2   :  { %15870 = vst [vmem:[#allocation40_spill] sm:$0xff] %v13056_v3  ;;  %v13070_v28 = vadd.f32 %v6937_v46, %v15875_v42  ;;  %v13073_v58 = vadd.f32 %v6936_v13, %v15877_v60  ;;  %v15879_v31 = vld [vmem:[#allocation55_spill] sm:$0xff]  ;;  %v6943_v49 = vld [vmem:[%s15428_s2 + $0x338] sm:$0xff]  ;;  %v6942_v1 = vld [vmem:[%s15428_s2 + $0x330] sm:$0xff] }
 0x2b3   :  { %15872 = vst [vmem:[#allocation43_spill] sm:$0xff] %v13059_v4  ;;  %15874 = vst [vmem:[#allocation44_spill] sm:$0xff] %v13062_v17  ;;  %v13076_v54 = vadd.f32 %v6939_v56, %v15879_v31  ;;  %v15881_v46 = vld [vmem:[#allocation56_spill] sm:$0xff]  ;;  %v15883_v42 = vld [vmem:[#allocation59_spill] sm:$0xff]  ;;  %v9129_v17 = vpop.f32.mrb[66].mxu0 }
 0x2b4   :  { %15876 = vst [vmem:[#allocation47_spill] sm:$0xff] %v13070_v28  ;;  %15878 = vst [vmem:[#allocation48_spill] sm:$0xff] %v13073_v58  ;;  %v13089_v13 = vadd.f32 %v6938_v32, %v15881_v46  ;;  %v13092_v56 = vadd.f32 %v6941_v36, %v15883_v42  ;;  %v6945_v60 = vld [vmem:[%s15428_s2 + $0x348] sm:$0xff]  ;;  %v6944_v31 = vld [vmem:[%s15428_s2 + $0x340] sm:$0xff]  ;;  %v9097_v28 = vpop.f32.mrb[174].mxu1  ;;  %v3991_v46 = vmax.f32 %v3789_v26, 0.0 }
 0x2b5   :  { %15880 = vst [vmem:[#allocation51_spill] sm:$0xff] %v13076_v54  ;;  %v3990_v54 = vmax.f32 %v3784_v34, 0.0  ;;  %v15885_v33 = vld [vmem:[#allocation60_spill] sm:$0xff]  ;;  %v6947_v32 = vld [vmem:[%s15428_s2 + $0x358] sm:$0xff]  ;;  %v5113_v42 = vsel %vm2792_vm3, %v13085_v19, -inf  ;;  %v3799_v34 = vadd.f32 %v12521_v12, %v9097_v28  ;;  %v3793_v62 = vpop.f32.mrb[175].mxu1 }
 0x2b6   :  { %15882 = vst [vmem:[#allocation52_spill] sm:$0xff] %v13089_v13  ;;  %15884 = vst [vmem:[#allocation55_spill] sm:$0xff] %v13092_v56  ;;  %v13104_v58 = vadd.f32 %v6940_v25, %v15885_v33  ;;  %v6946_v36 = vld [vmem:[%s15428_s2 + $0x350] sm:$0xff]  ;;  %v15887_v56 = vld [vmem:[#allocation63_spill] sm:$0xff]  ;;  %v3794_v4 = vadd.f32 %v12521_v12, %v3793_v62  ;;  %v13138_v62 = vadd.f32 %v9129_v17, %v13040_v55 }
 0x2b7   :  { %v13116_v13 = vadd.f32 %v6943_v49, %v15887_v56  ;;  %v15889_v25 = vld [vmem:[#allocation64_spill] sm:$0xff]  ;;  %9286 = vmatprep.mubr.msk.f32.mxu0 %vm4018_vm4, %v3990_v54  ;;  %v15891_v26 = vld [vmem:[#allocation67_spill] sm:$0xff]  ;;  %v13142_v54 = vadd.f32 %v6947_v32, %v11959_v27 }
 0x2b8   :  { %15886 = vst [vmem:[#allocation56_spill] sm:$0xff] %v13104_v58  ;;  %v13119_v33 = vadd.f32 %v6942_v1, %v15889_v25  ;;  %v5112_v58 = vsel %vm2792_vm3, %v13101_v40, -inf  ;;  %v13126_v3 = vadd.f32 %v6945_v60, %v15891_v26  ;;  %v15893_v18 = vld [vmem:[#allocation68_spill] sm:$0xff]  ;;  %v6949_v49 = vld [vmem:[%s15428_s2 + $0x368] sm:$0xff]  ;;  %v6948_v1 = vld [vmem:[%s15428_s2 + $0x360] sm:$0xff]  ;;  %v4483_v25 = vpop.f32.mrb[67].mxu0  ;;  %9287 = vmatmul.mubr.msk.f32.gmra.mrb[172].mxu0 %vm4018_vm4, %v3991_v46 }
 0x2b9   :  { %15888 = vst [vmem:[#allocation59_spill] sm:$0xff] %v13116_v13  ;;  %v13129_v28 = vadd.f32 %v6944_v31, %v15893_v18  ;;  %v5114_v56 = vmax.f32 %v5112_v58, %v5113_v42  ;;  %15895 = vst [vmem:[#allocation67_spill] sm:$0xff] %v13142_v54  ;;  %v13145_v18 = vadd.f32 %v6946_v36, %v11949_v39  ;;  %v6951_v60 = vld [vmem:[%s15428_s2 + $0x378] sm:$0xff]  ;;  %v3992_v31 = vmax.f32 %v3794_v4, 0.0  ;;  %v9100_v58 = vpop.f32.mrb[176].mxu1  ;;  %v6950_v17 = vld [vmem:[%s15428_s2 + $0x370] sm:$0xff] }
 0x2ba   :  { %15890 = vst [vmem:[#allocation60_spill] sm:$0xff] %v13119_v33  ;;  %15892 = vst [vmem:[#allocation63_spill] sm:$0xff] %v13126_v3  ;;  %v13151_v26 = vadd.f32 %v13040_v55, %v4483_v25  ;;  %v3993_v42 = vmax.f32 %v3799_v34, 0.0  ;;  %v5122_v27 = vsel %vm2792_vm3, %v13138_v62, -inf  ;;  %v3809_v39 = vadd.f32 %v12521_v12, %v9100_v58  ;;  %v3803_v32 = vpop.f32.mrb[177].mxu1  ;;  %v6953_v58 = vld [vmem:[%s15428_s2 + $0x388] sm:$0xff] }
 0x2bb   :  { %15894 = vst [vmem:[#allocation64_spill] sm:$0xff] %v13129_v28  ;;  %15896 = vst [vmem:[#allocation68_spill] sm:$0xff] %v13145_v18  ;;  %v5115_v46 = vrot.slane %v5114_v56, 4  ;;  %v13160_v36 = vadd.f32 %v6949_v49, %v11971_v45  ;;  %v13163_v4 = vadd.f32 %v6948_v1, %v11975_v7  ;;  %v3804_v54 = vadd.f32 %v12521_v12, %v3803_v32  ;;  %v9132_v18 = vpop.f32.mrb[68].mxu0  ;;  %v6952_v7 = vld [vmem:[%s15428_s2 + $0x380] sm:$0xff] }
 0x2bc   :  { %v5121_v25 = vsel %vm2792_vm3, %v13151_v26, -inf  ;;  %9289 = vmatprep.mubr.msk.f32.mxu0 %vm4018_vm4, %v3992_v31  ;;  %v13170_v34 = vadd.f32 %v6951_v60, %v11980_v5  ;;  %v13179_v1 = vadd.f32 %v9132_v18, %v13040_v55  ;;  %v4493_v32 = vpop.f32.mrb[69].mxu0  ;;  %v13183_v31 = vadd.f32 %v6950_v17, %v11984_v52  ;;  %v6955_v5 = vld [vmem:[%s15428_s2 + $0x398] sm:$0xff]  ;;  %v15902_v17 = vld [vmem:[#allocation72_spill] sm:$0xff] }
 0x2bd   :  { %15897 = vst [vmem:[#allocation110_spill] sm:$0xff] %v13160_v36  ;;  %15898 = vst [vmem:[#allocation111_spill] sm:$0xff] %v13163_v4  ;;  %v5116_v45 = vmax.f32 %v5114_v56, %v5115_v46  ;;  %v5123_v49 = vmax.f32 %v5121_v25, %v5122_v27  ;;  %9290 = vmatmul.mubr.msk.f32.gmra.mrb[174].mxu0 %vm4018_vm4, %v3993_v42  ;;  %v3995_v60 = vmax.f32 %v3809_v39, 0.0  ;;  %v9103_v56 = vpop.f32.mrb[178].mxu1 }
 0x2be   :  { %15899 = vst [vmem:[#allocation112_spill] sm:$0xff] %v13170_v34  ;;  %15900 = vst [vmem:[#allocation113_spill] sm:$0xff] %v13183_v31  ;;  %v3994_v34 = vmax.f32 %v3804_v54, 0.0  ;;  %v13189_v36 = vadd.f32 %v13040_v55, %v4493_v32  ;;  %v5131_v18 = vsel %vm2792_vm3, %v13179_v1, -inf  ;;  %v3819_v42 = vadd.f32 %v12521_v12, %v9103_v56  ;;  %v3813_v25 = vpop.f32.mrb[179].mxu1  ;;  %v9135_v32 = vpop.f32.mrb[70].mxu0 }
 0x2bf   :  { %v5117_v46 = vrot.slane %v5116_v45, 2  ;;  %v5124_v27 = vrot.slane %v5123_v49, 4  ;;  %v13195_v52 = vadd.f32 %v6953_v58, %v12010_v44  ;;  %v13198_v31 = vadd.f32 %v6952_v7, %v15902_v17  ;;  %v6954_v56 = vld [vmem:[%s15428_s2 + $0x390] sm:$0xff]  ;;  %v4503_v7 = vpop.f32.mrb[71].mxu0 }
 0x2c0   :  { %v5130_v54 = vsel %vm2792_vm3, %v13189_v36, -inf  ;;  %v3814_v39 = vadd.f32 %v12521_v12, %v3813_v25  ;;  %9292 = vmatprep.mubr.msk.f32.mxu0 %vm4018_vm4, %v3994_v34  ;;  %v13205_v4 = vadd.f32 %v6955_v5, %v12057_v6  ;;  %v3997_v17 = vmax.f32 %v3819_v42, 0.0  ;;  %v9106_v6 = vpop.f32.mrb[180].mxu1  ;;  %v9138_v42 = vpop.f32.mrb[72].mxu0 }
 0x2c1   :  { %15901 = vst [vmem:[#allocation114_spill] sm:$0xff] %v13195_v52  ;;  %15903 = vst [vmem:[#allocation72_spill] sm:$0xff] %v13198_v31  ;;  %v5118_v44 = vmax.f32 %v5116_v45, %v5117_v46  ;;  %v5125_v58 = vmax.f32 %v5123_v49, %v5124_v27  ;;  %v5132_v52 = vmax.f32 %v5130_v54, %v5131_v18  ;;  %9293 = vmatmul.mubr.msk.f32.gmra.mrb[176].mxu0 %vm4018_vm4, %v3995_v60  ;;  %v3823_v45 = vpop.f32.mrb[181].mxu1  ;;  %v15905_v49 = vld [vmem:[#allocation71_spill] sm:$0xff] }
 0x2c2   :  { %15904 = vst [vmem:[#allocation115_spill] sm:$0xff] %v13205_v4  ;;  %v3996_v31 = vmax.f32 %v3814_v39, 0.0  ;;  %v13212_v25 = vadd.f32 %v9135_v32, %v13040_v55  ;;  %v13215_v34 = vadd.f32 %v13040_v55, %v4503_v7  ;;  %v3829_v28 = vadd.f32 %v12521_v12, %v9106_v6  ;;  %v4513_v6 = vpop.f32.mrb[73].mxu0  ;;  %v9109_v33 = vpop.f32.mrb[182].mxu1 }
 0x2c3   :  { %v5119_v5 = vrot.slane %v5118_v44, 1  ;;  %v5126_v4 = vrot.slane %v5125_v58, 2  ;;  %v5133_v3 = vrot.slane %v5132_v52, 4  ;;  %v13219_v46 = vadd.f32 %v6954_v56, %v15905_v49 }
 0x2c4   :  { %v5140_v60 = vsel %vm2792_vm3, %v13212_v25, -inf  ;;  %v5139_v27 = vsel %vm2792_vm3, %v13215_v34, -inf  ;;  %v3824_v18 = vadd.f32 %v12521_v12, %v3823_v45  ;;  %9295 = vmatprep.mubr.msk.f32.mxu0 %vm4018_vm4, %v3996_v31  ;;  %v3999_v56 = vmax.f32 %v3829_v28, 0.0 }
 0x2c5   :  { %15906 = vst [vmem:[#allocation71_spill] sm:$0xff] %v13219_v46  ;;  %v5120_v54 = vmax.f32 %v5118_v44, %v5119_v5  ;;  %v5127_v39 = vmax.f32 %v5125_v58, %v5126_v4  ;;  %v5134_v32 = vmax.f32 %v5132_v52, %v5133_v3  ;;  %v5141_v7 = vmax.f32 %v5139_v27, %v5140_v60  ;;  %v3833_v3 = vpop.f32.mrb[183].mxu1  ;;  %v9141_v5 = vpop.f32.mrb[74].mxu0 }
 0x2c6   :  { %9296 = vmatmul.mubr.msk.f32.gmra.mrb[178].mxu0 %vm4018_vm4, %v3997_v17  ;;  %v3998_v49 = vmax.f32 %v3824_v18, 0.0  ;;  %v13229_v46 = vadd.f32 %v9138_v42, %v13040_v55  ;;  %v13232_v13 = vadd.f32 %v13040_v55, %v4513_v6  ;;  %v3839_v17 = vadd.f32 %v12521_v12, %v9109_v33  ;;  %v9112_v16 = vpop.f32.mrb[184].mxu1 }
 0x2c7   :  { %v5688_v45 = vsub.f32 %v13101_v40, %v5120_v54  ;;  %v5689_v31 = vsub.f32 %v13085_v19, %v5120_v54  ;;  %v5128_v44 = vrot.slane %v5127_v39, 1  ;;  %v5135_v4 = vrot.slane %v5134_v32, 2  ;;  %v4523_v19 = vpop.f32.mrb[75].mxu0 }
 0x2c8   :  { %v5142_v52 = vrot.slane %v5141_v7, 4  ;;  %v5149_v58 = vsel %vm2792_vm3, %v13229_v46, -inf  ;;  %v5148_v28 = vsel %vm2792_vm3, %v13232_v13, -inf  ;;  %9298 = vmatprep.mubr.msk.f32.mxu0 %vm4018_vm4, %v3998_v49  ;;  %v4001_v6 = vmax.f32 %v3839_v17, 0.0  ;;  %v3843_v49 = vpop.f32.mrb[185].mxu1 }
 0x2c9   :  { %v5816_v60 = vmul.f32 1.442695, %v5688_v45  ;;  %v5818_v27 = vmul.f32 1.442695, %v5689_v31  ;;  %v5129_v40 = vmax.f32 %v5127_v39, %v5128_v44  ;;  %v5136_v18 = vmax.f32 %v5134_v32, %v5135_v4  ;;  %v9144_v31 = vpop.f32.mrb[76].mxu0 }
 0x2ca   :  { %9299 = vmatmul.mubr.msk.f32.gmra.mrb[180].mxu0 %vm4018_vm4, %v3999_v56  ;;  %v5143_v42 = vmax.f32 %v5141_v7, %v5142_v52  ;;  %v5150_v54 = vmax.f32 %v5148_v28, %v5149_v58  ;;  %v3834_v41 = vadd.f32 %v12521_v12, %v3833_v3  ;;  %v13247_v4 = vadd.f32 %v9141_v5, %v13040_v55  ;;  %v4533_v3 = vpop.f32.mrb[77].mxu0  ;;  %v9115_v28 = vpop.f32.mrb[186].mxu1 }
 0x2cb   :  { %9335 = vpow2.f32 %v5816_v60  ;;  %v5690_v53 = vsub.f32 %v13151_v26, %v5129_v40  ;;  %v5691_v33 = vsub.f32 %v13138_v62, %v5129_v40  ;;  %v5137_v30 = vrot.slane %v5136_v18, 1  ;;  %v3853_v17 = vpop.f32.mrb[187].mxu1 }
 0x2cc   :  { %9337 = vpow2.f32 %v5818_v27  ;;  %v5144_v45 = vrot.slane %v5143_v42, 2  ;;  %v5151_v39 = vrot.slane %v5150_v54, 4  ;;  %v4000_v32 = vmax.f32 %v3834_v41, 0.0  ;;  %v13261_v27 = vpop.f32.mrb[78].mxu0 }
 0x2cd   :  { %v5820_v44 = vmul.f32 1.442695, %v5690_v53  ;;  %v5822_v56 = vmul.f32 1.442695, %v5691_v33  ;;  %v5138_v7 = vmax.f32 %v5136_v18, %v5137_v30  ;;  %v13250_v26 = vadd.f32 %v13040_v55, %v4523_v19 }
 0x2ce   :  { %v5145_v52 = vmax.f32 %v5143_v42, %v5144_v45  ;;  %v5152_v58 = vmax.f32 %v5150_v54, %v5151_v39  ;;  %v3849_v62 = vadd.f32 %v12521_v12, %v9112_v16  ;;  %9301 = vmatprep.mubr.msk.f32.mxu0 %vm4018_vm4, %v4000_v32  ;;  %v5158_v30 = vsel %vm2792_vm3, %v13247_v4, -inf  ;;  %v13263_v42 = vpop.f32.mrb[79].mxu0  ;;  %v13269_v45 = vpop.f32.mrb[188].mxu1 }
 0x2cf   :  { %9339 = vpow2.f32 %v5820_v44  ;;  %v5692_v41 = vsub.f32 %v13189_v36, %v5138_v7  ;;  %v5693_v53 = vsub.f32 %v13179_v1, %v5138_v7  ;;  %9302 = vmatmul.mubr.msk.f32.gmra.mrb[182].mxu0 %vm4018_vm4, %v4001_v6  ;;  %v5157_v16 = vsel %vm2792_vm3, %v13250_v26, -inf }
 0x2d0   :  { %9341 = vpow2.f32 %v5822_v56  ;;  %v5146_v5 = vrot.slane %v5145_v52, 1  ;;  %v5153_v60 = vrot.slane %v5152_v58, 2  ;;  %v5159_v19 = vmax.f32 %v5157_v16, %v5158_v30  ;;  %v13277_v56 = vpop.f32.mrb[189].mxu1 }
 0x2d1   :  { %v5824_v40 = vmul.f32 1.442695, %v5692_v41  ;;  %v5826_v18 = vmul.f32 1.442695, %v5693_v53  ;;  %v4003_v36 = vmax.f32 %v3849_v62, 0.0  ;;  %v3844_v33 = vadd.f32 %v12521_v12, %v3843_v49  ;;  %v13295_v16 = vpop.f32.mrb[190].mxu1 }
 0x2d2   :  { %v5147_v1 = vmax.f32 %v5145_v52, %v5146_v5  ;;  %v5154_v54 = vmax.f32 %v5152_v58, %v5153_v60  ;;  %v13267_v6 = vadd.f32 %v9144_v31, %v13040_v55  ;;  %v5160_v39 = vrot.slane %v5159_v19, 4  ;;  %v13281_v31 = vpop.f32.mrb[80].mxu0 }
 0x2d3   :  { %9343 = vpow2.f32 %v5824_v40  ;;  %v13272_v32 = vadd.f32 %v13040_v55, %v4533_v3  ;;  %v13275_v44 = vadd.f32 %v12521_v12, %v9115_v28  ;;  %v4002_v41 = vmax.f32 %v3844_v33, 0.0  ;;  %v13289_v53 = vpop.f32.mrb[81].mxu0  ;;  %v13301_v33 = vpop.f32.mrb[191].mxu1 }
 0x2d4   :  { %9345 = vpow2.f32 %v5826_v18  ;;  %v5694_v7 = vsub.f32 %v13215_v34, %v5147_v1  ;;  %v5695_v49 = vsub.f32 %v13212_v25, %v5147_v1  ;;  %v5155_v52 = vrot.slane %v5154_v54, 1 }
 0x2d5   :  { %v13283_v58 = vpop.eup %9335  ;;  %v5161_v62 = vmax.f32 %v5159_v19, %v5160_v39  ;;  %v5167_v3 = vsel %vm2792_vm3, %v13267_v6, -inf  ;;  %v5166_v28 = vsel %vm2792_vm3, %v13272_v32, -inf  ;;  %v4005_v1 = vmax.f32 %v13275_v44, 0.0  ;;  %9304 = vmatprep.mubr.msk.f32.mxu0 %vm4018_vm4, %v4002_v41 }
 0x2d6   :  { %v13291_v30 = vpop.eup %9337  ;;  %v6072_v25 = vsel %vm2792_vm3, %v13283_v58, 0.0  ;;  %v5828_v34 = vmul.f32 1.442695, %v5694_v7  ;;  %v5830_v5 = vmul.f32 1.442695, %v5695_v49  ;;  %v5156_v60 = vmax.f32 %v5154_v54, %v5155_v52  ;;  %9305 = vmatmul.mubr.msk.f32.gmra.mrb[184].mxu0 %vm4018_vm4, %v4003_v36  ;;  %v13306_v54 = vpop.f32.mrb[82].mxu0 }
 0x2d7   :  { %v6073_v40 = vsel %vm2792_vm3, %v13291_v30, 0.0  ;;  %v5162_v18 = vrot.slane %v5161_v62, 2  ;;  %v5168_v19 = vmax.f32 %v5166_v28, %v5167_v3  ;;  %v3854_v44 = vadd.f32 %v12521_v12, %v3853_v17  ;;  %v13311_v41 = vpop.f32.mrb[83].mxu0 }
 0x2d8   :  { %v6074_v39 = vadd.f32 %v6073_v40, %v6072_v25  ;;  %9347 = vpow2.f32 %v5828_v34  ;;  %v5696_v15 = vsub.f32 %v13232_v13, %v5156_v60  ;;  %v5697_v7 = vsub.f32 %v13229_v46, %v5156_v60  ;;  %v13323_v2 = vpop.f32.mrb[84].mxu0 }
 0x2d9   :  { %v13308_v49 = vpop.eup %9339  ;;  %9349 = vpow2.f32 %v5830_v5  ;;  %v5163_v52 = vmax.f32 %v5161_v62, %v5162_v18  ;;  %v5169_v3 = vrot.slane %v5168_v19, 4  ;;  %v4004_v5 = vmax.f32 %v3854_v44, 0.0 }
 0x2da   :  { %v13313_v28 = vpop.eup %9341  ;;  %v6075_v25 = vrot.slane %v6074_v39, 4  ;;  %v6081_v13 = vsel %vm2792_vm3, %v13308_v49, 0.0  ;;  %v5832_v46 = vmul.f32 1.442695, %v5696_v15  ;;  %v5834_v34 = vmul.f32 1.442695, %v5697_v7 }
 0x2db   :  { %v6082_v36 = vsel %vm2792_vm3, %v13313_v28, 0.0  ;;  %v5164_v60 = vrot.slane %v5163_v52, 1  ;;  %v5170_v40 = vmax.f32 %v5168_v19, %v5169_v3  ;;  %v13321_v17 = vadd.f32 %v13261_v27, %v13040_v55  ;;  %9307 = vmatprep.mubr.msk.f32.mxu0 %vm4018_vm4, %v4004_v5  ;;  %v13332_v19 = vpop.f32.mrb[85].mxu0 }
 0x2dc   :  { %v6076_v62 = vadd.f32 %v6075_v25, %v6074_v39  ;;  %v6083_v18 = vadd.f32 %v6082_v36, %v6081_v13  ;;  %9351 = vpow2.f32 %v5832_v46  ;;  %v13329_v22 = vadd.f32 %v13040_v55, %v13263_v42  ;;  %9308 = vmatmul.mubr.msk.f32.gmra.mrb[186].mxu0 %vm4018_vm4, %v4005_v1  ;;  %v13347_v61 = vpop.f32.mrb[86].mxu0 }
 0x2dd   :  { %v13325_v59 = vpop.eup %9343  ;;  %9353 = vpow2.f32 %v5834_v34  ;;  %v5165_v15 = vmax.f32 %v5163_v52, %v5164_v60  ;;  %v5171_v7 = vrot.slane %v5170_v40, 2  ;;  %v5176_v25 = vsel %vm2792_vm3, %v13321_v17, -inf  ;;  %v13349_v14 = vpop.f32.mrb[87].mxu0 }
 0x2de   :  { %v13334_v39 = vpop.eup %9345  ;;  %v6077_v3 = vrot.slane %v6076_v62, 2  ;;  %v6084_v27 = vrot.slane %v6083_v18, 4  ;;  %v6090_v44 = vsel %vm2792_vm3, %v13325_v59, 0.0  ;;  %v5175_v5 = vsel %vm2792_vm3, %v13329_v22, -inf }
 0x2df   :  { %v6091_v42 = vsel %vm2792_vm3, %v13334_v39, 0.0  ;;  %v5698_v52 = vsub.f32 %v13250_v26, %v5165_v15  ;;  %v5699_v13 = vsub.f32 %v13247_v4, %v5165_v15  ;;  %v5172_v46 = vmax.f32 %v5170_v40, %v5171_v7 }
 0x2e0   :  { %v6078_v34 = vadd.f32 %v6077_v3, %v6076_v62  ;;  %v6085_v36 = vadd.f32 %v6084_v27, %v6083_v18  ;;  %v6092_v60 = vadd.f32 %v6091_v42, %v6090_v44  ;;  %v5177_v1 = vmax.f32 %v5175_v5, %v5176_v25  ;;  %v13363_v42 = vpop.f32.mrb[88].mxu0 }
 0x2e1   :  { %v5836_v63 = vmul.f32 1.442695, %v5698_v52  ;;  %v5838_v57 = vmul.f32 1.442695, %v5699_v13  ;;  %v5173_v37 = vrot.slane %v5172_v46, 1  ;;  %v13355_v40 = vadd.f32 %v12521_v12, %v13269_v45  ;;  %v13367_v13 = vpop.f32.mrb[89].mxu0 }
 0x2e2   :  { %v13351_v23 = vpop.eup %9347  ;;  %v6079_v26 = vrot.slane %v6078_v34, 1  ;;  %v6086_v10 = vrot.slane %v6085_v36, 2  ;;  %v6093_v4 = vrot.slane %v6092_v60, 4  ;;  %v5178_v7 = vrot.slane %v5177_v1, 4 }
 0x2e3   :  { %v13357_v62 = vpop.eup %9349  ;;  %v6099_v18 = vsel %vm2792_vm3, %v13351_v23, 0.0  ;;  %9355 = vpow2.f32 %v5836_v63  ;;  %v5174_v15 = vmax.f32 %v5172_v46, %v5173_v37 }
 0x2e4   :  { %v6080_v3 = vadd.f32 %v6079_v26, %v6078_v34  ;;  %v6087_v27 = vadd.f32 %v6086_v10, %v6085_v36  ;;  %v6094_v44 = vadd.f32 %v6093_v4, %v6092_v60  ;;  %v6100_v25 = vsel %vm2792_vm3, %v13357_v62, 0.0 }
 0x2e5   :  { %v6101_v52 = vadd.f32 %v6100_v25, %v6099_v18  ;;  %9357 = vpow2.f32 %v5838_v57  ;;  %v5700_v12 = vsub.f32 %v13272_v32, %v5174_v15  ;;  %v5701_v45 = vsub.f32 %v13267_v6, %v5174_v15  ;;  %v13377_v18 = vpop.f32.mrb[90].mxu0 }
 0x2e6   :  { %v13369_v5 = vpop.eup %9351  ;;  %9359 = vrcp.f32 %v6080_v3  ;;  %v6088_v63 = vrot.slane %v6087_v27, 1  ;;  %v6095_v37 = vrot.slane %v6094_v44, 2  ;;  %v5179_v10 = vmax.f32 %v5177_v1, %v5178_v7  ;;  %15907 = vst [vmem:[#allocation116_spill] sm:$0xff] %v13377_v18  ;;  %v13380_v7 = vpop.f32.mrb[91].mxu0 }
 0x2e7   :  { %v13371_v46 = vpop.eup %9353  ;;  %v6102_v34 = vrot.slane %v6101_v52, 4  ;;  %v6108_v36 = vsel %vm2792_vm3, %v13369_v5, 0.0  ;;  %v5840_v60 = vmul.f32 1.442695, %v5700_v12  ;;  %v5842_v57 = vmul.f32 1.442695, %v5701_v45 }
 0x2e8   :  { %v6089_v26 = vadd.f32 %v6088_v63, %v6087_v27  ;;  %v6096_v32 = vadd.f32 %v6095_v37, %v6094_v44  ;;  %v6109_v6 = vsel %vm2792_vm3, %v13371_v46, 0.0  ;;  %v5180_v4 = vrot.slane %v5179_v10, 2  ;;  %15908 = vst [vmem:[#allocation117_spill] sm:$0xff] %v13380_v7  ;;  %v9726_v27 = vld [vmem:[%s15427_s9] ss:$0 sm:$0xff] }
 0x2e9   :  { %v6103_v15 = vadd.f32 %v6102_v34, %v6101_v52  ;;  %v6110_v3 = vadd.f32 %v6109_v6, %v6108_v36  ;;  %9361 = vpow2.f32 %v5840_v60  ;;  %v4007_v1 = vmax.f32 %v13355_v40, 0.0 }
 0x2ea   :  { %9363 = vrcp.f32 %v6089_v26  ;;  %v6097_v25 = vrot.slane %v6096_v32, 1  ;;  %v5181_v43 = vmax.f32 %v5179_v10, %v5180_v4  ;;  %v3864_v44 = vadd.f32 %v9726_v27, %v13277_v56  ;;  %v13394_v10 = vpop.f32.mrb[92].mxu0 }
 0x2eb   :  { %v6104_v12 = vrot.slane %v6103_v15, 2  ;;  %v6111_v45 = vrot.slane %v6110_v3, 4  ;;  %9365 = vpow2.f32 %v5842_v57  ;;  %v13388_v52 = vadd.f32 %v13281_v31, %v13040_v55  ;;  %15909 = vst [vmem:[#allocation118_spill] sm:$0xff] %v13394_v10  ;;  %v13403_v31 = vpop.f32.mrb[93].mxu0 }
 0x2ec   :  { %v6098_v63 = vadd.f32 %v6097_v25, %v6096_v32  ;;  %v5182_v40 = vrot.slane %v5181_v43, 1  ;;  %v4006_v37 = vmax.f32 %v3864_v44, 0.0  ;;  %v13392_v34 = vadd.f32 %v13040_v55, %v13289_v53  ;;  %15910 = vst [vmem:[#allocation119_spill] sm:$0xff] %v13403_v31 }
 0x2ed   :  { %v13396_v36 = vpop.eup %9355  ;;  %v6105_v60 = vadd.f32 %v6104_v12, %v6103_v15  ;;  %v6112_v56 = vadd.f32 %v6111_v45, %v6110_v3  ;;  %v5185_v57 = vsel %vm2792_vm3, %v13388_v52, -inf  ;;  %v13401_v26 = vadd.f32 %v9726_v27, %v13295_v16 }
 0x2ee   :  { %9367 = vrcp.f32 %v6098_v63  ;;  %v6117_v32 = vsel %vm2792_vm3, %v13396_v36, 0.0  ;;  %v5183_v53 = vmax.f32 %v5181_v43, %v5182_v40  ;;  %v5184_v6 = vsel %vm2792_vm3, %v13392_v34, -inf  ;;  %9310 = vmatprep.mubr.msk.f32.mxu0 %vm4018_vm4, %v4006_v37  ;;  %v13421_v40 = vpop.f32.mrb[94].mxu0 }
 0x2ef   :  { %v13410_v4 = vpop.eup %9357  ;;  %v6106_v15 = vrot.slane %v6105_v60, 1  ;;  %v6113_v3 = vrot.slane %v6112_v56, 2  ;;  %v5186_v25 = vmax.f32 %v5184_v6, %v5185_v57  ;;  %9311 = vmatmul.mubr.msk.f32.gmra.mrb[188].mxu0 %vm4018_vm4, %v4007_v1  ;;  %v13419_v63 = vadd.f32 %v9726_v27, %v13301_v33  ;;  %v13425_v1 = vpop.f32.mrb[95].mxu0 }
 0x2f0   :  { %v9360_v44 = vpop.eup %9359  ;;  %v6118_v12 = vsel %vm2792_vm3, %v13410_v4, 0.0  ;;  %v5702_v43 = vsub.f32 %v13329_v22, %v5183_v53  ;;  %v5703_v45 = vsub.f32 %v13321_v17, %v5183_v53 }
 0x2f1   :  { %v6712_v37 = vmul.f32 %v9360_v44, %v13283_v58  ;;  %v6713_v57 = vmul.f32 %v9360_v44, %v13291_v30  ;;  %v6107_v6 = vadd.f32 %v6106_v15, %v6105_v60  ;;  %v6114_v16 = vadd.f32 %v6113_v3, %v6112_v56  ;;  %v13433_v56 = vpop.f32.mrb[96].mxu0 }
 0x2f2   :  { %v6119_v31 = vadd.f32 %v6118_v12, %v6117_v32  ;;  %v5844_v10 = vmul.f32 1.442695, %v5702_v43  ;;  %v5846_v7 = vmul.f32 1.442695, %v5703_v45  ;;  %v5187_v18 = vrot.slane %v5186_v25, 4  ;;  %v13441_v44 = vpop.f32.mrb[97].mxu0 }
 0x2f3   :  { %v13427_v22 = vpop.eup %9361  ;;  %v7096_v17 = vmul.f32 %v12467_v29, %v6712_v37  ;;  %v7097_v33 = vmul.f32 %v12464_v21, %v6713_v57  ;;  %9369 = vrcp.f32 %v6107_v6  ;;  %v6115_v27 = vrot.slane %v6114_v16, 1 }
 0x2f4   :  { %v9364_v53 = vpop.eup %9363  ;;  %v6120_v58 = vrot.slane %v6119_v31, 4  ;;  %v6126_v30 = vsel %vm2792_vm3, %v13427_v22, 0.0  ;;  %9371 = vpow2.f32 %v5844_v10  ;;  %v5188_v60 = vmax.f32 %v5186_v25, %v5187_v18 }
 0x2f5   :  { %v13435_v32 = vpop.eup %9365  ;;  %v7224_v15 = vsel %vm2792_vm3, %v7096_v17, 0.0  ;;  %v7225_v3 = vsel %vm2792_vm3, %v7097_v33, 0.0  ;;  %v6714_v29 = vmul.f32 %v9364_v53, %v13308_v49  ;;  %v6715_v21 = vmul.f32 %v9364_v53, %v13313_v28  ;;  %v13447_v28 = vpop.f32.mrb[98].mxu0 }
 0x2f6   :  { %v7226_v12 = vadd.f32 %v7225_v3, %v7224_v15  ;;  %v6116_v43 = vadd.f32 %v6115_v27, %v6114_v16  ;;  %v6121_v45 = vadd.f32 %v6120_v58, %v6119_v31  ;;  %v6127_v18 = vsel %vm2792_vm3, %v13435_v32, 0.0 }
 0x2f7   :  { %v7098_v10 = vmul.f32 %v12473_v51, %v6714_v29  ;;  %v7099_v25 = vmul.f32 %v12470_v35, %v6715_v21  ;;  %v6128_v37 = vadd.f32 %v6127_v18, %v6126_v30  ;;  %9373 = vpow2.f32 %v5846_v7  ;;  %v13453_v51 = vpop.f32.mrb[99].mxu0 }
 0x2f8   :  { %v9368_v57 = vpop.eup %9367  ;;  %v7227_v6 = vrot.slane %v7226_v12, 4  ;;  %9375 = vrcp.f32 %v6116_v43  ;;  %v6122_v49 = vrot.slane %v6121_v45, 2  ;;  %v5189_v17 = vrot.slane %v5188_v60, 2 }
 0x2f9   :  { %v7233_v33 = vsel %vm2792_vm3, %v7098_v10, 0.0  ;;  %v7234_v31 = vsel %vm2792_vm3, %v7099_v25, 0.0  ;;  %v6716_v16 = vmul.f32 %v9368_v57, %v13325_v59  ;;  %v6717_v27 = vmul.f32 %v9368_v57, %v13334_v39  ;;  %v13458_v59 = vpop.f32.mrb[100].mxu0 }
 0x2fa   :  { %v7228_v35 = vadd.f32 %v7227_v6, %v7226_v12  ;;  %v7235_v53 = vadd.f32 %v7234_v31, %v7233_v33  ;;  %v6123_v7 = vadd.f32 %v6122_v49, %v6121_v45  ;;  %v6129_v58 = vrot.slane %v6128_v37, 4 }
 0x2fb   :  { %v7100_v30 = vmul.f32 %v12489_v8, %v6716_v16  ;;  %v7101_v15 = vmul.f32 %v12486_v0, %v6717_v27  ;;  %v5190_v3 = vmax.f32 %v5188_v60, %v5189_v17  ;;  %v4008_v29 = vmax.f32 %v13419_v63, 0.0  ;;  %v13467_v0 = vpop.f32.mrb[101].mxu0 }
 0x2fc   :  { %v7229_v21 = vrot.slane %v7228_v35, 2  ;;  %v7236_v43 = vrot.slane %v7235_v53, 4  ;;  %v6124_v18 = vrot.slane %v6123_v7, 1  ;;  %v6130_v10 = vadd.f32 %v6129_v58, %v6128_v37 }
 0x2fd   :  { %v9370_v39 = vpop.eup %9369  ;;  %v7242_v12 = vsel %vm2792_vm3, %v7100_v30, 0.0  ;;  %v7243_v45 = vsel %vm2792_vm3, %v7101_v15, 0.0  ;;  %v5191_v25 = vrot.slane %v5190_v3, 1  ;;  %v13464_v8 = vadd.f32 %v13306_v54, %v13040_v55  ;;  %9313 = vmatprep.mubr.msk.f32.mxu0 %vm4018_vm4, %v4008_v29 }
 0x2fe   :  { %v13469_v63 = vpop.eup %9371  ;;  %v7230_v60 = vadd.f32 %v7229_v21, %v7228_v35  ;;  %v7237_v37 = vadd.f32 %v7236_v43, %v7235_v53  ;;  %v7244_v57 = vadd.f32 %v7243_v45, %v7242_v12  ;;  %v6718_v6 = vmul.f32 %v9370_v39, %v13351_v23  ;;  %v13479_v53 = vpop.f32.mrb[102].mxu0 }
 0x2ff   :  { %v15911_v49 = vmax.f32 %v13401_v26, 0.0  ;;  %v6719_v17 = vmul.f32 %v9370_v39, %v13357_v62  ;;  %v6125_v33 = vadd.f32 %v6124_v18, %v6123_v7  ;;  %v6131_v54 = vrot.slane %v6130_v10, 2  ;;  %v13484_v7 = vpop.f32.mrb[103].mxu0 }
 0x300   :  { %v6135_v31 = vsel %vm2792_vm3, %v13469_v63, 0.0  ;;  %v7231_v16 = vrot.slane %v7230_v60, 1  ;;  %v7238_v27 = vrot.slane %v7237_v37, 2  ;;  %v7245_v58 = vrot.slane %v7244_v57, 4 }
 0x301   :  { %9314 = vmatmul.mubr.msk.f32.gmra.mrb[190].mxu0 %vm4018_vm4, %v15911_v49  ;;  %v7102_v35 = vmul.f32 %v12504_v47, %v6718_v6  ;;  %v13481_v30 = vpop.eup %9373  ;;  %v7103_v23 = vmul.f32 %v12492_v50, %v6719_v17  ;;  %9377 = vrcp.f32 %v6125_v33  ;;  %v6132_v26 = vadd.f32 %v6131_v54, %v6130_v10  ;;  %v13492_v10 = vpop.f32.mrb[104].mxu0 }
 0x302   :  { %v5192_v62 = vmax.f32 %v5190_v3, %v5191_v25  ;;  %v9376_v15 = vpop.eup %9375  ;;  %v7232_v29 = vadd.f32 %v7231_v16, %v7230_v60  ;;  %v7239_v21 = vadd.f32 %v7238_v27, %v7237_v37  ;;  %v7246_v43 = vadd.f32 %v7245_v58, %v7244_v57  ;;  %v13496_v17 = vpop.f32.mrb[105].mxu0 }
 0x303   :  { %v7251_v18 = vsel %vm2792_vm3, %v7102_v35, 0.0  ;;  %v7252_v47 = vsel %vm2792_vm3, %v7103_v23, 0.0  ;;  %v6720_v39 = vmul.f32 %v9376_v15, %v13369_v5  ;;  %v6721_v12 = vmul.f32 %v9376_v15, %v13371_v46 }
 0x304   :  { %v6133_v45 = vrot.slane %v6132_v26, 1  ;;  %v7240_v6 = vrot.slane %v7239_v21, 1  ;;  %v7247_v50 = vrot.slane %v7246_v43, 2  ;;  %v7253_v49 = vadd.f32 %v7252_v47, %v7251_v18 }
 0x305   :  { %v6136_v3 = vsel %vm2792_vm3, %v13481_v30, 0.0  ;;  %v7104_v25 = vmul.f32 %v12525_v38, %v6720_v39  ;;  %v7105_v60 = vmul.f32 %v12507_v11, %v6721_v12  ;;  %v5704_v54 = vsub.f32 %v13392_v34, %v5192_v62 }
 0x306   :  { %v6134_v37 = vadd.f32 %v6133_v45, %v6132_v26  ;;  %v6137_v57 = vadd.f32 %v6136_v3, %v6135_v31  ;;  %v7241_v5 = vadd.f32 %v7240_v6, %v7239_v21  ;;  %v7248_v33 = vadd.f32 %v7247_v50, %v7246_v43  ;;  %v13502_v31 = vpop.f32.mrb[106].mxu0 }
 0x307   :  { %v7254_v46 = vrot.slane %v7253_v49, 4  ;;  %v7260_v16 = vsel %vm2792_vm3, %v7104_v25, 0.0  ;;  %v7261_v27 = vsel %vm2792_vm3, %v7105_v60, 0.0  ;;  %v5705_v15 = vsub.f32 %v13388_v52, %v5192_v62  ;;  %v13507_v43 = vpop.f32.mrb[107].mxu0 }
 0x308   :  { %9379 = vrcp.f32 %v6134_v37  ;;  %v6138_v58 = vrot.slane %v6137_v57, 4  ;;  %v7865_v38 = vsel %vm7864_vm5, %v7241_v5, %v7232_v29  ;;  %v7249_v35 = vrot.slane %v7248_v33, 1  ;;  %v13519_v25 = vpop.f32.mrb[108].mxu0 }
 0x309   :  { %v7255_v11 = vadd.f32 %v7254_v46, %v7253_v49  ;;  %v7262_v23 = vadd.f32 %v7261_v27, %v7260_v16  ;;  %v5848_v21 = vmul.f32 1.442695, %v5704_v54  ;;  %v5194_v34 = vsel %vm2792_vm3, %v13464_v8, -inf }
 0x30a   :  { %v6139_v26 = vadd.f32 %v6138_v58, %v6137_v57  ;;  %v7250_v18 = vadd.f32 %v7249_v35, %v7248_v33  ;;  %v13511_v29 = vadd.f32 %v13040_v55, %v13311_v41  ;;  %v5850_v6 = vmul.f32 1.442695, %v5705_v15  ;;  %v13524_v57 = vpop.f32.mrb[109].mxu0  ;;  %v13543_v15 = vld [vmem:[%s15429_s11] ss:$0 sm:$0xff] }
 0x30b   :  { %v7256_v47 = vrot.slane %v7255_v11, 2  ;;  %v7263_v39 = vrot.slane %v7262_v23, 4  ;;  %v9378_v12 = vpop.eup %9377  ;;  %9381 = vpow2.f32 %v5848_v21  ;;  %v13515_v52 = vadd.f32 %v13323_v2, %v13040_v55 }
 0x30c   :  { %v6140_v45 = vrot.slane %v6139_v26, 2  ;;  %v7867_v62 = vsel %vm7866_vm6, %v7250_v18, %v7865_v38  ;;  %v6722_v3 = vmul.f32 %v9378_v12, %v13396_v36  ;;  %v6723_v41 = vmul.f32 %v9378_v12, %v13410_v4 }
 0x30d   :  { %v7257_v50 = vadd.f32 %v7256_v47, %v7255_v11  ;;  %v7264_v49 = vadd.f32 %v7263_v39, %v7262_v23  ;;  %9383 = vpow2.f32 %v5850_v6  ;;  %v5193_v37 = vsel %vm2792_vm3, %v13511_v29, -inf  ;;  %v13535_v11 = vpop.f32.mrb[110].mxu0 }
 0x30e   :  { %v6141_v60 = vadd.f32 %v6140_v45, %v6139_v26  ;;  %v7106_v33 = vmul.f32 %v12545_v24, %v6722_v3  ;;  %v5195_v46 = vmax.f32 %v5193_v37, %v5194_v34  ;;  %v7107_v54 = vmul.f32 %v12528_v20, %v6723_v41 }
 0x30f   :  { %v7258_v5 = vrot.slane %v7257_v50, 1  ;;  %v7265_v2 = vrot.slane %v7264_v49, 2  ;;  %v5203_v36 = vsel %vm2792_vm3, %v13515_v52, -inf  ;;  %v13532_v4 = vadd.f32 %v13040_v55, %v13332_v19  ;;  %v13549_v19 = vpop.f32.mrb[111].mxu0 }
 0x310   :  { %v6142_v16 = vrot.slane %v6141_v60, 1  ;;  %v7269_v38 = vsel %vm2792_vm3, %v7106_v33, 0.0  ;;  %v5196_v35 = vrot.slane %v5195_v46, 4  ;;  %v7270_v24 = vsel %vm2792_vm3, %v7107_v54, 0.0  ;;  %v13557_v3 = vpop.f32.mrb[112].mxu0 }
 0x311   :  { %v7259_v27 = vadd.f32 %v7258_v5, %v7257_v50  ;;  %v7266_v58 = vadd.f32 %v7265_v2, %v7264_v49  ;;  %v5202_v20 = vsel %vm2792_vm3, %v13532_v4, -inf  ;;  %v13547_v55 = vadd.f32 %v13543_v15, %v13347_v61  ;;  %v13566_v37 = vpop.f32.mrb[113].mxu0 }
 0x312   :  { %v9380_v23 = vpop.eup %9379  ;;  %v6143_v26 = vadd.f32 %v6142_v16, %v6141_v60  ;;  %v7271_v18 = vadd.f32 %v7270_v24, %v7269_v38  ;;  %v5197_v12 = vmax.f32 %v5195_v46, %v5196_v35  ;;  %v5204_v45 = vmax.f32 %v5202_v20, %v5203_v36 }
 0x313   :  { %v7869_v21 = vsel %vm7868_vm7, %v7259_v27, %v7867_v62  ;;  %v7267_v34 = vrot.slane %v7266_v58, 1  ;;  %v6724_v47 = vmul.f32 %v9380_v23, %v13427_v22  ;;  %v6725_v39 = vmul.f32 %v9380_v23, %v13435_v32 }
 0x314   :  { %9385 = vrcp.f32 %v6143_v26  ;;  %v7272_v50 = vrot.slane %v7271_v18, 4  ;;  %v5212_v61 = vsel %vm2792_vm3, %v13547_v55, -inf  ;;  %v5198_v22 = vrot.slane %v5197_v12, 2 }
 0x315   :  { %v7268_v6 = vadd.f32 %v7267_v34, %v7266_v58  ;;  %v7108_v49 = vmul.f32 %v12551_v9, %v6724_v47  ;;  %v13559_v41 = vpop.eup %9381  ;;  %v7109_v62 = vmul.f32 %v12548_v48, %v6725_v39  ;;  %v5205_v60 = vrot.slane %v5204_v45, 4 }
 0x316   :  { %v13564_v32 = vadd.f32 %v13543_v15, %v13349_v14  ;;  %v7273_v5 = vadd.f32 %v7272_v50, %v7271_v18  ;;  %v6144_v33 = vsel %vm2792_vm3, %v13559_v41, 0.0  ;;  %v5199_v54 = vmax.f32 %v5197_v12, %v5198_v22 }
 0x317   :  { %v7871_v9 = vsel %vm7870_vm8, %v7268_v6, %v7869_v21  ;;  %v7278_v2 = vsel %vm2792_vm3, %v7108_v49, 0.0  ;;  %v13572_v46 = vpop.eup %9383  ;;  %v7279_v48 = vsel %vm2792_vm3, %v7109_v62, 0.0  ;;  %v5206_v16 = vmax.f32 %v5204_v45, %v5205_v60  ;;  %v13589_v6 = vpop.f32.mrb[114].mxu0 }
 0x318   :  { %v5211_v14 = vsel %vm2792_vm3, %v13564_v32, -inf  ;;  %v7274_v36 = vrot.slane %v7273_v5, 2  ;;  %v7280_v27 = vadd.f32 %v7279_v48, %v7278_v2  ;;  %v6145_v58 = vsel %vm2792_vm3, %v13572_v46, 0.0  ;;  %v13593_v62 = vpop.f32.mrb[115].mxu0 }
 0x319   :  { %v5213_v38 = vmax.f32 %v5211_v14, %v5212_v61  ;;  %v6146_v35 = vadd.f32 %v6145_v58, %v6144_v33  ;;  %v5200_v23 = vrot.slane %v5199_v54, 1  ;;  %v5207_v24 = vrot.slane %v5206_v16, 2 }
 0x31a   :  { %v13581_v26 = vadd.f32 %v13543_v15, %v13363_v42  ;;  %v7275_v20 = vadd.f32 %v7274_v36, %v7273_v5  ;;  %v7281_v21 = vrot.slane %v7280_v27, 4  ;;  %v13585_v18 = vadd.f32 %v13543_v15, %v13367_v13 }
 0x31b   :  { %v5214_v34 = vrot.slane %v5213_v38, 4  ;;  %v6147_v47 = vrot.slane %v6146_v35, 4  ;;  %v5201_v39 = vmax.f32 %v5199_v54, %v5200_v23  ;;  %v5208_v12 = vmax.f32 %v5206_v16, %v5207_v24  ;;  %v15912_v24 = vld [vmem:[#allocation5_spill] sm:$0xff] }
 0x31c   :  { %v5221_v45 = vsel %vm2792_vm3, %v13581_v26, -inf  ;;  %v7276_v50 = vrot.slane %v7275_v20, 1  ;;  %v7282_v49 = vadd.f32 %v7281_v21, %v7280_v27  ;;  %v5220_v61 = vsel %vm2792_vm3, %v13585_v18, -inf  ;;  %v15913_v21 = vld [vmem:[#allocation4_spill] sm:$0xff] }
 0x31d   :  { %v5215_v42 = vmax.f32 %v5213_v38, %v5214_v34  ;;  %v6148_v13 = vadd.f32 %v6147_v47, %v6146_v35  ;;  %v5706_v60 = vsub.f32 %v13511_v29, %v5201_v39  ;;  %v5707_v5 = vsub.f32 %v13464_v8, %v5201_v39 }
 0x31e   :  { %v9386_v22 = vpop.eup %9385  ;;  %v5209_v2 = vrot.slane %v5208_v12, 1  ;;  %v7277_v33 = vadd.f32 %v7276_v50, %v7275_v20  ;;  %v7283_v48 = vrot.slane %v7282_v49, 2 }
 0x31f   :  { %v6726_v54 = vmul.f32 %v9386_v22, %v13469_v63  ;;  %v6727_v16 = vmul.f32 %v9386_v22, %v13481_v30  ;;  %v6149_v14 = vrot.slane %v6148_v13, 2  ;;  %v5852_v36 = vmul.f32 1.442695, %v5706_v60 }
 0x320   :  { %v5854_v27 = vmul.f32 1.442695, %v5707_v5  ;;  %v5210_v58 = vmax.f32 %v5208_v12, %v5209_v2  ;;  %v7873_v38 = vsel %vm7872_vm9, %v7277_v33, %v7871_v9  ;;  %v7284_v23 = vadd.f32 %v7283_v48, %v7282_v49  ;;  %v15914_v5 = vld [vmem:[#allocation116_spill] sm:$0xff] }
 0x321   :  { %v7110_v35 = vmul.f32 %v15912_v24, %v6726_v54  ;;  %v7111_v29 = vmul.f32 %v15913_v21, %v6727_v16  ;;  %v6150_v34 = vadd.f32 %v6149_v14, %v6148_v13  ;;  %9387 = vpow2.f32 %v5852_v36  ;;  %v13615_v14 = vpop.f32.mrb[116].mxu0  ;;  %v15918_v21 = vld [vmem:[#allocation119_spill] sm:$0xff] }
 0x322   :  { %v5708_v8 = vsub.f32 %v13532_v4, %v5210_v58  ;;  %v5709_v20 = vsub.f32 %v13515_v52, %v5210_v58  ;;  %v7285_v63 = vrot.slane %v7284_v23, 1  ;;  %9389 = vpow2.f32 %v5854_v27  ;;  %v15915_v52 = vld [vmem:[#allocation117_spill] sm:$0xff]  ;;  %v13621_v27 = vpop.f32.mrb[117].mxu0 }
 0x323   :  { %v7287_v30 = vsel %vm2792_vm3, %v7110_v35, 0.0  ;;  %v7288_v47 = vsel %vm2792_vm3, %v7111_v29, 0.0  ;;  %v6151_v12 = vrot.slane %v6150_v34, 1  ;;  %v5216_v22 = vrot.slane %v5215_v42, 2  ;;  %15916 = vst [vmem:[#allocation5_spill] sm:$0xff] %v13621_v27 }
 0x324   :  { %v7289_v39 = vadd.f32 %v7288_v47, %v7287_v30  ;;  %v5856_v9 = vmul.f32 1.442695, %v5708_v8  ;;  %v5858_v50 = vmul.f32 1.442695, %v5709_v20  ;;  %v7286_v49 = vadd.f32 %v7285_v63, %v7284_v23 }
 0x325   :  { %v5222_v60 = vmax.f32 %v5220_v61, %v5221_v45  ;;  %v13608_v13 = vadd.f32 %v13543_v15, %v15914_v5  ;;  %v6152_v2 = vadd.f32 %v6151_v12, %v6150_v34  ;;  %v13612_v33 = vadd.f32 %v13543_v15, %v15915_v52 }
 0x326   :  { %v7290_v4 = vrot.slane %v7289_v39, 4  ;;  %9391 = vpow2.f32 %v5856_v9  ;;  %v7875_v48 = vsel %vm7874_vm10, %v7286_v49, %v7873_v38  ;;  %v5217_v54 = vmax.f32 %v5215_v42, %v5216_v22  ;;  %v15917_v38 = vld [vmem:[#allocation118_spill] sm:$0xff] }
 0x327   :  { %9393 = vpow2.f32 %v5858_v50  ;;  %v5223_v16 = vrot.slane %v5222_v60, 4  ;;  %v5230_v61 = vsel %vm2792_vm3, %v13608_v13, -inf  ;;  %v5229_v36 = vsel %vm2792_vm3, %v13612_v33, -inf }
 0x328   :  { %v7291_v45 = vadd.f32 %v7290_v4, %v7289_v39  ;;  %9395 = vrcp.f32 %v6152_v2  ;;  %v5218_v58 = vrot.slane %v5217_v54, 1  ;;  %v5231_v24 = vmax.f32 %v5229_v36, %v5230_v61 }
 0x329   :  { %v5224_v23 = vmax.f32 %v5222_v60, %v5223_v16  ;;  %v13625_v35 = vadd.f32 %v13543_v15, %v15917_v38  ;;  %v13629_v29 = vadd.f32 %v13543_v15, %v15918_v21  ;;  %v13633_v34 = vadd.f32 %v13543_v15, %v13421_v40 }
 0x32a   :  { %v7292_v42 = vrot.slane %v7291_v45, 2  ;;  %v13637_v8 = vadd.f32 %v13543_v15, %v13425_v1  ;;  %v5219_v20 = vmax.f32 %v5217_v54, %v5218_v58  ;;  %v5232_v30 = vrot.slane %v5231_v24, 4 }
 0x32b   :  { %v5225_v63 = vrot.slane %v5224_v23, 2  ;;  %v5239_v47 = vsel %vm2792_vm3, %v13625_v35, -inf  ;;  %v13641_v39 = vpop.eup %9387  ;;  %v5238_v9 = vsel %vm2792_vm3, %v13629_v29, -inf  ;;  %v5248_v40 = vsel %vm2792_vm3, %v13633_v34, -inf }
 0x32c   :  { %v7293_v12 = vadd.f32 %v7292_v42, %v7291_v45  ;;  %v5247_v50 = vsel %vm2792_vm3, %v13637_v8, -inf  ;;  %v13649_v1 = vpop.eup %9389  ;;  %v6153_v49 = vsel %vm2792_vm3, %v13641_v39, 0.0  ;;  %v5710_v22 = vsub.f32 %v13564_v32, %v5219_v20 }
 0x32d   :  { %v5711_v60 = vsub.f32 %v13547_v55, %v5219_v20  ;;  %v5226_v5 = vmax.f32 %v5224_v23, %v5225_v63  ;;  %v6154_v2 = vsel %vm2792_vm3, %v13649_v1, 0.0  ;;  %v5233_v52 = vmax.f32 %v5231_v24, %v5232_v30 }
 0x32e   :  { %v7294_v4 = vrot.slane %v7293_v12, 1  ;;  %v5240_v54 = vmax.f32 %v5238_v9, %v5239_v47  ;;  %v6155_v16 = vadd.f32 %v6154_v2, %v6153_v49  ;;  %v5860_v45 = vmul.f32 1.442695, %v5710_v22 }
 0x32f   :  { %v5862_v61 = vmul.f32 1.442695, %v5711_v60  ;;  %v5227_v36 = vrot.slane %v5226_v5, 1  ;;  %v5234_v42 = vrot.slane %v5233_v52, 2  ;;  %v5249_v27 = vmax.f32 %v5247_v50, %v5248_v40 }
 0x330   :  { %v13657_v58 = vpop.eup %9391  ;;  %v7295_v38 = vadd.f32 %v7294_v4, %v7293_v12  ;;  %v5241_v21 = vrot.slane %v5240_v54, 4  ;;  %v6156_v55 = vrot.slane %v6155_v16, 4  ;;  %9397 = vpow2.f32 %v5860_v45  ;;  %v15919_v4 = vld [vmem:[#allocation8_spill] sm:$0xff] }
 0x331   :  { %v13659_v32 = vpop.eup %9393  ;;  %v6162_v23 = vsel %vm2792_vm3, %v13657_v58, 0.0  ;;  %v5228_v20 = vmax.f32 %v5226_v5, %v5227_v36  ;;  %9399 = vpow2.f32 %v5862_v61  ;;  %v5235_v47 = vmax.f32 %v5233_v52, %v5234_v42  ;;  %v13674_v5 = vpop.f32.mrb[118].mxu0  ;;  %v15920_v52 = vld [vmem:[#allocation7_spill] sm:$0xff] }
 0x332   :  { %v9396_v24 = vpop.eup %9395  ;;  %v7877_v63 = vsel %vm7876_vm11, %v7295_v38, %v7875_v48  ;;  %v6163_v30 = vsel %vm2792_vm3, %v13659_v32, 0.0  ;;  %v6157_v40 = vadd.f32 %v6156_v55, %v6155_v16  ;;  %v5242_v60 = vmax.f32 %v5240_v54, %v5241_v21  ;;  %v13678_v38 = vpop.f32.mrb[119].mxu0 }
 0x333   :  { %7935 = vst.msk [vmem:[%s15430_s12] sm:$0xff] %vm2792_vm3, %v7877_v63  ;;  %v6728_v12 = vmul.f32 %v9396_v24, %v13559_v41  ;;  %v6729_v9 = vmul.f32 %v9396_v24, %v13572_v46  ;;  %v6164_v50 = vadd.f32 %v6163_v30, %v6162_v23  ;;  %v5712_v49 = vsub.f32 %v13585_v18, %v5228_v20 }
 0x334   :  { %v5713_v48 = vsub.f32 %v13581_v26, %v5228_v20  ;;  %v5236_v22 = vrot.slane %v5235_v47, 1  ;;  %v6158_v61 = vrot.slane %v6157_v40, 2  ;;  %v5243_v42 = vrot.slane %v5242_v60, 2 }
 0x335   :  { %v7112_v2 = vmul.f32 %v15919_v4, %v6728_v12  ;;  %v7113_v45 = vmul.f32 %v15920_v52, %v6729_v9  ;;  %v6165_v36 = vrot.slane %v6164_v50, 4  ;;  %v5864_v41 = vmul.f32 1.442695, %v5712_v49 }
 0x336   :  { %v5866_v46 = vmul.f32 1.442695, %v5713_v48  ;;  %v5237_v16 = vmax.f32 %v5235_v47, %v5236_v22  ;;  %v6159_v55 = vadd.f32 %v6158_v61, %v6157_v40  ;;  %v5244_v30 = vmax.f32 %v5242_v60, %v5243_v42 }
 0x337   :  { %v7296_v18 = vsel %vm2792_vm3, %v7112_v2, 0.0  ;;  %v7297_v26 = vsel %vm2792_vm3, %v7113_v45, 0.0  ;;  %v6166_v54 = vadd.f32 %v6165_v36, %v6164_v50  ;;  %9401 = vpow2.f32 %v5864_v41 }
 0x338   :  { %v7298_v21 = vadd.f32 %v7297_v26, %v7296_v18  ;;  %v5714_v23 = vsub.f32 %v13612_v33, %v5237_v16  ;;  %v5715_v20 = vsub.f32 %v13608_v13, %v5237_v16  ;;  %v6160_v24 = vrot.slane %v6159_v55, 1  ;;  %v13700_v26 = vpop.f32.mrb[120].mxu0 }
 0x339   :  { %v6167_v63 = vrot.slane %v6166_v54, 2  ;;  %9403 = vpow2.f32 %v5866_v46  ;;  %v5250_v49 = vrot.slane %v5249_v27, 4  ;;  %v5245_v40 = vrot.slane %v5244_v30, 1 }
 0x33a   :  { %v7299_v12 = vrot.slane %v7298_v21, 4  ;;  %v5868_v9 = vmul.f32 1.442695, %v5714_v23  ;;  %v5870_v47 = vmul.f32 1.442695, %v5715_v20  ;;  %v13684_v48 = vpop.eup %9397  ;;  %v6161_v22 = vadd.f32 %v6160_v24, %v6159_v55  ;;  %v13706_v23 = vpop.f32.mrb[121].mxu0 }
 0x33b   :  { %v6168_v4 = vadd.f32 %v6167_v63, %v6166_v54  ;;  %v13688_v50 = vadd.f32 %v13543_v15, %v13433_v56  ;;  %v13690_v33 = vpop.eup %9399  ;;  %v6171_v2 = vsel %vm2792_vm3, %v13684_v48, 0.0  ;;  %v5251_v60 = vmax.f32 %v5249_v27, %v5250_v49 }
 0x33c   :  { %v7300_v13 = vadd.f32 %v7299_v12, %v7298_v21  ;;  %9405 = vpow2.f32 %v5868_v9  ;;  %v6172_v45 = vsel %vm2792_vm3, %v13690_v33, 0.0  ;;  %v5246_v61 = vmax.f32 %v5244_v30, %v5245_v40 }
 0x33d   :  { %9407 = vrcp.f32 %v6161_v22  ;;  %v6169_v52 = vrot.slane %v6168_v4, 1  ;;  %v6173_v41 = vadd.f32 %v6172_v45, %v6171_v2  ;;  %v5252_v46 = vrot.slane %v5251_v60, 2 }
 0x33e   :  { %v7301_v36 = vrot.slane %v7300_v13, 2  ;;  %9409 = vpow2.f32 %v5870_v47  ;;  %v5716_v16 = vsub.f32 %v13629_v29, %v5246_v61  ;;  %v5717_v42 = vsub.f32 %v13625_v35, %v5246_v61 }
 0x33f   :  { %v6170_v56 = vadd.f32 %v6169_v52, %v6168_v4  ;;  %v5257_v18 = vsel %vm2792_vm3, %v13688_v50, -inf  ;;  %v6174_v55 = vrot.slane %v6173_v41, 4  ;;  %v5253_v54 = vmax.f32 %v5251_v60, %v5252_v46 }
 0x340   :  { %v7302_v27 = vadd.f32 %v7301_v36, %v7300_v13  ;;  %v13704_v21 = vadd.f32 %v13543_v15, %v13441_v44  ;;  %v5872_v20 = vmul.f32 1.442695, %v5716_v16  ;;  %v5874_v24 = vmul.f32 1.442695, %v5717_v42 }
 0x341   :  { %9411 = vrcp.f32 %v6170_v56  ;;  %v13710_v35 = vadd.f32 %v13543_v15, %v13447_v28  ;;  %v13712_v29 = vpop.eup %9401  ;;  %v6175_v30 = vadd.f32 %v6174_v55, %v6173_v41  ;;  %v5254_v12 = vrot.slane %v5253_v54, 1 }
 0x342   :  { %v7303_v63 = vrot.slane %v7302_v27, 1  ;;  %v5256_v9 = vsel %vm2792_vm3, %v13704_v21, -inf  ;;  %v6180_v44 = vsel %vm2792_vm3, %v13712_v29, 0.0  ;;  %9413 = vpow2.f32 %v5872_v20 }
 0x343   :  { %v13716_v47 = vpop.eup %9403  ;;  %v5258_v49 = vmax.f32 %v5256_v9, %v5257_v18  ;;  %v13722_v22 = vsel %vm2792_vm3, %v13710_v35, -inf  ;;  %v6176_v4 = vrot.slane %v6175_v30, 2  ;;  %9415 = vpow2.f32 %v5874_v24  ;;  %v15922_v9 = vld [vmem:[#allocation9_spill] sm:$0xff] }
 0x344   :  { %v13724_v28 = vadd.f32 %v7303_v63, %v7302_v27  ;;  %v6181_v40 = vsel %vm2792_vm3, %v13716_v47, 0.0  ;;  %v5255_v2 = vmax.f32 %v5253_v54, %v5254_v12  ;;  %v13730_v52 = vadd.f32 %v13543_v15, %v13453_v51 }
 0x345   :  { %v6182_v13 = vadd.f32 %v6181_v40, %v6180_v44  ;;  %v5259_v60 = vrot.slane %v5258_v49, 4  ;;  %v6177_v61 = vadd.f32 %v6176_v4, %v6175_v30  ;;  %v13736_v36 = vadd.f32 %v13543_v15, %v13458_v59  ;;  %v15921_v30 = vld [vmem:[#allocation10_spill] sm:$0xff]  ;;  %v13758_v4 = vpop.f32.mrb[122].mxu0 }
 0x346   :  { %v13732_v45 = vpop.eup %9405  ;;  %v13740_v41 = vadd.f32 %v13543_v15, %v13467_v0  ;;  %v13744_v46 = vadd.f32 %v13543_v15, %v13479_v53  ;;  %v5718_v42 = vsub.f32 %v13637_v8, %v5255_v2  ;;  %v5719_v18 = vsub.f32 %v13633_v34, %v5255_v2  ;;  %15923 = vst [vmem:[#allocation4_spill] sm:$0xff] %v13758_v4 }
 0x347   :  { %v9408_v56 = vpop.eup %9407  ;;  %v6183_v16 = vrot.slane %v6182_v13, 4  ;;  %v6189_v51 = vsel %vm2792_vm3, %v13732_v45, 0.0  ;;  %v6178_v55 = vrot.slane %v6177_v61, 1  ;;  %v5260_v54 = vmax.f32 %v5258_v49, %v5259_v60 }
 0x348   :  { %v13750_v27 = vpop.eup %9409  ;;  %v6730_v59 = vmul.f32 %v9408_v56, %v13641_v39  ;;  %v6731_v0 = vmul.f32 %v9408_v56, %v13649_v1  ;;  %v5876_v24 = vmul.f32 1.442695, %v5718_v42  ;;  %v5878_v63 = vmul.f32 1.442695, %v5719_v18 }
 0x349   :  { %v6184_v20 = vadd.f32 %v6183_v16, %v6182_v13  ;;  %v6190_v53 = vsel %vm2792_vm3, %v13750_v27, 0.0  ;;  %v6179_v44 = vadd.f32 %v6178_v55, %v6177_v61  ;;  %v5261_v1 = vrot.slane %v5260_v54, 2  ;;  %v13762_v13 = vpop.f32.mrb[123].mxu0 }
 0x34a   :  { %v7114_v12 = vmul.f32 %v15921_v30, %v6730_v59  ;;  %v7115_v8 = vmul.f32 %v15922_v9, %v6731_v0  ;;  %v6191_v34 = vadd.f32 %v6190_v53, %v6189_v51  ;;  %9417 = vpow2.f32 %v5876_v24  ;;  %15924 = vst [vmem:[#allocation116_spill] sm:$0xff] %v13762_v13  ;;  %v15925_v0 = vld [vmem:[#allocation13_spill] sm:$0xff]  ;;  %v15926_v53 = vld [vmem:[#allocation12_spill] sm:$0xff] }
 0x34b   :  { %v9412_v40 = vpop.eup %9411  ;;  %v6185_v39 = vrot.slane %v6184_v20, 2  ;;  %v5265_v49 = vsel %vm2792_vm3, %v13730_v52, -inf  ;;  %9419 = vrcp.f32 %v6179_v44 }
 0x34c   :  { %v7305_v2 = vsel %vm2792_vm3, %v7114_v12, 0.0  ;;  %v7306_v60 = vsel %vm2792_vm3, %v7115_v8, 0.0  ;;  %v6732_v56 = vmul.f32 %v9412_v40, %v13657_v58  ;;  %v6733_v61 = vmul.f32 %v9412_v40, %v13659_v32  ;;  %v13768_v16 = vpop.eup %9413 }
 0x34d   :  { %v7307_v51 = vadd.f32 %v7306_v60, %v7305_v2  ;;  %v6186_v42 = vadd.f32 %v6185_v39, %v6184_v20  ;;  %v6192_v18 = vrot.slane %v6191_v34, 4  ;;  %v13770_v59 = vpop.eup %9415  ;;  %v6198_v30 = vsel %vm2792_vm3, %v13768_v16, 0.0 }
 0x34e   :  { %v7116_v55 = vmul.f32 %v15925_v0, %v6732_v56  ;;  %v7117_v24 = vmul.f32 %v15926_v53, %v6733_v61  ;;  %9421 = vpow2.f32 %v5878_v63  ;;  %v6199_v32 = vsel %vm2792_vm3, %v13770_v59, 0.0 }
 0x34f   :  { %v7308_v12 = vrot.slane %v7307_v51, 4  ;;  %v6187_v58 = vrot.slane %v6186_v42, 1  ;;  %v6193_v9 = vadd.f32 %v6192_v18, %v6191_v34  ;;  %v6200_v44 = vadd.f32 %v6199_v32, %v6198_v30 }
 0x350   :  { %v7314_v8 = vsel %vm2792_vm3, %v7116_v55, 0.0  ;;  %v7315_v20 = vsel %vm2792_vm3, %v7117_v24, 0.0  ;;  %v5262_v40 = vmax.f32 %v5260_v54, %v5261_v1  ;;  %v5267_v63 = vmax.f32 %v5265_v49, %v13722_v22  ;;  %v13787_v22 = vpop.f32.mrb[124].mxu0 }
 0x351   :  { %v7309_v39 = vadd.f32 %v7308_v12, %v7307_v51  ;;  %v7316_v2 = vadd.f32 %v7315_v20, %v7314_v8  ;;  %v6188_v60 = vadd.f32 %v6187_v58, %v6186_v42  ;;  %v6194_v56 = vrot.slane %v6193_v9, 2  ;;  %v13793_v8 = vpop.f32.mrb[125].mxu0 }
 0x352   :  { %v6201_v61 = vrot.slane %v6200_v44, 4  ;;  %v5263_v0 = vrot.slane %v5262_v40, 1  ;;  %v5275_v34 = vsel %vm2792_vm3, %v13736_v36, -inf  ;;  %v5268_v24 = vrot.slane %v5267_v63, 4  ;;  %15927 = vst [vmem:[#allocation117_spill] sm:$0xff] %v13793_v8 }
 0x353   :  { %v7310_v18 = vrot.slane %v7309_v39, 2  ;;  %v7317_v53 = vrot.slane %v7316_v2, 4  ;;  %9423 = vrcp.f32 %v6188_v60  ;;  %v6195_v13 = vadd.f32 %v6194_v56, %v6193_v9 }
 0x354   :  { %v6202_v55 = vadd.f32 %v6201_v61, %v6200_v44  ;;  %v5264_v4 = vmax.f32 %v5262_v40, %v5263_v0  ;;  %v5274_v54 = vsel %vm2792_vm3, %v13740_v41, -inf  ;;  %v13785_v1 = vpop.eup %9417 }
 0x355   :  { %v7311_v51 = vadd.f32 %v7310_v18, %v7309_v39  ;;  %v7318_v42 = vadd.f32 %v7317_v53, %v7316_v2  ;;  %v6196_v30 = vrot.slane %v6195_v13, 1  ;;  %v5276_v12 = vmax.f32 %v5274_v54, %v5275_v34  ;;  %v9420_v20 = vpop.eup %9419 }
 0x356   :  { %v6203_v49 = vrot.slane %v6202_v55, 2  ;;  %v6207_v58 = vsel %vm2792_vm3, %v13785_v1, 0.0  ;;  %v5720_v9 = vsub.f32 %v13704_v21, %v5264_v4  ;;  %v5721_v32 = vsub.f32 %v13688_v50, %v5264_v4  ;;  %v13801_v21 = vpop.f32.mrb[126].mxu0  ;;  %v15928_v4 = vld [vmem:[#allocation16_spill] sm:$0xff] }
 0x357   :  { %v7312_v44 = vrot.slane %v7311_v51, 1  ;;  %v7319_v40 = vrot.slane %v7318_v42, 2  ;;  %v6197_v60 = vadd.f32 %v6196_v30, %v6195_v13  ;;  %v5269_v39 = vmax.f32 %v5267_v63, %v5268_v24  ;;  %v15929_v13 = vld [vmem:[#allocation14_spill] sm:$0xff]  ;;  %v13805_v8 = vpop.f32.mrb[127].mxu0 }
 0x358   :  { %v13795_v2 = vpop.eup %9421  ;;  %v6734_v56 = vmul.f32 %v9420_v20, %v13684_v48  ;;  %v6735_v61 = vmul.f32 %v9420_v20, %v13690_v33  ;;  %v6204_v0 = vadd.f32 %v6203_v49, %v6202_v55  ;;  %v5880_v34 = vmul.f32 1.442695, %v5720_v9 }
 0x359   :  { %v7313_v18 = vadd.f32 %v7312_v44, %v7311_v51  ;;  %v7320_v53 = vadd.f32 %v7319_v40, %v7318_v42  ;;  %9425 = vrcp.f32 %v6197_v60  ;;  %v6208_v50 = vsel %vm2792_vm3, %v13795_v2, 0.0 }
 0x35a   :  { %v7118_v54 = vmul.f32 %v15928_v4, %v6734_v56  ;;  %v7119_v63 = vmul.f32 %v15929_v13, %v6735_v61  ;;  %v6205_v24 = vrot.slane %v6204_v0, 1  ;;  %v6209_v30 = vadd.f32 %v6208_v50, %v6207_v58  ;;  %v15930_v50 = vld [vmem:[#allocation19_spill] sm:$0xff] }
 0x35b   :  { %v7878_v48 = vsel %vm7864_vm5, %v7313_v18, %v13724_v28  ;;  %v7321_v33 = vrot.slane %v7320_v53, 1  ;;  %9427 = vpow2.f32 %v5880_v34  ;;  %v5882_v55 = vmul.f32 1.442695, %v5721_v32 }
 0x35c   :  { %v7323_v51 = vsel %vm2792_vm3, %v7118_v54, 0.0  ;;  %v7324_v42 = vsel %vm2792_vm3, %v7119_v63, 0.0  ;;  %v6206_v49 = vadd.f32 %v6205_v24, %v6204_v0  ;;  %v6210_v9 = vrot.slane %v6209_v30, 4  ;;  %v15931_v0 = vld [vmem:[#allocation17_spill] sm:$0xff] }
 0x35d   :  { %v9424_v20 = vpop.eup %9423  ;;  %v7322_v44 = vadd.f32 %v7321_v33, %v7320_v53  ;;  %v7325_v40 = vadd.f32 %v7324_v42, %v7323_v51  ;;  %9429 = vpow2.f32 %v5882_v55  ;;  %v5270_v60 = vrot.slane %v5269_v39, 2 }
 0x35e   :  { %v6736_v58 = vmul.f32 %v9424_v20, %v13712_v29  ;;  %v6737_v56 = vmul.f32 %v9424_v20, %v13716_v47  ;;  %9431 = vrcp.f32 %v6206_v49  ;;  %v6211_v28 = vadd.f32 %v6210_v9, %v6209_v30 }
 0x35f   :  { %v7879_v61 = vsel %vm7866_vm6, %v7322_v44, %v7878_v48  ;;  %v7326_v32 = vrot.slane %v7325_v40, 4  ;;  %v5271_v34 = vmax.f32 %v5269_v39, %v5270_v60  ;;  %v5277_v18 = vrot.slane %v5276_v12, 4 }
 0x360   :  { %v7120_v4 = vmul.f32 %v15930_v50, %v6736_v58  ;;  %v7121_v54 = vmul.f32 %v15931_v0, %v6737_v56  ;;  %v6212_v13 = vrot.slane %v6211_v28, 2  ;;  %v5284_v53 = vsel %vm2792_vm3, %v13744_v46, -inf }
 0x361   :  { %v7327_v63 = vadd.f32 %v7326_v32, %v7325_v40  ;;  %v5272_v24 = vrot.slane %v5271_v34, 1  ;;  %v5278_v29 = vmax.f32 %v5276_v12, %v5277_v18  ;;  %v13820_v47 = vadd.f32 %v13543_v15, %v13484_v7 }
 0x362   :  { %v7332_v30 = vsel %vm2792_vm3, %v7120_v4, 0.0  ;;  %v7333_v39 = vsel %vm2792_vm3, %v7121_v54, 0.0  ;;  %v6213_v48 = vadd.f32 %v6212_v13, %v6211_v28  ;;  %v13826_v33 = vadd.f32 %v13543_v15, %v13492_v10  ;;  %v15932_v28 = vld [vmem:[#allocation21_spill] sm:$0xff] }
 0x363   :  { %v9426_v55 = vpop.eup %9425  ;;  %v7328_v51 = vrot.slane %v7327_v63, 2  ;;  %v7334_v42 = vadd.f32 %v7333_v39, %v7332_v30  ;;  %v5273_v49 = vmax.f32 %v5271_v34, %v5272_v24  ;;  %v5279_v9 = vrot.slane %v5278_v29, 2  ;;  %v15933_v34 = vld [vmem:[#allocation20_spill] sm:$0xff] }
 0x364   :  { %v6738_v12 = vmul.f32 %v9426_v55, %v13732_v45  ;;  %v6739_v20 = vmul.f32 %v9426_v55, %v13750_v27  ;;  %v6214_v7 = vrot.slane %v6213_v48, 1  ;;  %v5283_v44 = vsel %vm2792_vm3, %v13820_v47, -inf  ;;  %v13840_v27 = vpop.f32.mrb[128].mxu0 }
 0x365   :  { %v13832_v40 = vpop.eup %9427  ;;  %v7329_v60 = vadd.f32 %v7328_v51, %v7327_v63  ;;  %v7335_v58 = vrot.slane %v7334_v42, 4  ;;  %v5722_v10 = vsub.f32 %v13730_v52, %v5273_v49  ;;  %v5723_v56 = vsub.f32 %v13710_v35, %v5273_v49  ;;  %v13844_v24 = vpop.f32.mrb[129].mxu0 }
 0x366   :  { %v7122_v32 = vmul.f32 %v15932_v28, %v6738_v12  ;;  %v7123_v18 = vmul.f32 %v15933_v34, %v6739_v20  ;;  %v6215_v50 = vadd.f32 %v6214_v7, %v6213_v48  ;;  %v6216_v45 = vsel %vm2792_vm3, %v13832_v40, 0.0 }
 0x367   :  { %v13842_v4 = vpop.eup %9429  ;;  %v7330_v0 = vrot.slane %v7329_v60, 1  ;;  %v7336_v54 = vadd.f32 %v7335_v58, %v7334_v42  ;;  %v5884_v13 = vmul.f32 1.442695, %v5722_v10  ;;  %v5886_v63 = vmul.f32 1.442695, %v5723_v56  ;;  %v15934_v56 = vld [vmem:[#allocation24_spill] sm:$0xff] }
 0x368   :  { %v9432_v52 = vpop.eup %9431  ;;  %v7341_v35 = vsel %vm2792_vm3, %v7122_v32, 0.0  ;;  %v7342_v30 = vsel %vm2792_vm3, %v7123_v18, 0.0  ;;  %9433 = vrcp.f32 %v6215_v50  ;;  %v6217_v39 = vsel %vm2792_vm3, %v13842_v4, 0.0  ;;  %v15935_v32 = vld [vmem:[#allocation22_spill] sm:$0xff] }
 0x369   :  { %v7331_v48 = vadd.f32 %v7330_v0, %v7329_v60  ;;  %v7337_v55 = vrot.slane %v7336_v54, 2  ;;  %v7343_v51 = vadd.f32 %v7342_v30, %v7341_v35  ;;  %v6740_v49 = vmul.f32 %v9432_v52, %v13768_v16 }
 0x36a   :  { %v6741_v42 = vmul.f32 %v9432_v52, %v13770_v59  ;;  %v6218_v12 = vadd.f32 %v6217_v39, %v6216_v45  ;;  %9435 = vpow2.f32 %v5884_v13  ;;  %v5280_v20 = vmax.f32 %v5278_v29, %v5279_v9  ;;  %v13856_v59 = vpop.f32.mrb[130].mxu0 }
 0x36b   :  { %v7880_v7 = vsel %vm7868_vm7, %v7331_v48, %v7879_v61  ;;  %v7338_v58 = vadd.f32 %v7337_v55, %v7336_v54  ;;  %v7344_v10 = vrot.slane %v7343_v51, 4  ;;  %v7124_v28 = vmul.f32 %v15934_v56, %v6740_v49  ;;  %v13861_v54 = vpop.f32.mrb[131].mxu0 }
 0x36c   :  { %v7125_v34 = vmul.f32 %v15935_v32, %v6741_v42  ;;  %v6219_v18 = vrot.slane %v6218_v12, 4  ;;  %9437 = vpow2.f32 %v5886_v63  ;;  %v5281_v60 = vrot.slane %v5280_v20, 1 }
 0x36d   :  { %v7339_v50 = vrot.slane %v7338_v58, 1  ;;  %v7345_v0 = vadd.f32 %v7344_v10, %v7343_v51  ;;  %v7350_v16 = vsel %vm2792_vm3, %v7124_v28, 0.0  ;;  %v5285_v35 = vmax.f32 %v5283_v44, %v5284_v53 }
 0x36e   :  { %v7351_v29 = vsel %vm2792_vm3, %v7125_v34, 0.0  ;;  %v6220_v9 = vadd.f32 %v6219_v18, %v6218_v12  ;;  %v5282_v61 = vmax.f32 %v5280_v20, %v5281_v60  ;;  %v5293_v45 = vsel %vm2792_vm3, %v13826_v33, -inf }
 0x36f   :  { %v7340_v13 = vadd.f32 %v7339_v50, %v7338_v58  ;;  %v7346_v52 = vrot.slane %v7345_v0, 2  ;;  %v7352_v63 = vadd.f32 %v7351_v29, %v7350_v16  ;;  %v5286_v30 = vrot.slane %v5285_v35, 4 }
 0x370   :  { %v6221_v39 = vrot.slane %v6220_v9, 2  ;;  %v5724_v48 = vsub.f32 %v13740_v41, %v5282_v61  ;;  %v5725_v53 = vsub.f32 %v13736_v36, %v5282_v61  ;;  %v13867_v44 = vadd.f32 %v13543_v15, %v13496_v17 }
 0x371   :  { %v7881_v55 = vsel %vm7870_vm8, %v7340_v13, %v7880_v7  ;;  %v7347_v51 = vadd.f32 %v7346_v52, %v7345_v0  ;;  %v7353_v49 = vrot.slane %v7352_v63, 4  ;;  %v5287_v42 = vmax.f32 %v5285_v35, %v5286_v30  ;;  %v15936_v0 = vld [vmem:[#allocation26_spill] sm:$0xff]  ;;  %v15937_v35 = vld [vmem:[#allocation25_spill] sm:$0xff]  ;;  %v13882_v13 = vpop.f32.mrb[132].mxu0 }
 0x372   :  { %v9434_v12 = vpop.eup %9433  ;;  %v6222_v20 = vadd.f32 %v6221_v39, %v6220_v9  ;;  %v5888_v58 = vmul.f32 1.442695, %v5724_v48  ;;  %v5890_v10 = vmul.f32 1.442695, %v5725_v53  ;;  %v5292_v56 = vsel %vm2792_vm3, %v13867_v44, -inf }
 0x373   :  { %v7348_v28 = vrot.slane %v7347_v51, 1  ;;  %v7354_v41 = vadd.f32 %v7353_v49, %v7352_v63  ;;  %v6742_v36 = vmul.f32 %v9434_v12, %v13785_v1  ;;  %v6743_v32 = vmul.f32 %v9434_v12, %v13795_v2 }
 0x374   :  { %v13874_v17 = vpop.eup %9435  ;;  %v6223_v34 = vrot.slane %v6222_v20, 1  ;;  %9439 = vpow2.f32 %v5888_v58  ;;  %v5288_v7 = vrot.slane %v5287_v42, 2  ;;  %v5294_v18 = vmax.f32 %v5292_v56, %v5293_v45 }
 0x375   :  { %v7349_v60 = vadd.f32 %v7348_v28, %v7347_v51  ;;  %v7355_v50 = vrot.slane %v7354_v41, 2  ;;  %v7126_v16 = vmul.f32 %v15936_v0, %v6742_v36  ;;  %v7127_v29 = vmul.f32 %v15937_v35, %v6743_v32  ;;  %v13903_v32 = vpop.f32.mrb[133].mxu0 }
 0x376   :  { %v13878_v9 = vpop.eup %9437  ;;  %v6224_v61 = vadd.f32 %v6223_v34, %v6222_v20  ;;  %v6225_v1 = vsel %vm2792_vm3, %v13874_v17, 0.0  ;;  %9441 = vpow2.f32 %v5890_v10  ;;  %v5289_v2 = vmax.f32 %v5287_v42, %v5288_v7 }
 0x377   :  { %v7882_v52 = vsel %vm7872_vm9, %v7349_v60, %v7881_v55  ;;  %v7356_v63 = vadd.f32 %v7355_v50, %v7354_v41  ;;  %v7359_v45 = vsel %vm2792_vm3, %v7126_v16, 0.0  ;;  %v7360_v30 = vsel %vm2792_vm3, %v7127_v29, 0.0 }
 0x378   :  { %v7361_v39 = vadd.f32 %v7360_v30, %v7359_v45  ;;  %9443 = vrcp.f32 %v6224_v61  ;;  %v6226_v48 = vsel %vm2792_vm3, %v13878_v9, 0.0  ;;  %v5290_v53 = vrot.slane %v5289_v2, 1 }
 0x379   :  { %v7357_v51 = vrot.slane %v7356_v63, 1  ;;  %v6227_v49 = vadd.f32 %v6226_v48, %v6225_v1  ;;  %v5295_v12 = vrot.slane %v5294_v18, 4  ;;  %v13891_v42 = vadd.f32 %v13543_v15, %v13502_v31 }
 0x37a   :  { %v7362_v20 = vrot.slane %v7361_v39, 4  ;;  %v5291_v55 = vmax.f32 %v5289_v2, %v5290_v53  ;;  %v13895_v58 = vadd.f32 %v13543_v15, %v13507_v43  ;;  %v13899_v10 = vadd.f32 %v13543_v15, %v13519_v25 }
 0x37b   :  { %v7358_v56 = vadd.f32 %v7357_v51, %v7356_v63  ;;  %v6228_v28 = vrot.slane %v6227_v49, 4  ;;  %v5296_v41 = vmax.f32 %v5294_v18, %v5295_v12  ;;  %v5302_v36 = vsel %vm2792_vm3, %v13891_v42, -inf }
 0x37c   :  { %v7363_v31 = vadd.f32 %v7362_v20, %v7361_v39  ;;  %v5726_v34 = vsub.f32 %v13820_v47, %v5291_v55  ;;  %v5727_v7 = vsub.f32 %v13744_v46, %v5291_v55  ;;  %v5301_v43 = vsel %vm2792_vm3, %v13895_v58, -inf }
 0x37d   :  { %v7883_v60 = vsel %vm7874_vm10, %v7358_v56, %v7882_v52  ;;  %v6229_v25 = vadd.f32 %v6228_v28, %v6227_v49  ;;  %v5297_v50 = vrot.slane %v5296_v41, 2  ;;  %v5303_v0 = vmax.f32 %v5301_v43, %v5302_v36  ;;  %v15939_v43 = vld [vmem:[#allocation28_spill] sm:$0xff] }
 0x37e   :  { %v13910_v16 = vpop.eup %9439  ;;  %v7364_v18 = vrot.slane %v7363_v31, 2  ;;  %v5892_v35 = vmul.f32 1.442695, %v5726_v34  ;;  %v5894_v29 = vmul.f32 1.442695, %v5727_v7  ;;  %v5311_v61 = vsel %vm2792_vm3, %v13899_v10, -inf }
 0x37f   :  { %v6230_v1 = vrot.slane %v6229_v25, 2  ;;  %v6234_v46 = vsel %vm2792_vm3, %v13910_v16, 0.0  ;;  %v5298_v47 = vmax.f32 %v5296_v41, %v5297_v50  ;;  %v5304_v2 = vrot.slane %v5303_v0, 4  ;;  %v15938_v34 = vld [vmem:[#allocation29_spill] sm:$0xff] }
 0x380   :  { %v13916_v63 = vpop.eup %9441  ;;  %v7365_v52 = vadd.f32 %v7364_v18, %v7363_v31  ;;  %9445 = vpow2.f32 %v5892_v35  ;;  %v13920_v45 = vadd.f32 %v13543_v15, %v13524_v57  ;;  %v13924_v30 = vadd.f32 %v13543_v15, %v13535_v11 }
 0x381   :  { %v6231_v39 = vadd.f32 %v6230_v1, %v6229_v25  ;;  %v6235_v48 = vsel %vm2792_vm3, %v13916_v63, 0.0  ;;  %9447 = vpow2.f32 %v5894_v29  ;;  %v5299_v53 = vrot.slane %v5298_v47, 1 }
 0x382   :  { %v9444_v51 = vpop.eup %9443  ;;  %v7366_v49 = vrot.slane %v7365_v52, 1  ;;  %v6236_v12 = vadd.f32 %v6235_v48, %v6234_v46  ;;  %v5305_v20 = vmax.f32 %v5303_v0, %v5304_v2  ;;  %v5310_v55 = vsel %vm2792_vm3, %v13920_v45, -inf  ;;  %v13954_v48 = vpop.f32.mrb[134].mxu0 }
 0x383   :  { %v6744_v57 = vmul.f32 %v9444_v51, %v13832_v40  ;;  %v6745_v56 = vmul.f32 %v9444_v51, %v13842_v4  ;;  %v6232_v28 = vrot.slane %v6231_v39, 1  ;;  %v5300_v11 = vmax.f32 %v5298_v47, %v5299_v53 }
 0x384   :  { %v7367_v15 = vadd.f32 %v7366_v49, %v7365_v52  ;;  %v6237_v41 = vrot.slane %v6236_v12, 4  ;;  %v5306_v36 = vrot.slane %v5305_v20, 2  ;;  %v5312_v31 = vmax.f32 %v5310_v55, %v5311_v61  ;;  %v13948_v52 = vld [vmem:[%s15429_s11] ss:$0 sm:$0xff] }
 0x385   :  { %v7128_v7 = vmul.f32 %v15938_v34, %v6744_v57  ;;  %v7129_v25 = vmul.f32 %v15939_v43, %v6745_v56  ;;  %v6233_v50 = vadd.f32 %v6232_v28, %v6231_v39  ;;  %v5728_v0 = vsub.f32 %v13867_v44, %v5300_v11 }
 0x386   :  { %v7884_v18 = vsel %vm7876_vm11, %v7367_v15, %v7883_v60  ;;  %v6238_v35 = vadd.f32 %v6237_v41, %v6236_v12  ;;  %v5729_v40 = vsub.f32 %v13826_v33, %v5300_v11  ;;  %v5307_v29 = vmax.f32 %v5305_v20, %v5306_v36  ;;  %v13958_v20 = vpop.f32.mrb[135].mxu0 }
 0x387   :  { %7936 = vst.msk [vmem:[%s15430_s12 + $0x8] sm:$0xff] %vm2792_vm3, %v7884_v18  ;;  %v7368_v4 = vsel %vm2792_vm3, %v7128_v7, 0.0  ;;  %v7369_v61 = vsel %vm2792_vm3, %v7129_v25, 0.0  ;;  %9449 = vrcp.f32 %v6233_v50  ;;  %v5896_v1 = vmul.f32 1.442695, %v5728_v0 }
 0x388   :  { %v7370_v46 = vadd.f32 %v7369_v61, %v7368_v4  ;;  %v6239_v47 = vrot.slane %v6238_v35, 2  ;;  %v5898_v44 = vmul.f32 1.442695, %v5729_v40  ;;  %v5308_v2 = vrot.slane %v5307_v29, 1 }
 0x389   :  { %9451 = vpow2.f32 %v5896_v1  ;;  %v5313_v60 = vrot.slane %v5312_v31, 4  ;;  %v5320_v33 = vsel %vm2792_vm3, %v13924_v30, -inf  ;;  %v13952_v39 = vadd.f32 %v13948_v52, %v13549_v19 }
 0x38a   :  { %v13956_v53 = vpop.eup %9445  ;;  %v7371_v51 = vrot.slane %v7370_v46, 4  ;;  %v6240_v49 = vadd.f32 %v6239_v47, %v6238_v35  ;;  %9453 = vpow2.f32 %v5898_v44  ;;  %v5309_v12 = vmax.f32 %v5307_v29, %v5308_v2 }
 0x38b   :  { %v13960_v55 = vpop.eup %9447  ;;  %v6243_v57 = vsel %vm2792_vm3, %v13956_v53, 0.0  ;;  %v5314_v56 = vmax.f32 %v5312_v31, %v5313_v60  ;;  %v5319_v19 = vsel %vm2792_vm3, %v13952_v39, -inf  ;;  %v13968_v28 = vadd.f32 %v13948_v52, %v13557_v3 }
 0x38c   :  { %v7372_v11 = vadd.f32 %v7371_v51, %v7370_v46  ;;  %v6241_v15 = vrot.slane %v6240_v49, 1  ;;  %v6244_v41 = vsel %vm2792_vm3, %v13960_v55, 0.0  ;;  %v5730_v36 = vsub.f32 %v13895_v58, %v5309_v12 }
 0x38d   :  { %v6245_v34 = vadd.f32 %v6244_v41, %v6243_v57  ;;  %v5731_v7 = vsub.f32 %v13891_v42, %v5309_v12  ;;  %v5315_v43 = vrot.slane %v5314_v56, 2  ;;  %v5321_v25 = vmax.f32 %v5319_v19, %v5320_v33  ;;  %v13986_v33 = vpop.f32.mrb[136].mxu0 }
 0x38e   :  { %v7373_v31 = vrot.slane %v7372_v11, 2  ;;  %v6242_v50 = vadd.f32 %v6241_v15, %v6240_v49  ;;  %v5900_v0 = vmul.f32 1.442695, %v5730_v36  ;;  %v5329_v18 = vsel %vm2792_vm3, %v13968_v28, -inf  ;;  %v13992_v57 = vpop.f32.mrb[137].mxu0 }
 0x38f   :  { %v6246_v3 = vrot.slane %v6245_v34, 4  ;;  %v5902_v35 = vmul.f32 1.442695, %v5731_v7  ;;  %v5316_v40 = vmax.f32 %v5314_v56, %v5315_v43  ;;  %v5322_v29 = vrot.slane %v5321_v25, 4 }
 0x390   :  { %v7374_v4 = vadd.f32 %v7373_v31, %v7372_v11  ;;  %9455 = vrcp.f32 %v6242_v50  ;;  %v13978_v58 = vadd.f32 %v13948_v52, %v13566_v37  ;;  %v13982_v42 = vadd.f32 %v13948_v52, %v13589_v6 }
 0x391   :  { %v9450_v61 = vpop.eup %9449  ;;  %v6247_v1 = vadd.f32 %v6246_v3, %v6245_v34  ;;  %9457 = vpow2.f32 %v5900_v0  ;;  %v5317_v46 = vrot.slane %v5316_v40, 1  ;;  %v5323_v47 = vmax.f32 %v5321_v25, %v5322_v29 }
 0x392   :  { %v7375_v44 = vrot.slane %v7374_v4, 1  ;;  %v6746_v2 = vmul.f32 %v9450_v61, %v13874_v17  ;;  %v6747_v60 = vmul.f32 %v9450_v61, %v13878_v9  ;;  %9459 = vpow2.f32 %v5902_v35  ;;  %v15940_v17 = vld [vmem:[#allocation31_spill] sm:$0xff] }
 0x393   :  { %v13988_v51 = vpop.eup %9451  ;;  %v6248_v37 = vrot.slane %v6247_v1, 2  ;;  %v5318_v49 = vmax.f32 %v5316_v40, %v5317_v46  ;;  %v5324_v12 = vrot.slane %v5323_v47, 2  ;;  %v5328_v6 = vsel %vm2792_vm3, %v13978_v58, -inf  ;;  %v15941_v9 = vld [vmem:[#allocation95_spill] sm:$0xff] }
 0x394   :  { %v13994_v56 = vpop.eup %9453  ;;  %v13996_v19 = vadd.f32 %v7375_v44, %v7374_v4  ;;  %v7130_v11 = vmul.f32 %v15940_v17, %v6746_v2  ;;  %v7131_v15 = vmul.f32 %v15941_v9, %v6747_v60  ;;  %v6252_v41 = vsel %vm2792_vm3, %v13988_v51, 0.0  ;;  %v14008_v4 = vpop.f32.mrb[138].mxu0 }
 0x395   :  { %v6249_v36 = vadd.f32 %v6248_v37, %v6247_v1  ;;  %v6253_v34 = vsel %vm2792_vm3, %v13994_v56, 0.0  ;;  %v5732_v7 = vsub.f32 %v13920_v45, %v5318_v49  ;;  %v5733_v43 = vsub.f32 %v13899_v10, %v5318_v49 }
 0x396   :  { %v7377_v25 = vsel %vm2792_vm3, %v7130_v11, 0.0  ;;  %v7378_v31 = vsel %vm2792_vm3, %v7131_v15, 0.0  ;;  %v6254_v50 = vadd.f32 %v6253_v34, %v6252_v41  ;;  %v5325_v0 = vmax.f32 %v5323_v47, %v5324_v12  ;;  %v14016_v47 = vpop.f32.mrb[139].mxu0 }
 0x397   :  { %v7379_v3 = vadd.f32 %v7378_v31, %v7377_v25  ;;  %v6250_v35 = vrot.slane %v6249_v36, 1  ;;  %v5904_v40 = vmul.f32 1.442695, %v5732_v7  ;;  %v5906_v29 = vmul.f32 1.442695, %v5733_v43  ;;  %v15942_v7 = vld [vmem:[#allocation34_spill] sm:$0xff] }
 0x398   :  { %v6255_v61 = vrot.slane %v6254_v50, 4  ;;  %v5326_v1 = vrot.slane %v5325_v0, 1  ;;  %v5330_v46 = vmax.f32 %v5328_v6, %v5329_v18  ;;  %v5338_v45 = vsel %vm2792_vm3, %v13982_v42, -inf  ;;  %v15943_v25 = vld [vmem:[#allocation33_spill] sm:$0xff] }
 0x399   :  { %v7380_v44 = vrot.slane %v7379_v3, 4  ;;  %v6251_v10 = vadd.f32 %v6250_v35, %v6249_v36  ;;  %9461 = vpow2.f32 %v5904_v40  ;;  %v14014_v2 = vadd.f32 %v13948_v52, %v13593_v62 }
 0x39a   :  { %v9456_v60 = vpop.eup %9455  ;;  %v6256_v37 = vadd.f32 %v6255_v61, %v6254_v50  ;;  %9463 = vpow2.f32 %v5906_v29  ;;  %v5327_v49 = vmax.f32 %v5325_v0, %v5326_v1  ;;  %v5331_v12 = vrot.slane %v5330_v46, 4 }
 0x39b   :  { %v14018_v17 = vpop.eup %9457  ;;  %v7381_v18 = vadd.f32 %v7380_v44, %v7379_v3  ;;  %v6748_v6 = vmul.f32 %v9456_v60, %v13910_v16  ;;  %v6749_v11 = vmul.f32 %v9456_v60, %v13916_v63  ;;  %9465 = vrcp.f32 %v6251_v10 }
 0x39c   :  { %v14022_v9 = vpop.eup %9459  ;;  %v6257_v15 = vrot.slane %v6256_v37, 2  ;;  %v6261_v62 = vsel %vm2792_vm3, %v14018_v17, 0.0  ;;  %v5734_v41 = vsub.f32 %v13952_v39, %v5327_v49  ;;  %v5735_v36 = vsub.f32 %v13924_v30, %v5327_v49 }
 0x39d   :  { %v7382_v34 = vrot.slane %v7381_v18, 2  ;;  %v7132_v43 = vmul.f32 %v15942_v7, %v6748_v6  ;;  %v7133_v31 = vmul.f32 %v15943_v25, %v6749_v11  ;;  %v6262_v16 = vsel %vm2792_vm3, %v14022_v9, 0.0 }
 0x39e   :  { %v6258_v63 = vadd.f32 %v6257_v15, %v6256_v37  ;;  %v6263_v50 = vadd.f32 %v6262_v16, %v6261_v62  ;;  %v5908_v0 = vmul.f32 1.442695, %v5734_v41  ;;  %v5910_v3 = vmul.f32 1.442695, %v5735_v36 }
 0x39f   :  { %v7383_v35 = vadd.f32 %v7382_v34, %v7381_v18  ;;  %v7386_v40 = vsel %vm2792_vm3, %v7132_v43, 0.0  ;;  %v7387_v29 = vsel %vm2792_vm3, %v7133_v31, 0.0  ;;  %v5332_v39 = vmax.f32 %v5330_v46, %v5331_v12  ;;  %v15944_v12 = vld [vmem:[#allocation5_spill] sm:$0xff]  ;;  %v14050_v43 = vpop.f32.mrb[140].mxu0 }
 0x3a0   :  { %v7388_v61 = vadd.f32 %v7387_v29, %v7386_v40  ;;  %v6259_v30 = vrot.slane %v6258_v63, 1  ;;  %v6264_v1 = vrot.slane %v6263_v50, 4  ;;  %9467 = vpow2.f32 %v5908_v0 }
 0x3a1   :  { %v7384_v44 = vrot.slane %v7383_v35, 1  ;;  %9469 = vpow2.f32 %v5910_v3  ;;  %v5333_v10 = vrot.slane %v5332_v39, 2  ;;  %v5337_v60 = vsel %vm2792_vm3, %v14014_v2, -inf }
 0x3a2   :  { %v7389_v37 = vrot.slane %v7388_v61, 4  ;;  %v6260_v49 = vadd.f32 %v6259_v30, %v6258_v63  ;;  %v6265_v6 = vadd.f32 %v6264_v1, %v6263_v50  ;;  %v5339_v11 = vmax.f32 %v5337_v60, %v5338_v45  ;;  %v14056_v50 = vpop.f32.mrb[141].mxu0  ;;  %v15945_v1 = vld [vmem:[#allocation38_spill] sm:$0xff] }
 0x3a3   :  { %v14036_v18 = vpop.eup %9461  ;;  %v7385_v15 = vadd.f32 %v7384_v44, %v7383_v35  ;;  %v5334_v62 = vmax.f32 %v5332_v39, %v5333_v10  ;;  %v14040_v46 = vadd.f32 %v13948_v52, %v13615_v14  ;;  %v14044_v41 = vadd.f32 %v13948_v52, %v15944_v12  ;;  %v15946_v10 = vld [vmem:[#allocation37_spill] sm:$0xff] }
 0x3a4   :  { %v14046_v36 = vpop.eup %9463  ;;  %v7390_v34 = vadd.f32 %v7389_v37, %v7388_v61  ;;  %9471 = vrcp.f32 %v6260_v49  ;;  %v6266_v7 = vrot.slane %v6265_v6, 2  ;;  %v6270_v45 = vsel %vm2792_vm3, %v14036_v18, 0.0 }
 0x3a5   :  { %v9466_v25 = vpop.eup %9465  ;;  %v7885_v31 = vsel %vm7864_vm5, %v7385_v15, %v13996_v19  ;;  %v6271_v14 = vsel %vm2792_vm3, %v14046_v36, 0.0  ;;  %v5335_v16 = vrot.slane %v5334_v62, 1  ;;  %v5340_v63 = vrot.slane %v5339_v11, 4 }
 0x3a6   :  { %v7391_v0 = vrot.slane %v7390_v34, 2  ;;  %v6750_v3 = vmul.f32 %v9466_v25, %v13956_v53  ;;  %v6751_v35 = vmul.f32 %v9466_v25, %v13960_v55  ;;  %v6267_v40 = vadd.f32 %v6266_v7, %v6265_v6 }
 0x3a7   :  { %v6272_v29 = vadd.f32 %v6271_v14, %v6270_v45  ;;  %v5336_v39 = vmax.f32 %v5334_v62, %v5335_v16  ;;  %v5341_v61 = vmax.f32 %v5339_v11, %v5340_v63  ;;  %v5347_v30 = vsel %vm2792_vm3, %v14040_v46, -inf }
 0x3a8   :  { %v7392_v19 = vadd.f32 %v7391_v0, %v7390_v34  ;;  %v7134_v44 = vmul.f32 %v15945_v1, %v6750_v3  ;;  %v7135_v60 = vmul.f32 %v15946_v10, %v6751_v35  ;;  %v6268_v37 = vrot.slane %v6267_v40, 1 }
 0x3a9   :  { %v6273_v49 = vrot.slane %v6272_v29, 4  ;;  %v5736_v15 = vsub.f32 %v13978_v58, %v5336_v39  ;;  %v5737_v53 = vsub.f32 %v13968_v28, %v5336_v39  ;;  %v5342_v12 = vrot.slane %v5341_v61, 2 }
 0x3aa   :  { %v14066_v55 = vpop.eup %9467  ;;  %v7393_v6 = vrot.slane %v7392_v19, 1  ;;  %v7395_v11 = vsel %vm2792_vm3, %v7134_v44, 0.0  ;;  %v7396_v62 = vsel %vm2792_vm3, %v7135_v60, 0.0  ;;  %v6269_v7 = vadd.f32 %v6268_v37, %v6267_v40 }
 0x3ab   :  { %v14070_v34 = vpop.eup %9469  ;;  %v7397_v45 = vadd.f32 %v7396_v62, %v7395_v11  ;;  %v6274_v25 = vadd.f32 %v6273_v49, %v6272_v29  ;;  %v6279_v14 = vsel %vm2792_vm3, %v14066_v55, 0.0  ;;  %v5912_v16 = vmul.f32 1.442695, %v5736_v15 }
 0x3ac   :  { %v7394_v58 = vadd.f32 %v7393_v6, %v7392_v19  ;;  %9473 = vrcp.f32 %v6269_v7  ;;  %v6280_v28 = vsel %vm2792_vm3, %v14070_v34, 0.0  ;;  %v5914_v63 = vmul.f32 1.442695, %v5737_v53  ;;  %v14087_v7 = vpop.f32.mrb[142].mxu0 }
 0x3ad   :  { %v7398_v0 = vrot.slane %v7397_v45, 4  ;;  %v6275_v3 = vrot.slane %v6274_v25, 2  ;;  %v6281_v35 = vadd.f32 %v6280_v28, %v6279_v14  ;;  %9475 = vpow2.f32 %v5912_v16 }
 0x3ae   :  { %v9472_v39 = vpop.eup %9471  ;;  %v7886_v40 = vsel %vm7866_vm6, %v7394_v58, %v7885_v31  ;;  %9477 = vpow2.f32 %v5914_v63  ;;  %v5343_v1 = vmax.f32 %v5341_v61, %v5342_v12  ;;  %v5346_v29 = vsel %vm2792_vm3, %v14044_v41, -inf  ;;  %v15947_v31 = vld [vmem:[#allocation45_spill] sm:$0xff] }
 0x3af   :  { %v7399_v44 = vadd.f32 %v7398_v0, %v7397_v45  ;;  %v6752_v19 = vmul.f32 %v9472_v39, %v13988_v51  ;;  %v6753_v10 = vmul.f32 %v9472_v39, %v13994_v56  ;;  %v6276_v60 = vadd.f32 %v6275_v3, %v6274_v25  ;;  %v15948_v61 = vld [vmem:[#allocation41_spill] sm:$0xff]  ;;  %v14091_v25 = vpop.f32.mrb[143].mxu0 }
 0x3b0   :  { %v6282_v37 = vrot.slane %v6281_v35, 4  ;;  %v5344_v49 = vrot.slane %v5343_v1, 1  ;;  %v5348_v15 = vmax.f32 %v5346_v29, %v5347_v30  ;;  %v14083_v53 = vadd.f32 %v13948_v52, %v13674_v5 }
 0x3b1   :  { %v7400_v6 = vrot.slane %v7399_v44, 2  ;;  %v7136_v11 = vmul.f32 %v15947_v31, %v6752_v19  ;;  %v7137_v12 = vmul.f32 %v15948_v61, %v6753_v10  ;;  %v6277_v62 = vrot.slane %v6276_v60, 1 }
 0x3b2   :  { %v6283_v45 = vadd.f32 %v6282_v37, %v6281_v35  ;;  %v5345_v51 = vmax.f32 %v5343_v1, %v5344_v49  ;;  %v5349_v14 = vrot.slane %v5348_v15, 4  ;;  %v5356_v56 = vsel %vm2792_vm3, %v14083_v53, -inf  ;;  %v14101_v49 = vpop.f32.mrb[144].mxu0 }
 0x3b3   :  { %v7401_v30 = vadd.f32 %v7400_v6, %v7399_v44  ;;  %v7404_v5 = vsel %vm2792_vm3, %v7136_v11, 0.0  ;;  %v7405_v16 = vsel %vm2792_vm3, %v7137_v12, 0.0  ;;  %v6278_v58 = vadd.f32 %v6277_v62, %v6276_v60 }
 0x3b4   :  { %v7406_v28 = vadd.f32 %v7405_v16, %v7404_v5  ;;  %v6284_v63 = vrot.slane %v6283_v45, 2  ;;  %v5738_v0 = vsub.f32 %v14014_v2, %v5345_v51  ;;  %v5739_v3 = vsub.f32 %v13982_v42, %v5345_v51 }
 0x3b5   :  { %v7402_v35 = vrot.slane %v7401_v30, 1  ;;  %9479 = vrcp.f32 %v6278_v58  ;;  %v5350_v39 = vmax.f32 %v5348_v15, %v5349_v14  ;;  %v14099_v1 = vadd.f32 %v13948_v52, %v13678_v38  ;;  %v14107_v15 = vpop.f32.mrb[145].mxu0  ;;  %v15950_v14 = vld [vmem:[#allocation46_spill] sm:$0xff] }
 0x3b6   :  { %v9474_v29 = vpop.eup %9473  ;;  %v7407_v44 = vrot.slane %v7406_v28, 4  ;;  %v6285_v19 = vadd.f32 %v6284_v63, %v6283_v45  ;;  %v5916_v10 = vmul.f32 1.442695, %v5738_v0  ;;  %v5918_v37 = vmul.f32 1.442695, %v5739_v3  ;;  %v15949_v45 = vld [vmem:[#allocation49_spill] sm:$0xff] }
 0x3b7   :  { %v14103_v60 = vpop.eup %9475  ;;  %v7403_v6 = vadd.f32 %v7402_v35, %v7401_v30  ;;  %v6754_v2 = vmul.f32 %v9474_v29, %v14018_v17  ;;  %v6755_v42 = vmul.f32 %v9474_v29, %v14022_v9  ;;  %v5351_v31 = vrot.slane %v5350_v39, 2 }
 0x3b8   :  { %v14109_v11 = vpop.eup %9477  ;;  %v7408_v38 = vadd.f32 %v7407_v44, %v7406_v28  ;;  %v6286_v61 = vrot.slane %v6285_v19, 1  ;;  %v6288_v12 = vsel %vm2792_vm3, %v14103_v60, 0.0  ;;  %9481 = vpow2.f32 %v5916_v10 }
 0x3b9   :  { %v7887_v62 = vsel %vm7868_vm7, %v7403_v6, %v7886_v40  ;;  %v7138_v51 = vmul.f32 %v15949_v45, %v6754_v2  ;;  %v7139_v30 = vmul.f32 %v15950_v14, %v6755_v42  ;;  %v6289_v17 = vsel %vm2792_vm3, %v14109_v11, 0.0  ;;  %v15951_v2 = vld [vmem:[#allocation4_spill] sm:$0xff]  ;;  %v14140_v14 = vpop.f32.mrb[146].mxu0 }
 0x3ba   :  { %v7409_v9 = vrot.slane %v7408_v38, 2  ;;  %v6287_v5 = vadd.f32 %v6286_v61, %v6285_v19  ;;  %v6290_v16 = vadd.f32 %v6289_v17, %v6288_v12  ;;  %9483 = vpow2.f32 %v5918_v37 }
 0x3bb   :  { %v7413_v58 = vsel %vm2792_vm3, %v7138_v51, 0.0  ;;  %v7414_v28 = vsel %vm2792_vm3, %v7139_v30, 0.0  ;;  %v5352_v63 = vmax.f32 %v5350_v39, %v5351_v31  ;;  %v5355_v0 = vsel %vm2792_vm3, %v14099_v1, -inf }
 0x3bc   :  { %v7410_v40 = vadd.f32 %v7409_v9, %v7408_v38  ;;  %v7415_v3 = vadd.f32 %v7414_v28, %v7413_v58  ;;  %9485 = vrcp.f32 %v6287_v5  ;;  %v6291_v35 = vrot.slane %v6290_v16, 4 }
 0x3bd   :  { %v5353_v29 = vrot.slane %v5352_v63, 1  ;;  %v5357_v44 = vmax.f32 %v5355_v0, %v5356_v56  ;;  %v14124_v10 = vadd.f32 %v13948_v52, %v13700_v26  ;;  %v14128_v19 = vadd.f32 %v13948_v52, %v13706_v23  ;;  %v15952_v0 = vld [vmem:[#allocation53_spill] sm:$0xff] }
 0x3be   :  { %v7411_v37 = vrot.slane %v7410_v40, 1  ;;  %v7416_v6 = vrot.slane %v7415_v3, 4  ;;  %v6292_v39 = vadd.f32 %v6291_v35, %v6290_v16  ;;  %v14132_v42 = vadd.f32 %v13948_v52, %v15951_v2  ;;  %v14144_v16 = vpop.f32.mrb[147].mxu0 }
 0x3bf   :  { %v9480_v31 = vpop.eup %9479  ;;  %v5354_v38 = vmax.f32 %v5352_v63, %v5353_v29  ;;  %v5358_v61 = vrot.slane %v5357_v44, 4  ;;  %v5365_v56 = vsel %vm2792_vm3, %v14124_v10, -inf  ;;  %v5364_v26 = vsel %vm2792_vm3, %v14128_v19, -inf }
 0x3c0   :  { %v7412_v12 = vadd.f32 %v7411_v37, %v7410_v40  ;;  %v7417_v45 = vadd.f32 %v7416_v6, %v7415_v3  ;;  %v6756_v23 = vmul.f32 %v9480_v31, %v14036_v18  ;;  %v6757_v51 = vmul.f32 %v9480_v31, %v14046_v36  ;;  %v15953_v18 = vld [vmem:[#allocation50_spill] sm:$0xff] }
 0x3c1   :  { %v6293_v30 = vrot.slane %v6292_v39, 2  ;;  %v5740_v17 = vsub.f32 %v14044_v41, %v5354_v38  ;;  %v5741_v9 = vsub.f32 %v14040_v46, %v5354_v38  ;;  %v5359_v5 = vmax.f32 %v5357_v44, %v5358_v61 }
 0x3c2   :  { %v14146_v58 = vpop.eup %9481  ;;  %v7888_v28 = vsel %vm7870_vm8, %v7412_v12, %v7887_v62  ;;  %v7418_v63 = vrot.slane %v7417_v45, 2  ;;  %v7140_v40 = vmul.f32 %v15952_v0, %v6756_v23  ;;  %v7141_v3 = vmul.f32 %v15953_v18, %v6757_v51 }
 0x3c3   :  { %v6294_v36 = vadd.f32 %v6293_v30, %v6292_v39  ;;  %v6297_v35 = vsel %vm2792_vm3, %v14146_v58, 0.0  ;;  %v5920_v29 = vmul.f32 1.442695, %v5740_v17  ;;  %v5922_v41 = vmul.f32 1.442695, %v5741_v9  ;;  %v14161_v9 = vpop.f32.mrb[148].mxu0 }
 0x3c4   :  { %v14153_v37 = vpop.eup %9483  ;;  %v7419_v46 = vadd.f32 %v7418_v63, %v7417_v45  ;;  %v7422_v44 = vsel %vm2792_vm3, %v7140_v40, 0.0  ;;  %v7423_v6 = vsel %vm2792_vm3, %v7141_v3, 0.0  ;;  %v5360_v2 = vrot.slane %v5359_v5, 2  ;;  %v14163_v3 = vpop.f32.mrb[149].mxu0 }
 0x3c5   :  { %v7424_v62 = vadd.f32 %v7423_v6, %v7422_v44  ;;  %v6295_v31 = vrot.slane %v6294_v36, 1  ;;  %v6298_v38 = vsel %vm2792_vm3, %v14153_v37, 0.0  ;;  %9487 = vpow2.f32 %v5920_v29  ;;  %v15954_v44 = vld [vmem:[#allocation58_spill] sm:$0xff] }
 0x3c6   :  { %v9486_v39 = vpop.eup %9485  ;;  %v7420_v61 = vrot.slane %v7419_v46, 1  ;;  %v6299_v12 = vadd.f32 %v6298_v38, %v6297_v35  ;;  %9489 = vpow2.f32 %v5922_v41  ;;  %v5361_v23 = vmax.f32 %v5359_v5, %v5360_v2  ;;  %v15955_v35 = vld [vmem:[#allocation54_spill] sm:$0xff] }
 0x3c7   :  { %v7425_v51 = vrot.slane %v7424_v62, 4  ;;  %v6758_v30 = vmul.f32 %v9486_v39, %v14066_v55  ;;  %v6759_v45 = vmul.f32 %v9486_v39, %v14070_v34  ;;  %v6296_v17 = vadd.f32 %v6295_v31, %v6294_v36 }
 0x3c8   :  { %v7421_v63 = vadd.f32 %v7420_v61, %v7419_v46  ;;  %v6300_v0 = vrot.slane %v6299_v12, 4  ;;  %v5362_v40 = vrot.slane %v5361_v23, 1  ;;  %v5366_v18 = vmax.f32 %v5364_v26, %v5365_v56 }
 0x3c9   :  { %v7426_v29 = vadd.f32 %v7425_v51, %v7424_v62  ;;  %v7142_v6 = vmul.f32 %v15954_v44, %v6758_v30  ;;  %v7143_v41 = vmul.f32 %v15955_v35, %v6759_v45  ;;  %9491 = vrcp.f32 %v6296_v17 }
 0x3ca   :  { %v7889_v5 = vsel %vm7872_vm9, %v7421_v63, %v7888_v28  ;;  %v6301_v55 = vadd.f32 %v6300_v0, %v6299_v12  ;;  %v5363_v2 = vmax.f32 %v5361_v23, %v5362_v40  ;;  %v5367_v34 = vrot.slane %v5366_v18, 4  ;;  %v15956_v28 = vld [vmem:[#allocation116_spill] sm:$0xff] }
 0x3cb   :  { %v7427_v36 = vrot.slane %v7426_v29, 2  ;;  %v7431_v31 = vsel %vm2792_vm3, %v7142_v6, 0.0  ;;  %v7432_v46 = vsel %vm2792_vm3, %v7143_v41, 0.0  ;;  %v5374_v56 = vsel %vm2792_vm3, %v14132_v42, -inf }
 0x3cc   :  { %v7433_v26 = vadd.f32 %v7432_v46, %v7431_v31  ;;  %v6302_v62 = vrot.slane %v6301_v55, 2  ;;  %v5742_v38 = vsub.f32 %v14099_v1, %v5363_v2  ;;  %v5743_v39 = vsub.f32 %v14083_v53, %v5363_v2 }
 0x3cd   :  { %v7428_v61 = vadd.f32 %v7427_v36, %v7426_v29  ;;  %v5368_v51 = vmax.f32 %v5366_v18, %v5367_v34  ;;  %v14176_v12 = vadd.f32 %v13948_v52, %v15956_v28  ;;  %v14180_v23 = vadd.f32 %v13948_v52, %v13787_v22 }
 0x3ce   :  { %v7434_v30 = vrot.slane %v7433_v26, 4  ;;  %v6303_v45 = vadd.f32 %v6302_v62, %v6301_v55  ;;  %v5924_v17 = vmul.f32 1.442695, %v5742_v38  ;;  %v5926_v63 = vmul.f32 1.442695, %v5743_v39 }
 0x3cf   :  { %v14182_v0 = vpop.eup %9487  ;;  %v7429_v40 = vrot.slane %v7428_v61, 1  ;;  %v5369_v1 = vrot.slane %v5368_v51, 2  ;;  %v5373_v53 = vsel %vm2792_vm3, %v14176_v12, -inf  ;;  %v5383_v18 = vsel %vm2792_vm3, %v14180_v23, -inf }
 0x3d0   :  { %v14188_v29 = vpop.eup %9489  ;;  %v7435_v44 = vadd.f32 %v7434_v30, %v7433_v26  ;;  %v6304_v6 = vrot.slane %v6303_v45, 1  ;;  %v6306_v22 = vsel %vm2792_vm3, %v14182_v0, 0.0  ;;  %9493 = vpow2.f32 %v5924_v17  ;;  %v15957_v26 = vld [vmem:[#allocation117_spill] sm:$0xff] }
 0x3d1   :  { %v7430_v35 = vadd.f32 %v7429_v40, %v7428_v61  ;;  %v6307_v41 = vsel %vm2792_vm3, %v14188_v29, 0.0  ;;  %9495 = vpow2.f32 %v5926_v63  ;;  %v5370_v55 = vmax.f32 %v5368_v51, %v5369_v1  ;;  %v15958_v40 = vld [vmem:[#allocation62_spill] sm:$0xff] }
 0x3d2   :  { %v7436_v2 = vrot.slane %v7435_v44, 2  ;;  %v6305_v34 = vadd.f32 %v6304_v6, %v6303_v45  ;;  %v6308_v36 = vadd.f32 %v6307_v41, %v6306_v22  ;;  %v5375_v31 = vmax.f32 %v5373_v53, %v5374_v56  ;;  %v15959_v53 = vld [vmem:[#allocation61_spill] sm:$0xff] }
 0x3d3   :  { %v9492_v46 = vpop.eup %9491  ;;  %v7890_v62 = vsel %vm7874_vm10, %v7430_v35, %v7889_v5  ;;  %v5371_v38 = vrot.slane %v5370_v55, 1  ;;  %v14197_v39 = vadd.f32 %v13948_v52, %v15957_v26  ;;  %v14201_v61 = vadd.f32 %v13948_v52, %v13801_v21 }
 0x3d4   :  { %v7437_v28 = vadd.f32 %v7436_v2, %v7435_v44  ;;  %v6760_v30 = vmul.f32 %v9492_v46, %v14103_v60  ;;  %v6761_v51 = vmul.f32 %v9492_v46, %v14109_v11  ;;  %9497 = vrcp.f32 %v6305_v34 }
 0x3d5   :  { %v6309_v45 = vrot.slane %v6308_v36, 4  ;;  %v5372_v56 = vmax.f32 %v5370_v55, %v5371_v38  ;;  %v5376_v17 = vrot.slane %v5375_v31, 4  ;;  %v5382_v5 = vsel %vm2792_vm3, %v14197_v39, -inf }
 0x3d6   :  { %v7438_v63 = vrot.slane %v7437_v28, 1  ;;  %v7144_v1 = vmul.f32 %v15958_v40, %v6760_v30  ;;  %v7145_v6 = vmul.f32 %v15959_v53, %v6761_v51  ;;  %v5384_v22 = vmax.f32 %v5382_v5, %v5383_v18  ;;  %v14213_v30 = vpop.f32.mrb[150].mxu0 }
 0x3d7   :  { %v6310_v21 = vadd.f32 %v6309_v45, %v6308_v36  ;;  %v5744_v44 = vsub.f32 %v14128_v19, %v5372_v56  ;;  %v5745_v60 = vsub.f32 %v14124_v10, %v5372_v56  ;;  %v5377_v35 = vmax.f32 %v5375_v31, %v5376_v17  ;;  %v14220_v31 = vpop.f32.mrb[151].mxu0 }
 0x3d8   :  { %v7439_v11 = vadd.f32 %v7438_v63, %v7437_v28  ;;  %v7440_v41 = vsel %vm2792_vm3, %v7144_v1, 0.0  ;;  %v7441_v55 = vsel %vm2792_vm3, %v7145_v6, 0.0  ;;  %v5385_v2 = vrot.slane %v5384_v22, 4 }
 0x3d9   :  { %v7442_v34 = vadd.f32 %v7441_v55, %v7440_v41  ;;  %v6311_v46 = vrot.slane %v6310_v21, 2  ;;  %v5928_v38 = vmul.f32 1.442695, %v5744_v44  ;;  %v5930_v26 = vmul.f32 1.442695, %v5745_v60 }
 0x3da   :  { %v14215_v51 = vpop.eup %9493  ;;  %v7891_v18 = vsel %vm7876_vm11, %v7439_v11, %v7890_v62  ;;  %v5378_v19 = vrot.slane %v5377_v35, 2  ;;  %v5386_v36 = vmax.f32 %v5384_v22, %v5385_v2  ;;  %v5392_v10 = vsel %vm2792_vm3, %v14201_v61, -inf }
 0x3db   :  { %v14222_v28 = vpop.eup %9495  ;;  %7937 = vst.msk [vmem:[%s15430_s12 + $0x10] sm:$0xff] %vm2792_vm3, %v7891_v18  ;;  %v7443_v45 = vrot.slane %v7442_v34, 4  ;;  %v6312_v56 = vadd.f32 %v6311_v46, %v6310_v21  ;;  %v6315_v17 = vsel %vm2792_vm3, %v14215_v51, 0.0  ;;  %9499 = vpow2.f32 %v5928_v38  ;;  %v15960_v18 = vld [vmem:[#allocation66_spill] sm:$0xff] }
 0x3dc   :  { %v6316_v62 = vsel %vm2792_vm3, %v14222_v28, 0.0  ;;  %9501 = vpow2.f32 %v5930_v26  ;;  %v5379_v5 = vmax.f32 %v5377_v35, %v5378_v19  ;;  %v5387_v63 = vrot.slane %v5386_v36, 2  ;;  %v15961_v19 = vld [vmem:[#allocation98_spill] sm:$0xff] }
 0x3dd   :  { %v7444_v40 = vadd.f32 %v7443_v45, %v7442_v34  ;;  %v6313_v1 = vrot.slane %v6312_v56, 1  ;;  %v6317_v53 = vadd.f32 %v6316_v62, %v6315_v17  ;;  %v14234_v6 = vadd.f32 %v13948_v52, %v13805_v8 }
 0x3de   :  { %v9498_v22 = vpop.eup %9497  ;;  %v5380_v44 = vrot.slane %v5379_v5, 1  ;;  %v5388_v21 = vmax.f32 %v5386_v36, %v5387_v63  ;;  %v14238_v60 = vadd.f32 %v13948_v52, %v13840_v27  ;;  %v14242_v11 = vadd.f32 %v13948_v52, %v13844_v24  ;;  %v14250_v24 = vpop.f32.mrb[152].mxu0 }
 0x3df   :  { %v7445_v35 = vrot.slane %v7444_v40, 2  ;;  %v6762_v41 = vmul.f32 %v9498_v22, %v14146_v58  ;;  %v6763_v55 = vmul.f32 %v9498_v22, %v14153_v37  ;;  %v6314_v2 = vadd.f32 %v6313_v1, %v6312_v56  ;;  %v14254_v17 = vpop.f32.mrb[153].mxu0 }
 0x3e0   :  { %v6318_v34 = vrot.slane %v6317_v53, 4  ;;  %v5381_v8 = vmax.f32 %v5379_v5, %v5380_v44  ;;  %v5389_v46 = vrot.slane %v5388_v21, 1  ;;  %v5391_v38 = vsel %vm2792_vm3, %v14234_v6, -inf }
 0x3e1   :  { %v7446_v26 = vadd.f32 %v7445_v35, %v7444_v40  ;;  %v7146_v27 = vmul.f32 %v15960_v18, %v6762_v41  ;;  %v7147_v36 = vmul.f32 %v15961_v19, %v6763_v55  ;;  %9503 = vrcp.f32 %v6314_v2 }
 0x3e2   :  { %v6319_v45 = vadd.f32 %v6318_v34, %v6317_v53  ;;  %v5746_v58 = vsub.f32 %v14176_v12, %v5381_v8  ;;  %v5747_v37 = vsub.f32 %v14132_v42, %v5381_v8  ;;  %v5390_v56 = vmax.f32 %v5388_v21, %v5389_v46 }
 0x3e3   :  { %v7447_v62 = vrot.slane %v7446_v26, 1  ;;  %v7449_v5 = vsel %vm2792_vm3, %v7146_v27, 0.0  ;;  %v7450_v63 = vsel %vm2792_vm3, %v7147_v36, 0.0  ;;  %v5393_v40 = vmax.f32 %v5391_v38, %v5392_v10 }
 0x3e4   :  { %v7451_v1 = vadd.f32 %v7450_v63, %v7449_v5  ;;  %v6320_v22 = vrot.slane %v6319_v45, 2  ;;  %v5932_v44 = vmul.f32 1.442695, %v5746_v58  ;;  %v5934_v35 = vmul.f32 1.442695, %v5747_v37 }
 0x3e5   :  { %v14258_v41 = vpop.eup %9499  ;;  %v7448_v53 = vadd.f32 %v7447_v62, %v7446_v26  ;;  %v5748_v12 = vsub.f32 %v14197_v39, %v5390_v56  ;;  %v5749_v42 = vsub.f32 %v14180_v23, %v5390_v56  ;;  %v5394_v21 = vrot.slane %v5393_v40, 4  ;;  %v14276_v56 = vpop.f32.mrb[154].mxu0 }
 0x3e6   :  { %v14262_v55 = vpop.eup %9501  ;;  %v7452_v2 = vrot.slane %v7451_v1, 4  ;;  %v6321_v34 = vadd.f32 %v6320_v22, %v6319_v45  ;;  %v6324_v8 = vsel %vm2792_vm3, %v14258_v41, 0.0  ;;  %9505 = vpow2.f32 %v5932_v44  ;;  %v14284_v22 = vpop.f32.mrb[155].mxu0 }
 0x3e7   :  { %v6325_v10 = vsel %vm2792_vm3, %v14262_v55, 0.0  ;;  %9507 = vpow2.f32 %v5934_v35  ;;  %v5936_v46 = vmul.f32 1.442695, %v5748_v12  ;;  %v5938_v38 = vmul.f32 1.442695, %v5749_v42 }
 0x3e8   :  { %v7453_v26 = vadd.f32 %v7452_v2, %v7451_v1  ;;  %v6322_v18 = vrot.slane %v6321_v34, 1  ;;  %v6326_v39 = vadd.f32 %v6325_v10, %v6324_v8  ;;  %v5395_v27 = vmax.f32 %v5393_v40, %v5394_v21  ;;  %v15962_v8 = vld [vmem:[#allocation97_spill] sm:$0xff] }
 0x3e9   :  { %9509 = vpow2.f32 %v5936_v46  ;;  %v5401_v23 = vsel %vm2792_vm3, %v14238_v60, -inf  ;;  %v5400_v19 = vsel %vm2792_vm3, %v14242_v11, -inf  ;;  %v14274_v36 = vadd.f32 %v13948_v52, %v13856_v59  ;;  %v15963_v46 = vld [vmem:[#allocation70_spill] sm:$0xff] }
 0x3ea   :  { %v7454_v45 = vrot.slane %v7453_v26, 2  ;;  %v6323_v58 = vadd.f32 %v6322_v18, %v6321_v34  ;;  %v6327_v37 = vrot.slane %v6326_v39, 4  ;;  %9511 = vpow2.f32 %v5938_v38 }
 0x3eb   :  { %v9504_v62 = vpop.eup %9503  ;;  %v5396_v5 = vrot.slane %v5395_v27, 2  ;;  %v5402_v63 = vmax.f32 %v5400_v19, %v5401_v23  ;;  %v5410_v40 = vsel %vm2792_vm3, %v14274_v36, -inf  ;;  %v14282_v1 = vadd.f32 %v13948_v52, %v13861_v54 }
 0x3ec   :  { %v7455_v59 = vadd.f32 %v7454_v45, %v7453_v26  ;;  %v6764_v44 = vmul.f32 %v9504_v62, %v14182_v0  ;;  %v6765_v35 = vmul.f32 %v9504_v62, %v14188_v29  ;;  %9513 = vrcp.f32 %v6323_v58 }
 0x3ed   :  { %v6328_v12 = vadd.f32 %v6327_v37, %v6326_v39  ;;  %v5397_v42 = vmax.f32 %v5395_v27, %v5396_v5  ;;  %v5403_v21 = vrot.slane %v5402_v63, 4  ;;  %v5409_v2 = vsel %vm2792_vm3, %v14282_v1, -inf }
 0x3ee   :  { %v7456_v34 = vrot.slane %v7455_v59, 1  ;;  %v7148_v10 = vmul.f32 %v15962_v8, %v6764_v44  ;;  %v7149_v54 = vmul.f32 %v15963_v46, %v6765_v35  ;;  %v5411_v38 = vmax.f32 %v5409_v2, %v5410_v40 }
 0x3ef   :  { %v6329_v18 = vrot.slane %v6328_v12, 2  ;;  %v5398_v23 = vrot.slane %v5397_v42, 1  ;;  %v5404_v26 = vmax.f32 %v5402_v63, %v5403_v21  ;;  %v14294_v0 = vadd.f32 %v13948_v52, %v13882_v13 }
 0x3f0   :  { %v14296_v29 = vpop.eup %9505  ;;  %v7457_v39 = vadd.f32 %v7456_v34, %v7455_v59  ;;  %v7458_v27 = vsel %vm2792_vm3, %v7148_v10, 0.0  ;;  %v7459_v19 = vsel %vm2792_vm3, %v7149_v54, 0.0  ;;  %v5412_v45 = vrot.slane %v5411_v38, 4 }
 0x3f1   :  { %v14300_v58 = vpop.eup %9507  ;;  %v7460_v37 = vadd.f32 %v7459_v19, %v7458_v27  ;;  %v6330_v62 = vadd.f32 %v6329_v18, %v6328_v12  ;;  %v6333_v5 = vsel %vm2792_vm3, %v14296_v29, 0.0  ;;  %v5399_v63 = vmax.f32 %v5397_v42, %v5398_v23 }
 0x3f2   :  { %v7892_v40 = vsel %vm7864_vm5, %v7457_v39, %v7448_v53  ;;  %v6334_v13 = vsel %vm2792_vm3, %v14300_v58, 0.0  ;;  %v5405_v52 = vrot.slane %v5404_v26, 2  ;;  %v5413_v59 = vmax.f32 %v5411_v38, %v5412_v45 }
 0x3f3   :  { %v14307_v44 = vpop.eup %9509  ;;  %v7461_v35 = vrot.slane %v7460_v37, 4  ;;  %v6331_v21 = vrot.slane %v6330_v62, 1  ;;  %v6335_v2 = vadd.f32 %v6334_v13, %v6333_v5  ;;  %v5750_v34 = vsub.f32 %v14234_v6, %v5399_v63 }
 0x3f4   :  { %v14310_v8 = vpop.eup %9511  ;;  %v6342_v12 = vsel %vm2792_vm3, %v14307_v44, 0.0  ;;  %v5751_v42 = vsub.f32 %v14201_v61, %v5399_v63  ;;  %v5406_v53 = vmax.f32 %v5404_v26, %v5405_v52  ;;  %v5414_v10 = vrot.slane %v5413_v59, 2  ;;  %v15964_v52 = vld [vmem:[#allocation74_spill] sm:$0xff] }
 0x3f5   :  { %v7462_v46 = vadd.f32 %v7461_v35, %v7460_v37  ;;  %v6332_v54 = vadd.f32 %v6331_v21, %v6330_v62  ;;  %v6336_v18 = vrot.slane %v6335_v2, 4  ;;  %v6343_v38 = vsel %vm2792_vm3, %v14310_v8, 0.0  ;;  %v14319_v62 = vpop.f32.mrb[156].mxu0  ;;  %v15965_v21 = vld [vmem:[#allocation73_spill] sm:$0xff] }
 0x3f6   :  { %v9514_v23 = vpop.eup %9513  ;;  %v6344_v39 = vadd.f32 %v6343_v38, %v6342_v12  ;;  %v5940_v27 = vmul.f32 1.442695, %v5750_v34  ;;  %v5942_v19 = vmul.f32 1.442695, %v5751_v42  ;;  %v5407_v6 = vrot.slane %v5406_v53, 1  ;;  %v14323_v34 = vpop.f32.mrb[157].mxu0 }
 0x3f7   :  { %v7463_v45 = vrot.slane %v7462_v46, 2  ;;  %v6766_v5 = vmul.f32 %v9514_v23, %v14215_v51  ;;  %v6767_v13 = vmul.f32 %v9514_v23, %v14222_v28  ;;  %9515 = vrcp.f32 %v6332_v54  ;;  %15966 = vst [vmem:[#allocation118_spill] sm:$0xff] %v14323_v34 }
 0x3f8   :  { %v6337_v61 = vadd.f32 %v6336_v18, %v6335_v2  ;;  %v6345_v26 = vrot.slane %v6344_v39, 4  ;;  %9517 = vpow2.f32 %v5940_v27  ;;  %v5408_v37 = vmax.f32 %v5406_v53, %v5407_v6 }
 0x3f9   :  { %v7464_v63 = vadd.f32 %v7463_v45, %v7462_v46  ;;  %v7150_v35 = vmul.f32 %v15964_v52, %v6766_v5  ;;  %v7151_v12 = vmul.f32 %v15965_v21, %v6767_v13  ;;  %9519 = vpow2.f32 %v5942_v19 }
 0x3fa   :  { %v6338_v42 = vrot.slane %v6337_v61, 2  ;;  %v6346_v38 = vadd.f32 %v6345_v26, %v6344_v39  ;;  %v5752_v51 = vsub.f32 %v14242_v11, %v5408_v37  ;;  %v5753_v28 = vsub.f32 %v14238_v60, %v5408_v37  ;;  %v14331_v60 = vpop.f32.mrb[158].mxu0 }
 0x3fb   :  { %v7465_v2 = vrot.slane %v7464_v63, 1  ;;  %v7467_v54 = vsel %vm2792_vm3, %v7150_v35, 0.0  ;;  %v7468_v53 = vsel %vm2792_vm3, %v7151_v12, 0.0  ;;  %v5415_v18 = vmax.f32 %v5413_v59, %v5414_v10  ;;  %15967 = vst [vmem:[#allocation119_spill] sm:$0xff] %v14331_v60  ;;  %v14337_v10 = vld [vmem:[%s15429_s11] ss:$0 sm:$0xff] }
 0x3fc   :  { %v7469_v46 = vadd.f32 %v7468_v53, %v7467_v54  ;;  %v6339_v23 = vadd.f32 %v6338_v42, %v6337_v61  ;;  %v6347_v27 = vrot.slane %v6346_v38, 2  ;;  %v5944_v6 = vmul.f32 1.442695, %v5752_v51 }
 0x3fd   :  { %v7466_v45 = vadd.f32 %v7465_v2, %v7464_v63  ;;  %v5946_v19 = vmul.f32 1.442695, %v5753_v28  ;;  %v5416_v5 = vrot.slane %v5415_v18, 1  ;;  %v5419_v39 = vsel %vm2792_vm3, %v14294_v0, -inf }
 0x3fe   :  { %v7470_v13 = vrot.slane %v7469_v46, 4  ;;  %v6340_v11 = vrot.slane %v6339_v23, 1  ;;  %v6348_v26 = vadd.f32 %v6347_v27, %v6346_v38  ;;  %9521 = vpow2.f32 %v5944_v6  ;;  %v15970_v6 = vld [vmem:[#allocation78_spill] sm:$0xff] }
 0x3ff   :  { %v7893_v37 = vsel %vm7866_vm6, %v7466_v45, %v7892_v40  ;;  %9523 = vpow2.f32 %v5946_v19  ;;  %v5417_v59 = vmax.f32 %v5415_v18, %v5416_v5  ;;  %v14341_v61 = vadd.f32 %v14337_v10, %v13903_v32  ;;  %v14355_v32 = vpop.f32.mrb[159].mxu0 }
 0x400   :  { %v7471_v63 = vadd.f32 %v7470_v13, %v7469_v46  ;;  %v6341_v52 = vadd.f32 %v6340_v11, %v6339_v23  ;;  %v6349_v35 = vrot.slane %v6348_v26, 1  ;;  %v14345_v21 = vadd.f32 %v14337_v10, %v13954_v48  ;;  %15968 = vst [vmem:[#allocation8_spill] sm:$0xff] %v14355_v32  ;;  %v15969_v23 = vld [vmem:[#allocation81_spill] sm:$0xff] }
 0x401   :  { %v9516_v12 = vpop.eup %9515  ;;  %v5754_v40 = vsub.f32 %v14282_v1, %v5417_v59  ;;  %v5755_v42 = vsub.f32 %v14274_v36, %v5417_v59  ;;  %v5418_v38 = vsel %vm2792_vm3, %v14341_v61, -inf  ;;  %v14353_v51 = vadd.f32 %v14337_v10, %v13958_v20 }
 0x402   :  { %v14357_v28 = vpop.eup %9517  ;;  %v7472_v2 = vrot.slane %v7471_v63, 2  ;;  %v6768_v48 = vmul.f32 %v9516_v12, %v14258_v41  ;;  %v6769_v54 = vmul.f32 %v9516_v12, %v14262_v55  ;;  %9525 = vrcp.f32 %v6341_v52 }
 0x403   :  { %v14361_v1 = vpop.eup %9519  ;;  %v6350_v36 = vadd.f32 %v6349_v35, %v6348_v26  ;;  %v6351_v53 = vsel %vm2792_vm3, %v14357_v28, 0.0  ;;  %v5948_v18 = vmul.f32 1.442695, %v5754_v40  ;;  %v5950_v46 = vmul.f32 1.442695, %v5755_v42 }
 0x404   :  { %v7473_v20 = vadd.f32 %v7472_v2, %v7471_v63  ;;  %v7152_v27 = vmul.f32 %v15969_v23, %v6768_v48  ;;  %v7153_v45 = vmul.f32 %v15970_v6, %v6769_v54  ;;  %v6352_v19 = vsel %vm2792_vm3, %v14361_v1, 0.0 }
 0x405   :  { %9527 = vrcp.f32 %v6350_v36  ;;  %v6353_v41 = vadd.f32 %v6352_v19, %v6351_v53  ;;  %v5420_v55 = vmax.f32 %v5418_v38, %v5419_v39  ;;  %v5428_v5 = vsel %vm2792_vm3, %v14345_v21, -inf  ;;  %v14385_v38 = vpop.f32.mrb[160].mxu0 }
 0x406   :  { %v7474_v13 = vrot.slane %v7473_v20, 1  ;;  %v7476_v11 = vsel %vm2792_vm3, %v7152_v27, 0.0  ;;  %v7477_v26 = vsel %vm2792_vm3, %v7153_v45, 0.0  ;;  %9529 = vpow2.f32 %v5948_v18  ;;  %15971 = vst [vmem:[#allocation7_spill] sm:$0xff] %v14385_v38  ;;  %v14396_v45 = vpop.f32.mrb[161].mxu0 }
 0x407   :  { %v7478_v59 = vadd.f32 %v7477_v26, %v7476_v11  ;;  %v6354_v63 = vrot.slane %v6353_v41, 4  ;;  %9531 = vpow2.f32 %v5950_v46  ;;  %v5421_v52 = vrot.slane %v5420_v55, 4  ;;  %15972 = vst [vmem:[#allocation10_spill] sm:$0xff] %v14396_v45 }
 0x408   :  { %v14373_v35 = vpop.eup %9521  ;;  %v7475_v12 = vadd.f32 %v7474_v13, %v7473_v20  ;;  %v5427_v40 = vsel %vm2792_vm3, %v14353_v51, -inf  ;;  %v14379_v39 = vadd.f32 %v14337_v10, %v13986_v33  ;;  %v14383_v42 = vadd.f32 %v14337_v10, %v13992_v57 }
 0x409   :  { %v14387_v2 = vpop.eup %9523  ;;  %v7479_v48 = vrot.slane %v7478_v59, 4  ;;  %v6355_v54 = vadd.f32 %v6354_v63, %v6353_v41  ;;  %v6360_v36 = vsel %vm2792_vm3, %v14373_v35, 0.0  ;;  %v5422_v53 = vmax.f32 %v5420_v55, %v5421_v52 }
 0x40a   :  { %v7894_v18 = vsel %vm7868_vm7, %v7475_v12, %v7893_v37  ;;  %v6361_v33 = vsel %vm2792_vm3, %v14387_v2, 0.0  ;;  %v5429_v46 = vmax.f32 %v5427_v40, %v5428_v5  ;;  %v5437_v57 = vsel %vm2792_vm3, %v14379_v39, -inf }
 0x40b   :  { %v7480_v20 = vadd.f32 %v7479_v48, %v7478_v59  ;;  %v6356_v23 = vrot.slane %v6355_v54, 2  ;;  %v6362_v27 = vadd.f32 %v6361_v33, %v6360_v36  ;;  %v5423_v6 = vrot.slane %v5422_v53, 2  ;;  %v15973_v33 = vld [vmem:[#allocation85_spill] sm:$0xff] }
 0x40c   :  { %v9526_v19 = vpop.eup %9525  ;;  %v5430_v41 = vrot.slane %v5429_v46, 4  ;;  %v5436_v55 = vsel %vm2792_vm3, %v14383_v42, -inf  ;;  %v14402_v37 = vadd.f32 %v14337_v10, %v14008_v4  ;;  %v14406_v5 = vadd.f32 %v14337_v10, %v14016_v47  ;;  %v15974_v4 = vld [vmem:[#allocation82_spill] sm:$0xff] }
 0x40d   :  { %v7481_v13 = vrot.slane %v7480_v20, 2  ;;  %v6770_v11 = vmul.f32 %v9526_v19, %v14296_v29  ;;  %v6771_v26 = vmul.f32 %v9526_v19, %v14300_v58  ;;  %v6357_v59 = vadd.f32 %v6356_v23, %v6355_v54 }
 0x40e   :  { %v6363_v63 = vrot.slane %v6362_v27, 4  ;;  %v5424_v52 = vmax.f32 %v5422_v53, %v5423_v6  ;;  %v5431_v12 = vmax.f32 %v5429_v46, %v5430_v41  ;;  %v5438_v40 = vmax.f32 %v5436_v55, %v5437_v57  ;;  %v15975_v6 = vld [vmem:[#allocation88_spill] sm:$0xff]  ;;  %v15976_v41 = vld [vmem:[#allocation86_spill] sm:$0xff] }
 0x40f   :  { %v9528_v48 = vpop.eup %9527  ;;  %v7482_v36 = vadd.f32 %v7481_v13, %v7480_v20  ;;  %v7154_v45 = vmul.f32 %v15973_v33, %v6770_v11  ;;  %v7155_v38 = vmul.f32 %v15974_v4, %v6771_v26  ;;  %v6358_v32 = vrot.slane %v6357_v59, 1  ;;  %v14429_v33 = vpop.f32.mrb[162].mxu0 }
 0x410   :  { %v14412_v60 = vpop.eup %9529  ;;  %v6772_v47 = vmul.f32 %v9528_v48, %v14307_v44  ;;  %v6773_v29 = vmul.f32 %v9528_v48, %v14310_v8  ;;  %v6364_v34 = vadd.f32 %v6363_v63, %v6362_v27  ;;  %v5425_v58 = vrot.slane %v5424_v52, 1 }
 0x411   :  { %v14416_v54 = vpop.eup %9531  ;;  %v7483_v53 = vrot.slane %v7482_v36, 1  ;;  %v7485_v46 = vsel %vm2792_vm3, %v7154_v45, 0.0  ;;  %v7486_v57 = vsel %vm2792_vm3, %v7155_v38, 0.0  ;;  %v6359_v20 = vadd.f32 %v6358_v32, %v6357_v59 }
 0x412   :  { %v7487_v23 = vadd.f32 %v7486_v57, %v7485_v46  ;;  %v7156_v19 = vmul.f32 %v15975_v6, %v6772_v47  ;;  %v7157_v55 = vmul.f32 %v15976_v41, %v6773_v29  ;;  %v6365_v13 = vrot.slane %v6364_v34, 2 }
 0x413   :  { %v7484_v11 = vadd.f32 %v7483_v53, %v7482_v36  ;;  %9533 = vrcp.f32 %v6359_v20  ;;  %v6369_v44 = vsel %vm2792_vm3, %v14412_v60, 0.0  ;;  %v6370_v8 = vsel %vm2792_vm3, %v14416_v54, 0.0  ;;  %v14431_v53 = vpop.f32.mrb[163].mxu0 }
 0x414   :  { %v7488_v27 = vrot.slane %v7487_v23, 4  ;;  %v7494_v45 = vsel %vm2792_vm3, %v7156_v19, 0.0  ;;  %v7495_v38 = vsel %vm2792_vm3, %v7157_v55, 0.0  ;;  %v6366_v32 = vadd.f32 %v6365_v13, %v6364_v34 }
 0x415   :  { %v7895_v26 = vsel %vm7870_vm8, %v7484_v11, %v7894_v18  ;;  %v7496_v59 = vadd.f32 %v7495_v38, %v7494_v45  ;;  %v6371_v63 = vadd.f32 %v6370_v8, %v6369_v44  ;;  %v5426_v48 = vmax.f32 %v5424_v52, %v5425_v58  ;;  %v14435_v8 = vpop.f32.mrb[164].mxu0 }
 0x416   :  { %v7489_v36 = vadd.f32 %v7488_v27, %v7487_v23  ;;  %v6367_v4 = vrot.slane %v6366_v32, 1  ;;  %v5432_v47 = vrot.slane %v5431_v12, 2  ;;  %v5439_v29 = vrot.slane %v5438_v40, 4 }
 0x417   :  { %v7497_v46 = vrot.slane %v7496_v59, 4  ;;  %v6372_v57 = vrot.slane %v6371_v63, 4  ;;  %v5756_v20 = vsub.f32 %v14341_v61, %v5426_v48  ;;  %v5757_v6 = vsub.f32 %v14294_v0, %v5426_v48  ;;  %v14439_v61 = vpop.f32.mrb[165].mxu0 }
 0x418   :  { %v7490_v34 = vrot.slane %v7489_v36, 2  ;;  %v6368_v19 = vadd.f32 %v6367_v4, %v6366_v32  ;;  %v5433_v18 = vmax.f32 %v5431_v12, %v5432_v47  ;;  %v5440_v41 = vmax.f32 %v5438_v40, %v5439_v29 }
 0x419   :  { %v7498_v55 = vadd.f32 %v7497_v46, %v7496_v59  ;;  %v6373_v52 = vadd.f32 %v6372_v57, %v6371_v63  ;;  %v5952_v58 = vmul.f32 1.442695, %v5756_v20  ;;  %v5954_v13 = vmul.f32 1.442695, %v5757_v6 }
 0x41a   :  { %v7491_v23 = vadd.f32 %v7490_v34, %v7489_v36  ;;  %9535 = vrcp.f32 %v6368_v19  ;;  %v5434_v11 = vrot.slane %v5433_v18, 1  ;;  %v5441_v44 = vrot.slane %v5440_v41, 2 }
 0x41b   :  { %v7499_v27 = vrot.slane %v7498_v55, 2  ;;  %v6374_v45 = vrot.slane %v6373_v52, 2  ;;  %9537 = vpow2.f32 %v5952_v58  ;;  %v5446_v0 = vsel %vm2792_vm3, %v14402_v37, -inf }
 0x41c   :  { %v7492_v12 = vrot.slane %v7491_v23, 1  ;;  %9539 = vpow2.f32 %v5954_v13  ;;  %v5435_v40 = vmax.f32 %v5433_v18, %v5434_v11  ;;  %v5442_v38 = vmax.f32 %v5440_v41, %v5441_v44  ;;  %v15977_v18 = vld [vmem:[#allocation91_spill] sm:$0xff] }
 0x41d   :  { %v9534_v32 = vpop.eup %9533  ;;  %v7500_v59 = vadd.f32 %v7499_v27, %v7498_v55  ;;  %v6375_v63 = vadd.f32 %v6374_v45, %v6373_v52  ;;  %v5445_v48 = vsel %vm2792_vm3, %v14406_v5, -inf  ;;  %v14445_v36 = vadd.f32 %v14337_v10, %v14050_v43  ;;  %v15978_v55 = vld [vmem:[#allocation90_spill] sm:$0xff] }
 0x41e   :  { %v7493_v4 = vadd.f32 %v7492_v12, %v7491_v23  ;;  %v6774_v47 = vmul.f32 %v9534_v32, %v14357_v28  ;;  %v6775_v29 = vmul.f32 %v9534_v32, %v14361_v1  ;;  %v5758_v46 = vsub.f32 %v14353_v51, %v5435_v40 }
 0x41f   :  { %v7501_v57 = vrot.slane %v7500_v59, 1  ;;  %v6376_v20 = vrot.slane %v6375_v63, 1  ;;  %v5759_v6 = vsub.f32 %v14345_v21, %v5435_v40  ;;  %v5443_v34 = vrot.slane %v5442_v38, 1 }
 0x420   :  { %v7896_v19 = vsel %vm7872_vm9, %v7493_v4, %v7895_v26  ;;  %v7158_v41 = vmul.f32 %v15977_v18, %v6774_v47  ;;  %v7159_v52 = vmul.f32 %v15978_v55, %v6775_v29  ;;  %v5956_v43 = vmul.f32 1.442695, %v5758_v46  ;;  %v15979_v46 = vld [vmem:[#allocation3_spill] sm:$0xff]  ;;  %v14481_v18 = vpop.f32.mrb[166].mxu0 }
 0x421   :  { %v7502_v58 = vadd.f32 %v7501_v57, %v7500_v59  ;;  %v6377_v13 = vadd.f32 %v6376_v20, %v6375_v63  ;;  %v5958_v23 = vmul.f32 1.442695, %v5759_v6  ;;  %v5444_v28 = vmax.f32 %v5442_v38, %v5443_v34  ;;  %v15980_v20 = vld [vmem:[#allocation2_spill] sm:$0xff] }
 0x422   :  { %v7503_v1 = vsel %vm2792_vm3, %v7158_v41, 0.0  ;;  %v7504_v51 = vsel %vm2792_vm3, %v7159_v52, 0.0  ;;  %9541 = vpow2.f32 %v5956_v43  ;;  %v5447_v11 = vmax.f32 %v5445_v48, %v5446_v0  ;;  %v14485_v52 = vpop.f32.mrb[167].mxu0 }
 0x423   :  { %v14457_v21 = vsel %vm7874_vm10, %v7502_v58, %v7896_v19  ;;  %v7505_v44 = vadd.f32 %v7504_v51, %v7503_v1  ;;  %9543 = vrcp.f32 %v6377_v13  ;;  %v5760_v26 = vsub.f32 %v14383_v42, %v5444_v28 }
 0x424   :  { %v9536_v27 = vpop.eup %9535  ;;  %9545 = vpow2.f32 %v5958_v23  ;;  %v5761_v45 = vsub.f32 %v14379_v39, %v5444_v28  ;;  %v5448_v12 = vrot.slane %v5447_v11, 4  ;;  %v5455_v40 = vsel %vm2792_vm3, %v14445_v36, -inf }
 0x425   :  { %v14463_v38 = vpop.eup %9537  ;;  %v7506_v32 = vrot.slane %v7505_v44, 4  ;;  %v6776_v0 = vmul.f32 %v9536_v27, %v14373_v35  ;;  %v6777_v59 = vmul.f32 %v9536_v27, %v14387_v2  ;;  %v5960_v63 = vmul.f32 1.442695, %v5760_v26 }
 0x426   :  { %v14467_v48 = vpop.eup %9539  ;;  %v6378_v42 = vsel %vm2792_vm3, %v14463_v38, 0.0  ;;  %v5962_v4 = vmul.f32 1.442695, %v5761_v45  ;;  %v5449_v47 = vmax.f32 %v5447_v11, %v5448_v12  ;;  %v14473_v39 = vadd.f32 %v14337_v10, %v14056_v50 }
 0x427   :  { %v7507_v29 = vadd.f32 %v7506_v32, %v7505_v44  ;;  %v7160_v57 = vmul.f32 %v15979_v46, %v6776_v0  ;;  %v7161_v6 = vmul.f32 %v15980_v20, %v6777_v59  ;;  %v6379_v35 = vsel %vm2792_vm3, %v14467_v48, 0.0 }
 0x428   :  { %v6380_v2 = vadd.f32 %v6379_v35, %v6378_v42  ;;  %9547 = vpow2.f32 %v5960_v63  ;;  %v5450_v34 = vrot.slane %v5449_v47, 2  ;;  %v5454_v19 = vsel %vm2792_vm3, %v14473_v39, -inf }
 0x429   :  { %v7508_v41 = vrot.slane %v7507_v29, 2  ;;  %v7512_v50 = vsel %vm2792_vm3, %v7160_v57, 0.0  ;;  %v7513_v55 = vsel %vm2792_vm3, %v7161_v6, 0.0  ;;  %9549 = vpow2.f32 %v5962_v4  ;;  %v15981_v6 = vld [vmem:[#allocation11_spill] sm:$0xff] }
 0x42a   :  { %v7514_v43 = vadd.f32 %v7513_v55, %v7512_v50  ;;  %v6381_v58 = vrot.slane %v6380_v2, 4  ;;  %v5451_v13 = vmax.f32 %v5449_v47, %v5450_v34  ;;  %v5456_v23 = vmax.f32 %v5454_v19, %v5455_v40 }
 0x42b   :  { %v7509_v28 = vadd.f32 %v7508_v41, %v7507_v29  ;;  %v14489_v1 = vadd.f32 %v14337_v10, %v14087_v7  ;;  %v14493_v51 = vadd.f32 %v14337_v10, %v14091_v25  ;;  %v14497_v11 = vadd.f32 %v14337_v10, %v14101_v49 }
 0x42c   :  { %v14499_v44 = vpop.eup %9541  ;;  %v7515_v26 = vrot.slane %v7514_v43, 4  ;;  %v6382_v27 = vadd.f32 %v6381_v58, %v6380_v2  ;;  %v5452_v45 = vrot.slane %v5451_v13, 1  ;;  %v5457_v12 = vrot.slane %v5456_v23, 4  ;;  %v15982_v2 = vld [vmem:[#allocation6_spill] sm:$0xff] }
 0x42d   :  { %v9544_v40 = vpop.eup %9543  ;;  %v7510_v32 = vrot.slane %v7509_v28, 1  ;;  %v6387_v7 = vsel %vm2792_vm3, %v14499_v44, 0.0  ;;  %v5464_v0 = vsel %vm2792_vm3, %v14489_v1, -inf  ;;  %v5463_v25 = vsel %vm2792_vm3, %v14493_v51, -inf }
 0x42e   :  { %v14507_v59 = vpop.eup %9545  ;;  %v7516_v49 = vadd.f32 %v7515_v26, %v7514_v43  ;;  %v6778_v63 = vmul.f32 %v9544_v40, %v14412_v60  ;;  %v6779_v42 = vmul.f32 %v9544_v40, %v14416_v54  ;;  %v6383_v4 = vrot.slane %v6382_v27, 2 }
 0x42f   :  { %v7511_v47 = vadd.f32 %v7510_v32, %v7509_v28  ;;  %v6388_v29 = vsel %vm2792_vm3, %v14507_v59, 0.0  ;;  %v5453_v46 = vmax.f32 %v5451_v13, %v5452_v45  ;;  %v5458_v57 = vmax.f32 %v5456_v23, %v5457_v12 }
 0x430   :  { %v7517_v20 = vrot.slane %v7516_v49, 2  ;;  %v7162_v35 = vmul.f32 %v15981_v6, %v6778_v63  ;;  %v7163_v34 = vmul.f32 %v15982_v2, %v6779_v42  ;;  %v6384_v19 = vadd.f32 %v6383_v4, %v6382_v27  ;;  %v14531_v27 = vpop.f32.mrb[168].mxu0 }
 0x431   :  { %v7898_v41 = vsel %vm7876_vm11, %v7511_v47, %v14457_v21  ;;  %v6389_v50 = vadd.f32 %v6388_v29, %v6387_v7  ;;  %v5762_v60 = vsub.f32 %v14406_v5, %v5453_v46  ;;  %v5763_v54 = vsub.f32 %v14402_v37, %v5453_v46  ;;  %v14535_v7 = vpop.f32.mrb[169].mxu0 }
 0x432   :  { %v14519_v55 = vpop.eup %9547  ;;  %7938 = vst.msk [vmem:[%s15430_s12 + $0x18] sm:$0xff] %vm2792_vm3, %v7898_v41  ;;  %v7518_v43 = vadd.f32 %v7517_v20, %v7516_v49  ;;  %v7521_v58 = vsel %vm2792_vm3, %v7162_v35, 0.0  ;;  %v7522_v13 = vsel %vm2792_vm3, %v7163_v34, 0.0  ;;  %v6385_v23 = vrot.slane %v6384_v19, 1 }
 0x433   :  { %v14527_v28 = vpop.eup %9549  ;;  %v7523_v21 = vadd.f32 %v7522_v13, %v7521_v58  ;;  %v6390_v26 = vrot.slane %v6389_v50, 4  ;;  %v6396_v37 = vsel %vm2792_vm3, %v14519_v55, 0.0  ;;  %v5964_v5 = vmul.f32 1.442695, %v5762_v60 }
 0x434   :  { %v7519_v45 = vrot.slane %v7518_v43, 1  ;;  %v6386_v12 = vadd.f32 %v6385_v23, %v6384_v19  ;;  %v6397_v40 = vsel %vm2792_vm3, %v14527_v28, 0.0  ;;  %v5966_v32 = vmul.f32 1.442695, %v5763_v54 }
 0x435   :  { %v7524_v49 = vrot.slane %v7523_v21, 4  ;;  %v6391_v63 = vadd.f32 %v6390_v26, %v6389_v50  ;;  %v6398_v42 = vadd.f32 %v6397_v40, %v6396_v37  ;;  %9551 = vpow2.f32 %v5964_v5 }
 0x436   :  { %v7520_v4 = vadd.f32 %v7519_v45, %v7518_v43  ;;  %9553 = vrcp.f32 %v6386_v12  ;;  %v5459_v47 = vrot.slane %v5458_v57, 2  ;;  %v5465_v29 = vmax.f32 %v5463_v25, %v5464_v0 }
 0x437   :  { %v7525_v46 = vadd.f32 %v7524_v49, %v7523_v21  ;;  %v6392_v20 = vrot.slane %v6391_v63, 2  ;;  %v6399_v6 = vrot.slane %v6398_v42, 4  ;;  %9555 = vpow2.f32 %v5966_v32 }
 0x438   :  { %v5460_v35 = vmax.f32 %v5458_v57, %v5459_v47  ;;  %v5466_v2 = vrot.slane %v5465_v29, 4  ;;  %v5473_v34 = vsel %vm2792_vm3, %v14497_v11, -inf  ;;  %v14541_v19 = vadd.f32 %v14337_v10, %v14107_v15 }
 0x439   :  { %v7526_v41 = vrot.slane %v7525_v46, 2  ;;  %v6393_v50 = vadd.f32 %v6392_v20, %v6391_v63  ;;  %v6400_v60 = vadd.f32 %v6399_v6, %v6398_v42  ;;  %v14545_v54 = vadd.f32 %v14337_v10, %v14140_v14 }
 0x43a   :  { %v5461_v0 = vrot.slane %v5460_v35, 1  ;;  %v5467_v25 = vmax.f32 %v5465_v29, %v5466_v2  ;;  %v5472_v57 = vsel %vm2792_vm3, %v14541_v19, -inf  ;;  %v14551_v43 = vadd.f32 %v14337_v10, %v14144_v16 }
 0x43b   :  { %v7527_v58 = vadd.f32 %v7526_v41, %v7525_v46  ;;  %v6394_v13 = vrot.slane %v6393_v50, 1  ;;  %v6401_v15 = vrot.slane %v6400_v60, 2  ;;  %v5474_v23 = vmax.f32 %v5472_v57, %v5473_v34 }
 0x43c   :  { %v5462_v21 = vmax.f32 %v5460_v35, %v5461_v0  ;;  %v5468_v26 = vrot.slane %v5467_v25, 2  ;;  %v5482_v37 = vsel %vm2792_vm3, %v14545_v54, -inf  ;;  %v5481_v14 = vsel %vm2792_vm3, %v14551_v43, -inf }
 0x43d   :  { %v7528_v5 = vrot.slane %v7527_v58, 1  ;;  %v6395_v45 = vadd.f32 %v6394_v13, %v6393_v50  ;;  %v6402_v12 = vadd.f32 %v6401_v15, %v6400_v60  ;;  %v5475_v40 = vrot.slane %v5474_v23, 4  ;;  %v15984_v15 = vld [vmem:[#allocation15_spill] sm:$0xff] }
 0x43e   :  { %v5764_v32 = vsub.f32 %v14473_v39, %v5462_v21  ;;  %v5765_v16 = vsub.f32 %v14445_v36, %v5462_v21  ;;  %v5469_v49 = vmax.f32 %v5467_v25, %v5468_v26  ;;  %v5483_v63 = vmax.f32 %v5481_v14, %v5482_v37 }
 0x43f   :  { %v14559_v42 = vpop.eup %9551  ;;  %v7529_v47 = vadd.f32 %v7528_v5, %v7527_v58  ;;  %9557 = vrcp.f32 %v6395_v45  ;;  %v6403_v29 = vrot.slane %v6402_v12, 1  ;;  %v5476_v46 = vmax.f32 %v5474_v23, %v5475_v40  ;;  %v15983_v58 = vld [vmem:[#allocation18_spill] sm:$0xff] }
 0x440   :  { %v9554_v20 = vpop.eup %9553  ;;  %v6405_v6 = vsel %vm2792_vm3, %v14559_v42, 0.0  ;;  %v5968_v35 = vmul.f32 1.442695, %v5764_v32  ;;  %v5970_v2 = vmul.f32 1.442695, %v5765_v16  ;;  %v5470_v34 = vrot.slane %v5469_v49, 1 }
 0x441   :  { %v14563_v41 = vpop.eup %9555  ;;  %v14566_v39 = vsel %vm7864_vm5, %v7529_v47, %v7520_v4  ;;  %v6780_v36 = vmul.f32 %v9554_v20, %v14463_v38  ;;  %v6781_v50 = vmul.f32 %v9554_v20, %v14467_v48  ;;  %v6404_v60 = vadd.f32 %v6403_v29, %v6402_v12  ;;  %v14576_v48 = vpop.f32.mrb[170].mxu0 }
 0x442   :  { %v6406_v0 = vsel %vm2792_vm3, %v14563_v41, 0.0  ;;  %9559 = vpow2.f32 %v5968_v35  ;;  %v5471_v25 = vmax.f32 %v5469_v49, %v5470_v34  ;;  %v5477_v57 = vrot.slane %v5476_v46, 2  ;;  %v14580_v12 = vpop.f32.mrb[171].mxu0 }
 0x443   :  { %v7164_v13 = vmul.f32 %v15983_v58, %v6780_v36  ;;  %v7165_v23 = vmul.f32 %v15984_v15, %v6781_v50  ;;  %9561 = vrcp.f32 %v6404_v60  ;;  %v6407_v21 = vadd.f32 %v6406_v0, %v6405_v6  ;;  %v14594_v35 = vpop.f32.mrb[172].mxu0 }
 0x444   :  { %9563 = vpow2.f32 %v5970_v2  ;;  %v5766_v4 = vsub.f32 %v14493_v51, %v5471_v25  ;;  %v5767_v38 = vsub.f32 %v14489_v1, %v5471_v25  ;;  %v5478_v26 = vmax.f32 %v5476_v46, %v5477_v57  ;;  %v14598_v36 = vpop.f32.mrb[173].mxu0 }
 0x445   :  { %v7530_v37 = vsel %vm2792_vm3, %v7164_v13, 0.0  ;;  %v7531_v14 = vsel %vm2792_vm3, %v7165_v23, 0.0  ;;  %v6408_v5 = vrot.slane %v6407_v21, 4  ;;  %v5484_v45 = vrot.slane %v5483_v63, 4  ;;  %v15985_v23 = vld [vmem:[#allocation27_spill] sm:$0xff] }
 0x446   :  { %v7532_v40 = vadd.f32 %v7531_v14, %v7530_v37  ;;  %v5972_v32 = vmul.f32 1.442695, %v5766_v4  ;;  %v5974_v16 = vmul.f32 1.442695, %v5767_v38  ;;  %v5479_v49 = vrot.slane %v5478_v26, 1  ;;  %v15986_v4 = vld [vmem:[#allocation23_spill] sm:$0xff] }
 0x447   :  { %v6409_v47 = vadd.f32 %v6408_v5, %v6407_v21  ;;  %v5485_v29 = vmax.f32 %v5483_v63, %v5484_v45  ;;  %v14584_v1 = vadd.f32 %v14337_v10, %v14161_v9  ;;  %v14588_v51 = vadd.f32 %v14337_v10, %v14163_v3 }
 0x448   :  { %v7533_v46 = vrot.slane %v7532_v40, 4  ;;  %9565 = vpow2.f32 %v5972_v32  ;;  %v5480_v20 = vmax.f32 %v5478_v26, %v5479_v49  ;;  %v14592_v6 = vadd.f32 %v14337_v10, %v14213_v30 }
 0x449   :  { %v9558_v2 = vpop.eup %9557  ;;  %v6410_v34 = vrot.slane %v6409_v47, 2  ;;  %9567 = vpow2.f32 %v5974_v16  ;;  %v5486_v63 = vrot.slane %v5485_v29, 2  ;;  %v5491_v9 = vsel %vm2792_vm3, %v14584_v1, -inf }
 0x44a   :  { %v7534_v3 = vadd.f32 %v7533_v46, %v7532_v40  ;;  %v6782_v50 = vmul.f32 %v9558_v2, %v14499_v44  ;;  %v6783_v60 = vmul.f32 %v9558_v2, %v14507_v59  ;;  %v5768_v0 = vsub.f32 %v14541_v19, %v5480_v20 }
 0x44b   :  { %v6411_v30 = vadd.f32 %v6410_v34, %v6409_v47  ;;  %v5769_v25 = vsub.f32 %v14497_v11, %v5480_v20  ;;  %v5487_v57 = vmax.f32 %v5485_v29, %v5486_v63  ;;  %v5490_v58 = vsel %vm2792_vm3, %v14588_v51, -inf  ;;  %v15987_v20 = vld [vmem:[#allocation94_spill] sm:$0xff] }
 0x44c   :  { %v14606_v13 = vpop.eup %9559  ;;  %v7535_v15 = vrot.slane %v7534_v3, 2  ;;  %v7166_v21 = vmul.f32 %v15985_v23, %v6782_v50  ;;  %v7167_v38 = vmul.f32 %v15986_v4, %v6783_v60  ;;  %v5976_v26 = vmul.f32 1.442695, %v5768_v0 }
 0x44d   :  { %v9562_v44 = vpop.eup %9561  ;;  %v6412_v37 = vrot.slane %v6411_v30, 1  ;;  %v6414_v59 = vsel %vm2792_vm3, %v14606_v13, 0.0  ;;  %v5978_v19 = vmul.f32 1.442695, %v5769_v25  ;;  %v5488_v14 = vrot.slane %v5487_v57, 1 }
 0x44e   :  { %v14612_v11 = vpop.eup %9563  ;;  %v7536_v5 = vadd.f32 %v7535_v15, %v7534_v3  ;;  %v7539_v45 = vsel %vm2792_vm3, %v7166_v21, 0.0  ;;  %v7540_v40 = vsel %vm2792_vm3, %v7167_v38, 0.0  ;;  %v6784_v32 = vmul.f32 %v9562_v44, %v14519_v55  ;;  %v15988_v3 = vld [vmem:[#allocation30_spill] sm:$0xff]  ;;  %v14631_v38 = vpop.f32.mrb[174].mxu0 }
 0x44f   :  { %v7541_v16 = vadd.f32 %v7540_v40, %v7539_v45  ;;  %v6785_v49 = vmul.f32 %v9562_v44, %v14527_v28  ;;  %v6413_v47 = vadd.f32 %v6412_v37, %v6411_v30  ;;  %v6415_v29 = vsel %vm2792_vm3, %v14612_v11, 0.0 }
 0x450   :  { %v7537_v46 = vrot.slane %v7536_v5, 1  ;;  %v7168_v2 = vmul.f32 %v15987_v20, %v6784_v32  ;;  %v6416_v34 = vadd.f32 %v6415_v29, %v6414_v59  ;;  %9569 = vpow2.f32 %v5976_v26  ;;  %v14637_v59 = vpop.f32.mrb[175].mxu0 }
 0x451   :  { %v7542_v63 = vrot.slane %v7541_v16, 4  ;;  %v7169_v50 = vmul.f32 %v15988_v3, %v6785_v49  ;;  %9571 = vrcp.f32 %v6413_v47  ;;  %v5489_v60 = vmax.f32 %v5487_v57, %v5488_v14 }
 0x452   :  { %v14622_v0 = vpop.eup %9565  ;;  %v7538_v55 = vadd.f32 %v7537_v46, %v7536_v5  ;;  %v7548_v25 = vsel %vm2792_vm3, %v7168_v2, 0.0  ;;  %v6417_v28 = vrot.slane %v6416_v34, 4  ;;  %9573 = vpow2.f32 %v5978_v19 }
 0x453   :  { %v14625_v30 = vpop.eup %9567  ;;  %v7543_v15 = vadd.f32 %v7542_v63, %v7541_v16  ;;  %v7549_v23 = vsel %vm2792_vm3, %v7169_v50, 0.0  ;;  %v6423_v21 = vsel %vm2792_vm3, %v14622_v0, 0.0  ;;  %v5770_v4 = vsub.f32 %v14551_v43, %v5489_v60 }
 0x454   :  { %v7900_v57 = vsel %vm7866_vm6, %v7538_v55, %v14566_v39  ;;  %v7550_v26 = vadd.f32 %v7549_v23, %v7548_v25  ;;  %v6418_v44 = vadd.f32 %v6417_v28, %v6416_v34  ;;  %v6424_v37 = vsel %vm2792_vm3, %v14625_v30, 0.0  ;;  %v14654_v55 = vpop.f32.mrb[176].mxu0 }
 0x455   :  { %v7544_v19 = vrot.slane %v7543_v15, 2  ;;  %v6425_v14 = vadd.f32 %v6424_v37, %v6423_v21  ;;  %v5771_v5 = vsub.f32 %v14545_v54, %v5489_v60  ;;  %v5980_v45 = vmul.f32 1.442695, %v5770_v4  ;;  %v14658_v21 = vpop.f32.mrb[177].mxu0 }
 0x456   :  { %v7551_v40 = vrot.slane %v7550_v26, 4  ;;  %v6419_v32 = vrot.slane %v6418_v44, 2  ;;  %v5492_v43 = vmax.f32 %v5490_v58, %v5491_v9  ;;  %v5500_v16 = vsel %vm2792_vm3, %v14592_v6, -inf }
 0x457   :  { %v7545_v49 = vadd.f32 %v7544_v19, %v7543_v15  ;;  %v6426_v39 = vrot.slane %v6425_v14, 4  ;;  %9575 = vpow2.f32 %v5980_v45  ;;  %v5982_v47 = vmul.f32 1.442695, %v5771_v5 }
 0x458   :  { %v7552_v29 = vadd.f32 %v7551_v40, %v7550_v26  ;;  %v6420_v46 = vadd.f32 %v6419_v32, %v6418_v44  ;;  %v5493_v20 = vrot.slane %v5492_v43, 4  ;;  %v14644_v2 = vadd.f32 %v14337_v10, %v14220_v31  ;;  %v15989_v32 = vld [vmem:[#allocation96_spill] sm:$0xff] }
 0x459   :  { %v7546_v34 = vrot.slane %v7545_v49, 1  ;;  %v6427_v54 = vadd.f32 %v6426_v39, %v6425_v14  ;;  %9577 = vpow2.f32 %v5982_v47  ;;  %v14648_v9 = vadd.f32 %v14337_v10, %v14250_v24 }
 0x45a   :  { %v14650_v58 = vpop.eup %9569  ;;  %v7553_v63 = vrot.slane %v7552_v29, 2  ;;  %v6421_v3 = vrot.slane %v6420_v46, 1  ;;  %v5494_v50 = vmax.f32 %v5492_v43, %v5493_v20  ;;  %v5499_v60 = vsel %vm2792_vm3, %v14644_v2, -inf }
 0x45b   :  { %v9572_v25 = vpop.eup %9571  ;;  %v7547_v31 = vadd.f32 %v7546_v34, %v7545_v49  ;;  %v6428_v28 = vrot.slane %v6427_v54, 2  ;;  %v6432_v15 = vsel %vm2792_vm3, %v14650_v58, 0.0  ;;  %v5501_v23 = vmax.f32 %v5499_v60, %v5500_v16  ;;  %v15990_v16 = vld [vmem:[#allocation42_spill] sm:$0xff] }
 0x45c   :  { %v14660_v24 = vpop.eup %9573  ;;  %v7554_v4 = vadd.f32 %v7553_v63, %v7552_v29  ;;  %v6786_v26 = vmul.f32 %v9572_v25, %v14559_v42  ;;  %v6787_v44 = vmul.f32 %v9572_v25, %v14563_v41  ;;  %v6422_v37 = vadd.f32 %v6421_v3, %v6420_v46 }
 0x45d   :  { %v7901_v19 = vsel %vm7868_vm7, %v7547_v31, %v7900_v57  ;;  %v6429_v14 = vadd.f32 %v6428_v28, %v6427_v54  ;;  %v6433_v5 = vsel %vm2792_vm3, %v14660_v24, 0.0  ;;  %v5495_v45 = vrot.slane %v5494_v50, 2 }
 0x45e   :  { %v7555_v40 = vrot.slane %v7554_v4, 1  ;;  %v7170_v43 = vmul.f32 %v15989_v32, %v6786_v26  ;;  %v7171_v49 = vmul.f32 %v15990_v16, %v6787_v44  ;;  %9579 = vrcp.f32 %v6422_v37 }
 0x45f   :  { %v6430_v39 = vrot.slane %v6429_v14, 1  ;;  %v6434_v47 = vadd.f32 %v6433_v5, %v6432_v15  ;;  %v5496_v29 = vmax.f32 %v5494_v50, %v5495_v45  ;;  %v5502_v42 = vrot.slane %v5501_v23, 4 }
 0x460   :  { %v7556_v20 = vadd.f32 %v7555_v40, %v7554_v4  ;;  %v7557_v41 = vsel %vm2792_vm3, %v7170_v43, 0.0  ;;  %v7558_v57 = vsel %vm2792_vm3, %v7171_v49, 0.0  ;;  %v5509_v46 = vsel %vm2792_vm3, %v14648_v9, -inf }
 0x461   :  { %v14673_v34 = vpop.eup %9575  ;;  %v7559_v54 = vadd.f32 %v7558_v57, %v7557_v41  ;;  %v6431_v63 = vadd.f32 %v6430_v39, %v6429_v14  ;;  %v6435_v3 = vrot.slane %v6434_v47, 4  ;;  %v5497_v60 = vrot.slane %v5496_v29, 1  ;;  %v14696_v39 = vpop.f32.mrb[178].mxu0 }
 0x462   :  { %v7902_v25 = vsel %vm7870_vm8, %v7556_v20, %v7901_v19  ;;  %v6441_v50 = vsel %vm2792_vm3, %v14673_v34, 0.0  ;;  %v5503_v31 = vmax.f32 %v5501_v23, %v5502_v42  ;;  %v14680_v28 = vadd.f32 %v14337_v10, %v14254_v17 }
 0x463   :  { %v14682_v15 = vpop.eup %9577  ;;  %v7560_v4 = vrot.slane %v7559_v54, 4  ;;  %9581 = vrcp.f32 %v6431_v63  ;;  %v6436_v26 = vadd.f32 %v6435_v3, %v6434_v47  ;;  %v5498_v44 = vmax.f32 %v5496_v29, %v5497_v60 }
 0x464   :  { %v6442_v37 = vsel %vm2792_vm3, %v14682_v15, 0.0  ;;  %v5504_v14 = vrot.slane %v5503_v31, 2  ;;  %v5508_v19 = vsel %vm2792_vm3, %v14680_v28, -inf  ;;  %v14690_v23 = vadd.f32 %v14337_v10, %v14276_v56  ;;  %v14698_v56 = vpop.f32.mrb[179].mxu0 }
 0x465   :  { %v7561_v5 = vadd.f32 %v7560_v4, %v7559_v54  ;;  %v6437_v17 = vrot.slane %v6436_v26, 2  ;;  %v6443_v45 = vadd.f32 %v6442_v37, %v6441_v50  ;;  %v5772_v40 = vsub.f32 %v14588_v51, %v5498_v44 }
 0x466   :  { %v5773_v32 = vsub.f32 %v14584_v1, %v5498_v44  ;;  %v5505_v43 = vmax.f32 %v5503_v31, %v5504_v14  ;;  %v5510_v16 = vmax.f32 %v5508_v19, %v5509_v46  ;;  %v5518_v49 = vsel %vm2792_vm3, %v14690_v23, -inf  ;;  %v15991_v44 = vld [vmem:[#allocation65_spill] sm:$0xff] }
 0x467   :  { %v7562_v47 = vrot.slane %v7561_v5, 2  ;;  %v6438_v29 = vadd.f32 %v6437_v17, %v6436_v26  ;;  %v6444_v42 = vrot.slane %v6443_v45, 4  ;;  %v5984_v20 = vmul.f32 1.442695, %v5772_v40  ;;  %v15992_v14 = vld [vmem:[#allocation57_spill] sm:$0xff] }
 0x468   :  { %v9580_v41 = vpop.eup %9579  ;;  %v5986_v57 = vmul.f32 1.442695, %v5773_v32  ;;  %v5506_v54 = vrot.slane %v5505_v43, 1  ;;  %v5511_v63 = vrot.slane %v5510_v16, 4  ;;  %v14702_v1 = vadd.f32 %v14337_v10, %v14284_v22 }
 0x469   :  { %v7563_v51 = vadd.f32 %v7562_v47, %v7561_v5  ;;  %v6788_v46 = vmul.f32 %v9580_v41, %v14606_v13  ;;  %v6789_v3 = vmul.f32 %v9580_v41, %v14612_v11  ;;  %v6439_v60 = vrot.slane %v6438_v29, 1  ;;  %v14710_v13 = vpop.f32.mrb[180].mxu0 }
 0x46a   :  { %v6445_v50 = vadd.f32 %v6444_v42, %v6443_v45  ;;  %9583 = vpow2.f32 %v5984_v20  ;;  %v5507_v31 = vmax.f32 %v5505_v43, %v5506_v54  ;;  %v5512_v4 = vmax.f32 %v5510_v16, %v5511_v63  ;;  %v14714_v43 = vpop.f32.mrb[181].mxu0  ;;  %v15993_v54 = vld [vmem:[#allocation77_spill] sm:$0xff] }
 0x46b   :  { %v7564_v26 = vrot.slane %v7563_v51, 1  ;;  %v7172_v37 = vmul.f32 %v15991_v44, %v6788_v46  ;;  %v7173_v19 = vmul.f32 %v15992_v14, %v6789_v3  ;;  %v6440_v17 = vadd.f32 %v6439_v60, %v6438_v29 }
 0x46c   :  { %v6446_v40 = vrot.slane %v6445_v50, 2  ;;  %9585 = vpow2.f32 %v5986_v57  ;;  %v5774_v22 = vsub.f32 %v14644_v2, %v5507_v31  ;;  %v5775_v10 = vsub.f32 %v14592_v6, %v5507_v31 }
 0x46d   :  { %v9582_v11 = vpop.eup %9581  ;;  %v7565_v5 = vadd.f32 %v7564_v26, %v7563_v51  ;;  %v7566_v45 = vsel %vm2792_vm3, %v7172_v37, 0.0  ;;  %v7567_v32 = vsel %vm2792_vm3, %v7173_v19, 0.0  ;;  %9587 = vrcp.f32 %v6440_v17  ;;  %v15994_v51 = vld [vmem:[#allocation69_spill] sm:$0xff] }
 0x46e   :  { %v7568_v16 = vadd.f32 %v7567_v32, %v7566_v45  ;;  %v6790_v47 = vmul.f32 %v9582_v11, %v14622_v0  ;;  %v6791_v29 = vmul.f32 %v9582_v11, %v14625_v30  ;;  %v6447_v42 = vadd.f32 %v6446_v40, %v6445_v50  ;;  %v14726_v0 = vld [vmem:[%s15429_s11] ss:$0 sm:$0xff] }
 0x46f   :  { %v7903_v2 = vsel %vm7872_vm9, %v7565_v5, %v7902_v25  ;;  %v5988_v6 = vmul.f32 1.442695, %v5774_v22  ;;  %v5990_v20 = vmul.f32 1.442695, %v5775_v10  ;;  %v5513_v41 = vrot.slane %v5512_v4, 2  ;;  %v15995_v22 = vld [vmem:[#allocation118_spill] sm:$0xff] }
 0x470   :  { %v7569_v57 = vrot.slane %v7568_v16, 4  ;;  %v7174_v63 = vmul.f32 %v15993_v54, %v6790_v47  ;;  %v7175_v46 = vmul.f32 %v15994_v51, %v6791_v29  ;;  %v6448_v3 = vrot.slane %v6447_v42, 1  ;;  %v15996_v47 = vld [vmem:[#allocation119_spill] sm:$0xff] }
 0x471   :  { %9589 = vpow2.f32 %v5988_v6  ;;  %v5514_v60 = vmax.f32 %v5512_v4, %v5513_v41  ;;  %v5517_v31 = vsel %vm2792_vm3, %v14702_v1, -inf  ;;  %v14730_v30 = vadd.f32 %v14726_v0, %v14319_v62 }
 0x472   :  { %v7570_v25 = vadd.f32 %v7569_v57, %v7568_v16  ;;  %v7575_v50 = vsel %vm2792_vm3, %v7174_v63, 0.0  ;;  %v7576_v26 = vsel %vm2792_vm3, %v7175_v46, 0.0  ;;  %v6449_v44 = vadd.f32 %v6448_v3, %v6447_v42  ;;  %v15997_v42 = vld [vmem:[#allocation8_spill] sm:$0xff] }
 0x473   :  { %v7577_v37 = vadd.f32 %v7576_v26, %v7575_v50  ;;  %9591 = vpow2.f32 %v5990_v20  ;;  %v5515_v4 = vrot.slane %v5514_v60, 1  ;;  %v5519_v14 = vmax.f32 %v5517_v31, %v5518_v49  ;;  %v14756_v20 = vpop.f32.mrb[182].mxu0 }
 0x474   :  { %v14734_v19 = vpop.eup %9583  ;;  %v7571_v17 = vrot.slane %v7570_v25, 2  ;;  %9593 = vrcp.f32 %v6449_v44  ;;  %v5527_v40 = vsel %vm2792_vm3, %v14730_v30, -inf  ;;  %v14740_v62 = vadd.f32 %v14726_v0, %v15995_v22  ;;  %v14762_v46 = vpop.f32.mrb[183].mxu0 }
 0x475   :  { %v7578_v10 = vrot.slane %v7577_v37, 4  ;;  %v6450_v11 = vsel %vm2792_vm3, %v14734_v19, 0.0  ;;  %v5516_v5 = vmax.f32 %v5514_v60, %v5515_v4  ;;  %v5520_v45 = vrot.slane %v5519_v14, 4  ;;  %15998 = vst [vmem:[#allocation9_spill] sm:$0xff] %v14762_v46 }
 0x476   :  { %v14744_v32 = vpop.eup %9585  ;;  %v7572_v49 = vadd.f32 %v7571_v17, %v7570_v25  ;;  %v5526_v16 = vsel %vm2792_vm3, %v14740_v62, -inf  ;;  %v14750_v29 = vadd.f32 %v14726_v0, %v15996_v47  ;;  %v14754_v6 = vadd.f32 %v14726_v0, %v15997_v42  ;;  %v15999_v17 = vld [vmem:[#allocation87_spill] sm:$0xff] }
 0x477   :  { %v9588_v41 = vpop.eup %9587  ;;  %v7579_v57 = vadd.f32 %v7578_v10, %v7577_v37  ;;  %v6451_v54 = vsel %vm2792_vm3, %v14744_v32, 0.0  ;;  %v5776_v63 = vsub.f32 %v14680_v28, %v5516_v5  ;;  %v5777_v51 = vsub.f32 %v14648_v9, %v5516_v5  ;;  %v16000_v10 = vld [vmem:[#allocation99_spill] sm:$0xff] }
 0x478   :  { %v7573_v3 = vrot.slane %v7572_v49, 1  ;;  %v6792_v60 = vmul.f32 %v9588_v41, %v14650_v58  ;;  %v6793_v31 = vmul.f32 %v9588_v41, %v14660_v24  ;;  %v6452_v25 = vadd.f32 %v6451_v54, %v6450_v11 }
 0x479   :  { %v7580_v50 = vrot.slane %v7579_v57, 2  ;;  %v5992_v26 = vmul.f32 1.442695, %v5776_v63  ;;  %v5994_v44 = vmul.f32 1.442695, %v5777_v51  ;;  %v5521_v4 = vmax.f32 %v5519_v14, %v5520_v45 }
 0x47a   :  { %v7574_v37 = vadd.f32 %v7573_v3, %v7572_v49  ;;  %v7176_v22 = vmul.f32 %v15999_v17, %v6792_v60  ;;  %v7177_v47 = vmul.f32 %v16000_v10, %v6793_v31  ;;  %v6453_v28 = vrot.slane %v6452_v25, 4 }
 0x47b   :  { %v14768_v42 = vpop.eup %9589  ;;  %v7581_v9 = vadd.f32 %v7580_v50, %v7579_v57  ;;  %9595 = vpow2.f32 %v5992_v26  ;;  %v5522_v5 = vrot.slane %v5521_v4, 2  ;;  %v5528_v46 = vmax.f32 %v5526_v16, %v5527_v40 }
 0x47c   :  { %v7904_v58 = vsel %vm7874_vm10, %v7574_v37, %v7903_v2  ;;  %v7584_v24 = vsel %vm2792_vm3, %v7176_v22, 0.0  ;;  %v7585_v11 = vsel %vm2792_vm3, %v7177_v47, 0.0  ;;  %v6454_v41 = vadd.f32 %v6453_v28, %v6452_v25  ;;  %v16001_v22 = vld [vmem:[#allocation93_spill] sm:$0xff]  ;;  %v16002_v47 = vld [vmem:[#allocation92_spill] sm:$0xff] }
 0x47d   :  { %v14773_v14 = vpop.eup %9591  ;;  %v7582_v45 = vrot.slane %v7581_v9, 1  ;;  %v7586_v49 = vadd.f32 %v7585_v11, %v7584_v24  ;;  %v6459_v54 = vsel %vm2792_vm3, %v14768_v42, 0.0  ;;  %9597 = vpow2.f32 %v5994_v44  ;;  %v14792_v11 = vpop.f32.mrb[184].mxu0 }
 0x47e   :  { %v9594_v63 = vpop.eup %9593  ;;  %v6455_v57 = vrot.slane %v6454_v41, 2  ;;  %v6460_v40 = vsel %vm2792_vm3, %v14773_v14, 0.0  ;;  %v5523_v16 = vmax.f32 %v5521_v4, %v5522_v5  ;;  %v5529_v2 = vrot.slane %v5528_v46, 4 }
 0x47f   :  { %v7583_v51 = vadd.f32 %v7582_v45, %v7581_v9  ;;  %v7587_v3 = vrot.slane %v7586_v49, 4  ;;  %v6794_v60 = vmul.f32 %v9594_v63, %v14673_v34  ;;  %v6795_v31 = vmul.f32 %v9594_v63, %v14682_v15  ;;  %v14795_v63 = vpop.f32.mrb[185].mxu0 }
 0x480   :  { %v6456_v25 = vadd.f32 %v6455_v57, %v6454_v41  ;;  %v6461_v50 = vadd.f32 %v6460_v40, %v6459_v54  ;;  %v5524_v26 = vrot.slane %v5523_v16, 1  ;;  %v5530_v37 = vmax.f32 %v5528_v46, %v5529_v2 }
 0x481   :  { %v7905_v17 = vsel %vm7876_vm11, %v7583_v51, %v7904_v58  ;;  %v7588_v44 = vadd.f32 %v7587_v3, %v7586_v49  ;;  %v7178_v10 = vmul.f32 %v16001_v22, %v6794_v60  ;;  %v7179_v28 = vmul.f32 %v16002_v47, %v6795_v31 }
 0x482   :  { %7939 = vst.msk [vmem:[%s15430_s12 + $0x20] sm:$0xff] %vm2792_vm3, %v7905_v17  ;;  %v6457_v4 = vrot.slane %v6456_v25, 1  ;;  %v6462_v34 = vrot.slane %v6461_v50, 4  ;;  %v5525_v9 = vmax.f32 %v5523_v16, %v5524_v26  ;;  %v5531_v15 = vrot.slane %v5530_v37, 2 }
 0x483   :  { %v7589_v5 = vrot.slane %v7588_v44, 2  ;;  %v7593_v24 = vsel %vm2792_vm3, %v7178_v10, 0.0  ;;  %v7594_v46 = vsel %vm2792_vm3, %v7179_v28, 0.0  ;;  %v5536_v58 = vsel %vm2792_vm3, %v14750_v29, -inf }
 0x484   :  { %v7595_v41 = vadd.f32 %v7594_v46, %v7593_v24  ;;  %v6458_v45 = vadd.f32 %v6457_v4, %v6456_v25  ;;  %v6463_v49 = vadd.f32 %v6462_v34, %v6461_v50  ;;  %v5778_v54 = vsub.f32 %v14702_v1, %v5525_v9  ;;  %v16003_v46 = vld [vmem:[#allocation7_spill] sm:$0xff] }
 0x485   :  { %v14797_v57 = vpop.eup %9595  ;;  %v7590_v40 = vadd.f32 %v7589_v5, %v7588_v44  ;;  %v5779_v16 = vsub.f32 %v14690_v23, %v5525_v9  ;;  %v5532_v2 = vmax.f32 %v5530_v37, %v5531_v15  ;;  %v5535_v51 = vsel %vm2792_vm3, %v14754_v6, -inf }
 0x486   :  { %v7596_v3 = vrot.slane %v7595_v41, 4  ;;  %9599 = vrcp.f32 %v6458_v45  ;;  %v6464_v60 = vrot.slane %v6463_v49, 2  ;;  %v6468_v31 = vsel %vm2792_vm3, %v14797_v57, 0.0  ;;  %v14814_v45 = vpop.f32.mrb[186].mxu0 }
 0x487   :  { %v14804_v25 = vpop.eup %9597  ;;  %v7591_v1 = vrot.slane %v7590_v40, 1  ;;  %v5996_v50 = vmul.f32 1.442695, %v5778_v54  ;;  %v5998_v26 = vmul.f32 1.442695, %v5779_v16  ;;  %v5533_v17 = vrot.slane %v5532_v2, 1 }
 0x488   :  { %v7597_v22 = vadd.f32 %v7596_v3, %v7595_v41  ;;  %v6465_v44 = vadd.f32 %v6464_v60, %v6463_v49  ;;  %v6469_v23 = vsel %vm2792_vm3, %v14804_v25, 0.0  ;;  %v5537_v37 = vmax.f32 %v5535_v51, %v5536_v58 }
 0x489   :  { %v7592_v10 = vadd.f32 %v7591_v1, %v7590_v40  ;;  %v6470_v47 = vadd.f32 %v6469_v23, %v6468_v31  ;;  %9601 = vpow2.f32 %v5996_v50  ;;  %v5534_v28 = vmax.f32 %v5532_v2, %v5533_v17  ;;  %v16004_v40 = vld [vmem:[#allocation10_spill] sm:$0xff]  ;;  %v14828_v17 = vpop.f32.mrb[187].mxu0 }
 0x48a   :  { %v7598_v4 = vrot.slane %v7597_v22, 2  ;;  %v6466_v34 = vrot.slane %v6465_v44, 1  ;;  %9603 = vpow2.f32 %v5998_v26  ;;  %v5538_v9 = vrot.slane %v5537_v37, 4 }
 0x48b   :  { %v6471_v15 = vrot.slane %v6470_v47, 4  ;;  %v5780_v5 = vsub.f32 %v14740_v62, %v5534_v28  ;;  %v5781_v24 = vsub.f32 %v14730_v30, %v5534_v28  ;;  %v14812_v41 = vadd.f32 %v14726_v0, %v16003_v46 }
 0x48c   :  { %v7599_v58 = vadd.f32 %v7598_v4, %v7597_v22  ;;  %v6467_v49 = vadd.f32 %v6466_v34, %v6465_v44  ;;  %v5539_v54 = vmax.f32 %v5537_v37, %v5538_v9  ;;  %v14818_v16 = vadd.f32 %v14726_v0, %v16004_v40 }
 0x48d   :  { %v6472_v2 = vadd.f32 %v6471_v15, %v6470_v47  ;;  %v6000_v51 = vmul.f32 1.442695, %v5780_v5  ;;  %v6002_v3 = vmul.f32 1.442695, %v5781_v24  ;;  %v5545_v62 = vsel %vm2792_vm3, %v14812_v41, -inf }
 0x48e   :  { %v7600_v30 = vrot.slane %v7599_v58, 1  ;;  %9605 = vrcp.f32 %v6467_v49  ;;  %v5540_v60 = vrot.slane %v5539_v54, 2  ;;  %v5544_v31 = vsel %vm2792_vm3, %v14818_v16, -inf }
 0x48f   :  { %v6473_v1 = vrot.slane %v6472_v2, 2  ;;  %9607 = vpow2.f32 %v6000_v51  ;;  %v5546_v50 = vmax.f32 %v5544_v31, %v5545_v62  ;;  %v14826_v26 = vadd.f32 %v14726_v0, %v14429_v33 }
 0x490   :  { %v9600_v22 = vpop.eup %9599  ;;  %v7601_v44 = vadd.f32 %v7600_v30, %v7599_v58  ;;  %9609 = vpow2.f32 %v6002_v3  ;;  %v5541_v23 = vmax.f32 %v5539_v54, %v5540_v60  ;;  %v14832_v37 = vadd.f32 %v14726_v0, %v14431_v53  ;;  %v16005_v53 = vld [vmem:[#allocation100_spill] sm:$0xff]  ;;  %v16006_v58 = vld [vmem:[#allocation101_spill] sm:$0xff] }
 0x491   :  { %v6796_v47 = vmul.f32 %v9600_v22, %v14734_v19  ;;  %v6797_v28 = vmul.f32 %v9600_v22, %v14744_v32  ;;  %v6474_v4 = vadd.f32 %v6473_v1, %v6472_v2  ;;  %v5547_v34 = vrot.slane %v5546_v50, 4 }
 0x492   :  { %v14837_v9 = vsel %vm7864_vm5, %v7601_v44, %v7592_v10  ;;  %v5542_v33 = vrot.slane %v5541_v23, 1  ;;  %v5554_v15 = vsel %vm2792_vm3, %v14826_v26, -inf  ;;  %v5553_v5 = vsel %vm2792_vm3, %v14832_v37, -inf }
 0x493   :  { %v14843_v24 = vpop.eup %9601  ;;  %v7180_v46 = vmul.f32 %v16005_v53, %v6796_v47  ;;  %v7181_v19 = vmul.f32 %v16006_v58, %v6797_v28  ;;  %v6475_v49 = vrot.slane %v6474_v4, 1  ;;  %v5548_v32 = vmax.f32 %v5546_v50, %v5547_v34 }
 0x494   :  { %v14847_v54 = vpop.eup %9603  ;;  %v6477_v10 = vsel %vm2792_vm3, %v14843_v24, 0.0  ;;  %v5543_v40 = vmax.f32 %v5541_v23, %v5542_v33  ;;  %v5555_v2 = vmax.f32 %v5553_v5, %v5554_v15  ;;  %v14853_v51 = vadd.f32 %v14726_v0, %v14435_v8 }
 0x495   :  { %v7602_v3 = vsel %vm2792_vm3, %v7180_v46, 0.0  ;;  %v7603_v62 = vsel %vm2792_vm3, %v7181_v19, 0.0  ;;  %v6476_v30 = vadd.f32 %v6475_v49, %v6474_v4  ;;  %v6478_v60 = vsel %vm2792_vm3, %v14847_v54, 0.0 }
 0x496   :  { %v7604_v31 = vadd.f32 %v7603_v62, %v7602_v3  ;;  %v6479_v1 = vadd.f32 %v6478_v60, %v6477_v10  ;;  %v5782_v50 = vsub.f32 %v14754_v6, %v5543_v40  ;;  %v5783_v22 = vsub.f32 %v14750_v29, %v5543_v40  ;;  %v16007_v10 = vld [vmem:[#allocation103_spill] sm:$0xff]  ;;  %v16008_v3 = vld [vmem:[#allocation102_spill] sm:$0xff]  ;;  %v14875_v60 = vpop.f32.mrb[188].mxu0 }
 0x497   :  { %9611 = vrcp.f32 %v6476_v30  ;;  %v5549_v44 = vrot.slane %v5548_v32, 2  ;;  %v5556_v23 = vrot.slane %v5555_v2, 4  ;;  %v5563_v8 = vsel %vm2792_vm3, %v14853_v51, -inf }
 0x498   :  { %v9606_v47 = vpop.eup %9605  ;;  %v7605_v28 = vrot.slane %v7604_v31, 4  ;;  %v6480_v34 = vrot.slane %v6479_v1, 4  ;;  %v6004_v33 = vmul.f32 1.442695, %v5782_v50  ;;  %v6006_v4 = vmul.f32 1.442695, %v5783_v22 }
 0x499   :  { %v14863_v15 = vpop.eup %9607  ;;  %v6798_v5 = vmul.f32 %v9606_v47, %v14768_v42  ;;  %v6799_v53 = vmul.f32 %v9606_v47, %v14773_v14  ;;  %v5550_v6 = vmax.f32 %v5548_v32, %v5549_v44  ;;  %v5557_v46 = vmax.f32 %v5555_v2, %v5556_v23  ;;  %v14883_v44 = vpop.f32.mrb[189].mxu0 }
 0x49a   :  { %v14867_v29 = vpop.eup %9609  ;;  %v7606_v58 = vadd.f32 %v7605_v28, %v7604_v31  ;;  %v6481_v19 = vadd.f32 %v6480_v34, %v6479_v1  ;;  %v6486_v49 = vsel %vm2792_vm3, %v14863_v15, 0.0  ;;  %9613 = vpow2.f32 %v6004_v33 }
 0x49b   :  { %v7182_v40 = vmul.f32 %v16007_v10, %v6798_v5  ;;  %v7183_v62 = vmul.f32 %v16008_v3, %v6799_v53  ;;  %v6487_v30 = vsel %vm2792_vm3, %v14867_v29, 0.0  ;;  %9615 = vpow2.f32 %v6006_v4 }
 0x49c   :  { %v7607_v42 = vrot.slane %v7606_v58, 2  ;;  %v6482_v14 = vrot.slane %v6481_v19, 2  ;;  %v6488_v32 = vadd.f32 %v6487_v30, %v6486_v49  ;;  %v5551_v2 = vrot.slane %v5550_v6, 1 }
 0x49d   :  { %v7611_v31 = vsel %vm2792_vm3, %v7182_v40, 0.0  ;;  %v7612_v1 = vsel %vm2792_vm3, %v7183_v62, 0.0  ;;  %v5558_v50 = vrot.slane %v5557_v46, 2  ;;  %v14881_v22 = vadd.f32 %v14726_v0, %v14439_v61 }
 0x49e   :  { %v7608_v23 = vadd.f32 %v7607_v42, %v7606_v58  ;;  %v7613_v47 = vadd.f32 %v7612_v1, %v7611_v31  ;;  %v6483_v28 = vadd.f32 %v6482_v14, %v6481_v19  ;;  %v6489_v34 = vrot.slane %v6488_v32, 4 }
 0x49f   :  { %v5552_v33 = vmax.f32 %v5550_v6, %v5551_v2  ;;  %v5559_v4 = vmax.f32 %v5557_v46, %v5558_v50  ;;  %v5562_v5 = vsel %vm2792_vm3, %v14881_v22, -inf  ;;  %v14889_v53 = vadd.f32 %v14726_v0, %v14481_v18  ;;  %v14895_v50 = vpop.f32.mrb[190].mxu0 }
 0x4a0   :  { %v7609_v49 = vrot.slane %v7608_v23, 1  ;;  %v7614_v10 = vrot.slane %v7613_v47, 4  ;;  %v6484_v40 = vrot.slane %v6483_v28, 1  ;;  %v6490_v61 = vadd.f32 %v6489_v34, %v6488_v32  ;;  %v16009_v34 = vld [vmem:[#allocation104_spill] sm:$0xff] }
 0x4a1   :  { %v9612_v3 = vpop.eup %9611  ;;  %v5784_v62 = vsub.f32 %v14818_v16, %v5552_v33  ;;  %v5785_v58 = vsub.f32 %v14812_v41, %v5552_v33  ;;  %v5560_v19 = vrot.slane %v5559_v4, 1  ;;  %v5564_v30 = vmax.f32 %v5562_v5, %v5563_v8  ;;  %v14903_v33 = vpop.f32.mrb[191].mxu0 }
 0x4a2   :  { %v7610_v6 = vadd.f32 %v7609_v49, %v7608_v23  ;;  %v7615_v46 = vadd.f32 %v7614_v10, %v7613_v47  ;;  %v6800_v42 = vmul.f32 %v9612_v3, %v14797_v57  ;;  %v6801_v14 = vmul.f32 %v9612_v3, %v14804_v25  ;;  %v16010_v23 = vld [vmem:[#allocation32_spill] sm:$0xff] }
 0x4a3   :  { %v6485_v2 = vadd.f32 %v6484_v40, %v6483_v28  ;;  %v6491_v18 = vrot.slane %v6490_v61, 2  ;;  %v6008_v31 = vmul.f32 1.442695, %v5784_v62  ;;  %v6010_v1 = vmul.f32 1.442695, %v5785_v58 }
 0x4a4   :  { %v14897_v32 = vpop.eup %9613  ;;  %v7907_v16 = vsel %vm7866_vm6, %v7610_v6, %v14837_v9  ;;  %v7616_v41 = vrot.slane %v7615_v46, 2  ;;  %v7184_v8 = vmul.f32 %v16009_v34, %v6800_v42  ;;  %v7185_v47 = vmul.f32 %v16010_v23, %v6801_v14 }
 0x4a5   :  { %v14905_v57 = vpop.eup %9615  ;;  %9617 = vrcp.f32 %v6485_v2  ;;  %v6492_v25 = vadd.f32 %v6491_v18, %v6490_v61  ;;  %v6495_v28 = vsel %vm2792_vm3, %v14897_v32, 0.0  ;;  %v5561_v5 = vmax.f32 %v5559_v4, %v5560_v19 }
 0x4a6   :  { %v7617_v49 = vadd.f32 %v7616_v41, %v7615_v46  ;;  %v7620_v10 = vsel %vm2792_vm3, %v7184_v8, 0.0  ;;  %v7621_v9 = vsel %vm2792_vm3, %v7185_v47, 0.0  ;;  %v6496_v40 = vsel %vm2792_vm3, %v14905_v57, 0.0 }
 0x4a7   :  { %v7622_v3 = vadd.f32 %v7621_v9, %v7620_v10  ;;  %v6493_v62 = vrot.slane %v6492_v25, 1  ;;  %v6497_v58 = vadd.f32 %v6496_v40, %v6495_v28  ;;  %9619 = vpow2.f32 %v6008_v31 }
 0x4a8   :  { %v7618_v6 = vrot.slane %v7617_v49, 1  ;;  %9621 = vpow2.f32 %v6010_v1  ;;  %v5786_v61 = vsub.f32 %v14832_v37, %v5561_v5  ;;  %v5787_v42 = vsub.f32 %v14826_v26, %v5561_v5 }
 0x4a9   :  { %v7623_v14 = vrot.slane %v7622_v3, 4  ;;  %v6494_v4 = vadd.f32 %v6493_v62, %v6492_v25  ;;  %v6498_v19 = vrot.slane %v6497_v58, 4  ;;  %v5565_v46 = vrot.slane %v5564_v30, 4 }
 0x4aa   :  { %v7619_v2 = vadd.f32 %v7618_v6, %v7617_v49  ;;  %v6012_v18 = vmul.f32 1.442695, %v5786_v61  ;;  %v6014_v41 = vmul.f32 1.442695, %v5787_v42  ;;  %v5572_v34 = vsel %vm2792_vm3, %v14889_v53, -inf }
 0x4ab   :  { %v7624_v8 = vadd.f32 %v7623_v14, %v7622_v3  ;;  %9623 = vrcp.f32 %v6494_v4  ;;  %v6499_v23 = vadd.f32 %v6498_v19, %v6497_v58  ;;  %v5566_v31 = vmax.f32 %v5564_v30, %v5565_v46  ;;  %v16011_v19 = vld [vmem:[#allocation36_spill] sm:$0xff] }
 0x4ac   :  { %v7908_v1 = vsel %vm7868_vm7, %v7619_v2, %v7907_v16  ;;  %9625 = vpow2.f32 %v6012_v18  ;;  %v14920_v26 = vadd.f32 %v14726_v0, %v14485_v52  ;;  %v14924_v37 = vadd.f32 %v14726_v0, %v14531_v27 }
 0x4ad   :  { %v7625_v47 = vrot.slane %v7624_v8, 2  ;;  %v6500_v25 = vrot.slane %v6499_v23, 2  ;;  %9627 = vpow2.f32 %v6014_v41  ;;  %v5567_v28 = vrot.slane %v5566_v31, 2 }
 0x4ae   :  { %v5571_v5 = vsel %vm2792_vm3, %v14920_v26, -inf  ;;  %v5581_v30 = vsel %vm2792_vm3, %v14924_v37, -inf  ;;  %v14932_v16 = vadd.f32 %v14726_v0, %v14535_v7  ;;  %v14936_v52 = vadd.f32 %v14726_v0, %v14576_v48 }
 0x4af   :  { %v9618_v27 = vpop.eup %9617  ;;  %v7626_v49 = vadd.f32 %v7625_v47, %v7624_v8  ;;  %v6501_v10 = vadd.f32 %v6500_v25, %v6499_v23  ;;  %v5568_v9 = vmax.f32 %v5566_v31, %v5567_v28  ;;  %v5573_v40 = vmax.f32 %v5571_v5, %v5572_v34 }
 0x4b0   :  { %v6802_v3 = vmul.f32 %v9618_v27, %v14843_v24  ;;  %v6803_v62 = vmul.f32 %v9618_v27, %v14847_v54  ;;  %v5580_v58 = vsel %vm2792_vm3, %v14932_v16, -inf  ;;  %v14944_v7 = vsel %vm2792_vm3, %v14936_v52, -inf  ;;  %v16012_v24 = vld [vmem:[#allocation35_spill] sm:$0xff] }
 0x4b1   :  { %v14946_v6 = vpop.eup %9619  ;;  %v7627_v48 = vrot.slane %v7626_v49, 1  ;;  %v6502_v61 = vrot.slane %v6501_v10, 1  ;;  %v5569_v42 = vrot.slane %v5568_v9, 1  ;;  %v5574_v14 = vrot.slane %v5573_v40, 4 }
 0x4b2   :  { %v14948_v4 = vpop.eup %9621  ;;  %v7186_v46 = vmul.f32 %v16011_v19, %v6802_v3  ;;  %v7187_v2 = vmul.f32 %v16012_v24, %v6803_v62  ;;  %v6504_v54 = vsel %vm2792_vm3, %v14946_v6, 0.0  ;;  %v5582_v18 = vmax.f32 %v5580_v58, %v5581_v30 }
 0x4b3   :  { %v7628_v41 = vadd.f32 %v7627_v48, %v7626_v49  ;;  %v6503_v34 = vadd.f32 %v6502_v61, %v6501_v10  ;;  %v6505_v8 = vsel %vm2792_vm3, %v14948_v4, 0.0  ;;  %v5570_v23 = vmax.f32 %v5568_v9, %v5569_v42 }
 0x4b4   :  { %v7629_v31 = vsel %vm2792_vm3, %v7186_v46, 0.0  ;;  %v7630_v47 = vsel %vm2792_vm3, %v7187_v2, 0.0  ;;  %v6506_v25 = vadd.f32 %v6505_v8, %v6504_v54  ;;  %v5575_v28 = vmax.f32 %v5573_v40, %v5574_v14  ;;  %v16013_v14 = vld [vmem:[#allocation40_spill] sm:$0xff] }
 0x4b5   :  { %v9624_v5 = vpop.eup %9623  ;;  %v7909_v27 = vsel %vm7870_vm8, %v7628_v41, %v7908_v1  ;;  %v7631_v3 = vadd.f32 %v7630_v47, %v7629_v31  ;;  %9629 = vrcp.f32 %v6503_v34  ;;  %v5788_v62 = vsub.f32 %v14881_v22, %v5570_v23  ;;  %v16014_v22 = vld [vmem:[#allocation39_spill] sm:$0xff] }
 0x4b6   :  { %v14960_v30 = vpop.eup %9625  ;;  %v6804_v49 = vmul.f32 %v9624_v5, %v14863_v15  ;;  %v6805_v10 = vmul.f32 %v9624_v5, %v14867_v29  ;;  %v6507_v9 = vrot.slane %v6506_v25, 4  ;;  %v5789_v58 = vsub.f32 %v14853_v51, %v5570_v23 }
 0x4b7   :  { %v14965_v48 = vpop.eup %9627  ;;  %v7632_v61 = vrot.slane %v7631_v3, 4  ;;  %v6513_v40 = vsel %vm2792_vm3, %v14960_v30, 0.0  ;;  %v6016_v1 = vmul.f32 1.442695, %v5788_v62  ;;  %v5576_v42 = vrot.slane %v5575_v28, 2 }
 0x4b8   :  { %v7188_v19 = vmul.f32 %v16013_v14, %v6804_v49  ;;  %v7189_v46 = vmul.f32 %v16014_v22, %v6805_v10  ;;  %v6508_v24 = vadd.f32 %v6507_v9, %v6506_v25  ;;  %v6514_v15 = vsel %vm2792_vm3, %v14965_v48, 0.0 }
 0x4b9   :  { %v7633_v29 = vadd.f32 %v7632_v61, %v7631_v3  ;;  %v6515_v2 = vadd.f32 %v6514_v15, %v6513_v40  ;;  %9631 = vpow2.f32 %v6016_v1  ;;  %v6018_v51 = vmul.f32 1.442695, %v5789_v58 }
 0x4ba   :  { %v7638_v54 = vsel %vm2792_vm3, %v7188_v19, 0.0  ;;  %v7639_v41 = vsel %vm2792_vm3, %v7189_v46, 0.0  ;;  %v6509_v34 = vrot.slane %v6508_v24, 2  ;;  %v5577_v8 = vmax.f32 %v5575_v28, %v5576_v42 }
 0x4bb   :  { %v7634_v23 = vrot.slane %v7633_v29, 2  ;;  %v7640_v31 = vadd.f32 %v7639_v41, %v7638_v54  ;;  %v6516_v47 = vrot.slane %v6515_v2, 4  ;;  %9633 = vpow2.f32 %v6018_v51  ;;  %v16015_v54 = vld [vmem:[#allocation44_spill] sm:$0xff] }
 0x4bc   :  { %v6510_v5 = vadd.f32 %v6509_v34, %v6508_v24  ;;  %v5578_v62 = vrot.slane %v5577_v8, 1  ;;  %v5583_v25 = vrot.slane %v5582_v18, 4  ;;  %v14977_v49 = vadd.f32 %v14726_v0, %v14580_v12  ;;  %v16016_v34 = vld [vmem:[#allocation43_spill] sm:$0xff] }
 0x4bd   :  { %v7635_v3 = vadd.f32 %v7634_v23, %v7633_v29  ;;  %v7641_v10 = vrot.slane %v7640_v31, 4  ;;  %v6517_v9 = vadd.f32 %v6516_v47, %v6515_v2  ;;  %v14981_v58 = vadd.f32 %v14726_v0, %v14594_v35 }
 0x4be   :  { %v6511_v61 = vrot.slane %v6510_v5, 1  ;;  %v5579_v28 = vmax.f32 %v5577_v8, %v5578_v62  ;;  %v5584_v40 = vmax.f32 %v5582_v18, %v5583_v25  ;;  %v5589_v1 = vsel %vm2792_vm3, %v14977_v49, -inf }
 0x4bf   :  { %v9630_v42 = vpop.eup %9629  ;;  %v7636_v14 = vrot.slane %v7635_v3, 1  ;;  %v7642_v19 = vadd.f32 %v7641_v10, %v7640_v31  ;;  %v6518_v22 = vrot.slane %v6517_v9, 2  ;;  %v5591_v12 = vmax.f32 %v5589_v1, %v14944_v7 }
 0x4c0   :  { %v6806_v46 = vmul.f32 %v9630_v42, %v14897_v32  ;;  %v6807_v24 = vmul.f32 %v9630_v42, %v14905_v57  ;;  %v6512_v15 = vadd.f32 %v6511_v61, %v6510_v5  ;;  %v5790_v35 = vsub.f32 %v14920_v26, %v5579_v28 }
 0x4c1   :  { %v7637_v29 = vadd.f32 %v7636_v14, %v7635_v3  ;;  %v7643_v2 = vrot.slane %v7642_v19, 2  ;;  %v6519_v51 = vadd.f32 %v6518_v22, %v6517_v9  ;;  %v5791_v18 = vsub.f32 %v14889_v53, %v5579_v28 }
 0x4c2   :  { %v7190_v41 = vmul.f32 %v16015_v54, %v6806_v46  ;;  %v7191_v8 = vmul.f32 %v16016_v34, %v6807_v24  ;;  %9635 = vrcp.f32 %v6512_v15  ;;  %v6020_v23 = vmul.f32 1.442695, %v5790_v35 }
 0x4c3   :  { %v14992_v31 = vpop.eup %9631  ;;  %v7910_v32 = vsel %vm7872_vm9, %v7637_v29, %v7909_v27  ;;  %v7644_v7 = vadd.f32 %v7643_v2, %v7642_v19  ;;  %v6520_v57 = vrot.slane %v6519_v51, 1  ;;  %v6022_v47 = vmul.f32 1.442695, %v5791_v18 }
 0x4c4   :  { %v7647_v26 = vsel %vm2792_vm3, %v7190_v41, 0.0  ;;  %v7648_v5 = vsel %vm2792_vm3, %v7191_v8, 0.0  ;;  %v6522_v53 = vsel %vm2792_vm3, %v14992_v31, 0.0  ;;  %9637 = vpow2.f32 %v6020_v23 }
 0x4c5   :  { %v14999_v62 = vpop.eup %9633  ;;  %v7645_v25 = vrot.slane %v7644_v7, 1  ;;  %v7649_v3 = vadd.f32 %v7648_v5, %v7647_v26  ;;  %v6521_v10 = vadd.f32 %v6520_v57, %v6519_v51  ;;  %9639 = vpow2.f32 %v6022_v47 }
 0x4c6   :  { %v6523_v27 = vsel %vm2792_vm3, %v14999_v62, 0.0  ;;  %v5585_v9 = vrot.slane %v5584_v40, 2  ;;  %v5592_v61 = vrot.slane %v5591_v12, 4  ;;  %v5599_v28 = vsel %vm2792_vm3, %v14981_v58, -inf }
 0x4c7   :  { %v7646_v1 = vadd.f32 %v7645_v25, %v7644_v7  ;;  %v7650_v42 = vrot.slane %v7649_v3, 4  ;;  %9641 = vrcp.f32 %v6521_v10  ;;  %v6524_v14 = vadd.f32 %v6523_v27, %v6522_v53 }
 0x4c8   :  { %v5586_v19 = vmax.f32 %v5584_v40, %v5585_v9  ;;  %v5593_v22 = vmax.f32 %v5591_v12, %v5592_v61  ;;  %v15007_v46 = vadd.f32 %v14726_v0, %v14598_v36  ;;  %v15011_v24 = vadd.f32 %v14726_v0, %v14631_v38  ;;  %v16017_v61 = vld [vmem:[#allocation48_spill] sm:$0xff] }
 0x4c9   :  { %v7911_v15 = vsel %vm7874_vm10, %v7646_v1, %v7910_v32  ;;  %v7651_v35 = vadd.f32 %v7650_v42, %v7649_v3  ;;  %v6525_v29 = vrot.slane %v6524_v14, 4  ;;  %v15016_v2 = vadd.f32 %v14726_v0, %v14637_v59 }
 0x4ca   :  { %v5587_v51 = vrot.slane %v5586_v19, 1  ;;  %v5594_v18 = vrot.slane %v5593_v22, 2  ;;  %v5598_v40 = vsel %vm2792_vm3, %v15007_v46, -inf  ;;  %v5608_v36 = vsel %vm2792_vm3, %v15011_v24, -inf }
 0x4cb   :  { %v7652_v12 = vrot.slane %v7651_v35, 2  ;;  %v6526_v54 = vadd.f32 %v6525_v29, %v6524_v14  ;;  %v5600_v38 = vmax.f32 %v5598_v40, %v5599_v28  ;;  %v5607_v41 = vsel %vm2792_vm3, %v15016_v2, -inf  ;;  %v16018_v28 = vld [vmem:[#allocation47_spill] sm:$0xff] }
 0x4cc   :  { %v9636_v34 = vpop.eup %9635  ;;  %v5588_v8 = vmax.f32 %v5586_v19, %v5587_v51  ;;  %v5595_v23 = vmax.f32 %v5593_v22, %v5594_v18  ;;  %v15024_v32 = vmax.f32 %v5607_v41, %v5608_v36  ;;  %v15028_v59 = vadd.f32 %v14726_v0, %v14654_v55 }
 0x4cd   :  { %v7653_v7 = vadd.f32 %v7652_v12, %v7651_v35  ;;  %v6808_v57 = vmul.f32 %v9636_v34, %v14946_v6  ;;  %v6809_v47 = vmul.f32 %v9636_v34, %v14948_v4  ;;  %v6527_v26 = vrot.slane %v6526_v54, 2 }
 0x4ce   :  { %v15032_v5 = vpop.eup %9637  ;;  %v5792_v53 = vsub.f32 %v14932_v16, %v5588_v8  ;;  %v5793_v25 = vsub.f32 %v14924_v37, %v5588_v8  ;;  %v5596_v3 = vrot.slane %v5595_v23, 1  ;;  %v5601_v10 = vrot.slane %v5600_v38, 4  ;;  %v16019_v8 = vld [vmem:[#allocation52_spill] sm:$0xff] }
 0x4cf   :  { %v15036_v27 = vpop.eup %9639  ;;  %v7654_v9 = vrot.slane %v7653_v7, 1  ;;  %v7192_v55 = vmul.f32 %v16017_v61, %v6808_v57  ;;  %v7193_v1 = vmul.f32 %v16018_v28, %v6809_v47  ;;  %v6528_v42 = vadd.f32 %v6527_v26, %v6526_v54  ;;  %v16020_v57 = vld [vmem:[#allocation51_spill] sm:$0xff] }
 0x4d0   :  { %v6531_v6 = vsel %vm2792_vm3, %v15032_v5, 0.0  ;;  %v6532_v4 = vsel %vm2792_vm3, %v15036_v27, 0.0  ;;  %v6024_v14 = vmul.f32 1.442695, %v5792_v53  ;;  %v6026_v16 = vmul.f32 1.442695, %v5793_v25 }
 0x4d1   :  { %v9642_v19 = vpop.eup %9641  ;;  %v7655_v37 = vadd.f32 %v7654_v9, %v7653_v7  ;;  %v7656_v22 = vsel %vm2792_vm3, %v7192_v55, 0.0  ;;  %v7657_v35 = vsel %vm2792_vm3, %v7193_v1, 0.0  ;;  %v6529_v29 = vrot.slane %v6528_v42, 1 }
 0x4d2   :  { %v7658_v51 = vadd.f32 %v7657_v35, %v7656_v22  ;;  %v6810_v18 = vmul.f32 %v9642_v19, %v14960_v30  ;;  %v6811_v40 = vmul.f32 %v9642_v19, %v14965_v48  ;;  %v6533_v36 = vadd.f32 %v6532_v4, %v6531_v6 }
 0x4d3   :  { %v7912_v12 = vsel %vm7876_vm11, %v7655_v37, %v7911_v15  ;;  %v6530_v54 = vadd.f32 %v6529_v29, %v6528_v42  ;;  %9643 = vpow2.f32 %v6024_v14  ;;  %v5597_v41 = vmax.f32 %v5595_v23, %v5596_v3 }
 0x4d4   :  { %7940 = vst.msk [vmem:[%s15430_s12 + $0x28] sm:$0xff] %vm2792_vm3, %v7912_v12  ;;  %v7659_v34 = vrot.slane %v7658_v51, 4  ;;  %v7194_v7 = vmul.f32 %v16019_v8, %v6810_v18  ;;  %v7195_v47 = vmul.f32 %v16020_v57, %v6811_v40  ;;  %v6534_v26 = vrot.slane %v6533_v36, 4 }
 0x4d5   :  { %9645 = vrcp.f32 %v6530_v54  ;;  %v5794_v30 = vsub.f32 %v14977_v49, %v5597_v41  ;;  %v5795_v48 = vsub.f32 %v14936_v52, %v5597_v41  ;;  %v5602_v15 = vmax.f32 %v5600_v38, %v5601_v10 }
 0x4d6   :  { %v7660_v53 = vadd.f32 %v7659_v34, %v7658_v51  ;;  %v7665_v23 = vsel %vm2792_vm3, %v7194_v7, 0.0  ;;  %v7666_v25 = vsel %vm2792_vm3, %v7195_v47, 0.0  ;;  %v6535_v3 = vadd.f32 %v6534_v26, %v6533_v36 }
 0x4d7   :  { %v7667_v9 = vadd.f32 %v7666_v25, %v7665_v23  ;;  %9647 = vpow2.f32 %v6026_v16  ;;  %v6028_v61 = vmul.f32 1.442695, %v5794_v30  ;;  %v6030_v55 = vmul.f32 1.442695, %v5795_v48 }
 0x4d8   :  { %v7661_v28 = vrot.slane %v7660_v53, 2  ;;  %v6536_v1 = vrot.slane %v6535_v3, 2  ;;  %v5603_v42 = vrot.slane %v5602_v15, 2  ;;  %v5610_v6 = vrot.slane %v15024_v32, 4 }
 0x4d9   :  { %v7668_v4 = vrot.slane %v7667_v9, 4  ;;  %9649 = vpow2.f32 %v6028_v61  ;;  %v5617_v52 = vsel %vm2792_vm3, %v15028_v59, -inf  ;;  %v15064_v49 = vadd.f32 %v14726_v0, %v14658_v21  ;;  %v16022_v61 = vld [vmem:[#allocation55_spill] sm:$0xff] }
 0x4da   :  { %v7662_v38 = vadd.f32 %v7661_v28, %v7660_v53  ;;  %v6537_v10 = vadd.f32 %v6536_v1, %v6535_v3  ;;  %9651 = vpow2.f32 %v6030_v55  ;;  %v5604_v14 = vmax.f32 %v5602_v15, %v5603_v42  ;;  %v16021_v3 = vld [vmem:[#allocation56_spill] sm:$0xff] }
 0x4db   :  { %v7669_v16 = vadd.f32 %v7668_v4, %v7667_v9  ;;  %v5611_v19 = vmax.f32 %v15024_v32, %v5610_v6  ;;  %v5616_v37 = vsel %vm2792_vm3, %v15064_v49, -inf  ;;  %v15071_v22 = vadd.f32 %v14726_v0, %v14696_v39 }
 0x4dc   :  { %v7663_v35 = vrot.slane %v7662_v38, 1  ;;  %v6538_v29 = vrot.slane %v6537_v10, 1  ;;  %v5605_v51 = vrot.slane %v5604_v14, 1  ;;  %v5618_v18 = vmax.f32 %v5616_v37, %v5617_v52 }
 0x4dd   :  { %v15073_v21 = vpop.eup %9643  ;;  %v7670_v40 = vrot.slane %v7669_v16, 2  ;;  %v5612_v36 = vrot.slane %v5611_v19, 2  ;;  %v5626_v12 = vsel %vm2792_vm3, %v15071_v22, -inf  ;;  %v15079_v32 = vadd.f32 %v14726_v0, %v14698_v56 }
 0x4de   :  { %v7664_v54 = vadd.f32 %v7663_v35, %v7662_v38  ;;  %v6539_v41 = vadd.f32 %v6538_v29, %v6537_v10  ;;  %v6540_v39 = vsel %vm2792_vm3, %v15073_v21, 0.0  ;;  %v5606_v34 = vmax.f32 %v5604_v14, %v5605_v51 }
 0x4df   :  { %v9646_v8 = vpop.eup %9645  ;;  %v7671_v7 = vadd.f32 %v7670_v40, %v7669_v16  ;;  %v5613_v57 = vmax.f32 %v5611_v19, %v5612_v36  ;;  %v5619_v47 = vrot.slane %v5618_v18, 4  ;;  %v5625_v26 = vsel %vm2792_vm3, %v15079_v32, -inf }
 0x4e0   :  { %v6812_v30 = vmul.f32 %v9646_v8, %v14992_v31  ;;  %v6813_v48 = vmul.f32 %v9646_v8, %v14999_v62  ;;  %9653 = vrcp.f32 %v6539_v41  ;;  %v5796_v56 = vsub.f32 %v15007_v46, %v5606_v34 }
 0x4e1   :  { %v15088_v0 = vpop.eup %9647  ;;  %v7672_v15 = vrot.slane %v7671_v7, 1  ;;  %v5797_v53 = vsub.f32 %v14981_v58, %v5606_v34  ;;  %v5614_v23 = vrot.slane %v5613_v57, 1  ;;  %v5620_v25 = vmax.f32 %v5618_v18, %v5619_v47 }
 0x4e2   :  { %v7196_v9 = vmul.f32 %v16021_v3, %v6812_v30  ;;  %v7197_v55 = vmul.f32 %v16022_v61, %v6813_v48  ;;  %v6541_v28 = vsel %vm2792_vm3, %v15088_v0, 0.0  ;;  %v6032_v31 = vmul.f32 1.442695, %v5796_v56 }
 0x4e3   :  { %v15095_v1 = vpop.eup %9649  ;;  %v7673_v62 = vadd.f32 %v7672_v15, %v7671_v7  ;;  %v6542_v42 = vadd.f32 %v6541_v28, %v6540_v39  ;;  %v6034_v46 = vmul.f32 1.442695, %v5797_v53  ;;  %v5615_v6 = vmax.f32 %v5613_v57, %v5614_v23 }
 0x4e4   :  { %v15097_v4 = vpop.eup %9651  ;;  %v7674_v58 = vsel %vm2792_vm3, %v7196_v9, 0.0  ;;  %v7675_v52 = vsel %vm2792_vm3, %v7197_v55, 0.0  ;;  %v6549_v38 = vsel %vm2792_vm3, %v15095_v1, 0.0  ;;  %9655 = vpow2.f32 %v6032_v31  ;;  %v16023_v9 = vld [vmem:[#allocation60_spill] sm:$0xff]  ;;  %v16024_v55 = vld [vmem:[#allocation59_spill] sm:$0xff] }
 0x4e5   :  { %v7913_v10 = vsel %vm7864_vm5, %v7673_v62, %v7664_v54  ;;  %v7676_v14 = vadd.f32 %v7675_v52, %v7674_v58  ;;  %v6543_v16 = vrot.slane %v6542_v42, 4  ;;  %v6550_v19 = vsel %vm2792_vm3, %v15097_v4, 0.0  ;;  %v15111_v54 = vld [vmem:[%s15429_s11] ss:$0 sm:$0xff] }
 0x4e6   :  { %v6551_v37 = vadd.f32 %v6550_v19, %v6549_v38  ;;  %9657 = vpow2.f32 %v6034_v46  ;;  %v5798_v35 = vsub.f32 %v15016_v2, %v5615_v6  ;;  %v5799_v29 = vsub.f32 %v15011_v24, %v5615_v6 }
 0x4e7   :  { %v7677_v51 = vrot.slane %v7676_v14, 4  ;;  %v6544_v18 = vadd.f32 %v6543_v16, %v6542_v42  ;;  %v5621_v40 = vrot.slane %v5620_v25, 2  ;;  %v5627_v36 = vmax.f32 %v5625_v26, %v5626_v12 }
 0x4e8   :  { %v6552_v41 = vrot.slane %v6551_v37, 4  ;;  %v6036_v39 = vmul.f32 1.442695, %v5798_v35  ;;  %v6038_v34 = vmul.f32 1.442695, %v5799_v29  ;;  %v15115_v8 = vadd.f32 %v15111_v54, %v14710_v13 }
 0x4e9   :  { %v7678_v7 = vadd.f32 %v7677_v51, %v7676_v14  ;;  %v6545_v2 = vrot.slane %v6544_v18, 2  ;;  %v5622_v57 = vmax.f32 %v5620_v25, %v5621_v40  ;;  %v5628_v24 = vrot.slane %v5627_v36, 4 }
 0x4ea   :  { %v9654_v47 = vpop.eup %9653  ;;  %v6553_v30 = vadd.f32 %v6552_v41, %v6551_v37  ;;  %9659 = vpow2.f32 %v6036_v39  ;;  %v5635_v12 = vsel %vm2792_vm3, %v15115_v8, -inf  ;;  %v15121_v26 = vadd.f32 %v15111_v54, %v14714_v43 }
 0x4eb   :  { %v7679_v48 = vrot.slane %v7678_v7, 2  ;;  %v6814_v56 = vmul.f32 %v9654_v47, %v15032_v5  ;;  %v6815_v13 = vmul.f32 %v9654_v47, %v15036_v27  ;;  %v6546_v15 = vadd.f32 %v6545_v2, %v6544_v18 }
 0x4ec   :  { %v6554_v53 = vrot.slane %v6553_v30, 2  ;;  %9661 = vpow2.f32 %v6038_v34  ;;  %v5623_v23 = vrot.slane %v5622_v57, 1  ;;  %v5629_v25 = vmax.f32 %v5627_v36, %v5628_v24 }
 0x4ed   :  { %v7680_v3 = vadd.f32 %v7679_v48, %v7678_v7  ;;  %v7198_v61 = vmul.f32 %v16023_v9, %v6814_v56  ;;  %v7199_v28 = vmul.f32 %v16024_v55, %v6815_v13  ;;  %v6547_v31 = vrot.slane %v6546_v15, 1 }
 0x4ee   :  { %v15127_v62 = vpop.eup %9655  ;;  %v6555_v43 = vadd.f32 %v6554_v53, %v6553_v30  ;;  %v5624_v42 = vmax.f32 %v5622_v57, %v5623_v23  ;;  %v5630_v46 = vrot.slane %v5629_v25, 2  ;;  %v5634_v5 = vsel %vm2792_vm3, %v15121_v26, -inf  ;;  %v16025_v23 = vld [vmem:[#allocation9_spill] sm:$0xff] }
 0x4ef   :  { %v7681_v27 = vrot.slane %v7680_v3, 1  ;;  %v7683_v6 = vsel %vm2792_vm3, %v7198_v61, 0.0  ;;  %v7684_v58 = vsel %vm2792_vm3, %v7199_v28, 0.0  ;;  %v6548_v52 = vadd.f32 %v6547_v31, %v6546_v15 }
 0x4f0   :  { %v15133_v38 = vpop.eup %9657  ;;  %v7685_v14 = vadd.f32 %v7684_v58, %v7683_v6  ;;  %v6556_v16 = vrot.slane %v6555_v43, 1  ;;  %v6558_v19 = vsel %vm2792_vm3, %v15127_v62, 0.0  ;;  %v5800_v37 = vsub.f32 %v15064_v49, %v5624_v42 }
 0x4f1   :  { %v7682_v35 = vadd.f32 %v7681_v27, %v7680_v3  ;;  %9663 = vrcp.f32 %v6548_v52  ;;  %v6559_v29 = vsel %vm2792_vm3, %v15133_v38, 0.0  ;;  %v5801_v51 = vsub.f32 %v15028_v59, %v5624_v42 }
 0x4f2   :  { %v7686_v18 = vrot.slane %v7685_v14, 4  ;;  %v6557_v40 = vadd.f32 %v6556_v16, %v6555_v43  ;;  %v6560_v36 = vadd.f32 %v6559_v29, %v6558_v19  ;;  %v6040_v41 = vmul.f32 1.442695, %v5800_v37 }
 0x4f3   :  { %v7914_v39 = vsel %vm7866_vm6, %v7682_v35, %v7913_v10  ;;  %v6042_v34 = vmul.f32 1.442695, %v5801_v51  ;;  %v5631_v7 = vmax.f32 %v5629_v25, %v5630_v46  ;;  %v5636_v2 = vmax.f32 %v5634_v5, %v5635_v12 }
 0x4f4   :  { %v15142_v57 = vpop.eup %9659  ;;  %v7687_v24 = vadd.f32 %v7686_v18, %v7685_v14  ;;  %9665 = vrcp.f32 %v6557_v40  ;;  %v6561_v49 = vrot.slane %v6560_v36, 4  ;;  %v15146_v47 = vadd.f32 %v15111_v54, %v14756_v20 }
 0x4f5   :  { %v6567_v59 = vsel %vm2792_vm3, %v15142_v57, 0.0  ;;  %9667 = vpow2.f32 %v6040_v41  ;;  %v5632_v30 = vrot.slane %v5631_v7, 1  ;;  %v5637_v48 = vrot.slane %v5636_v2, 4 }
 0x4f6   :  { %v15150_v56 = vpop.eup %9661  ;;  %v7688_v10 = vrot.slane %v7687_v24, 2  ;;  %v6562_v13 = vadd.f32 %v6561_v49, %v6560_v36  ;;  %9669 = vpow2.f32 %v6042_v34  ;;  %v5644_v12 = vsel %vm2792_vm3, %v15146_v47, -inf  ;;  %v16026_v36 = vld [vmem:[#allocation64_spill] sm:$0xff]  ;;  %v16027_v34 = vld [vmem:[#allocation63_spill] sm:$0xff] }
 0x4f7   :  { %v6568_v15 = vsel %vm2792_vm3, %v15150_v56, 0.0  ;;  %v5633_v53 = vmax.f32 %v5631_v7, %v5632_v30  ;;  %v5638_v20 = vmax.f32 %v5636_v2, %v5637_v48  ;;  %v15158_v25 = vadd.f32 %v15111_v54, %v16025_v23 }
 0x4f8   :  { %v7689_v3 = vadd.f32 %v7688_v10, %v7687_v24  ;;  %v6563_v9 = vrot.slane %v6562_v13, 2  ;;  %v6569_v61 = vadd.f32 %v6568_v15, %v6567_v59  ;;  %v15162_v55 = vadd.f32 %v15111_v54, %v14792_v11  ;;  %v16029_v15 = vld [vmem:[#allocation67_spill] sm:$0xff] }
 0x4f9   :  { %v5802_v28 = vsub.f32 %v15079_v32, %v5633_v53  ;;  %v5803_v31 = vsub.f32 %v15071_v22, %v5633_v53  ;;  %v5639_v43 = vrot.slane %v5638_v20, 2  ;;  %v5643_v42 = vsel %vm2792_vm3, %v15158_v25, -inf }
 0x4fa   :  { %v7690_v46 = vrot.slane %v7689_v3, 1  ;;  %v6564_v5 = vadd.f32 %v6563_v9, %v6562_v13  ;;  %v6570_v27 = vrot.slane %v6569_v61, 4  ;;  %v5645_v6 = vmax.f32 %v5643_v42, %v5644_v12  ;;  %v16028_v13 = vld [vmem:[#allocation68_spill] sm:$0xff] }
 0x4fb   :  { %v9664_v58 = vpop.eup %9663  ;;  %v6044_v52 = vmul.f32 1.442695, %v5802_v28  ;;  %v6046_v14 = vmul.f32 1.442695, %v5803_v31  ;;  %v5640_v16 = vmax.f32 %v5638_v20, %v5639_v43  ;;  %v5653_v11 = vsel %vm2792_vm3, %v15162_v55, -inf }
 0x4fc   :  { %v7691_v19 = vadd.f32 %v7690_v46, %v7689_v3  ;;  %v6816_v32 = vmul.f32 %v9664_v58, %v15073_v21  ;;  %v6817_v22 = vmul.f32 %v9664_v58, %v15088_v0  ;;  %v6565_v37 = vrot.slane %v6564_v5, 1 }
 0x4fd   :  { %v6571_v35 = vadd.f32 %v6570_v27, %v6569_v61  ;;  %9671 = vpow2.f32 %v6044_v52  ;;  %v5641_v29 = vrot.slane %v5640_v16, 1  ;;  %v5646_v51 = vrot.slane %v5645_v6, 4 }
 0x4fe   :  { %v9666_v18 = vpop.eup %9665  ;;  %v15173_v40 = vsel %vm7868_vm7, %v7691_v19, %v7914_v39  ;;  %v7200_v41 = vmul.f32 %v16026_v36, %v6816_v32  ;;  %v7201_v7 = vmul.f32 %v16027_v34, %v6817_v22  ;;  %v6566_v2 = vadd.f32 %v6565_v37, %v6564_v5 }
 0x4ff   :  { %v15177_v24 = vpop.eup %9667  ;;  %v6818_v21 = vmul.f32 %v9666_v18, %v15095_v1  ;;  %v6819_v0 = vmul.f32 %v9666_v18, %v15097_v4  ;;  %v6572_v49 = vrot.slane %v6571_v35, 2  ;;  %9673 = vpow2.f32 %v6046_v14 }
 0x500   :  { %v15181_v59 = vpop.eup %9669  ;;  %v7692_v30 = vsel %vm2792_vm3, %v7200_v41, 0.0  ;;  %v7693_v39 = vsel %vm2792_vm3, %v7201_v7, 0.0  ;;  %9675 = vrcp.f32 %v6566_v2  ;;  %v6576_v48 = vsel %vm2792_vm3, %v15177_v24, 0.0 }
 0x501   :  { %v7694_v10 = vadd.f32 %v7693_v39, %v7692_v30  ;;  %v7202_v12 = vmul.f32 %v16028_v13, %v6818_v21  ;;  %v7203_v53 = vmul.f32 %v16029_v15, %v6819_v0  ;;  %v6573_v1 = vadd.f32 %v6572_v49, %v6571_v35 }
 0x502   :  { %v6577_v4 = vsel %vm2792_vm3, %v15181_v59, 0.0  ;;  %v5642_v20 = vmax.f32 %v5640_v16, %v5641_v29  ;;  %v5647_v23 = vmax.f32 %v5645_v6, %v5646_v51  ;;  %v15193_v3 = vadd.f32 %v15111_v54, %v14795_v63 }
 0x503   :  { %v7695_v9 = vrot.slane %v7694_v10, 4  ;;  %v7701_v61 = vsel %vm2792_vm3, %v7202_v12, 0.0  ;;  %v7702_v28 = vsel %vm2792_vm3, %v7203_v53, 0.0  ;;  %v6574_v31 = vrot.slane %v6573_v1, 1  ;;  %v16030_v53 = vld [vmem:[#allocation111_spill] sm:$0xff] }
 0x504   :  { %v7703_v43 = vadd.f32 %v7702_v28, %v7701_v61  ;;  %v6578_v42 = vadd.f32 %v6577_v4, %v6576_v48  ;;  %v5804_v46 = vsub.f32 %v15121_v26, %v5642_v20  ;;  %v5805_v5 = vsub.f32 %v15115_v8, %v5642_v20  ;;  %v16031_v4 = vld [vmem:[#allocation110_spill] sm:$0xff] }
 0x505   :  { %v7696_v27 = vadd.f32 %v7695_v9, %v7694_v10  ;;  %v6575_v58 = vadd.f32 %v6574_v31, %v6573_v1  ;;  %v5648_v52 = vrot.slane %v5647_v23, 2  ;;  %v5652_v6 = vsel %vm2792_vm3, %v15193_v3, -inf }
 0x506   :  { %v7704_v63 = vrot.slane %v7703_v43, 4  ;;  %v6579_v14 = vrot.slane %v6578_v42, 4  ;;  %v6048_v16 = vmul.f32 1.442695, %v5804_v46  ;;  %v6050_v19 = vmul.f32 1.442695, %v5805_v5 }
 0x507   :  { %v15201_v32 = vpop.eup %9671  ;;  %v7697_v22 = vrot.slane %v7696_v27, 2  ;;  %9677 = vrcp.f32 %v6575_v58  ;;  %v5649_v37 = vmax.f32 %v5647_v23, %v5648_v52  ;;  %v5654_v35 = vmax.f32 %v5652_v6, %v5653_v11 }
 0x508   :  { %v7705_v29 = vadd.f32 %v7704_v63, %v7703_v43  ;;  %v6580_v26 = vadd.f32 %v6579_v14, %v6578_v42  ;;  %v6585_v8 = vsel %vm2792_vm3, %v15201_v32, 0.0  ;;  %9679 = vpow2.f32 %v6048_v16 }
 0x509   :  { %v15205_v51 = vpop.eup %9673  ;;  %v7698_v18 = vadd.f32 %v7697_v22, %v7696_v27  ;;  %9681 = vpow2.f32 %v6050_v19  ;;  %v5650_v36 = vrot.slane %v5649_v37, 1  ;;  %v5655_v41 = vrot.slane %v5654_v35, 4 }
 0x50a   :  { %v9676_v34 = vpop.eup %9675  ;;  %v7706_v7 = vrot.slane %v7705_v29, 2  ;;  %v6581_v2 = vrot.slane %v6580_v26, 2  ;;  %v6586_v21 = vsel %vm2792_vm3, %v15205_v51, 0.0  ;;  %v15211_v11 = vadd.f32 %v15111_v54, %v14814_v45 }
 0x50b   :  { %v7699_v0 = vrot.slane %v7698_v18, 1  ;;  %v6820_v49 = vmul.f32 %v9676_v34, %v15127_v62  ;;  %v6821_v30 = vmul.f32 %v9676_v34, %v15133_v38  ;;  %v6587_v39 = vadd.f32 %v6586_v21, %v6585_v8  ;;  %v16032_v8 = vld [vmem:[#allocation113_spill] sm:$0xff] }
 0x50c   :  { %v7707_v48 = vadd.f32 %v7706_v7, %v7705_v29  ;;  %v6582_v10 = vadd.f32 %v6581_v2, %v6580_v26  ;;  %v5651_v13 = vmax.f32 %v5649_v37, %v5650_v36  ;;  %v5656_v12 = vmax.f32 %v5654_v35, %v5655_v41  ;;  %v16033_v36 = vld [vmem:[#allocation112_spill] sm:$0xff] }
 0x50d   :  { %v7700_v15 = vadd.f32 %v7699_v0, %v7698_v18  ;;  %v7204_v1 = vmul.f32 %v16030_v53, %v6820_v49  ;;  %v7205_v20 = vmul.f32 %v16031_v4, %v6821_v30  ;;  %v6588_v23 = vrot.slane %v6587_v39, 4  ;;  %v6957_v49 = vld [vmem:[%s15428_s2 + $0x3a8] sm:$0xff] }
 0x50e   :  { %v7708_v9 = vrot.slane %v7707_v48, 1  ;;  %v6583_v61 = vrot.slane %v6582_v10, 1  ;;  %v5806_v45 = vsub.f32 %v15158_v25, %v5651_v13  ;;  %v5807_v28 = vsub.f32 %v15146_v47, %v5651_v13 }
 0x50f   :  { %v7916_v62 = vsel %vm7870_vm8, %v7700_v15, %v15173_v40  ;;  %v7710_v38 = vsel %vm2792_vm3, %v7204_v1, 0.0  ;;  %v7711_v31 = vsel %vm2792_vm3, %v7205_v20, 0.0  ;;  %v6589_v43 = vadd.f32 %v6588_v23, %v6587_v39  ;;  %v16034_v23 = vld [vmem:[#allocation76_spill] sm:$0xff] }
 0x510   :  { %v7709_v42 = vadd.f32 %v7708_v9, %v7707_v48  ;;  %v7712_v46 = vadd.f32 %v7711_v31, %v7710_v38  ;;  %v6584_v5 = vadd.f32 %v6583_v61, %v6582_v10  ;;  %v6052_v27 = vmul.f32 1.442695, %v5806_v45 }
 0x511   :  { %v9678_v58 = vpop.eup %9677  ;;  %v6590_v52 = vrot.slane %v6589_v43, 2  ;;  %v6054_v6 = vmul.f32 1.442695, %v5807_v28  ;;  %v5657_v63 = vrot.slane %v5656_v12, 2  ;;  %v5662_v25 = vsel %vm2792_vm3, %v15211_v11, -inf }
 0x512   :  { %v15225_v47 = vpop.eup %9679  ;;  %v7917_v40 = vsel %vm7872_vm9, %v7709_v42, %v7916_v62  ;;  %v7713_v14 = vrot.slane %v7712_v46, 4  ;;  %v6822_v16 = vmul.f32 %v9678_v58, %v15142_v57  ;;  %v6823_v19 = vmul.f32 %v9678_v58, %v15150_v56 }
 0x513   :  { %v15230_v22 = vpop.eup %9681  ;;  %9683 = vrcp.f32 %v6584_v5  ;;  %v6591_v37 = vadd.f32 %v6590_v52, %v6589_v43  ;;  %v6594_v35 = vsel %vm2792_vm3, %v15225_v47, 0.0  ;;  %v5658_v29 = vmax.f32 %v5656_v12, %v5657_v63 }
 0x514   :  { %v7714_v26 = vadd.f32 %v7713_v14, %v7712_v46  ;;  %v7206_v18 = vmul.f32 %v16032_v8, %v6822_v16  ;;  %v7207_v41 = vmul.f32 %v16033_v36, %v6823_v19  ;;  %v6595_v34 = vsel %vm2792_vm3, %v15230_v22, 0.0 }
 0x515   :  { %v6592_v7 = vrot.slane %v6591_v37, 1  ;;  %v6596_v57 = vadd.f32 %v6595_v34, %v6594_v35  ;;  %9685 = vpow2.f32 %v6052_v27  ;;  %v5659_v56 = vrot.slane %v5658_v29, 1 }
 0x516   :  { %v7715_v2 = vrot.slane %v7714_v26, 2  ;;  %v7719_v21 = vsel %vm2792_vm3, %v7206_v18, 0.0  ;;  %v7720_v0 = vsel %vm2792_vm3, %v7207_v41, 0.0  ;;  %9687 = vpow2.f32 %v6054_v6 }
 0x517   :  { %v7721_v30 = vadd.f32 %v7720_v0, %v7719_v21  ;;  %v6593_v39 = vadd.f32 %v6592_v7, %v6591_v37  ;;  %v6597_v48 = vrot.slane %v6596_v57, 4  ;;  %v5660_v10 = vmax.f32 %v5658_v29, %v5659_v56  ;;  %v16035_v37 = vld [vmem:[#allocation72_spill] sm:$0xff]  ;;  %v16036_v29 = vld [vmem:[#allocation114_spill] sm:$0xff] }
 0x518   :  { %v7716_v13 = vadd.f32 %v7715_v2, %v7714_v26  ;;  %v15245_v12 = vadd.f32 %v15111_v54, %v14828_v17  ;;  %v15249_v15 = vadd.f32 %v15111_v54, %v14875_v60  ;;  %v15253_v53 = vadd.f32 %v15111_v54, %v14883_v44 }
 0x519   :  { %v7722_v1 = vrot.slane %v7721_v30, 4  ;;  %9689 = vrcp.f32 %v6593_v39  ;;  %v6598_v4 = vadd.f32 %v6597_v48, %v6596_v57  ;;  %v5808_v20 = vsub.f32 %v15193_v3, %v5660_v10 }
 0x51a   :  { %v15257_v9 = vadd.f32 %v6957_v49, %v16034_v23  ;;  %v7717_v61 = vrot.slane %v7716_v13, 1  ;;  %v5809_v17 = vsub.f32 %v15162_v55, %v5660_v10  ;;  %v5661_v45 = vsel %vm2792_vm3, %v15245_v12, -inf }
 0x51b   :  { %v7723_v60 = vadd.f32 %v7722_v1, %v7721_v30  ;;  %v6599_v28 = vrot.slane %v6598_v4, 2  ;;  %v6056_v62 = vmul.f32 1.442695, %v5808_v20  ;;  %v5663_v38 = vmax.f32 %v5661_v45, %v5662_v25 }
 0x51c   :  { %v7718_v44 = vadd.f32 %v7717_v61, %v7716_v13  ;;  %v6058_v31 = vmul.f32 1.442695, %v5809_v17  ;;  %v5671_v43 = vsel %vm2792_vm3, %v15249_v15, -inf  ;;  %v5670_v3 = vsel %vm2792_vm3, %v15253_v53, -inf }
 0x51d   :  { %v9684_v42 = vpop.eup %9683  ;;  %v7724_v46 = vrot.slane %v7723_v60, 2  ;;  %v6600_v5 = vadd.f32 %v6599_v28, %v6598_v4  ;;  %9691 = vpow2.f32 %v6056_v62  ;;  %v5664_v55 = vrot.slane %v5663_v38, 4  ;;  %v16037_v4 = vld [vmem:[#allocation71_spill] sm:$0xff] }
 0x51e   :  { %v7918_v27 = vsel %vm7874_vm10, %v7718_v44, %v7917_v40  ;;  %v6824_v58 = vmul.f32 %v9684_v42, %v15177_v24  ;;  %v6825_v52 = vmul.f32 %v9684_v42, %v15181_v59  ;;  %9693 = vpow2.f32 %v6058_v31 }
 0x51f   :  { %v15269_v6 = vpop.eup %9685  ;;  %v7725_v63 = vadd.f32 %v7724_v46, %v7723_v60  ;;  %v6601_v25 = vrot.slane %v6600_v5, 1  ;;  %v5665_v14 = vmax.f32 %v5663_v38, %v5664_v55  ;;  %v5672_v16 = vmax.f32 %v5670_v3, %v5671_v43 }
 0x520   :  { %v15271_v19 = vpop.eup %9687  ;;  %v7208_v35 = vmul.f32 %v16035_v37, %v6824_v58  ;;  %v7209_v26 = vmul.f32 %v16036_v29, %v6825_v52  ;;  %v6603_v40 = vsel %vm2792_vm3, %v15269_v6, 0.0  ;;  %v15279_v24 = vadd.f32 %v15111_v54, %v14895_v50 }
 0x521   :  { %v7726_v59 = vrot.slane %v7725_v63, 1  ;;  %v6602_v8 = vadd.f32 %v6601_v25, %v6600_v5  ;;  %v6604_v18 = vsel %vm2792_vm3, %v15271_v19, 0.0  ;;  %v5666_v36 = vrot.slane %v5665_v14, 2  ;;  %v6956_v5 = vld [vmem:[%s15428_s2 + $0x3a0] sm:$0xff] }
 0x522   :  { %v7728_v41 = vsel %vm2792_vm3, %v7208_v35, 0.0  ;;  %v7729_v34 = vsel %vm2792_vm3, %v7209_v26, 0.0  ;;  %v6605_v7 = vadd.f32 %v6604_v18, %v6603_v40  ;;  %v5673_v57 = vrot.slane %v5672_v16, 4 }
 0x523   :  { %v9690_v56 = vpop.eup %9689  ;;  %v7727_v2 = vadd.f32 %v7726_v59, %v7725_v63  ;;  %v7730_v21 = vadd.f32 %v7729_v34, %v7728_v41  ;;  %9695 = vrcp.f32 %v6602_v8  ;;  %v5667_v0 = vmax.f32 %v5665_v14, %v5666_v36  ;;  %v16039_v59 = vld [vmem:[#allocation75_spill] sm:$0xff] }
 0x524   :  { %v6826_v50 = vmul.f32 %v9690_v56, %v15201_v32  ;;  %v6827_v49 = vmul.f32 %v9690_v56, %v15205_v51  ;;  %v6606_v30 = vrot.slane %v6605_v7, 4  ;;  %v5674_v39 = vmax.f32 %v5672_v16, %v5673_v57  ;;  %v16038_v32 = vld [vmem:[#allocation115_spill] sm:$0xff] }
 0x525   :  { %v7919_v48 = vsel %vm7876_vm11, %v7727_v2, %v7918_v27  ;;  %v7731_v10 = vrot.slane %v7730_v21, 4  ;;  %v5668_v13 = vrot.slane %v5667_v0, 1  ;;  %v15290_v1 = vadd.f32 %v15111_v54, %v14903_v33 }
 0x526   :  { %7941 = vst.msk [vmem:[%s15430_s12 + $0x30] sm:$0xff] %vm2792_vm3, %v7919_v48  ;;  %v7210_v20 = vmul.f32 %v16037_v4, %v6826_v50  ;;  %v7211_v23 = vmul.f32 %v16038_v32, %v6827_v49  ;;  %v6607_v51 = vadd.f32 %v6606_v30, %v6605_v7  ;;  %v5675_v61 = vrot.slane %v5674_v39, 2 }
 0x527   :  { %v15298_v17 = vpop.eup %9691  ;;  %v7732_v45 = vadd.f32 %v7731_v10, %v7730_v21  ;;  %v5669_v60 = vmax.f32 %v5667_v0, %v5668_v13  ;;  %v5680_v28 = vsel %vm2792_vm3, %v15279_v24, -inf  ;;  %v5679_v33 = vsel %vm2792_vm3, %v15290_v1, -inf }
 0x528   :  { %v15304_v54 = vpop.eup %9693  ;;  %v7737_v62 = vsel %vm2792_vm3, %v7210_v20, 0.0  ;;  %v7738_v38 = vsel %vm2792_vm3, %v7211_v23, 0.0  ;;  %v6608_v44 = vrot.slane %v6607_v51, 2  ;;  %v6612_v31 = vsel %vm2792_vm3, %v15298_v17, 0.0 }
 0x529   :  { %v7733_v43 = vrot.slane %v7732_v45, 2  ;;  %v7739_v3 = vadd.f32 %v7738_v38, %v7737_v62  ;;  %v6613_v42 = vsel %vm2792_vm3, %v15304_v54, 0.0  ;;  %v5810_v46 = vsub.f32 %v15245_v12, %v5669_v60 }
 0x52a   :  { %v6609_v55 = vadd.f32 %v6608_v44, %v6607_v51  ;;  %v6614_v27 = vadd.f32 %v6613_v42, %v6612_v31  ;;  %v5811_v58 = vsub.f32 %v15211_v11, %v5669_v60  ;;  %v5676_v52 = vmax.f32 %v5674_v39, %v5675_v61  ;;  %v6959_v60 = vld [vmem:[%s15428_s2 + $0x3b8] sm:$0xff]  ;;  %v16040_v42 = vld [vmem:[#allocation80_spill] sm:$0xff] }
 0x52b   :  { %v7734_v63 = vadd.f32 %v7733_v43, %v7732_v45  ;;  %v7740_v25 = vrot.slane %v7739_v3, 4  ;;  %v6060_v14 = vmul.f32 1.442695, %v5810_v46  ;;  %v5681_v16 = vmax.f32 %v5679_v33, %v5680_v28  ;;  %v6958_v28 = vld [vmem:[%s15428_s2 + $0x3b0] sm:$0xff] }
 0x52c   :  { %v6610_v37 = vrot.slane %v6609_v55, 1  ;;  %v6615_v35 = vrot.slane %v6614_v27, 4  ;;  %v6062_v29 = vmul.f32 1.442695, %v5811_v58  ;;  %v5677_v26 = vrot.slane %v5676_v52, 1 }
 0x52d   :  { %v9696_v40 = vpop.eup %9695  ;;  %v7084_v12 = vadd.f32 %v6956_v5, %v16039_v59  ;;  %v7741_v8 = vadd.f32 %v7740_v25, %v7739_v3  ;;  %9697 = vpow2.f32 %v6060_v14  ;;  %v5682_v18 = vrot.slane %v5681_v16, 4  ;;  %v16041_v5 = vld [vmem:[#allocation79_spill] sm:$0xff] }
 0x52e   :  { %v6828_v36 = vmul.f32 %v9696_v40, %v15225_v47  ;;  %v6829_v41 = vmul.f32 %v9696_v40, %v15230_v22  ;;  %v6611_v11 = vadd.f32 %v6610_v37, %v6609_v55  ;;  %v6616_v34 = vadd.f32 %v6615_v35, %v6614_v27 }
 0x52f   :  { %v7735_v7 = vrot.slane %v7734_v63, 1  ;;  %v7742_v57 = vrot.slane %v7741_v8, 2  ;;  %9699 = vpow2.f32 %v6062_v29  ;;  %v5678_v56 = vmax.f32 %v5676_v52, %v5677_v26 }
 0x530   :  { %v7212_v2 = vmul.f32 %v7084_v12, %v6828_v36  ;;  %v7213_v21 = vmul.f32 %v15257_v9, %v6829_v41  ;;  %9701 = vrcp.f32 %v6611_v11  ;;  %v6617_v0 = vrot.slane %v6616_v34, 2 }
 0x531   :  { %v7743_v50 = vadd.f32 %v7742_v57, %v7741_v8  ;;  %v5812_v49 = vsub.f32 %v15253_v53, %v5678_v56  ;;  %v5813_v30 = vsub.f32 %v15249_v15, %v5678_v56  ;;  %v5683_v39 = vmax.f32 %v5681_v16, %v5682_v18  ;;  %v6961_v18 = vld [vmem:[%s15428_s2 + $0x3c8] sm:$0xff] }
 0x532   :  { %v7746_v47 = vsel %vm2792_vm3, %v7212_v2, 0.0  ;;  %v7747_v22 = vsel %vm2792_vm3, %v7213_v21, 0.0  ;;  %v6618_v48 = vadd.f32 %v6617_v0, %v6616_v34  ;;  %v7736_v9 = vadd.f32 %v7735_v7, %v7734_v63  ;;  %v16042_v21 = vld [vmem:[#allocation83_spill] sm:$0xff] }
 0x533   :  { %v7744_v10 = vrot.slane %v7743_v50, 1  ;;  %v7748_v13 = vadd.f32 %v7747_v22, %v7746_v47  ;;  %v6064_v4 = vmul.f32 1.442695, %v5812_v49  ;;  %v6066_v20 = vmul.f32 1.442695, %v5813_v30  ;;  %v16043_v30 = vld [vmem:[#allocation84_spill] sm:$0xff] }
 0x534   :  { %v6619_v32 = vrot.slane %v6618_v48, 1  ;;  %v5684_v23 = vrot.slane %v5683_v39, 2  ;;  %v7087_v46 = vadd.f32 %v6959_v60, %v16040_v42  ;;  %v7086_v55 = vadd.f32 %v6958_v28, %v16041_v5 }
 0x535   :  { %v7745_v51 = vadd.f32 %v7744_v10, %v7743_v50  ;;  %v7749_v61 = vrot.slane %v7748_v13, 4  ;;  %9703 = vpow2.f32 %v6064_v4  ;;  %v7089_v0 = vadd.f32 %v6961_v18, %v16042_v21 }
 0x536   :  { %v6620_v45 = vadd.f32 %v6619_v32, %v6618_v48  ;;  %9705 = vpow2.f32 %v6066_v20  ;;  %v5685_v53 = vmax.f32 %v5683_v39, %v5684_v23 }
 0x537   :  { %v15325_v15 = vpop.eup %9697  ;;  %v7920_v33 = vsel %vm7864_vm5, %v7745_v51, %v7736_v9  ;;  %v7750_v62 = vadd.f32 %v7749_v61, %v7748_v13 }
 0x538   :  { %9707 = vrcp.f32 %v6620_v45  ;;  %v6621_v38 = vsel %vm2792_vm3, %v15325_v15, 0.0  ;;  %v5686_v44 = vrot.slane %v5685_v53, 1 }
 0x539   :  { %v15336_v31 = vpop.eup %9699  ;;  %v7751_v43 = vrot.slane %v7750_v62, 2 }
 0x53a   :  { %v9702_v3 = vpop.eup %9701  ;;  %v6622_v27 = vsel %vm2792_vm3, %v15336_v31, 0.0  ;;  %v5687_v58 = vmax.f32 %v5685_v53, %v5686_v44 }
 0x53b   :  { %v7752_v52 = vadd.f32 %v7751_v43, %v7750_v62  ;;  %v6830_v63 = vmul.f32 %v9702_v3, %v15269_v6  ;;  %v6831_v25 = vmul.f32 %v9702_v3, %v15271_v19  ;;  %v6623_v14 = vadd.f32 %v6622_v27, %v6621_v38 }
 0x53c   :  { %v5814_v16 = vsub.f32 %v15290_v1, %v5687_v58  ;;  %v5815_v37 = vsub.f32 %v15279_v24, %v5687_v58  ;;  %v6960_v24 = vld [vmem:[%s15428_s2 + $0x3c0] sm:$0xff] }
 0x53d   :  { %v7753_v35 = vrot.slane %v7752_v52, 1  ;;  %v7214_v29 = vmul.f32 %v7086_v55, %v6830_v63  ;;  %v7215_v26 = vmul.f32 %v7087_v46, %v6831_v25  ;;  %v6624_v40 = vrot.slane %v6623_v14, 4  ;;  %v6963_v63 = vld [vmem:[%s15428_s2 + $0x3d8] sm:$0xff] }
 0x53e   :  { %v6068_v59 = vmul.f32 1.442695, %v5814_v16  ;;  %v6070_v12 = vmul.f32 1.442695, %v5815_v37  ;;  %v7088_v39 = vadd.f32 %v6960_v24, %v16043_v30 }
 0x53f   :  { %v15346_v8 = vpop.eup %9703  ;;  %v7754_v6 = vadd.f32 %v7753_v35, %v7752_v52  ;;  %v7755_v19 = vsel %vm2792_vm3, %v7214_v29, 0.0  ;;  %v7756_v36 = vsel %vm2792_vm3, %v7215_v26, 0.0  ;;  %v6625_v1 = vadd.f32 %v6624_v40, %v6623_v14  ;;  %v6962_v14 = vld [vmem:[%s15428_s2 + $0x3d0] sm:$0xff]  ;;  %v16044_v29 = vld [vmem:[#allocation105_spill] sm:$0xff] }
 0x540   :  { %v15353_v41 = vpop.eup %9705  ;;  %v7757_v11 = vadd.f32 %v7756_v36, %v7755_v19  ;;  %v6630_v34 = vsel %vm2792_vm3, %v15346_v8, 0.0  ;;  %9709 = vpow2.f32 %v6068_v59  ;;  %v7091_v26 = vadd.f32 %v6963_v63, %v16044_v29  ;;  %v16045_v59 = vld [vmem:[#allocation89_spill] sm:$0xff] }
 0x541   :  { %v7921_v7 = vsel %vm7866_vm6, %v7754_v6, %v7920_v33  ;;  %v6626_v57 = vrot.slane %v6625_v1, 2  ;;  %v6631_v56 = vsel %vm2792_vm3, %v15353_v41, 0.0  ;;  %9711 = vpow2.f32 %v6070_v12 }
 0x542   :  { %v9708_v2 = vpop.eup %9707  ;;  %v7758_v50 = vrot.slane %v7757_v11, 4  ;;  %v6632_v49 = vadd.f32 %v6631_v56, %v6630_v34  ;;  %v7090_v12 = vadd.f32 %v6962_v14, %v16045_v59  ;;  %v6965_v34 = vld [vmem:[%s15428_s2 + $0x3e8] sm:$0xff] }
 0x543   :  { %v6832_v47 = vmul.f32 %v9708_v2, %v15298_v17  ;;  %v6833_v22 = vmul.f32 %v9708_v2, %v15304_v54  ;;  %v6627_v48 = vadd.f32 %v6626_v57, %v6625_v1 }
 0x544   :  { %v7759_v10 = vadd.f32 %v7758_v50, %v7757_v11  ;;  %v6633_v13 = vrot.slane %v6632_v49, 4 }
 0x545   :  { %v7216_v4 = vmul.f32 %v7088_v39, %v6832_v47  ;;  %v7217_v20 = vmul.f32 %v7089_v0, %v6833_v22  ;;  %v6628_v32 = vrot.slane %v6627_v48, 1  ;;  %v16046_v0 = vld [vmem:[#allocation107_spill] sm:$0xff] }
 0x546   :  { %v7760_v23 = vrot.slane %v7759_v10, 2  ;;  %v6634_v9 = vadd.f32 %v6633_v13, %v6632_v49  ;;  %v7093_v50 = vadd.f32 %v6965_v34, %v16046_v0  ;;  %v16047_v49 = vld [vmem:[#allocation106_spill] sm:$0xff] }
 0x547   :  { %v7764_v51 = vsel %vm2792_vm3, %v7216_v4, 0.0  ;;  %v7765_v61 = vsel %vm2792_vm3, %v7217_v20, 0.0  ;;  %v6629_v45 = vadd.f32 %v6628_v32, %v6627_v48 }
 0x548   :  { %v7761_v53 = vadd.f32 %v7760_v23, %v7759_v10  ;;  %v7766_v60 = vadd.f32 %v7765_v61, %v7764_v51  ;;  %v6635_v28 = vrot.slane %v6634_v9, 2  ;;  %v6967_v51 = vld [vmem:[%s15428_s2 + $0x3f8] sm:$0xff] }
 0x549   :  { %9713 = vrcp.f32 %v6629_v45 }
 0x54a   :  { %v15369_v17 = vpop.eup %9709  ;;  %v7762_v54 = vrot.slane %v7761_v53, 1  ;;  %v7767_v33 = vrot.slane %v7766_v60, 4  ;;  %v6636_v62 = vadd.f32 %v6635_v28, %v6634_v9 }
 0x54b   :  { %v9712_v38 = vpop.eup %9711  ;;  %v6639_v44 = vsel %vm2792_vm3, %v15369_v17, 0.0 }
 0x54c   :  { %v7763_v43 = vadd.f32 %v7762_v54, %v7761_v53  ;;  %v7768_v3 = vadd.f32 %v7767_v33, %v7766_v60  ;;  %v6637_v42 = vrot.slane %v6636_v62, 1  ;;  %v6640_v46 = vsel %vm2792_vm3, %v9712_v38, 0.0  ;;  %v16048_v60 = vld [vmem:[#allocation109_spill] sm:$0xff]  ;;  %v16049_v33 = vld [vmem:[#allocation108_spill] sm:$0xff] }
 0x54d   :  { %v6641_v5 = vadd.f32 %v6640_v46, %v6639_v44  ;;  %v7095_v28 = vadd.f32 %v6967_v51, %v16048_v60 }
 0x54e   :  { %v7922_v55 = vsel %vm7868_vm7, %v7763_v43, %v7921_v7  ;;  %v7769_v27 = vrot.slane %v7768_v3, 2  ;;  %v6638_v58 = vadd.f32 %v6637_v42, %v6636_v62  ;;  %v6964_v7 = vld [vmem:[%s15428_s2 + $0x3e0] sm:$0xff] }
 0x54f   :  { %v6642_v52 = vrot.slane %v6641_v5, 4  ;;  %v7092_v30 = vadd.f32 %v6964_v7, %v16047_v49 }
 0x550   :  { %v7770_v25 = vadd.f32 %v7769_v27, %v7768_v3  ;;  %9715 = vrcp.f32 %v6638_v58 }
 0x551   :  { %v6643_v16 = vadd.f32 %v6642_v52, %v6641_v5 }
 0x552   :  { %v7771_v37 = vrot.slane %v7770_v25, 1 }
 0x553   :  { %v9714_v35 = vpop.eup %9713  ;;  %v6644_v40 = vrot.slane %v6643_v16, 2 }
 0x554   :  { %v7772_v18 = vadd.f32 %v7771_v37, %v7770_v25  ;;  %v6834_v6 = vmul.f32 %v9714_v35, %v15325_v15  ;;  %v6835_v19 = vmul.f32 %v9714_v35, %v15336_v31 }
 0x555   :  { %v6645_v36 = vadd.f32 %v6644_v40, %v6643_v16 }
 0x556   :  { %v7923_v1 = vsel %vm7870_vm8, %v7772_v18, %v7922_v55  ;;  %v7218_v24 = vmul.f32 %v7090_v12, %v6834_v6  ;;  %v7219_v11 = vmul.f32 %v7091_v26, %v6835_v19 }
 0x557   :  { %v6646_v57 = vrot.slane %v6645_v36, 1 }
 0x558   :  { %v7773_v56 = vsel %vm2792_vm3, %v7218_v24, 0.0  ;;  %v7774_v15 = vsel %vm2792_vm3, %v7219_v11, 0.0 }
 0x559   :  { %v7775_v2 = vadd.f32 %v7774_v15, %v7773_v56  ;;  %v6647_v31 = vadd.f32 %v6646_v57, %v6645_v36 }
 0x55a   :  { %v9716_v21 = vpop.eup %9715 }
 0x55b   :  { %v7776_v39 = vrot.slane %v7775_v2, 4  ;;  %v6836_v47 = vmul.f32 %v9716_v21, %v15346_v8  ;;  %v6837_v22 = vmul.f32 %v9716_v21, %v15353_v41  ;;  %9717 = vrcp.f32 %v6647_v31  ;;  %v6966_v8 = vld [vmem:[%s15428_s2 + $0x3f0] sm:$0xff] }
 0x55c   :  { %v7094_v62 = vadd.f32 %v6966_v8, %v16049_v33 }
 0x55d   :  { %v7777_v48 = vadd.f32 %v7776_v39, %v7775_v2  ;;  %v7220_v10 = vmul.f32 %v7092_v30, %v6836_v47  ;;  %v7221_v13 = vmul.f32 %v7093_v50, %v6837_v22 }
 0x55f   :  { %v7778_v4 = vrot.slane %v7777_v48, 2  ;;  %v7782_v20 = vsel %vm2792_vm3, %v7220_v10, 0.0  ;;  %v7783_v32 = vsel %vm2792_vm3, %v7221_v13, 0.0 }
 0x560   :  { %v7784_v23 = vadd.f32 %v7783_v32, %v7782_v20 }
 0x561   :  { %v7779_v9 = vadd.f32 %v7778_v4, %v7777_v48 }
 0x562   :  { %v7785_v61 = vrot.slane %v7784_v23, 4 }
 0x563   :  { %v7780_v41 = vrot.slane %v7779_v9, 1 }
 0x564   :  { %v7786_v45 = vadd.f32 %v7785_v61, %v7784_v23 }
 0x565   :  { %v9718_v53 = vpop.eup %9717  ;;  %v7781_v54 = vadd.f32 %v7780_v41, %v7779_v9 }
 0x566   :  { %v7787_v44 = vrot.slane %v7786_v45, 2  ;;  %v6838_v43 = vmul.f32 %v9718_v53, %v15369_v17  ;;  %v6839_v3 = vmul.f32 %v9718_v53, %v9712_v38 }
 0x567   :  { %v7924_v42 = vsel %vm7872_vm9, %v7781_v54, %v7923_v1 }
 0x568   :  { %v7788_v46 = vadd.f32 %v7787_v44, %v7786_v45  ;;  %v7222_v5 = vmul.f32 %v7094_v62, %v6838_v43  ;;  %v7223_v55 = vmul.f32 %v7095_v28, %v6839_v3 }
 0x56a   :  { %v7789_v27 = vrot.slane %v7788_v46, 1  ;;  %v7791_v58 = vsel %vm2792_vm3, %v7222_v5, 0.0  ;;  %v7792_v52 = vsel %vm2792_vm3, %v7223_v55, 0.0 }
 0x56b   :  { %v7793_v63 = vadd.f32 %v7792_v52, %v7791_v58 }
 0x56c   :  { %v7790_v25 = vadd.f32 %v7789_v27, %v7788_v46 }
 0x56d   :  { %v7794_v14 = vrot.slane %v7793_v63, 4 }
 0x56e   :  { %v7925_v16 = vsel %vm7874_vm10, %v7790_v25, %v7924_v42 }
 0x56f   :  { %v7795_v37 = vadd.f32 %v7794_v14, %v7793_v63 }
 0x571   :  { %v7796_v35 = vrot.slane %v7795_v37, 2 }
 0x573   :  { %v7797_v29 = vadd.f32 %v7796_v35, %v7795_v37 }
 0x575   :  { %v7798_v17 = vrot.slane %v7797_v29, 1 }
 0x577   :  { %v7799_v38 = vadd.f32 %v7798_v17, %v7797_v29 }
 0x579   :  { %v7926_v26 = vsel %vm7876_vm11, %v7799_v38, %v7925_v16 }
 0x57a   :  { %7942 = vst.msk [vmem:[%s15430_s12 + $0x38] sm:$0xff] %vm2792_vm3, %v7926_v26 }

</bundles_post_ra>
